<compile_context>
chip_gen: v7x
topology: tpu7x:2x2x1
jax: 0.10.0
libtpu: 0.0.40
codegen_flags: <defaults>
</compile_context>

<pallas_src>
import functools

import jax
import jax.numpy as jnp
import numpy as np
from jax.experimental import pallas as pl
from jax.experimental.pallas import tpu as pltpu

LANE = 128


def _round_up(x, m):
    return ((x + m - 1) // m) * m


# ----------------------------- Pallas kernels --------------------------------

def _conv_taps_accum(slabs, w_ref, *, H, W):
    """27-tap 3x3x3 conv accumulation over three flattened depth-halo slabs.

    slabs : 3 refs, each ((H+2)*(W+2), Cin) — spatially padded slab, flattened
    w_ref : (27, Cin, Coutp) bf16 per-tap weights
    Returns an f32 (L, Coutp) accumulator with L = H*(W+2)-2.  Row p maps to
    output pixel (h, w) = (p // (W+2), p % (W+2)); rows with w >= W are garbage
    from the contiguous-slice trick and must be masked/ignored by the caller.
    Every tap is a contiguous shifted ref slice (no sublane-retiling window
    copies), per the perf review.
    """
    # TODO(synk): fold kw into the contraction (K = 3*Cin, 9 dots) for v6e/v7x
    # and tile the L rows for real UNet H*W so the accumulator stays in vregs.
    W2 = W + 2
    L = H * W2 - 2
    coutp = w_ref.shape[-1]
    acc = jnp.zeros((L, coutp), jnp.float32)
    for kd in range(3):
        s = slabs[kd]
        for kh in range(3):
            for kw in range(3):
                lhs = s[pl.ds(kh * W2 + kw, L), :].astype(jnp.bfloat16)
                acc = acc + jnp.dot(lhs, w_ref[kd * 9 + kh * 3 + kw],
                                    preferred_element_type=jnp.float32)
    return acc


def _conv1_kernel(s0_ref, s1_ref, s2_ref, w_ref, scale_ref, shift_ref, o_ref,
                  *, H, W, D):
    """Conv3d(3,3,3,pad=1) + BN(eval) + ReLU; output written directly in the
    spatially padded, lane-padded bf16 layout that conv2 consumes."""
    W2 = W + 2
    L = H * W2 - 2
    coutp = o_ref.shape[-1]
    dp = pl.program_id(1)                      # padded output depth in [0, D+2)
    interior = jnp.logical_and(dp >= 1, dp <= D)

    @pl.when(jnp.logical_not(interior))
    def _():                                   # depth-border slab: all zeros
        o_ref[...] = jnp.zeros_like(o_ref)

    @pl.when(interior)
    def _():
        acc = _conv_taps_accum((s0_ref, s1_ref, s2_ref), w_ref, H=H, W=W)
        y = acc * scale_ref[...] + shift_ref[...]
        y = jnp.maximum(y, 0.0)
        # Zero the 2 garbage columns each row drags along: stored at offset
        # W2+1 they land exactly on the W-border positions of the padded
        # layout, which must be zero for conv2.
        col = jax.lax.broadcasted_iota(jnp.int32, (L, 1), 0) % W2
        y = jnp.where(col < W, y, 0.0)
        edge = jnp.zeros((W2 + 1, coutp), o_ref.dtype)
        o_ref[:W2 + 1, :] = edge                              # padded row 0 + (1,0)
        o_ref[W2 + 1:W2 + 1 + L, :] = y.astype(o_ref.dtype)   # interior (+ W borders)
        o_ref[W2 + 1 + L:, :] = edge                          # (H,W+1) + padded row H+1


def _conv2_pool_kernel(s0_ref, s1_ref, s2_ref, s3_ref, w_ref, scale_ref,
                       shift_ref, res_ref, *pool_refs, H, W, with_pool):
    """Conv3d(3,3,3,pad=1) + BN(eval) + ReLU for a pair of output depths, with
    the 2x2x2 max-pool fused into the epilogue (one pooled depth per step)."""
    W2 = W + 2
    L = H * W2 - 2
    coutp = res_ref.shape[-1]
    slabs = (s0_ref, s1_ref, s2_ref, s3_ref)

    for dd in range(2):                        # the two output depths 2*do + dd
        acc = _conv_taps_accum(slabs[dd:dd + 3], w_ref, H=H, W=W)
        y = acc * scale_ref[...] + shift_ref[...]
        y = jnp.maximum(y, 0.0)
        # Garbage columns (w in {W, W+1}) are intentionally NOT masked: they
        # only ever land in the last width pair of the pooled output and in
        # res columns that the wrapper slices away.
        res_ref[dd, :L, :] = y
        res_ref[dd, L:, :] = jnp.zeros((2, coutp), res_ref.dtype)

    if with_pool:
        pool_ref = pool_refs[0]
        Ho, Wo1 = H // 2, W2 // 2
        r = jnp.maximum(res_ref[0], res_ref[1])            # depth-pair max
        r = r.reshape(H * Wo1, 2, coutp)
        r = jnp.maximum(r[:, 0, :], r[:, 1, :])            # width-pair max
        r = r.reshape(Ho, 2, Wo1, coutp)
        r = jnp.maximum(r[:, 0, :, :], r[:, 1, :, :])      # height-pair max
        pool_ref[...] = r.reshape(Ho * Wo1, coutp)


# ------------------------------- wrappers -------------------------------------

def _prep_weight(w_t, cin_p, coutp):
    """torch (Cout, Cin, kd, kh, kw) -> bf16 (27, Cin_p, Coutp), zero padded."""
    cout, cin = int(w_t.shape[0]), int(w_t.shape[1])
    w = jnp.transpose(w_t, (2, 3, 4, 1, 0)).reshape(27, cin, cout)
    w = jnp.pad(w, ((0, 0), (0, cin_p - cin), (0, coutp - cout)))
    return w.astype(jnp.bfloat16)


def _fold_bn(bias, gamma, beta, mean, var, eps, coutp):
    """Fold conv bias + BatchNorm running stats into a per-channel affine."""
    cout = int(bias.shape[0])
    scale = (gamma / jnp.sqrt(var + eps)).astype(jnp.float32)
    shift = (scale * (bias - mean) + beta).astype(jnp.float32)
    scale = jnp.pad(scale, (0, coutp - cout)).reshape(1, coutp)
    shift = jnp.pad(shift, (0, coutp - cout)).reshape(1, coutp)
    return scale, shift


def _vmem_limit(in_bytes, out_bytes, work_bytes):
    # Double-buffered in/out blocks + accumulator/work margin; keep within the
    # 64 MiB v7x physical budget, floor at the 32 MiB default scoped limit.
    need = 2 * (in_bytes + out_bytes) + 2 * work_bytes + (4 << 20)
    return int(min(max(need, 32 << 20), 100 << 20))


def conv1_bn_relu_padded(xp1, w_t, bias, gamma, beta, mean, var, *, eps=1e-5):
    """conv1 + bn1 + relu on a spatially pre-padded NDHWC input.

    xp1: (N, D+2, H+2, W+2, Cin) f32.  Returns the activation in the padded
    bf16 layout conv2 consumes: (N, D+2, (H+2)*(W+2), Coutp) with zero spatial
    borders and zero padded lanes, Coutp = round_up(Cout, 128).
    """
    N, Dp2, Hp2, Wp2, cin = xp1.shape
    D, H, W = Dp2 - 2, Hp2 - 2, Wp2 - 2
    W2 = Wp2
    HW2p = Hp2 * W2
    L = H * W2 - 2
    cout = int(w_t.shape[0])
    coutp = _round_up(cout, LANE)

    xf = xp1.reshape(N, Dp2, HW2p, cin)                 # free, contiguous
    w = _prep_weight(w_t, cin, coutp)
    scale, shift = _fold_bn(bias, gamma, beta, mean, var, eps, coutp)

    def slab_spec(kd):
        # Depth-halo slab kd of output padded-depth dp -> input padded depth
        # dp-1+kd (clamped; border steps only write zeros and ignore inputs).
        return pl.BlockSpec(
            (None, None, HW2p, cin),
            lambda n, dp, kd=kd: (n, jnp.clip(dp - 1 + kd, 0, D + 1), 0, 0))

    vmem = _vmem_limit(
        in_bytes=3 * HW2p * cin * 4 + 27 * cin * coutp * 2 + 2 * coutp * 4,
        out_bytes=HW2p * coutp * 2,
        work_bytes=2 * L * coutp * 4)

    # TODO(synk): a rolling 3-slab manual-DMA buffer (memory_space=pl.ANY)
    # would cut the ~3x depth-slab read amplification of the (xf, xf, xf)
    # pattern; left as a follow-up.
    return pl.pallas_call(
        functools.partial(_conv1_kernel, H=H, W=W, D=D),
        out_shape=jax.ShapeDtypeStruct((N, Dp2, HW2p, coutp), jnp.bfloat16),
        grid=(N, Dp2),
        in_specs=[
            slab_spec(0), slab_spec(1), slab_spec(2),
            pl.BlockSpec((27, cin, coutp), lambda n, dp: (0, 0, 0)),
            pl.BlockSpec((1, coutp), lambda n, dp: (0, 0)),
            pl.BlockSpec((1, coutp), lambda n, dp: (0, 0)),
        ],
        out_specs=pl.BlockSpec((None, None, HW2p, coutp),
                               lambda n, dp: (n, dp, 0, 0)),
        compiler_params=pltpu.CompilerParams(
            dimension_semantics=("parallel", "parallel"),
            vmem_limit_bytes=vmem),
    )(xf, xf, xf, w, scale, shift)


def conv2_bn_relu_pool(h1p, D, H, W, w_t, bias, gamma, beta, mean, var, *,
                       with_pool=True, eps=1e-5):
    """conv2 + bn2 + relu (+ fused MaxPool3d(2,2,2)) on conv1's padded layout.

    h1p: (N, D+2, (H+2)*(W+2), Cin_p) bf16.
    Returns a tuple:
      res    (N, D,   H*(W+2),          Coutp) f32  (junk cols/lanes sliced later)
      pooled (N, D/2, (H/2)*((W+2)/2),  Coutp) f32  [only if with_pool]
    """
    N = h1p.shape[0]
    cin_p = int(h1p.shape[-1])
    W2 = W + 2
    HW2p = (H + 2) * W2
    L = H * W2 - 2
    Ho, Wo1, Do = H // 2, W2 // 2, D // 2
    cout = int(w_t.shape[0])
    coutp = _round_up(cout, LANE)

    w = _prep_weight(w_t, cin_p, coutp)
    scale, shift = _fold_bn(bias, gamma, beta, mean, var, eps, coutp)

    def slab_spec(k):
        return pl.BlockSpec((None, None, HW2p, cin_p),
                            lambda n, do, k=k: (n, 2 * do + k, 0, 0))

    out_shape = [jax.ShapeDtypeStruct((N, D, H * W2, coutp), jnp.float32)]
    out_specs = [pl.BlockSpec((None, 2, H * W2, coutp),
                              lambda n, do: (n, do, 0, 0))]
    if with_pool:
        out_shape.append(jax.ShapeDtypeStruct((N, Do, Ho * Wo1, coutp),
                                              jnp.float32))
        out_specs.append(pl.BlockSpec((None, None, Ho * Wo1, coutp),
                                      lambda n, do: (n, do, 0, 0)))

    vmem = _vmem_limit(
        in_bytes=4 * HW2p * cin_p * 2 + 27 * cin_p * coutp * 2 + 2 * coutp * 4,
        out_bytes=2 * H * W2 * coutp * 4
                  + (Ho * Wo1 * coutp * 4 if with_pool else 0),
        work_bytes=4 * L * coutp * 4)

    # TODO(synk): at real UNet widths (256-512 ch) tile Coutp onto the grid and
    # single-buffer the constant weights (pl.Buffered(1)) to fit v7x's 64 MiB.
    outs = pl.pallas_call(
        functools.partial(_conv2_pool_kernel, H=H, W=W, with_pool=with_pool),
        out_shape=tuple(out_shape),
        grid=(N, Do),
        in_specs=[
            slab_spec(0), slab_spec(1), slab_spec(2), slab_spec(3),
            pl.BlockSpec((27, cin_p, coutp), lambda n, do: (0, 0, 0)),
            pl.BlockSpec((1, coutp), lambda n, do: (0, 0)),
            pl.BlockSpec((1, coutp), lambda n, do: (0, 0)),
        ],
        out_specs=tuple(out_specs),
        compiler_params=pltpu.CompilerParams(
            dimension_semantics=("parallel", "parallel"),
            vmem_limit_bytes=vmem),
    )(h1p, h1p, h1p, h1p, w, scale, shift)
    return outs


def conv_block3d_forward(x_ncdhw, params, *, bottleneck=False):
    """Mirrors ConvBlock3D.forward (cross_hair=False): returns (out, res) NCDHW."""
    x = jnp.transpose(x_ncdhw, (0, 2, 3, 4, 1)).astype(jnp.float32)  # -> NDHWC
    N, D, H, W, _ = x.shape
    assert D % 2 == 0 and H % 2 == 0 and W % 2 == 0, \
        "even spatial extents assumed"  # TODO(synk): floor-mode pool for odd sizes
    cout = int(params["w2"].shape[0])
    W2 = W + 2

    # conv1 + bn1 + relu: written straight into the spatially padded bf16
    # layout conv2 reads (no jnp.pad / extra HBM pass between the two convs).
    xp1 = jnp.pad(x, ((0, 0), (1, 1), (1, 1), (1, 1), (0, 0)))
    h1p = conv1_bn_relu_padded(xp1, params["w1"], params["b1"], params["g1"],
                               params["be1"], params["m1"], params["v1"])

    # conv2 + bn2 + relu with the 2x2x2 max-pool fused into its epilogue.
    outs = conv2_bn_relu_pool(h1p, D, H, W, params["w2"], params["b2"],
                              params["g2"], params["be2"], params["m2"],
                              params["v2"], with_pool=not bottleneck)
    res_p = outs[0]
    cp2 = res_p.shape[-1]

    # Junk-column / junk-lane slicing fuses with the unavoidable NCDHW transpose.
    res = res_p.reshape(N, D, H, W2, cp2)[..., :W, :cout]
    res = jnp.transpose(res, (0, 4, 1, 2, 3))
    if bottleneck:
        out = res
    else:
        Do, Ho, Wo = D // 2, H // 2, W // 2
        pooled = outs[1].reshape(N, Do, Ho, W2 // 2, cp2)[..., :Wo, :cout]
        out = jnp.transpose(pooled, (0, 4, 1, 2, 3))
    return out, res


# --------------------------- pure-JAX reference -------------------------------

def _ref_conv_bn_relu(x, w_torch, b, g, be, m, v, eps=1e-5):
    wk = jnp.transpose(w_torch, (2, 3, 4, 1, 0))  # DHWIO
    y = jax.lax.conv_general_dilated(
        x, wk, window_strides=(1, 1, 1),
        padding=((1, 1), (1, 1), (1, 1)),
        dimension_numbers=('NDHWC', 'DHWIO', 'NDHWC'),
        precision=jax.lax.Precision.HIGHEST)
    y = y + b
    y = g * (y - m) / jnp.sqrt(v + eps) + be
    return jnp.maximum(y, 0.0)


def _ref_maxpool(x):
    return jax.lax.reduce_window(
        x, -jnp.inf, jax.lax.max,
        window_dimensions=(1, 2, 2, 2, 1),
        window_strides=(1, 2, 2, 2, 1), padding='VALID')


def _ref_block(x_ncdhw, p):
    x = jnp.transpose(x_ncdhw, (0, 2, 3, 4, 1))
    h = _ref_conv_bn_relu(x, p["w1"], p["b1"], p["g1"], p["be1"], p["m1"], p["v1"])
    res = _ref_conv_bn_relu(h, p["w2"], p["b2"], p["g2"], p["be2"], p["m2"], p["v2"])
    out = _ref_maxpool(res)
    to_ncdhw = lambda t: jnp.transpose(t, (0, 4, 1, 2, 3))
    return to_ncdhw(out), to_ncdhw(res)


# ---------------------------------- main ---------------------------------------

if __name__ == "__main__":
    N, Cin, Cout = 2, 4, 8      # ConvBlock3D(in_channels=4, out_channels=8)
    Cmid = Cout // 2
    D = H = W = 8

    key = jax.random.PRNGKey(0)
    ks = jax.random.split(key, 16)

    def uinit(k, shape, fan_in):
        bnd = 1.0 / np.sqrt(fan_in)
        return jax.random.uniform(k, shape, jnp.float32, -bnd, bnd)

    params = {
        # conv1: Conv3d(Cin -> Cmid, 3x3x3)
        "w1": uinit(ks[0], (Cmid, Cin, 3, 3, 3), Cin * 27),
        "b1": uinit(ks[1], (Cmid,), Cin * 27),
        # bn1 (inference-mode params / running stats)
        "g1": jax.random.uniform(ks[2], (Cmid,), jnp.float32, 0.5, 1.5),
        "be1": 0.1 * jax.random.normal(ks[3], (Cmid,), jnp.float32),
        "m1": 0.1 * jax.random.normal(ks[4], (Cmid,), jnp.float32),
        "v1": jax.random.uniform(ks[5], (Cmid,), jnp.float32, 0.5, 1.5),
        # conv2: Conv3d(Cmid -> Cout, 3x3x3)
        "w2": uinit(ks[6], (Cout, Cmid, 3, 3, 3), Cmid * 27),
        "b2": uinit(ks[7], (Cout,), Cmid * 27),
        # bn2
        "g2": jax.random.uniform(ks[8], (Cout,), jnp.float32, 0.5, 1.5),
        "be2": 0.1 * jax.random.normal(ks[9], (Cout,), jnp.float32),
        "m2": 0.1 * jax.random.normal(ks[10], (Cout,), jnp.float32),
        "v2": jax.random.uniform(ks[11], (Cout,), jnp.float32, 0.5, 1.5),
    }

    x = jax.random.normal(ks[12], (N, Cin, D, H, W), jnp.float32)

    fwd = jax.jit(lambda xx: conv_block3d_forward(xx, params, bottleneck=False))
    out, res = fwd(x)
    jax.block_until_ready((out, res))

    # Sanity-check against a pure-JAX f32 reference.  bf16 MXU operands (per
    # the perf review) => relaxed tolerance vs the HIGHEST-precision reference.
    out_ref, res_ref = _ref_block(x, params)
    np.testing.assert_allclose(np.asarray(res), np.asarray(res_ref),
                               rtol=3e-2, atol=5e-2)
    np.testing.assert_allclose(np.asarray(out), np.asarray(out_ref),
                               rtol=3e-2, atol=5e-2)

    assert out.shape == (N, Cout, D // 2, H // 2, W // 2)
    assert res.shape == (N, Cout, D, H, W)

    print("KERNEL_OK")
</pallas_src>

<mosaic_0001>
module attributes {stable_mosaic.version = 11 : i64} {
  func.func @_conv1_kernel(%arg0: i32, %arg1: i32, %arg2: memref<1x1x100x4xf32, #tpu.memory_space<vmem>>, %arg3: memref<1x1x100x4xf32, #tpu.memory_space<vmem>>, %arg4: memref<1x1x100x4xf32, #tpu.memory_space<vmem>>, %arg5: memref<27x4x128xbf16, #tpu.memory_space<vmem>>, %arg6: memref<1x128xf32, #tpu.memory_space<vmem>>, %arg7: memref<1x128xf32, #tpu.memory_space<vmem>>, %arg8: memref<1x1x100x128xbf16, #tpu.memory_space<vmem>>) attributes {dimension_semantics = [#tpu.dimension_semantics<parallel>, #tpu.dimension_semantics<parallel>], iteration_bounds = array<i64: 2, 10>, scalar_prefetch = 0 : i64, scratch_operands = 0 : i64, tpu.core_type = #tpu.core_type<tc>, window_params = [{transform_indices = @transform_0, window_bounds = array<i64: 1, 1, 100, 4>}, {transform_indices = @transform_1, window_bounds = array<i64: 1, 1, 100, 4>}, {transform_indices = @transform_2, window_bounds = array<i64: 1, 1, 100, 4>}, {pipeline_mode = #tpu.pipeline_mode<synchronous>, transform_indices = @transform_3, window_bounds = array<i64: 27, 4, 128>}, {pipeline_mode = #tpu.pipeline_mode<synchronous>, transform_indices = @transform_4, window_bounds = array<i64: 1, 128>}, {pipeline_mode = #tpu.pipeline_mode<synchronous>, transform_indices = @transform_5, window_bounds = array<i64: 1, 128>}, {transform_indices = @transform_6, window_bounds = array<i64: 1, 1, 100, 128>}]} {
    %c1_i32 = arith.constant 1 : i32
    %0 = arith.cmpi sge, %arg1, %c1_i32 : i32
    %c8_i32 = arith.constant 8 : i32
    %1 = arith.cmpi sle, %arg1, %c8_i32 : i32
    %2 = arith.andi %0, %1 : i1
    %true = arith.constant true
    %3 = arith.xori %2, %true : i1
    %4 = arith.extui %3 : i1 to i32
    %c0_i32 = arith.constant 0 : i32
    %5 = arith.cmpi ne, %4, %c0_i32 : i32
    scf.if %5 {
      %cst = arith.constant 0.000000e+00 : bf16
      %8 = vector.broadcast %cst : bf16 to vector<100x128xbf16>
      %c0 = arith.constant 0 : index
      %c0_1 = arith.constant 0 : index
      %c0_2 = arith.constant 0 : index
      %c0_3 = arith.constant 0 : index
      %9 = vector.load %arg8[%c0, %c0_1, %c0_2, %c0_3] : memref<1x1x100x128xbf16, #tpu.memory_space<vmem>>, vector<1x1x100x128xbf16>
      %10 = vector.shape_cast %9 : vector<1x1x100x128xbf16> to vector<100x128xbf16>
      %11 = vector.shape_cast %8 : vector<100x128xbf16> to vector<1x1x100x128xbf16>
      tpu.vector_store %arg8[%c0, %c0_1, %c0_2, %c0_3], %11 {strides = array<i32>} : memref<1x1x100x128xbf16, #tpu.memory_space<vmem>>, vector<1x1x100x128xbf16>,
    } else {
    }
    %6 = arith.extui %2 : i1 to i32
    %c0_i32_0 = arith.constant 0 : i32
    %7 = arith.cmpi ne, %6, %c0_i32_0 : i32
    scf.if %7 {
      %cst = arith.constant 0.000000e+00 : f32
      %8 = vector.broadcast %cst : f32 to vector<78x128xf32>
      %c0 = arith.constant 0 : index
      %c0_1 = arith.constant 0 : index
      %c0_2 = arith.constant 0 : index
      %c0_3 = arith.constant 0 : index
      %9 = vector.load %arg2[%c0, %c0_1, %c0_2, %c0_3] : memref<1x1x100x4xf32, #tpu.memory_space<vmem>>, vector<1x1x78x4xf32>
      %10 = vector.shape_cast %9 : vector<1x1x78x4xf32> to vector<78x4xf32>
      %11 = arith.truncf %10 : vector<78x4xf32> to vector<78x4xbf16>
      %c0_4 = arith.constant 0 : index
      %c0_5 = arith.constant 0 : index
      %c0_6 = arith.constant 0 : index
      %12 = vector.load %arg5[%c0_4, %c0_5, %c0_6] : memref<27x4x128xbf16, #tpu.memory_space<vmem>>, vector<1x4x128xbf16>
      %13 = vector.shape_cast %12 : vector<1x4x128xbf16> to vector<4x128xbf16>
      %cst_7 = arith.constant dense<0.000000e+00> : vector<78x128xf32>
      %14 = tpu.matmul %11, %13, %cst_7 {dimension_numbers = #tpu.dot_dimension_numbers<[1], [0], [0], [1], [0, 0, 1, 1], [], []>} : vector<78x4xbf16>, vector<4x128xbf16>, vector<78x128xf32> -> vector<78x128xf32>
      %15 = arith.addf %8, %14 : vector<78x128xf32>
      %c0_8 = arith.constant 0 : index
      %c0_9 = arith.constant 0 : index
      %c1 = arith.constant 1 : index
      %c0_10 = arith.constant 0 : index
      %16 = vector.load %arg2[%c0_8, %c0_9, %c1, %c0_10] : memref<1x1x100x4xf32, #tpu.memory_space<vmem>>, vector<1x1x78x4xf32>
      %17 = vector.shape_cast %16 : vector<1x1x78x4xf32> to vector<78x4xf32>
      %18 = arith.truncf %17 : vector<78x4xf32> to vector<78x4xbf16>
      %c1_11 = arith.constant 1 : index
      %c0_12 = arith.constant 0 : index
      %c0_13 = arith.constant 0 : index
      %19 = vector.load %arg5[%c1_11, %c0_12, %c0_13] : memref<27x4x128xbf16, #tpu.memory_space<vmem>>, vector<1x4x128xbf16>
      %20 = vector.shape_cast %19 : vector<1x4x128xbf16> to vector<4x128xbf16>
      %cst_14 = arith.constant dense<0.000000e+00> : vector<78x128xf32>
      %21 = tpu.matmul %18, %20, %cst_14 {dimension_numbers = #tpu.dot_dimension_numbers<[1], [0], [0], [1], [0, 0, 1, 1], [], []>} : vector<78x4xbf16>, vector<4x128xbf16>, vector<78x128xf32> -> vector<78x128xf32>
      %22 = arith.addf %15, %21 : vector<78x128xf32>
      %c0_15 = arith.constant 0 : index
      %c0_16 = arith.constant 0 : index
      %c2 = arith.constant 2 : index
      %c0_17 = arith.constant 0 : index
      %23 = vector.load %arg2[%c0_15, %c0_16, %c2, %c0_17] : memref<1x1x100x4xf32, #tpu.memory_space<vmem>>, vector<1x1x78x4xf32>
      %24 = vector.shape_cast %23 : vector<1x1x78x4xf32> to vector<78x4xf32>
      %25 = arith.truncf %24 : vector<78x4xf32> to vector<78x4xbf16>
      %c2_18 = arith.constant 2 : index
      %c0_19 = arith.constant 0 : index
      %c0_20 = arith.constant 0 : index
      %26 = vector.load %arg5[%c2_18, %c0_19, %c0_20] : memref<27x4x128xbf16, #tpu.memory_space<vmem>>, vector<1x4x128xbf16>
      %27 = vector.shape_cast %26 : vector<1x4x128xbf16> to vector<4x128xbf16>
      %cst_21 = arith.constant dense<0.000000e+00> : vector<78x128xf32>
      %28 = tpu.matmul %25, %27, %cst_21 {dimension_numbers = #tpu.dot_dimension_numbers<[1], [0], [0], [1], [0, 0, 1, 1], [], []>} : vector<78x4xbf16>, vector<4x128xbf16>, vector<78x128xf32> -> vector<78x128xf32>
      %29 = arith.addf %22, %28 : vector<78x128xf32>
      %c0_22 = arith.constant 0 : index
      %c0_23 = arith.constant 0 : index
      %c10 = arith.constant 10 : index
      %c0_24 = arith.constant 0 : index
      %30 = vector.load %arg2[%c0_22, %c0_23, %c10, %c0_24] : memref<1x1x100x4xf32, #tpu.memory_space<vmem>>, vector<1x1x78x4xf32>
      %31 = vector.shape_cast %30 : vector<1x1x78x4xf32> to vector<78x4xf32>
      %32 = arith.truncf %31 : vector<78x4xf32> to vector<78x4xbf16>
      %c3 = arith.constant 3 : index
      %c0_25 = arith.constant 0 : index
      %c0_26 = arith.constant 0 : index
      %33 = vector.load %arg5[%c3, %c0_25, %c0_26] : memref<27x4x128xbf16, #tpu.memory_space<vmem>>, vector<1x4x128xbf16>
      %34 = vector.shape_cast %33 : vector<1x4x128xbf16> to vector<4x128xbf16>
      %cst_27 = arith.constant dense<0.000000e+00> : vector<78x128xf32>
      %35 = tpu.matmul %32, %34, %cst_27 {dimension_numbers = #tpu.dot_dimension_numbers<[1], [0], [0], [1], [0, 0, 1, 1], [], []>} : vector<78x4xbf16>, vector<4x128xbf16>, vector<78x128xf32> -> vector<78x128xf32>
      %36 = arith.addf %29, %35 : vector<78x128xf32>
      %c0_28 = arith.constant 0 : index
      %c0_29 = arith.constant 0 : index
      %c11 = arith.constant 11 : index
      %c0_30 = arith.constant 0 : index
      %37 = vector.load %arg2[%c0_28, %c0_29, %c11, %c0_30] : memref<1x1x100x4xf32, #tpu.memory_space<vmem>>, vector<1x1x78x4xf32>
      %38 = vector.shape_cast %37 : vector<1x1x78x4xf32> to vector<78x4xf32>
      %39 = arith.truncf %38 : vector<78x4xf32> to vector<78x4xbf16>
      %c4 = arith.constant 4 : index
      %c0_31 = arith.constant 0 : index
      %c0_32 = arith.constant 0 : index
      %40 = vector.load %arg5[%c4, %c0_31, %c0_32] : memref<27x4x128xbf16, #tpu.memory_space<vmem>>, vector<1x4x128xbf16>
      %41 = vector.shape_cast %40 : vector<1x4x128xbf16> to vector<4x128xbf16>
      %cst_33 = arith.constant dense<0.000000e+00> : vector<78x128xf32>
      %42 = tpu.matmul %39, %41, %cst_33 {dimension_numbers = #tpu.dot_dimension_numbers<[1], [0], [0], [1], [0, 0, 1, 1], [], []>} : vector<78x4xbf16>, vector<4x128xbf16>, vector<78x128xf32> -> vector<78x128xf32>
      %43 = arith.addf %36, %42 : vector<78x128xf32>
      %c0_34 = arith.constant 0 : index
      %c0_35 = arith.constant 0 : index
      %c12 = arith.constant 12 : index
      %c0_36 = arith.constant 0 : index
      %44 = vector.load %arg2[%c0_34, %c0_35, %c12, %c0_36] : memref<1x1x100x4xf32, #tpu.memory_space<vmem>>, vector<1x1x78x4xf32>
      %45 = vector.shape_cast %44 : vector<1x1x78x4xf32> to vector<78x4xf32>
      %46 = arith.truncf %45 : vector<78x4xf32> to vector<78x4xbf16>
      %c5 = arith.constant 5 : index
      %c0_37 = arith.constant 0 : index
      %c0_38 = arith.constant 0 : index
      %47 = vector.load %arg5[%c5, %c0_37, %c0_38] : memref<27x4x128xbf16, #tpu.memory_space<vmem>>, vector<1x4x128xbf16>
      %48 = vector.shape_cast %47 : vector<1x4x128xbf16> to vector<4x128xbf16>
      %cst_39 = arith.constant dense<0.000000e+00> : vector<78x128xf32>
      %49 = tpu.matmul %46, %48, %cst_39 {dimension_numbers = #tpu.dot_dimension_numbers<[1], [0], [0], [1], [0, 0, 1, 1], [], []>} : vector<78x4xbf16>, vector<4x128xbf16>, vector<78x128xf32> -> vector<78x128xf32>
      %50 = arith.addf %43, %49 : vector<78x128xf32>
      %c0_40 = arith.constant 0 : index
      %c0_41 = arith.constant 0 : index
      %c20 = arith.constant 20 : index
      %c0_42 = arith.constant 0 : index
      %51 = vector.load %arg2[%c0_40, %c0_41, %c20, %c0_42] : memref<1x1x100x4xf32, #tpu.memory_space<vmem>>, vector<1x1x78x4xf32>
      %52 = vector.shape_cast %51 : vector<1x1x78x4xf32> to vector<78x4xf32>
      %53 = arith.truncf %52 : vector<78x4xf32> to vector<78x4xbf16>
      %c6 = arith.constant 6 : index
      %c0_43 = arith.constant 0 : index
      %c0_44 = arith.constant 0 : index
      %54 = vector.load %arg5[%c6, %c0_43, %c0_44] : memref<27x4x128xbf16, #tpu.memory_space<vmem>>, vector<1x4x128xbf16>
      %55 = vector.shape_cast %54 : vector<1x4x128xbf16> to vector<4x128xbf16>
      %cst_45 = arith.constant dense<0.000000e+00> : vector<78x128xf32>
      %56 = tpu.matmul %53, %55, %cst_45 {dimension_numbers = #tpu.dot_dimension_numbers<[1], [0], [0], [1], [0, 0, 1, 1], [], []>} : vector<78x4xbf16>, vector<4x128xbf16>, vector<78x128xf32> -> vector<78x128xf32>
      %57 = arith.addf %50, %56 : vector<78x128xf32>
      %c0_46 = arith.constant 0 : index
      %c0_47 = arith.constant 0 : index
      %c21 = arith.constant 21 : index
      %c0_48 = arith.constant 0 : index
      %58 = vector.load %arg2[%c0_46, %c0_47, %c21, %c0_48] : memref<1x1x100x4xf32, #tpu.memory_space<vmem>>, vector<1x1x78x4xf32>
      %59 = vector.shape_cast %58 : vector<1x1x78x4xf32> to vector<78x4xf32>
      %60 = arith.truncf %59 : vector<78x4xf32> to vector<78x4xbf16>
      %c7 = arith.constant 7 : index
      %c0_49 = arith.constant 0 : index
      %c0_50 = arith.constant 0 : index
      %61 = vector.load %arg5[%c7, %c0_49, %c0_50] : memref<27x4x128xbf16, #tpu.memory_space<vmem>>, vector<1x4x128xbf16>
      %62 = vector.shape_cast %61 : vector<1x4x128xbf16> to vector<4x128xbf16>
      %cst_51 = arith.constant dense<0.000000e+00> : vector<78x128xf32>
      %63 = tpu.matmul %60, %62, %cst_51 {dimension_numbers = #tpu.dot_dimension_numbers<[1], [0], [0], [1], [0, 0, 1, 1], [], []>} : vector<78x4xbf16>, vector<4x128xbf16>, vector<78x128xf32> -> vector<78x128xf32>
      %64 = arith.addf %57, %63 : vector<78x128xf32>
      %c0_52 = arith.constant 0 : index
      %c0_53 = arith.constant 0 : index
      %c22 = arith.constant 22 : index
      %c0_54 = arith.constant 0 : index
      %65 = vector.load %arg2[%c0_52, %c0_53, %c22, %c0_54] : memref<1x1x100x4xf32, #tpu.memory_space<vmem>>, vector<1x1x78x4xf32>
      %66 = vector.shape_cast %65 : vector<1x1x78x4xf32> to vector<78x4xf32>
      %67 = arith.truncf %66 : vector<78x4xf32> to vector<78x4xbf16>
      %c8 = arith.constant 8 : index
      %c0_55 = arith.constant 0 : index
      %c0_56 = arith.constant 0 : index
      %68 = vector.load %arg5[%c8, %c0_55, %c0_56] : memref<27x4x128xbf16, #tpu.memory_space<vmem>>, vector<1x4x128xbf16>
      %69 = vector.shape_cast %68 : vector<1x4x128xbf16> to vector<4x128xbf16>
      %cst_57 = arith.constant dense<0.000000e+00> : vector<78x128xf32>
      %70 = tpu.matmul %67, %69, %cst_57 {dimension_numbers = #tpu.dot_dimension_numbers<[1], [0], [0], [1], [0, 0, 1, 1], [], []>} : vector<78x4xbf16>, vector<4x128xbf16>, vector<78x128xf32> -> vector<78x128xf32>
      %71 = arith.addf %64, %70 : vector<78x128xf32>
      %c0_58 = arith.constant 0 : index
      %c0_59 = arith.constant 0 : index
      %c0_60 = arith.constant 0 : index
      %c0_61 = arith.constant 0 : index
      %72 = vector.load %arg3[%c0_58, %c0_59, %c0_60, %c0_61] : memref<1x1x100x4xf32, #tpu.memory_space<vmem>>, vector<1x1x78x4xf32>
      %73 = vector.shape_cast %72 : vector<1x1x78x4xf32> to vector<78x4xf32>
      %74 = arith.truncf %73 : vector<78x4xf32> to vector<78x4xbf16>
      %c9 = arith.constant 9 : index
      %c0_62 = arith.constant 0 : index
      %c0_63 = arith.constant 0 : index
      %75 = vector.load %arg5[%c9, %c0_62, %c0_63] : memref<27x4x128xbf16, #tpu.memory_space<vmem>>, vector<1x4x128xbf16>
      %76 = vector.shape_cast %75 : vector<1x4x128xbf16> to vector<4x128xbf16>
      %cst_64 = arith.constant dense<0.000000e+00> : vector<78x128xf32>
      %77 = tpu.matmul %74, %76, %cst_64 {dimension_numbers = #tpu.dot_dimension_numbers<[1], [0], [0], [1], [0, 0, 1, 1], [], []>} : vector<78x4xbf16>, vector<4x128xbf16>, vector<78x128xf32> -> vector<78x128xf32>
      %78 = arith.addf %71, %77 : vector<78x128xf32>
      %c0_65 = arith.constant 0 : index
      %c0_66 = arith.constant 0 : index
      %c1_67 = arith.constant 1 : index
      %c0_68 = arith.constant 0 : index
      %79 = vector.load %arg3[%c0_65, %c0_66, %c1_67, %c0_68] : memref<1x1x100x4xf32, #tpu.memory_space<vmem>>, vector<1x1x78x4xf32>
      %80 = vector.shape_cast %79 : vector<1x1x78x4xf32> to vector<78x4xf32>
      %81 = arith.truncf %80 : vector<78x4xf32> to vector<78x4xbf16>
      %c10_69 = arith.constant 10 : index
      %c0_70 = arith.constant 0 : index
      %c0_71 = arith.constant 0 : index
      %82 = vector.load %arg5[%c10_69, %c0_70, %c0_71] : memref<27x4x128xbf16, #tpu.memory_space<vmem>>, vector<1x4x128xbf16>
      %83 = vector.shape_cast %82 : vector<1x4x128xbf16> to vector<4x128xbf16>
      %cst_72 = arith.constant dense<0.000000e+00> : vector<78x128xf32>
      %84 = tpu.matmul %81, %83, %cst_72 {dimension_numbers = #tpu.dot_dimension_numbers<[1], [0], [0], [1], [0, 0, 1, 1], [], []>} : vector<78x4xbf16>, vector<4x128xbf16>, vector<78x128xf32> -> vector<78x128xf32>
      %85 = arith.addf %78, %84 : vector<78x128xf32>
      %c0_73 = arith.constant 0 : index
      %c0_74 = arith.constant 0 : index
      %c2_75 = arith.constant 2 : index
      %c0_76 = arith.constant 0 : index
      %86 = vector.load %arg3[%c0_73, %c0_74, %c2_75, %c0_76] : memref<1x1x100x4xf32, #tpu.memory_space<vmem>>, vector<1x1x78x4xf32>
      %87 = vector.shape_cast %86 : vector<1x1x78x4xf32> to vector<78x4xf32>
      %88 = arith.truncf %87 : vector<78x4xf32> to vector<78x4xbf16>
      %c11_77 = arith.constant 11 : index
      %c0_78 = arith.constant 0 : index
      %c0_79 = arith.constant 0 : index
      %89 = vector.load %arg5[%c11_77, %c0_78, %c0_79] : memref<27x4x128xbf16, #tpu.memory_space<vmem>>, vector<1x4x128xbf16>
      %90 = vector.shape_cast %89 : vector<1x4x128xbf16> to vector<4x128xbf16>
      %cst_80 = arith.constant dense<0.000000e+00> : vector<78x128xf32>
      %91 = tpu.matmul %88, %90, %cst_80 {dimension_numbers = #tpu.dot_dimension_numbers<[1], [0], [0], [1], [0, 0, 1, 1], [], []>} : vector<78x4xbf16>, vector<4x128xbf16>, vector<78x128xf32> -> vector<78x128xf32>
      %92 = arith.addf %85, %91 : vector<78x128xf32>
      %c0_81 = arith.constant 0 : index
      %c0_82 = arith.constant 0 : index
      %c10_83 = arith.constant 10 : index
      %c0_84 = arith.constant 0 : index
      %93 = vector.load %arg3[%c0_81, %c0_82, %c10_83, %c0_84] : memref<1x1x100x4xf32, #tpu.memory_space<vmem>>, vector<1x1x78x4xf32>
      %94 = vector.shape_cast %93 : vector<1x1x78x4xf32> to vector<78x4xf32>
      %95 = arith.truncf %94 : vector<78x4xf32> to vector<78x4xbf16>
      %c12_85 = arith.constant 12 : index
      %c0_86 = arith.constant 0 : index
      %c0_87 = arith.constant 0 : index
      %96 = vector.load %arg5[%c12_85, %c0_86, %c0_87] : memref<27x4x128xbf16, #tpu.memory_space<vmem>>, vector<1x4x128xbf16>
      %97 = vector.shape_cast %96 : vector<1x4x128xbf16> to vector<4x128xbf16>
      %cst_88 = arith.constant dense<0.000000e+00> : vector<78x128xf32>
      %98 = tpu.matmul %95, %97, %cst_88 {dimension_numbers = #tpu.dot_dimension_numbers<[1], [0], [0], [1], [0, 0, 1, 1], [], []>} : vector<78x4xbf16>, vector<4x128xbf16>, vector<78x128xf32> -> vector<78x128xf32>
      %99 = arith.addf %92, %98 : vector<78x128xf32>
      %c0_89 = arith.constant 0 : index
      %c0_90 = arith.constant 0 : index
      %c11_91 = arith.constant 11 : index
      %c0_92 = arith.constant 0 : index
      %100 = vector.load %arg3[%c0_89, %c0_90, %c11_91, %c0_92] : memref<1x1x100x4xf32, #tpu.memory_space<vmem>>, vector<1x1x78x4xf32>
      %101 = vector.shape_cast %100 : vector<1x1x78x4xf32> to vector<78x4xf32>
      %102 = arith.truncf %101 : vector<78x4xf32> to vector<78x4xbf16>
      %c13 = arith.constant 13 : index
      %c0_93 = arith.constant 0 : index
      %c0_94 = arith.constant 0 : index
      %103 = vector.load %arg5[%c13, %c0_93, %c0_94] : memref<27x4x128xbf16, #tpu.memory_space<vmem>>, vector<1x4x128xbf16>
      %104 = vector.shape_cast %103 : vector<1x4x128xbf16> to vector<4x128xbf16>
      %cst_95 = arith.constant dense<0.000000e+00> : vector<78x128xf32>
      %105 = tpu.matmul %102, %104, %cst_95 {dimension_numbers = #tpu.dot_dimension_numbers<[1], [0], [0], [1], [0, 0, 1, 1], [], []>} : vector<78x4xbf16>, vector<4x128xbf16>, vector<78x128xf32> -> vector<78x128xf32>
      %106 = arith.addf %99, %105 : vector<78x128xf32>
      %c0_96 = arith.constant 0 : index
      %c0_97 = arith.constant 0 : index
      %c12_98 = arith.constant 12 : index
      %c0_99 = arith.constant 0 : index
      %107 = vector.load %arg3[%c0_96, %c0_97, %c12_98, %c0_99] : memref<1x1x100x4xf32, #tpu.memory_space<vmem>>, vector<1x1x78x4xf32>
      %108 = vector.shape_cast %107 : vector<1x1x78x4xf32> to vector<78x4xf32>
      %109 = arith.truncf %108 : vector<78x4xf32> to vector<78x4xbf16>
      %c14 = arith.constant 14 : index
      %c0_100 = arith.constant 0 : index
      %c0_101 = arith.constant 0 : index
      %110 = vector.load %arg5[%c14, %c0_100, %c0_101] : memref<27x4x128xbf16, #tpu.memory_space<vmem>>, vector<1x4x128xbf16>
      %111 = vector.shape_cast %110 : vector<1x4x128xbf16> to vector<4x128xbf16>
      %cst_102 = arith.constant dense<0.000000e+00> : vector<78x128xf32>
      %112 = tpu.matmul %109, %111, %cst_102 {dimension_numbers = #tpu.dot_dimension_numbers<[1], [0], [0], [1], [0, 0, 1, 1], [], []>} : vector<78x4xbf16>, vector<4x128xbf16>, vector<78x128xf32> -> vector<78x128xf32>
      %113 = arith.addf %106, %112 : vector<78x128xf32>
      %c0_103 = arith.constant 0 : index
      %c0_104 = arith.constant 0 : index
      %c20_105 = arith.constant 20 : index
      %c0_106 = arith.constant 0 : index
      %114 = vector.load %arg3[%c0_103, %c0_104, %c20_105, %c0_106] : memref<1x1x100x4xf32, #tpu.memory_space<vmem>>, vector<1x1x78x4xf32>
      %115 = vector.shape_cast %114 : vector<1x1x78x4xf32> to vector<78x4xf32>
      %116 = arith.truncf %115 : vector<78x4xf32> to vector<78x4xbf16>
      %c15 = arith.constant 15 : index
      %c0_107 = arith.constant 0 : index
      %c0_108 = arith.constant 0 : index
      %117 = vector.load %arg5[%c15, %c0_107, %c0_108] : memref<27x4x128xbf16, #tpu.memory_space<vmem>>, vector<1x4x128xbf16>
      %118 = vector.shape_cast %117 : vector<1x4x128xbf16> to vector<4x128xbf16>
      %cst_109 = arith.constant dense<0.000000e+00> : vector<78x128xf32>
      %119 = tpu.matmul %116, %118, %cst_109 {dimension_numbers = #tpu.dot_dimension_numbers<[1], [0], [0], [1], [0, 0, 1, 1], [], []>} : vector<78x4xbf16>, vector<4x128xbf16>, vector<78x128xf32> -> vector<78x128xf32>
      %120 = arith.addf %113, %119 : vector<78x128xf32>
      %c0_110 = arith.constant 0 : index
      %c0_111 = arith.constant 0 : index
      %c21_112 = arith.constant 21 : index
      %c0_113 = arith.constant 0 : index
      %121 = vector.load %arg3[%c0_110, %c0_111, %c21_112, %c0_113] : memref<1x1x100x4xf32, #tpu.memory_space<vmem>>, vector<1x1x78x4xf32>
      %122 = vector.shape_cast %121 : vector<1x1x78x4xf32> to vector<78x4xf32>
      %123 = arith.truncf %122 : vector<78x4xf32> to vector<78x4xbf16>
      %c16 = arith.constant 16 : index
      %c0_114 = arith.constant 0 : index
      %c0_115 = arith.constant 0 : index
      %124 = vector.load %arg5[%c16, %c0_114, %c0_115] : memref<27x4x128xbf16, #tpu.memory_space<vmem>>, vector<1x4x128xbf16>
      %125 = vector.shape_cast %124 : vector<1x4x128xbf16> to vector<4x128xbf16>
      %cst_116 = arith.constant dense<0.000000e+00> : vector<78x128xf32>
      %126 = tpu.matmul %123, %125, %cst_116 {dimension_numbers = #tpu.dot_dimension_numbers<[1], [0], [0], [1], [0, 0, 1, 1], [], []>} : vector<78x4xbf16>, vector<4x128xbf16>, vector<78x128xf32> -> vector<78x128xf32>
      %127 = arith.addf %120, %126 : vector<78x128xf32>
      %c0_117 = arith.constant 0 : index
      %c0_118 = arith.constant 0 : index
      %c22_119 = arith.constant 22 : index
      %c0_120 = arith.constant 0 : index
      %128 = vector.load %arg3[%c0_117, %c0_118, %c22_119, %c0_120] : memref<1x1x100x4xf32, #tpu.memory_space<vmem>>, vector<1x1x78x4xf32>
      %129 = vector.shape_cast %128 : vector<1x1x78x4xf32> to vector<78x4xf32>
      %130 = arith.truncf %129 : vector<78x4xf32> to vector<78x4xbf16>
      %c17 = arith.constant 17 : index
      %c0_121 = arith.constant 0 : index
      %c0_122 = arith.constant 0 : index
      %131 = vector.load %arg5[%c17, %c0_121, %c0_122] : memref<27x4x128xbf16, #tpu.memory_space<vmem>>, vector<1x4x128xbf16>
      %132 = vector.shape_cast %131 : vector<1x4x128xbf16> to vector<4x128xbf16>
      %cst_123 = arith.constant dense<0.000000e+00> : vector<78x128xf32>
      %133 = tpu.matmul %130, %132, %cst_123 {dimension_numbers = #tpu.dot_dimension_numbers<[1], [0], [0], [1], [0, 0, 1, 1], [], []>} : vector<78x4xbf16>, vector<4x128xbf16>, vector<78x128xf32> -> vector<78x128xf32>
      %134 = arith.addf %127, %133 : vector<78x128xf32>
      %c0_124 = arith.constant 0 : index
      %c0_125 = arith.constant 0 : index
      %c0_126 = arith.constant 0 : index
      %c0_127 = arith.constant 0 : index
      %135 = vector.load %arg4[%c0_124, %c0_125, %c0_126, %c0_127] : memref<1x1x100x4xf32, #tpu.memory_space<vmem>>, vector<1x1x78x4xf32>
      %136 = vector.shape_cast %135 : vector<1x1x78x4xf32> to vector<78x4xf32>
      %137 = arith.truncf %136 : vector<78x4xf32> to vector<78x4xbf16>
      %c18 = arith.constant 18 : index
      %c0_128 = arith.constant 0 : index
      %c0_129 = arith.constant 0 : index
      %138 = vector.load %arg5[%c18, %c0_128, %c0_129] : memref<27x4x128xbf16, #tpu.memory_space<vmem>>, vector<1x4x128xbf16>
      %139 = vector.shape_cast %138 : vector<1x4x128xbf16> to vector<4x128xbf16>
      %cst_130 = arith.constant dense<0.000000e+00> : vector<78x128xf32>
      %140 = tpu.matmul %137, %139, %cst_130 {dimension_numbers = #tpu.dot_dimension_numbers<[1], [0], [0], [1], [0, 0, 1, 1], [], []>} : vector<78x4xbf16>, vector<4x128xbf16>, vector<78x128xf32> -> vector<78x128xf32>
      %141 = arith.addf %134, %140 : vector<78x128xf32>
      %c0_131 = arith.constant 0 : index
      %c0_132 = arith.constant 0 : index
      %c1_133 = arith.constant 1 : index
      %c0_134 = arith.constant 0 : index
      %142 = vector.load %arg4[%c0_131, %c0_132, %c1_133, %c0_134] : memref<1x1x100x4xf32, #tpu.memory_space<vmem>>, vector<1x1x78x4xf32>
      %143 = vector.shape_cast %142 : vector<1x1x78x4xf32> to vector<78x4xf32>
      %144 = arith.truncf %143 : vector<78x4xf32> to vector<78x4xbf16>
      %c19 = arith.constant 19 : index
      %c0_135 = arith.constant 0 : index
      %c0_136 = arith.constant 0 : index
      %145 = vector.load %arg5[%c19, %c0_135, %c0_136] : memref<27x4x128xbf16, #tpu.memory_space<vmem>>, vector<1x4x128xbf16>
      %146 = vector.shape_cast %145 : vector<1x4x128xbf16> to vector<4x128xbf16>
      %cst_137 = arith.constant dense<0.000000e+00> : vector<78x128xf32>
      %147 = tpu.matmul %144, %146, %cst_137 {dimension_numbers = #tpu.dot_dimension_numbers<[1], [0], [0], [1], [0, 0, 1, 1], [], []>} : vector<78x4xbf16>, vector<4x128xbf16>, vector<78x128xf32> -> vector<78x128xf32>
      %148 = arith.addf %141, %147 : vector<78x128xf32>
      %c0_138 = arith.constant 0 : index
      %c0_139 = arith.constant 0 : index
      %c2_140 = arith.constant 2 : index
      %c0_141 = arith.constant 0 : index
      %149 = vector.load %arg4[%c0_138, %c0_139, %c2_140, %c0_141] : memref<1x1x100x4xf32, #tpu.memory_space<vmem>>, vector<1x1x78x4xf32>
      %150 = vector.shape_cast %149 : vector<1x1x78x4xf32> to vector<78x4xf32>
      %151 = arith.truncf %150 : vector<78x4xf32> to vector<78x4xbf16>
      %c20_142 = arith.constant 20 : index
      %c0_143 = arith.constant 0 : index
      %c0_144 = arith.constant 0 : index
      %152 = vector.load %arg5[%c20_142, %c0_143, %c0_144] : memref<27x4x128xbf16, #tpu.memory_space<vmem>>, vector<1x4x128xbf16>
      %153 = vector.shape_cast %152 : vector<1x4x128xbf16> to vector<4x128xbf16>
      %cst_145 = arith.constant dense<0.000000e+00> : vector<78x128xf32>
      %154 = tpu.matmul %151, %153, %cst_145 {dimension_numbers = #tpu.dot_dimension_numbers<[1], [0], [0], [1], [0, 0, 1, 1], [], []>} : vector<78x4xbf16>, vector<4x128xbf16>, vector<78x128xf32> -> vector<78x128xf32>
      %155 = arith.addf %148, %154 : vector<78x128xf32>
      %c0_146 = arith.constant 0 : index
      %c0_147 = arith.constant 0 : index
      %c10_148 = arith.constant 10 : index
      %c0_149 = arith.constant 0 : index
      %156 = vector.load %arg4[%c0_146, %c0_147, %c10_148, %c0_149] : memref<1x1x100x4xf32, #tpu.memory_space<vmem>>, vector<1x1x78x4xf32>
      %157 = vector.shape_cast %156 : vector<1x1x78x4xf32> to vector<78x4xf32>
      %158 = arith.truncf %157 : vector<78x4xf32> to vector<78x4xbf16>
      %c21_150 = arith.constant 21 : index
      %c0_151 = arith.constant 0 : index
      %c0_152 = arith.constant 0 : index
      %159 = vector.load %arg5[%c21_150, %c0_151, %c0_152] : memref<27x4x128xbf16, #tpu.memory_space<vmem>>, vector<1x4x128xbf16>
      %160 = vector.shape_cast %159 : vector<1x4x128xbf16> to vector<4x128xbf16>
      %cst_153 = arith.constant dense<0.000000e+00> : vector<78x128xf32>
      %161 = tpu.matmul %158, %160, %cst_153 {dimension_numbers = #tpu.dot_dimension_numbers<[1], [0], [0], [1], [0, 0, 1, 1], [], []>} : vector<78x4xbf16>, vector<4x128xbf16>, vector<78x128xf32> -> vector<78x128xf32>
      %162 = arith.addf %155, %161 : vector<78x128xf32>
      %c0_154 = arith.constant 0 : index
      %c0_155 = arith.constant 0 : index
      %c11_156 = arith.constant 11 : index
      %c0_157 = arith.constant 0 : index
      %163 = vector.load %arg4[%c0_154, %c0_155, %c11_156, %c0_157] : memref<1x1x100x4xf32, #tpu.memory_space<vmem>>, vector<1x1x78x4xf32>
      %164 = vector.shape_cast %163 : vector<1x1x78x4xf32> to vector<78x4xf32>
      %165 = arith.truncf %164 : vector<78x4xf32> to vector<78x4xbf16>
      %c22_158 = arith.constant 22 : index
      %c0_159 = arith.constant 0 : index
      %c0_160 = arith.constant 0 : index
      %166 = vector.load %arg5[%c22_158, %c0_159, %c0_160] : memref<27x4x128xbf16, #tpu.memory_space<vmem>>, vector<1x4x128xbf16>
      %167 = vector.shape_cast %166 : vector<1x4x128xbf16> to vector<4x128xbf16>
      %cst_161 = arith.constant dense<0.000000e+00> : vector<78x128xf32>
      %168 = tpu.matmul %165, %167, %cst_161 {dimension_numbers = #tpu.dot_dimension_numbers<[1], [0], [0], [1], [0, 0, 1, 1], [], []>} : vector<78x4xbf16>, vector<4x128xbf16>, vector<78x128xf32> -> vector<78x128xf32>
      %169 = arith.addf %162, %168 : vector<78x128xf32>
      %c0_162 = arith.constant 0 : index
      %c0_163 = arith.constant 0 : index
      %c12_164 = arith.constant 12 : index
      %c0_165 = arith.constant 0 : index
      %170 = vector.load %arg4[%c0_162, %c0_163, %c12_164, %c0_165] : memref<1x1x100x4xf32, #tpu.memory_space<vmem>>, vector<1x1x78x4xf32>
      %171 = vector.shape_cast %170 : vector<1x1x78x4xf32> to vector<78x4xf32>
      %172 = arith.truncf %171 : vector<78x4xf32> to vector<78x4xbf16>
      %c23 = arith.constant 23 : index
      %c0_166 = arith.constant 0 : index
      %c0_167 = arith.constant 0 : index
      %173 = vector.load %arg5[%c23, %c0_166, %c0_167] : memref<27x4x128xbf16, #tpu.memory_space<vmem>>, vector<1x4x128xbf16>
      %174 = vector.shape_cast %173 : vector<1x4x128xbf16> to vector<4x128xbf16>
      %cst_168 = arith.constant dense<0.000000e+00> : vector<78x128xf32>
      %175 = tpu.matmul %172, %174, %cst_168 {dimension_numbers = #tpu.dot_dimension_numbers<[1], [0], [0], [1], [0, 0, 1, 1], [], []>} : vector<78x4xbf16>, vector<4x128xbf16>, vector<78x128xf32> -> vector<78x128xf32>
      %176 = arith.addf %169, %175 : vector<78x128xf32>
      %c0_169 = arith.constant 0 : index
      %c0_170 = arith.constant 0 : index
      %c20_171 = arith.constant 20 : index
      %c0_172 = arith.constant 0 : index
      %177 = vector.load %arg4[%c0_169, %c0_170, %c20_171, %c0_172] : memref<1x1x100x4xf32, #tpu.memory_space<vmem>>, vector<1x1x78x4xf32>
      %178 = vector.shape_cast %177 : vector<1x1x78x4xf32> to vector<78x4xf32>
      %179 = arith.truncf %178 : vector<78x4xf32> to vector<78x4xbf16>
      %c24 = arith.constant 24 : index
      %c0_173 = arith.constant 0 : index
      %c0_174 = arith.constant 0 : index
      %180 = vector.load %arg5[%c24, %c0_173, %c0_174] : memref<27x4x128xbf16, #tpu.memory_space<vmem>>, vector<1x4x128xbf16>
      %181 = vector.shape_cast %180 : vector<1x4x128xbf16> to vector<4x128xbf16>
      %cst_175 = arith.constant dense<0.000000e+00> : vector<78x128xf32>
      %182 = tpu.matmul %179, %181, %cst_175 {dimension_numbers = #tpu.dot_dimension_numbers<[1], [0], [0], [1], [0, 0, 1, 1], [], []>} : vector<78x4xbf16>, vector<4x128xbf16>, vector<78x128xf32> -> vector<78x128xf32>
      %183 = arith.addf %176, %182 : vector<78x128xf32>
      %c0_176 = arith.constant 0 : index
      %c0_177 = arith.constant 0 : index
      %c21_178 = arith.constant 21 : index
      %c0_179 = arith.constant 0 : index
      %184 = vector.load %arg4[%c0_176, %c0_177, %c21_178, %c0_179] : memref<1x1x100x4xf32, #tpu.memory_space<vmem>>, vector<1x1x78x4xf32>
      %185 = vector.shape_cast %184 : vector<1x1x78x4xf32> to vector<78x4xf32>
      %186 = arith.truncf %185 : vector<78x4xf32> to vector<78x4xbf16>
      %c25 = arith.constant 25 : index
      %c0_180 = arith.constant 0 : index
      %c0_181 = arith.constant 0 : index
      %187 = vector.load %arg5[%c25, %c0_180, %c0_181] : memref<27x4x128xbf16, #tpu.memory_space<vmem>>, vector<1x4x128xbf16>
      %188 = vector.shape_cast %187 : vector<1x4x128xbf16> to vector<4x128xbf16>
      %cst_182 = arith.constant dense<0.000000e+00> : vector<78x128xf32>
      %189 = tpu.matmul %186, %188, %cst_182 {dimension_numbers = #tpu.dot_dimension_numbers<[1], [0], [0], [1], [0, 0, 1, 1], [], []>} : vector<78x4xbf16>, vector<4x128xbf16>, vector<78x128xf32> -> vector<78x128xf32>
      %190 = arith.addf %183, %189 : vector<78x128xf32>
      %c0_183 = arith.constant 0 : index
      %c0_184 = arith.constant 0 : index
      %c22_185 = arith.constant 22 : index
      %c0_186 = arith.constant 0 : index
      %191 = vector.load %arg4[%c0_183, %c0_184, %c22_185, %c0_186] : memref<1x1x100x4xf32, #tpu.memory_space<vmem>>, vector<1x1x78x4xf32>
      %192 = vector.shape_cast %191 : vector<1x1x78x4xf32> to vector<78x4xf32>
      %193 = arith.truncf %192 : vector<78x4xf32> to vector<78x4xbf16>
      %c26 = arith.constant 26 : index
      %c0_187 = arith.constant 0 : index
      %c0_188 = arith.constant 0 : index
      %194 = vector.load %arg5[%c26, %c0_187, %c0_188] : memref<27x4x128xbf16, #tpu.memory_space<vmem>>, vector<1x4x128xbf16>
      %195 = vector.shape_cast %194 : vector<1x4x128xbf16> to vector<4x128xbf16>
      %cst_189 = arith.constant dense<0.000000e+00> : vector<78x128xf32>
      %196 = tpu.matmul %193, %195, %cst_189 {dimension_numbers = #tpu.dot_dimension_numbers<[1], [0], [0], [1], [0, 0, 1, 1], [], []>} : vector<78x4xbf16>, vector<4x128xbf16>, vector<78x128xf32> -> vector<78x128xf32>
      %197 = arith.addf %190, %196 : vector<78x128xf32>
      %c0_190 = arith.constant 0 : index
      %c0_191 = arith.constant 0 : index
      %198 = vector.load %arg6[%c0_190, %c0_191] : memref<1x128xf32, #tpu.memory_space<vmem>>, vector<1x128xf32>
      %199 = vector.broadcast %198 : vector<1x128xf32> to vector<78x128xf32>
      %200 = arith.mulf %197, %199 : vector<78x128xf32>
      %c0_192 = arith.constant 0 : index
      %c0_193 = arith.constant 0 : index
      %201 = vector.load %arg7[%c0_192, %c0_193] : memref<1x128xf32, #tpu.memory_space<vmem>>, vector<1x128xf32>
      %202 = vector.broadcast %201 : vector<1x128xf32> to vector<78x128xf32>
      %203 = arith.addf %200, %202 : vector<78x128xf32>
      %cst_194 = arith.constant 0.000000e+00 : f32
      %204 = vector.broadcast %cst_194 : f32 to vector<78x128xf32>
      %205 = arith.maximumf %203, %204 : vector<78x128xf32>
      %206 = tpu.iota {dimensions = array<i32: 0>} : vector<78x1xi32>
      %c10_i32 = arith.constant 10 : i32
      %c0_i32_195 = arith.constant 0 : i32
      %207 = arith.cmpi eq, %c10_i32, %c0_i32_195 : i32
      %c1_i32_196 = arith.constant 1 : i32
      %208 = arith.select %207, %c1_i32_196, %c10_i32 : i32
      %209 = vector.broadcast %208 : i32 to vector<78x1xi32>
      %210 = arith.remsi %206, %209 : vector<78x1xi32>
      %c0_i32_197 = arith.constant 0 : i32
      %211 = vector.broadcast %c0_i32_197 : i32 to vector<78x1xi32>
      %212 = arith.cmpi ne, %210, %211 : vector<78x1xi32>
      %c0_i32_198 = arith.constant 0 : i32
      %213 = vector.broadcast %c0_i32_198 : i32 to vector<78x1xi32>
      %214 = arith.cmpi slt, %210, %213 : vector<78x1xi32>
      %c0_i32_199 = arith.constant 0 : i32
      %215 = arith.cmpi slt, %208, %c0_i32_199 : i32
      %216 = vector.broadcast %215 : i1 to vector<78x1xi1>
      %217 = vector.broadcast %216 : vector<78x1xi1> to vector<78x1xi1>
      %218 = arith.xori %214, %217 : vector<78x1xi1>
      %219 = arith.andi %218, %212 : vector<78x1xi1>
      %220 = vector.broadcast %208 : i32 to vector<78x1xi32>
      %221 = arith.addi %210, %220 : vector<78x1xi32>
      %222 = arith.select %219, %221, %210 : vector<78x1xi1>, vector<78x1xi32>
      %c8_i32_200 = arith.constant 8 : i32
      %223 = vector.broadcast %c8_i32_200 : i32 to vector<78x1xi32>
      %224 = arith.cmpi slt, %222, %223 : vector<78x1xi32>
      %cst_201 = arith.constant 0.000000e+00 : f32
      %225 = vector.shape_cast %224 : vector<78x1xi1> to vector<78x1xi1>
      %226 = vector.broadcast %225 : vector<78x1xi1> to vector<78x128xi1>
      %227 = vector.broadcast %cst_201 : f32 to vector<78x128xf32>
      %228 = arith.select %226, %205, %227 : vector<78x128xi1>, vector<78x128xf32>
      %cst_202 = arith.constant 0.000000e+00 : bf16
      %229 = vector.broadcast %cst_202 : bf16 to vector<11x128xbf16>
      %c0_203 = arith.constant 0 : index
      %c0_204 = arith.constant 0 : index
      %c0_205 = arith.constant 0 : index
      %c0_206 = arith.constant 0 : index
      %230 = vector.load %arg8[%c0_203, %c0_204, %c0_205, %c0_206] : memref<1x1x100x128xbf16, #tpu.memory_space<vmem>>, vector<1x1x11x128xbf16>
      %231 = vector.shape_cast %230 : vector<1x1x11x128xbf16> to vector<11x128xbf16>
      %232 = vector.shape_cast %229 : vector<11x128xbf16> to vector<1x1x11x128xbf16>
      tpu.vector_store %arg8[%c0_203, %c0_204, %c0_205, %c0_206], %232 {strides = array<i32>} : memref<1x1x100x128xbf16, #tpu.memory_space<vmem>>, vector<1x1x11x128xbf16>,
      %233 = arith.truncf %228 : vector<78x128xf32> to vector<78x128xbf16>
      %c0_207 = arith.constant 0 : index
      %c0_208 = arith.constant 0 : index
      %c11_209 = arith.constant 11 : index
      %c0_210 = arith.constant 0 : index
      %234 = vector.load %arg8[%c0_207, %c0_208, %c11_209, %c0_210] : memref<1x1x100x128xbf16, #tpu.memory_space<vmem>>, vector<1x1x78x128xbf16>
      %235 = vector.shape_cast %234 : vector<1x1x78x128xbf16> to vector<78x128xbf16>
      %236 = vector.shape_cast %233 : vector<78x128xbf16> to vector<1x1x78x128xbf16>
      tpu.vector_store %arg8[%c0_207, %c0_208, %c11_209, %c0_210], %236 {strides = array<i32>} : memref<1x1x100x128xbf16, #tpu.memory_space<vmem>>, vector<1x1x78x128xbf16>,
      %c0_211 = arith.constant 0 : index
      %c0_212 = arith.constant 0 : index
      %c89 = arith.constant 89 : index
      %c0_213 = arith.constant 0 : index
      %237 = vector.load %arg8[%c0_211, %c0_212, %c89, %c0_213] : memref<1x1x100x128xbf16, #tpu.memory_space<vmem>>, vector<1x1x11x128xbf16>
      %238 = vector.shape_cast %237 : vector<1x1x11x128xbf16> to vector<11x128xbf16>
      %239 = vector.shape_cast %229 : vector<11x128xbf16> to vector<1x1x11x128xbf16>
      tpu.vector_store %arg8[%c0_211, %c0_212, %c89, %c0_213], %239 {strides = array<i32>} : memref<1x1x100x128xbf16, #tpu.memory_space<vmem>>, vector<1x1x11x128xbf16>,
    } else {
    }
    return
  }
  func.func @transform_0(%arg0: i32, %arg1: i32) -> (i32, i32, i32, i32) {
    %c1_i32 = arith.constant 1 : i32
    %0 = arith.subi %arg1, %c1_i32 : i32
    %c0_i32 = arith.constant 0 : i32
    %1 = arith.addi %0, %c0_i32 : i32
    %c0_i32_0 = arith.constant 0 : i32
    %c9_i32 = arith.constant 9 : i32
    %2 = arith.maxsi %c0_i32_0, %1 : i32
    %3 = arith.minsi %c9_i32, %2 : i32
    %c0_i32_1 = arith.constant 0 : i32
    %c0_i32_2 = arith.constant 0 : i32
    %c0_i32_3 = arith.constant 0 : i32
    return %arg0, %3, %c0_i32_1, %c0_i32_2 : i32, i32, i32, i32
  }
  func.func @transform_1(%arg0: i32, %arg1: i32) -> (i32, i32, i32, i32) {
    %c1_i32 = arith.constant 1 : i32
    %0 = arith.subi %arg1, %c1_i32 : i32
    %c1_i32_0 = arith.constant 1 : i32
    %1 = arith.addi %0, %c1_i32_0 : i32
    %c0_i32 = arith.constant 0 : i32
    %c9_i32 = arith.constant 9 : i32
    %2 = arith.maxsi %c0_i32, %1 : i32
    %3 = arith.minsi %c9_i32, %2 : i32
    %c0_i32_1 = arith.constant 0 : i32
    %c0_i32_2 = arith.constant 0 : i32
    %c0_i32_3 = arith.constant 0 : i32
    return %arg0, %3, %c0_i32_1, %c0_i32_2 : i32, i32, i32, i32
  }
  func.func @transform_2(%arg0: i32, %arg1: i32) -> (i32, i32, i32, i32) {
    %c1_i32 = arith.constant 1 : i32
    %0 = arith.subi %arg1, %c1_i32 : i32
    %c2_i32 = arith.constant 2 : i32
    %1 = arith.addi %0, %c2_i32 : i32
    %c0_i32 = arith.constant 0 : i32
    %c9_i32 = arith.constant 9 : i32
    %2 = arith.maxsi %c0_i32, %1 : i32
    %3 = arith.minsi %c9_i32, %2 : i32
    %c0_i32_0 = arith.constant 0 : i32
    %c0_i32_1 = arith.constant 0 : i32
    %c0_i32_2 = arith.constant 0 : i32
    return %arg0, %3, %c0_i32_0, %c0_i32_1 : i32, i32, i32, i32
  }
  func.func @transform_3(%arg0: i32, %arg1: i32) -> (i32, i32, i32) {
    %c0_i32 = arith.constant 0 : i32
    %c0_i32_0 = arith.constant 0 : i32
    %c0_i32_1 = arith.constant 0 : i32
    %c0_i32_2 = arith.constant 0 : i32
    return %c0_i32, %c0_i32_0, %c0_i32_1 : i32, i32, i32
  }
  func.func @transform_4(%arg0: i32, %arg1: i32) -> (i32, i32) {
    %c0_i32 = arith.constant 0 : i32
    %c0_i32_0 = arith.constant 0 : i32
    %c0_i32_1 = arith.constant 0 : i32
    return %c0_i32, %c0_i32_0 : i32, i32
  }
  func.func @transform_5(%arg0: i32, %arg1: i32) -> (i32, i32) {
    %c0_i32 = arith.constant 0 : i32
    %c0_i32_0 = arith.constant 0 : i32
    %c0_i32_1 = arith.constant 0 : i32
    return %c0_i32, %c0_i32_0 : i32, i32
  }
  func.func @transform_6(%arg0: i32, %arg1: i32) -> (i32, i32, i32, i32) {
    %c0_i32 = arith.constant 0 : i32
    %c0_i32_0 = arith.constant 0 : i32
    %c0_i32_1 = arith.constant 0 : i32
    return %arg0, %arg1, %c0_i32, %c0_i32_0 : i32, i32, i32, i32
  }
}

module attributes {stable_mosaic.version = 11 : i64} {
  func.func @_conv2_pool_kernel(%arg0: i32, %arg1: i32, %arg2: memref<1x1x100x128xbf16, #tpu.memory_space<vmem>>, %arg3: memref<1x1x100x128xbf16, #tpu.memory_space<vmem>>, %arg4: memref<1x1x100x128xbf16, #tpu.memory_space<vmem>>, %arg5: memref<1x1x100x128xbf16, #tpu.memory_space<vmem>>, %arg6: memref<27x128x128xbf16, #tpu.memory_space<vmem>>, %arg7: memref<1x128xf32, #tpu.memory_space<vmem>>, %arg8: memref<1x128xf32, #tpu.memory_space<vmem>>, %arg9: memref<1x2x80x128xf32, #tpu.memory_space<vmem>>, %arg10: memref<1x1x20x128xf32, #tpu.memory_space<vmem>>) attributes {dimension_semantics = [#tpu.dimension_semantics<parallel>, #tpu.dimension_semantics<parallel>], iteration_bounds = array<i64: 2, 4>, scalar_prefetch = 0 : i64, scratch_operands = 0 : i64, tpu.core_type = #tpu.core_type<tc>, window_params = [{transform_indices = @transform_0, window_bounds = array<i64: 1, 1, 100, 128>}, {transform_indices = @transform_1, window_bounds = array<i64: 1, 1, 100, 128>}, {transform_indices = @transform_2, window_bounds = array<i64: 1, 1, 100, 128>}, {transform_indices = @transform_3, window_bounds = array<i64: 1, 1, 100, 128>}, {pipeline_mode = #tpu.pipeline_mode<synchronous>, transform_indices = @transform_4, window_bounds = array<i64: 27, 128, 128>}, {pipeline_mode = #tpu.pipeline_mode<synchronous>, transform_indices = @transform_5, window_bounds = array<i64: 1, 128>}, {pipeline_mode = #tpu.pipeline_mode<synchronous>, transform_indices = @transform_6, window_bounds = array<i64: 1, 128>}, {transform_indices = @transform_7, window_bounds = array<i64: 1, 2, 80, 128>}, {transform_indices = @transform_8, window_bounds = array<i64: 1, 1, 20, 128>}]} {
    %cst = arith.constant 0.000000e+00 : f32
    %0 = vector.broadcast %cst : f32 to vector<78x128xf32>
    %c0 = arith.constant 0 : index
    %c0_0 = arith.constant 0 : index
    %c0_1 = arith.constant 0 : index
    %c0_2 = arith.constant 0 : index
    %1 = vector.load %arg2[%c0, %c0_0, %c0_1, %c0_2] : memref<1x1x100x128xbf16, #tpu.memory_space<vmem>>, vector<1x1x78x128xbf16>
    %2 = vector.shape_cast %1 : vector<1x1x78x128xbf16> to vector<78x128xbf16>
    %c0_3 = arith.constant 0 : index
    %c0_4 = arith.constant 0 : index
    %c0_5 = arith.constant 0 : index
    %3 = vector.load %arg6[%c0_3, %c0_4, %c0_5] : memref<27x128x128xbf16, #tpu.memory_space<vmem>>, vector<1x128x128xbf16>
    %4 = vector.shape_cast %3 : vector<1x128x128xbf16> to vector<128x128xbf16>
    %cst_6 = arith.constant dense<0.000000e+00> : vector<78x128xf32>
    %5 = tpu.matmul %2, %4, %cst_6 {dimension_numbers = #tpu.dot_dimension_numbers<[1], [0], [0], [1], [0, 0, 1, 1], [], []>} : vector<78x128xbf16>, vector<128x128xbf16>, vector<78x128xf32> -> vector<78x128xf32>
    %6 = arith.addf %0, %5 : vector<78x128xf32>
    %c0_7 = arith.constant 0 : index
    %c0_8 = arith.constant 0 : index
    %c1 = arith.constant 1 : index
    %c0_9 = arith.constant 0 : index
    %7 = vector.load %arg2[%c0_7, %c0_8, %c1, %c0_9] : memref<1x1x100x128xbf16, #tpu.memory_space<vmem>>, vector<1x1x78x128xbf16>
    %8 = vector.shape_cast %7 : vector<1x1x78x128xbf16> to vector<78x128xbf16>
    %c1_10 = arith.constant 1 : index
    %c0_11 = arith.constant 0 : index
    %c0_12 = arith.constant 0 : index
    %9 = vector.load %arg6[%c1_10, %c0_11, %c0_12] : memref<27x128x128xbf16, #tpu.memory_space<vmem>>, vector<1x128x128xbf16>
    %10 = vector.shape_cast %9 : vector<1x128x128xbf16> to vector<128x128xbf16>
    %cst_13 = arith.constant dense<0.000000e+00> : vector<78x128xf32>
    %11 = tpu.matmul %8, %10, %cst_13 {dimension_numbers = #tpu.dot_dimension_numbers<[1], [0], [0], [1], [0, 0, 1, 1], [], []>} : vector<78x128xbf16>, vector<128x128xbf16>, vector<78x128xf32> -> vector<78x128xf32>
    %12 = arith.addf %6, %11 : vector<78x128xf32>
    %c0_14 = arith.constant 0 : index
    %c0_15 = arith.constant 0 : index
    %c2 = arith.constant 2 : index
    %c0_16 = arith.constant 0 : index
    %13 = vector.load %arg2[%c0_14, %c0_15, %c2, %c0_16] : memref<1x1x100x128xbf16, #tpu.memory_space<vmem>>, vector<1x1x78x128xbf16>
    %14 = vector.shape_cast %13 : vector<1x1x78x128xbf16> to vector<78x128xbf16>
    %c2_17 = arith.constant 2 : index
    %c0_18 = arith.constant 0 : index
    %c0_19 = arith.constant 0 : index
    %15 = vector.load %arg6[%c2_17, %c0_18, %c0_19] : memref<27x128x128xbf16, #tpu.memory_space<vmem>>, vector<1x128x128xbf16>
    %16 = vector.shape_cast %15 : vector<1x128x128xbf16> to vector<128x128xbf16>
    %cst_20 = arith.constant dense<0.000000e+00> : vector<78x128xf32>
    %17 = tpu.matmul %14, %16, %cst_20 {dimension_numbers = #tpu.dot_dimension_numbers<[1], [0], [0], [1], [0, 0, 1, 1], [], []>} : vector<78x128xbf16>, vector<128x128xbf16>, vector<78x128xf32> -> vector<78x128xf32>
    %18 = arith.addf %12, %17 : vector<78x128xf32>
    %c0_21 = arith.constant 0 : index
    %c0_22 = arith.constant 0 : index
    %c10 = arith.constant 10 : index
    %c0_23 = arith.constant 0 : index
    %19 = vector.load %arg2[%c0_21, %c0_22, %c10, %c0_23] : memref<1x1x100x128xbf16, #tpu.memory_space<vmem>>, vector<1x1x78x128xbf16>
    %20 = vector.shape_cast %19 : vector<1x1x78x128xbf16> to vector<78x128xbf16>
    %c3 = arith.constant 3 : index
    %c0_24 = arith.constant 0 : index
    %c0_25 = arith.constant 0 : index
    %21 = vector.load %arg6[%c3, %c0_24, %c0_25] : memref<27x128x128xbf16, #tpu.memory_space<vmem>>, vector<1x128x128xbf16>
    %22 = vector.shape_cast %21 : vector<1x128x128xbf16> to vector<128x128xbf16>
    %cst_26 = arith.constant dense<0.000000e+00> : vector<78x128xf32>
    %23 = tpu.matmul %20, %22, %cst_26 {dimension_numbers = #tpu.dot_dimension_numbers<[1], [0], [0], [1], [0, 0, 1, 1], [], []>} : vector<78x128xbf16>, vector<128x128xbf16>, vector<78x128xf32> -> vector<78x128xf32>
    %24 = arith.addf %18, %23 : vector<78x128xf32>
    %c0_27 = arith.constant 0 : index
    %c0_28 = arith.constant 0 : index
    %c11 = arith.constant 11 : index
    %c0_29 = arith.constant 0 : index
    %25 = vector.load %arg2[%c0_27, %c0_28, %c11, %c0_29] : memref<1x1x100x128xbf16, #tpu.memory_space<vmem>>, vector<1x1x78x128xbf16>
    %26 = vector.shape_cast %25 : vector<1x1x78x128xbf16> to vector<78x128xbf16>
    %c4 = arith.constant 4 : index
    %c0_30 = arith.constant 0 : index
    %c0_31 = arith.constant 0 : index
    %27 = vector.load %arg6[%c4, %c0_30, %c0_31] : memref<27x128x128xbf16, #tpu.memory_space<vmem>>, vector<1x128x128xbf16>
    %28 = vector.shape_cast %27 : vector<1x128x128xbf16> to vector<128x128xbf16>
    %cst_32 = arith.constant dense<0.000000e+00> : vector<78x128xf32>
    %29 = tpu.matmul %26, %28, %cst_32 {dimension_numbers = #tpu.dot_dimension_numbers<[1], [0], [0], [1], [0, 0, 1, 1], [], []>} : vector<78x128xbf16>, vector<128x128xbf16>, vector<78x128xf32> -> vector<78x128xf32>
    %30 = arith.addf %24, %29 : vector<78x128xf32>
    %c0_33 = arith.constant 0 : index
    %c0_34 = arith.constant 0 : index
    %c12 = arith.constant 12 : index
    %c0_35 = arith.constant 0 : index
    %31 = vector.load %arg2[%c0_33, %c0_34, %c12, %c0_35] : memref<1x1x100x128xbf16, #tpu.memory_space<vmem>>, vector<1x1x78x128xbf16>
    %32 = vector.shape_cast %31 : vector<1x1x78x128xbf16> to vector<78x128xbf16>
    %c5 = arith.constant 5 : index
    %c0_36 = arith.constant 0 : index
    %c0_37 = arith.constant 0 : index
    %33 = vector.load %arg6[%c5, %c0_36, %c0_37] : memref<27x128x128xbf16, #tpu.memory_space<vmem>>, vector<1x128x128xbf16>
    %34 = vector.shape_cast %33 : vector<1x128x128xbf16> to vector<128x128xbf16>
    %cst_38 = arith.constant dense<0.000000e+00> : vector<78x128xf32>
    %35 = tpu.matmul %32, %34, %cst_38 {dimension_numbers = #tpu.dot_dimension_numbers<[1], [0], [0], [1], [0, 0, 1, 1], [], []>} : vector<78x128xbf16>, vector<128x128xbf16>, vector<78x128xf32> -> vector<78x128xf32>
    %36 = arith.addf %30, %35 : vector<78x128xf32>
    %c0_39 = arith.constant 0 : index
    %c0_40 = arith.constant 0 : index
    %c20 = arith.constant 20 : index
    %c0_41 = arith.constant 0 : index
    %37 = vector.load %arg2[%c0_39, %c0_40, %c20, %c0_41] : memref<1x1x100x128xbf16, #tpu.memory_space<vmem>>, vector<1x1x78x128xbf16>
    %38 = vector.shape_cast %37 : vector<1x1x78x128xbf16> to vector<78x128xbf16>
    %c6 = arith.constant 6 : index
    %c0_42 = arith.constant 0 : index
    %c0_43 = arith.constant 0 : index
    %39 = vector.load %arg6[%c6, %c0_42, %c0_43] : memref<27x128x128xbf16, #tpu.memory_space<vmem>>, vector<1x128x128xbf16>
    %40 = vector.shape_cast %39 : vector<1x128x128xbf16> to vector<128x128xbf16>
    %cst_44 = arith.constant dense<0.000000e+00> : vector<78x128xf32>
    %41 = tpu.matmul %38, %40, %cst_44 {dimension_numbers = #tpu.dot_dimension_numbers<[1], [0], [0], [1], [0, 0, 1, 1], [], []>} : vector<78x128xbf16>, vector<128x128xbf16>, vector<78x128xf32> -> vector<78x128xf32>
    %42 = arith.addf %36, %41 : vector<78x128xf32>
    %c0_45 = arith.constant 0 : index
    %c0_46 = arith.constant 0 : index
    %c21 = arith.constant 21 : index
    %c0_47 = arith.constant 0 : index
    %43 = vector.load %arg2[%c0_45, %c0_46, %c21, %c0_47] : memref<1x1x100x128xbf16, #tpu.memory_space<vmem>>, vector<1x1x78x128xbf16>
    %44 = vector.shape_cast %43 : vector<1x1x78x128xbf16> to vector<78x128xbf16>
    %c7 = arith.constant 7 : index
    %c0_48 = arith.constant 0 : index
    %c0_49 = arith.constant 0 : index
    %45 = vector.load %arg6[%c7, %c0_48, %c0_49] : memref<27x128x128xbf16, #tpu.memory_space<vmem>>, vector<1x128x128xbf16>
    %46 = vector.shape_cast %45 : vector<1x128x128xbf16> to vector<128x128xbf16>
    %cst_50 = arith.constant dense<0.000000e+00> : vector<78x128xf32>
    %47 = tpu.matmul %44, %46, %cst_50 {dimension_numbers = #tpu.dot_dimension_numbers<[1], [0], [0], [1], [0, 0, 1, 1], [], []>} : vector<78x128xbf16>, vector<128x128xbf16>, vector<78x128xf32> -> vector<78x128xf32>
    %48 = arith.addf %42, %47 : vector<78x128xf32>
    %c0_51 = arith.constant 0 : index
    %c0_52 = arith.constant 0 : index
    %c22 = arith.constant 22 : index
    %c0_53 = arith.constant 0 : index
    %49 = vector.load %arg2[%c0_51, %c0_52, %c22, %c0_53] : memref<1x1x100x128xbf16, #tpu.memory_space<vmem>>, vector<1x1x78x128xbf16>
    %50 = vector.shape_cast %49 : vector<1x1x78x128xbf16> to vector<78x128xbf16>
    %c8 = arith.constant 8 : index
    %c0_54 = arith.constant 0 : index
    %c0_55 = arith.constant 0 : index
    %51 = vector.load %arg6[%c8, %c0_54, %c0_55] : memref<27x128x128xbf16, #tpu.memory_space<vmem>>, vector<1x128x128xbf16>
    %52 = vector.shape_cast %51 : vector<1x128x128xbf16> to vector<128x128xbf16>
    %cst_56 = arith.constant dense<0.000000e+00> : vector<78x128xf32>
    %53 = tpu.matmul %50, %52, %cst_56 {dimension_numbers = #tpu.dot_dimension_numbers<[1], [0], [0], [1], [0, 0, 1, 1], [], []>} : vector<78x128xbf16>, vector<128x128xbf16>, vector<78x128xf32> -> vector<78x128xf32>
    %54 = arith.addf %48, %53 : vector<78x128xf32>
    %c0_57 = arith.constant 0 : index
    %c0_58 = arith.constant 0 : index
    %c0_59 = arith.constant 0 : index
    %c0_60 = arith.constant 0 : index
    %55 = vector.load %arg3[%c0_57, %c0_58, %c0_59, %c0_60] : memref<1x1x100x128xbf16, #tpu.memory_space<vmem>>, vector<1x1x78x128xbf16>
    %56 = vector.shape_cast %55 : vector<1x1x78x128xbf16> to vector<78x128xbf16>
    %c9 = arith.constant 9 : index
    %c0_61 = arith.constant 0 : index
    %c0_62 = arith.constant 0 : index
    %57 = vector.load %arg6[%c9, %c0_61, %c0_62] : memref<27x128x128xbf16, #tpu.memory_space<vmem>>, vector<1x128x128xbf16>
    %58 = vector.shape_cast %57 : vector<1x128x128xbf16> to vector<128x128xbf16>
    %cst_63 = arith.constant dense<0.000000e+00> : vector<78x128xf32>
    %59 = tpu.matmul %56, %58, %cst_63 {dimension_numbers = #tpu.dot_dimension_numbers<[1], [0], [0], [1], [0, 0, 1, 1], [], []>} : vector<78x128xbf16>, vector<128x128xbf16>, vector<78x128xf32> -> vector<78x128xf32>
    %60 = arith.addf %54, %59 : vector<78x128xf32>
    %c0_64 = arith.constant 0 : index
    %c0_65 = arith.constant 0 : index
    %c1_66 = arith.constant 1 : index
    %c0_67 = arith.constant 0 : index
    %61 = vector.load %arg3[%c0_64, %c0_65, %c1_66, %c0_67] : memref<1x1x100x128xbf16, #tpu.memory_space<vmem>>, vector<1x1x78x128xbf16>
    %62 = vector.shape_cast %61 : vector<1x1x78x128xbf16> to vector<78x128xbf16>
    %c10_68 = arith.constant 10 : index
    %c0_69 = arith.constant 0 : index
    %c0_70 = arith.constant 0 : index
    %63 = vector.load %arg6[%c10_68, %c0_69, %c0_70] : memref<27x128x128xbf16, #tpu.memory_space<vmem>>, vector<1x128x128xbf16>
    %64 = vector.shape_cast %63 : vector<1x128x128xbf16> to vector<128x128xbf16>
    %cst_71 = arith.constant dense<0.000000e+00> : vector<78x128xf32>
    %65 = tpu.matmul %62, %64, %cst_71 {dimension_numbers = #tpu.dot_dimension_numbers<[1], [0], [0], [1], [0, 0, 1, 1], [], []>} : vector<78x128xbf16>, vector<128x128xbf16>, vector<78x128xf32> -> vector<78x128xf32>
    %66 = arith.addf %60, %65 : vector<78x128xf32>
    %c0_72 = arith.constant 0 : index
    %c0_73 = arith.constant 0 : index
    %c2_74 = arith.constant 2 : index
    %c0_75 = arith.constant 0 : index
    %67 = vector.load %arg3[%c0_72, %c0_73, %c2_74, %c0_75] : memref<1x1x100x128xbf16, #tpu.memory_space<vmem>>, vector<1x1x78x128xbf16>
    %68 = vector.shape_cast %67 : vector<1x1x78x128xbf16> to vector<78x128xbf16>
    %c11_76 = arith.constant 11 : index
    %c0_77 = arith.constant 0 : index
    %c0_78 = arith.constant 0 : index
    %69 = vector.load %arg6[%c11_76, %c0_77, %c0_78] : memref<27x128x128xbf16, #tpu.memory_space<vmem>>, vector<1x128x128xbf16>
    %70 = vector.shape_cast %69 : vector<1x128x128xbf16> to vector<128x128xbf16>
    %cst_79 = arith.constant dense<0.000000e+00> : vector<78x128xf32>
    %71 = tpu.matmul %68, %70, %cst_79 {dimension_numbers = #tpu.dot_dimension_numbers<[1], [0], [0], [1], [0, 0, 1, 1], [], []>} : vector<78x128xbf16>, vector<128x128xbf16>, vector<78x128xf32> -> vector<78x128xf32>
    %72 = arith.addf %66, %71 : vector<78x128xf32>
    %c0_80 = arith.constant 0 : index
    %c0_81 = arith.constant 0 : index
    %c10_82 = arith.constant 10 : index
    %c0_83 = arith.constant 0 : index
    %73 = vector.load %arg3[%c0_80, %c0_81, %c10_82, %c0_83] : memref<1x1x100x128xbf16, #tpu.memory_space<vmem>>, vector<1x1x78x128xbf16>
    %74 = vector.shape_cast %73 : vector<1x1x78x128xbf16> to vector<78x128xbf16>
    %c12_84 = arith.constant 12 : index
    %c0_85 = arith.constant 0 : index
    %c0_86 = arith.constant 0 : index
    %75 = vector.load %arg6[%c12_84, %c0_85, %c0_86] : memref<27x128x128xbf16, #tpu.memory_space<vmem>>, vector<1x128x128xbf16>
    %76 = vector.shape_cast %75 : vector<1x128x128xbf16> to vector<128x128xbf16>
    %cst_87 = arith.constant dense<0.000000e+00> : vector<78x128xf32>
    %77 = tpu.matmul %74, %76, %cst_87 {dimension_numbers = #tpu.dot_dimension_numbers<[1], [0], [0], [1], [0, 0, 1, 1], [], []>} : vector<78x128xbf16>, vector<128x128xbf16>, vector<78x128xf32> -> vector<78x128xf32>
    %78 = arith.addf %72, %77 : vector<78x128xf32>
    %c0_88 = arith.constant 0 : index
    %c0_89 = arith.constant 0 : index
    %c11_90 = arith.constant 11 : index
    %c0_91 = arith.constant 0 : index
    %79 = vector.load %arg3[%c0_88, %c0_89, %c11_90, %c0_91] : memref<1x1x100x128xbf16, #tpu.memory_space<vmem>>, vector<1x1x78x128xbf16>
    %80 = vector.shape_cast %79 : vector<1x1x78x128xbf16> to vector<78x128xbf16>
    %c13 = arith.constant 13 : index
    %c0_92 = arith.constant 0 : index
    %c0_93 = arith.constant 0 : index
    %81 = vector.load %arg6[%c13, %c0_92, %c0_93] : memref<27x128x128xbf16, #tpu.memory_space<vmem>>, vector<1x128x128xbf16>
    %82 = vector.shape_cast %81 : vector<1x128x128xbf16> to vector<128x128xbf16>
    %cst_94 = arith.constant dense<0.000000e+00> : vector<78x128xf32>
    %83 = tpu.matmul %80, %82, %cst_94 {dimension_numbers = #tpu.dot_dimension_numbers<[1], [0], [0], [1], [0, 0, 1, 1], [], []>} : vector<78x128xbf16>, vector<128x128xbf16>, vector<78x128xf32> -> vector<78x128xf32>
    %84 = arith.addf %78, %83 : vector<78x128xf32>
    %c0_95 = arith.constant 0 : index
    %c0_96 = arith.constant 0 : index
    %c12_97 = arith.constant 12 : index
    %c0_98 = arith.constant 0 : index
    %85 = vector.load %arg3[%c0_95, %c0_96, %c12_97, %c0_98] : memref<1x1x100x128xbf16, #tpu.memory_space<vmem>>, vector<1x1x78x128xbf16>
    %86 = vector.shape_cast %85 : vector<1x1x78x128xbf16> to vector<78x128xbf16>
    %c14 = arith.constant 14 : index
    %c0_99 = arith.constant 0 : index
    %c0_100 = arith.constant 0 : index
    %87 = vector.load %arg6[%c14, %c0_99, %c0_100] : memref<27x128x128xbf16, #tpu.memory_space<vmem>>, vector<1x128x128xbf16>
    %88 = vector.shape_cast %87 : vector<1x128x128xbf16> to vector<128x128xbf16>
    %cst_101 = arith.constant dense<0.000000e+00> : vector<78x128xf32>
    %89 = tpu.matmul %86, %88, %cst_101 {dimension_numbers = #tpu.dot_dimension_numbers<[1], [0], [0], [1], [0, 0, 1, 1], [], []>} : vector<78x128xbf16>, vector<128x128xbf16>, vector<78x128xf32> -> vector<78x128xf32>
    %90 = arith.addf %84, %89 : vector<78x128xf32>
    %c0_102 = arith.constant 0 : index
    %c0_103 = arith.constant 0 : index
    %c20_104 = arith.constant 20 : index
    %c0_105 = arith.constant 0 : index
    %91 = vector.load %arg3[%c0_102, %c0_103, %c20_104, %c0_105] : memref<1x1x100x128xbf16, #tpu.memory_space<vmem>>, vector<1x1x78x128xbf16>
    %92 = vector.shape_cast %91 : vector<1x1x78x128xbf16> to vector<78x128xbf16>
    %c15 = arith.constant 15 : index
    %c0_106 = arith.constant 0 : index
    %c0_107 = arith.constant 0 : index
    %93 = vector.load %arg6[%c15, %c0_106, %c0_107] : memref<27x128x128xbf16, #tpu.memory_space<vmem>>, vector<1x128x128xbf16>
    %94 = vector.shape_cast %93 : vector<1x128x128xbf16> to vector<128x128xbf16>
    %cst_108 = arith.constant dense<0.000000e+00> : vector<78x128xf32>
    %95 = tpu.matmul %92, %94, %cst_108 {dimension_numbers = #tpu.dot_dimension_numbers<[1], [0], [0], [1], [0, 0, 1, 1], [], []>} : vector<78x128xbf16>, vector<128x128xbf16>, vector<78x128xf32> -> vector<78x128xf32>
    %96 = arith.addf %90, %95 : vector<78x128xf32>
    %c0_109 = arith.constant 0 : index
    %c0_110 = arith.constant 0 : index
    %c21_111 = arith.constant 21 : index
    %c0_112 = arith.constant 0 : index
    %97 = vector.load %arg3[%c0_109, %c0_110, %c21_111, %c0_112] : memref<1x1x100x128xbf16, #tpu.memory_space<vmem>>, vector<1x1x78x128xbf16>
    %98 = vector.shape_cast %97 : vector<1x1x78x128xbf16> to vector<78x128xbf16>
    %c16 = arith.constant 16 : index
    %c0_113 = arith.constant 0 : index
    %c0_114 = arith.constant 0 : index
    %99 = vector.load %arg6[%c16, %c0_113, %c0_114] : memref<27x128x128xbf16, #tpu.memory_space<vmem>>, vector<1x128x128xbf16>
    %100 = vector.shape_cast %99 : vector<1x128x128xbf16> to vector<128x128xbf16>
    %cst_115 = arith.constant dense<0.000000e+00> : vector<78x128xf32>
    %101 = tpu.matmul %98, %100, %cst_115 {dimension_numbers = #tpu.dot_dimension_numbers<[1], [0], [0], [1], [0, 0, 1, 1], [], []>} : vector<78x128xbf16>, vector<128x128xbf16>, vector<78x128xf32> -> vector<78x128xf32>
    %102 = arith.addf %96, %101 : vector<78x128xf32>
    %c0_116 = arith.constant 0 : index
    %c0_117 = arith.constant 0 : index
    %c22_118 = arith.constant 22 : index
    %c0_119 = arith.constant 0 : index
    %103 = vector.load %arg3[%c0_116, %c0_117, %c22_118, %c0_119] : memref<1x1x100x128xbf16, #tpu.memory_space<vmem>>, vector<1x1x78x128xbf16>
    %104 = vector.shape_cast %103 : vector<1x1x78x128xbf16> to vector<78x128xbf16>
    %c17 = arith.constant 17 : index
    %c0_120 = arith.constant 0 : index
    %c0_121 = arith.constant 0 : index
    %105 = vector.load %arg6[%c17, %c0_120, %c0_121] : memref<27x128x128xbf16, #tpu.memory_space<vmem>>, vector<1x128x128xbf16>
    %106 = vector.shape_cast %105 : vector<1x128x128xbf16> to vector<128x128xbf16>
    %cst_122 = arith.constant dense<0.000000e+00> : vector<78x128xf32>
    %107 = tpu.matmul %104, %106, %cst_122 {dimension_numbers = #tpu.dot_dimension_numbers<[1], [0], [0], [1], [0, 0, 1, 1], [], []>} : vector<78x128xbf16>, vector<128x128xbf16>, vector<78x128xf32> -> vector<78x128xf32>
    %108 = arith.addf %102, %107 : vector<78x128xf32>
    %c0_123 = arith.constant 0 : index
    %c0_124 = arith.constant 0 : index
    %c0_125 = arith.constant 0 : index
    %c0_126 = arith.constant 0 : index
    %109 = vector.load %arg4[%c0_123, %c0_124, %c0_125, %c0_126] : memref<1x1x100x128xbf16, #tpu.memory_space<vmem>>, vector<1x1x78x128xbf16>
    %110 = vector.shape_cast %109 : vector<1x1x78x128xbf16> to vector<78x128xbf16>
    %c18 = arith.constant 18 : index
    %c0_127 = arith.constant 0 : index
    %c0_128 = arith.constant 0 : index
    %111 = vector.load %arg6[%c18, %c0_127, %c0_128] : memref<27x128x128xbf16, #tpu.memory_space<vmem>>, vector<1x128x128xbf16>
    %112 = vector.shape_cast %111 : vector<1x128x128xbf16> to vector<128x128xbf16>
    %cst_129 = arith.constant dense<0.000000e+00> : vector<78x128xf32>
    %113 = tpu.matmul %110, %112, %cst_129 {dimension_numbers = #tpu.dot_dimension_numbers<[1], [0], [0], [1], [0, 0, 1, 1], [], []>} : vector<78x128xbf16>, vector<128x128xbf16>, vector<78x128xf32> -> vector<78x128xf32>
    %114 = arith.addf %108, %113 : vector<78x128xf32>
    %c0_130 = arith.constant 0 : index
    %c0_131 = arith.constant 0 : index
    %c1_132 = arith.constant 1 : index
    %c0_133 = arith.constant 0 : index
    %115 = vector.load %arg4[%c0_130, %c0_131, %c1_132, %c0_133] : memref<1x1x100x128xbf16, #tpu.memory_space<vmem>>, vector<1x1x78x128xbf16>
    %116 = vector.shape_cast %115 : vector<1x1x78x128xbf16> to vector<78x128xbf16>
    %c19 = arith.constant 19 : index
    %c0_134 = arith.constant 0 : index
    %c0_135 = arith.constant 0 : index
    %117 = vector.load %arg6[%c19, %c0_134, %c0_135] : memref<27x128x128xbf16, #tpu.memory_space<vmem>>, vector<1x128x128xbf16>
    %118 = vector.shape_cast %117 : vector<1x128x128xbf16> to vector<128x128xbf16>
    %cst_136 = arith.constant dense<0.000000e+00> : vector<78x128xf32>
    %119 = tpu.matmul %116, %118, %cst_136 {dimension_numbers = #tpu.dot_dimension_numbers<[1], [0], [0], [1], [0, 0, 1, 1], [], []>} : vector<78x128xbf16>, vector<128x128xbf16>, vector<78x128xf32> -> vector<78x128xf32>
    %120 = arith.addf %114, %119 : vector<78x128xf32>
    %c0_137 = arith.constant 0 : index
    %c0_138 = arith.constant 0 : index
    %c2_139 = arith.constant 2 : index
    %c0_140 = arith.constant 0 : index
    %121 = vector.load %arg4[%c0_137, %c0_138, %c2_139, %c0_140] : memref<1x1x100x128xbf16, #tpu.memory_space<vmem>>, vector<1x1x78x128xbf16>
    %122 = vector.shape_cast %121 : vector<1x1x78x128xbf16> to vector<78x128xbf16>
    %c20_141 = arith.constant 20 : index
    %c0_142 = arith.constant 0 : index
    %c0_143 = arith.constant 0 : index
    %123 = vector.load %arg6[%c20_141, %c0_142, %c0_143] : memref<27x128x128xbf16, #tpu.memory_space<vmem>>, vector<1x128x128xbf16>
    %124 = vector.shape_cast %123 : vector<1x128x128xbf16> to vector<128x128xbf16>
    %cst_144 = arith.constant dense<0.000000e+00> : vector<78x128xf32>
    %125 = tpu.matmul %122, %124, %cst_144 {dimension_numbers = #tpu.dot_dimension_numbers<[1], [0], [0], [1], [0, 0, 1, 1], [], []>} : vector<78x128xbf16>, vector<128x128xbf16>, vector<78x128xf32> -> vector<78x128xf32>
    %126 = arith.addf %120, %125 : vector<78x128xf32>
    %c0_145 = arith.constant 0 : index
    %c0_146 = arith.constant 0 : index
    %c10_147 = arith.constant 10 : index
    %c0_148 = arith.constant 0 : index
    %127 = vector.load %arg4[%c0_145, %c0_146, %c10_147, %c0_148] : memref<1x1x100x128xbf16, #tpu.memory_space<vmem>>, vector<1x1x78x128xbf16>
    %128 = vector.shape_cast %127 : vector<1x1x78x128xbf16> to vector<78x128xbf16>
    %c21_149 = arith.constant 21 : index
    %c0_150 = arith.constant 0 : index
    %c0_151 = arith.constant 0 : index
    %129 = vector.load %arg6[%c21_149, %c0_150, %c0_151] : memref<27x128x128xbf16, #tpu.memory_space<vmem>>, vector<1x128x128xbf16>
    %130 = vector.shape_cast %129 : vector<1x128x128xbf16> to vector<128x128xbf16>
    %cst_152 = arith.constant dense<0.000000e+00> : vector<78x128xf32>
    %131 = tpu.matmul %128, %130, %cst_152 {dimension_numbers = #tpu.dot_dimension_numbers<[1], [0], [0], [1], [0, 0, 1, 1], [], []>} : vector<78x128xbf16>, vector<128x128xbf16>, vector<78x128xf32> -> vector<78x128xf32>
    %132 = arith.addf %126, %131 : vector<78x128xf32>
    %c0_153 = arith.constant 0 : index
    %c0_154 = arith.constant 0 : index
    %c11_155 = arith.constant 11 : index
    %c0_156 = arith.constant 0 : index
    %133 = vector.load %arg4[%c0_153, %c0_154, %c11_155, %c0_156] : memref<1x1x100x128xbf16, #tpu.memory_space<vmem>>, vector<1x1x78x128xbf16>
    %134 = vector.shape_cast %133 : vector<1x1x78x128xbf16> to vector<78x128xbf16>
    %c22_157 = arith.constant 22 : index
    %c0_158 = arith.constant 0 : index
    %c0_159 = arith.constant 0 : index
    %135 = vector.load %arg6[%c22_157, %c0_158, %c0_159] : memref<27x128x128xbf16, #tpu.memory_space<vmem>>, vector<1x128x128xbf16>
    %136 = vector.shape_cast %135 : vector<1x128x128xbf16> to vector<128x128xbf16>
    %cst_160 = arith.constant dense<0.000000e+00> : vector<78x128xf32>
    %137 = tpu.matmul %134, %136, %cst_160 {dimension_numbers = #tpu.dot_dimension_numbers<[1], [0], [0], [1], [0, 0, 1, 1], [], []>} : vector<78x128xbf16>, vector<128x128xbf16>, vector<78x128xf32> -> vector<78x128xf32>
    %138 = arith.addf %132, %137 : vector<78x128xf32>
    %c0_161 = arith.constant 0 : index
    %c0_162 = arith.constant 0 : index
    %c12_163 = arith.constant 12 : index
    %c0_164 = arith.constant 0 : index
    %139 = vector.load %arg4[%c0_161, %c0_162, %c12_163, %c0_164] : memref<1x1x100x128xbf16, #tpu.memory_space<vmem>>, vector<1x1x78x128xbf16>
    %140 = vector.shape_cast %139 : vector<1x1x78x128xbf16> to vector<78x128xbf16>
    %c23 = arith.constant 23 : index
    %c0_165 = arith.constant 0 : index
    %c0_166 = arith.constant 0 : index
    %141 = vector.load %arg6[%c23, %c0_165, %c0_166] : memref<27x128x128xbf16, #tpu.memory_space<vmem>>, vector<1x128x128xbf16>
    %142 = vector.shape_cast %141 : vector<1x128x128xbf16> to vector<128x128xbf16>
    %cst_167 = arith.constant dense<0.000000e+00> : vector<78x128xf32>
    %143 = tpu.matmul %140, %142, %cst_167 {dimension_numbers = #tpu.dot_dimension_numbers<[1], [0], [0], [1], [0, 0, 1, 1], [], []>} : vector<78x128xbf16>, vector<128x128xbf16>, vector<78x128xf32> -> vector<78x128xf32>
    %144 = arith.addf %138, %143 : vector<78x128xf32>
    %c0_168 = arith.constant 0 : index
    %c0_169 = arith.constant 0 : index
    %c20_170 = arith.constant 20 : index
    %c0_171 = arith.constant 0 : index
    %145 = vector.load %arg4[%c0_168, %c0_169, %c20_170, %c0_171] : memref<1x1x100x128xbf16, #tpu.memory_space<vmem>>, vector<1x1x78x128xbf16>
    %146 = vector.shape_cast %145 : vector<1x1x78x128xbf16> to vector<78x128xbf16>
    %c24 = arith.constant 24 : index
    %c0_172 = arith.constant 0 : index
    %c0_173 = arith.constant 0 : index
    %147 = vector.load %arg6[%c24, %c0_172, %c0_173] : memref<27x128x128xbf16, #tpu.memory_space<vmem>>, vector<1x128x128xbf16>
    %148 = vector.shape_cast %147 : vector<1x128x128xbf16> to vector<128x128xbf16>
    %cst_174 = arith.constant dense<0.000000e+00> : vector<78x128xf32>
    %149 = tpu.matmul %146, %148, %cst_174 {dimension_numbers = #tpu.dot_dimension_numbers<[1], [0], [0], [1], [0, 0, 1, 1], [], []>} : vector<78x128xbf16>, vector<128x128xbf16>, vector<78x128xf32> -> vector<78x128xf32>
    %150 = arith.addf %144, %149 : vector<78x128xf32>
    %c0_175 = arith.constant 0 : index
    %c0_176 = arith.constant 0 : index
    %c21_177 = arith.constant 21 : index
    %c0_178 = arith.constant 0 : index
    %151 = vector.load %arg4[%c0_175, %c0_176, %c21_177, %c0_178] : memref<1x1x100x128xbf16, #tpu.memory_space<vmem>>, vector<1x1x78x128xbf16>
    %152 = vector.shape_cast %151 : vector<1x1x78x128xbf16> to vector<78x128xbf16>
    %c25 = arith.constant 25 : index
    %c0_179 = arith.constant 0 : index
    %c0_180 = arith.constant 0 : index
    %153 = vector.load %arg6[%c25, %c0_179, %c0_180] : memref<27x128x128xbf16, #tpu.memory_space<vmem>>, vector<1x128x128xbf16>
    %154 = vector.shape_cast %153 : vector<1x128x128xbf16> to vector<128x128xbf16>
    %cst_181 = arith.constant dense<0.000000e+00> : vector<78x128xf32>
    %155 = tpu.matmul %152, %154, %cst_181 {dimension_numbers = #tpu.dot_dimension_numbers<[1], [0], [0], [1], [0, 0, 1, 1], [], []>} : vector<78x128xbf16>, vector<128x128xbf16>, vector<78x128xf32> -> vector<78x128xf32>
    %156 = arith.addf %150, %155 : vector<78x128xf32>
    %c0_182 = arith.constant 0 : index
    %c0_183 = arith.constant 0 : index
    %c22_184 = arith.constant 22 : index
    %c0_185 = arith.constant 0 : index
    %157 = vector.load %arg4[%c0_182, %c0_183, %c22_184, %c0_185] : memref<1x1x100x128xbf16, #tpu.memory_space<vmem>>, vector<1x1x78x128xbf16>
    %158 = vector.shape_cast %157 : vector<1x1x78x128xbf16> to vector<78x128xbf16>
    %c26 = arith.constant 26 : index
    %c0_186 = arith.constant 0 : index
    %c0_187 = arith.constant 0 : index
    %159 = vector.load %arg6[%c26, %c0_186, %c0_187] : memref<27x128x128xbf16, #tpu.memory_space<vmem>>, vector<1x128x128xbf16>
    %160 = vector.shape_cast %159 : vector<1x128x128xbf16> to vector<128x128xbf16>
    %cst_188 = arith.constant dense<0.000000e+00> : vector<78x128xf32>
    %161 = tpu.matmul %158, %160, %cst_188 {dimension_numbers = #tpu.dot_dimension_numbers<[1], [0], [0], [1], [0, 0, 1, 1], [], []>} : vector<78x128xbf16>, vector<128x128xbf16>, vector<78x128xf32> -> vector<78x128xf32>
    %162 = arith.addf %156, %161 : vector<78x128xf32>
    %c0_189 = arith.constant 0 : index
    %c0_190 = arith.constant 0 : index
    %163 = vector.load %arg7[%c0_189, %c0_190] : memref<1x128xf32, #tpu.memory_space<vmem>>, vector<1x128xf32>
    %164 = vector.broadcast %163 : vector<1x128xf32> to vector<78x128xf32>
    %165 = arith.mulf %162, %164 : vector<78x128xf32>
    %c0_191 = arith.constant 0 : index
    %c0_192 = arith.constant 0 : index
    %166 = vector.load %arg8[%c0_191, %c0_192] : memref<1x128xf32, #tpu.memory_space<vmem>>, vector<1x128xf32>
    %167 = vector.broadcast %166 : vector<1x128xf32> to vector<78x128xf32>
    %168 = arith.addf %165, %167 : vector<78x128xf32>
    %cst_193 = arith.constant 0.000000e+00 : f32
    %169 = vector.broadcast %cst_193 : f32 to vector<78x128xf32>
    %170 = arith.maximumf %168, %169 : vector<78x128xf32>
    %c0_194 = arith.constant 0 : index
    %c0_195 = arith.constant 0 : index
    %c0_196 = arith.constant 0 : index
    %c0_197 = arith.constant 0 : index
    %171 = vector.load %arg9[%c0_194, %c0_195, %c0_196, %c0_197] : memref<1x2x80x128xf32, #tpu.memory_space<vmem>>, vector<1x1x78x128xf32>
    %172 = vector.shape_cast %171 : vector<1x1x78x128xf32> to vector<78x128xf32>
    %173 = vector.shape_cast %170 : vector<78x128xf32> to vector<1x1x78x128xf32>
    tpu.vector_store %arg9[%c0_194, %c0_195, %c0_196, %c0_197], %173 {strides = array<i32>} : memref<1x2x80x128xf32, #tpu.memory_space<vmem>>, vector<1x1x78x128xf32>,
    %cst_198 = arith.constant 0.000000e+00 : f32
    %174 = vector.broadcast %cst_198 : f32 to vector<2x128xf32>
    %c0_199 = arith.constant 0 : index
    %c0_200 = arith.constant 0 : index
    %c78 = arith.constant 78 : index
    %c0_201 = arith.constant 0 : index
    %175 = vector.load %arg9[%c0_199, %c0_200, %c78, %c0_201] : memref<1x2x80x128xf32, #tpu.memory_space<vmem>>, vector<1x1x2x128xf32>
    %176 = vector.shape_cast %175 : vector<1x1x2x128xf32> to vector<2x128xf32>
    %177 = vector.shape_cast %174 : vector<2x128xf32> to vector<1x1x2x128xf32>
    tpu.vector_store %arg9[%c0_199, %c0_200, %c78, %c0_201], %177 {strides = array<i32>} : memref<1x2x80x128xf32, #tpu.memory_space<vmem>>, vector<1x1x2x128xf32>,
    %cst_202 = arith.constant 0.000000e+00 : f32
    %178 = vector.broadcast %cst_202 : f32 to vector<78x128xf32>
    %c0_203 = arith.constant 0 : index
    %c0_204 = arith.constant 0 : index
    %c0_205 = arith.constant 0 : index
    %c0_206 = arith.constant 0 : index
    %179 = vector.load %arg3[%c0_203, %c0_204, %c0_205, %c0_206] : memref<1x1x100x128xbf16, #tpu.memory_space<vmem>>, vector<1x1x78x128xbf16>
    %180 = vector.shape_cast %179 : vector<1x1x78x128xbf16> to vector<78x128xbf16>
    %c0_207 = arith.constant 0 : index
    %c0_208 = arith.constant 0 : index
    %c0_209 = arith.constant 0 : index
    %181 = vector.load %arg6[%c0_207, %c0_208, %c0_209] : memref<27x128x128xbf16, #tpu.memory_space<vmem>>, vector<1x128x128xbf16>
    %182 = vector.shape_cast %181 : vector<1x128x128xbf16> to vector<128x128xbf16>
    %cst_210 = arith.constant dense<0.000000e+00> : vector<78x128xf32>
    %183 = tpu.matmul %180, %182, %cst_210 {dimension_numbers = #tpu.dot_dimension_numbers<[1], [0], [0], [1], [0, 0, 1, 1], [], []>} : vector<78x128xbf16>, vector<128x128xbf16>, vector<78x128xf32> -> vector<78x128xf32>
    %184 = arith.addf %178, %183 : vector<78x128xf32>
    %c0_211 = arith.constant 0 : index
    %c0_212 = arith.constant 0 : index
    %c1_213 = arith.constant 1 : index
    %c0_214 = arith.constant 0 : index
    %185 = vector.load %arg3[%c0_211, %c0_212, %c1_213, %c0_214] : memref<1x1x100x128xbf16, #tpu.memory_space<vmem>>, vector<1x1x78x128xbf16>
    %186 = vector.shape_cast %185 : vector<1x1x78x128xbf16> to vector<78x128xbf16>
    %c1_215 = arith.constant 1 : index
    %c0_216 = arith.constant 0 : index
    %c0_217 = arith.constant 0 : index
    %187 = vector.load %arg6[%c1_215, %c0_216, %c0_217] : memref<27x128x128xbf16, #tpu.memory_space<vmem>>, vector<1x128x128xbf16>
    %188 = vector.shape_cast %187 : vector<1x128x128xbf16> to vector<128x128xbf16>
    %cst_218 = arith.constant dense<0.000000e+00> : vector<78x128xf32>
    %189 = tpu.matmul %186, %188, %cst_218 {dimension_numbers = #tpu.dot_dimension_numbers<[1], [0], [0], [1], [0, 0, 1, 1], [], []>} : vector<78x128xbf16>, vector<128x128xbf16>, vector<78x128xf32> -> vector<78x128xf32>
    %190 = arith.addf %184, %189 : vector<78x128xf32>
    %c0_219 = arith.constant 0 : index
    %c0_220 = arith.constant 0 : index
    %c2_221 = arith.constant 2 : index
    %c0_222 = arith.constant 0 : index
    %191 = vector.load %arg3[%c0_219, %c0_220, %c2_221, %c0_222] : memref<1x1x100x128xbf16, #tpu.memory_space<vmem>>, vector<1x1x78x128xbf16>
    %192 = vector.shape_cast %191 : vector<1x1x78x128xbf16> to vector<78x128xbf16>
    %c2_223 = arith.constant 2 : index
    %c0_224 = arith.constant 0 : index
    %c0_225 = arith.constant 0 : index
    %193 = vector.load %arg6[%c2_223, %c0_224, %c0_225] : memref<27x128x128xbf16, #tpu.memory_space<vmem>>, vector<1x128x128xbf16>
    %194 = vector.shape_cast %193 : vector<1x128x128xbf16> to vector<128x128xbf16>
    %cst_226 = arith.constant dense<0.000000e+00> : vector<78x128xf32>
    %195 = tpu.matmul %192, %194, %cst_226 {dimension_numbers = #tpu.dot_dimension_numbers<[1], [0], [0], [1], [0, 0, 1, 1], [], []>} : vector<78x128xbf16>, vector<128x128xbf16>, vector<78x128xf32> -> vector<78x128xf32>
    %196 = arith.addf %190, %195 : vector<78x128xf32>
    %c0_227 = arith.constant 0 : index
    %c0_228 = arith.constant 0 : index
    %c10_229 = arith.constant 10 : index
    %c0_230 = arith.constant 0 : index
    %197 = vector.load %arg3[%c0_227, %c0_228, %c10_229, %c0_230] : memref<1x1x100x128xbf16, #tpu.memory_space<vmem>>, vector<1x1x78x128xbf16>
    %198 = vector.shape_cast %197 : vector<1x1x78x128xbf16> to vector<78x128xbf16>
    %c3_231 = arith.constant 3 : index
    %c0_232 = arith.constant 0 : index
    %c0_233 = arith.constant 0 : index
    %199 = vector.load %arg6[%c3_231, %c0_232, %c0_233] : memref<27x128x128xbf16, #tpu.memory_space<vmem>>, vector<1x128x128xbf16>
    %200 = vector.shape_cast %199 : vector<1x128x128xbf16> to vector<128x128xbf16>
    %cst_234 = arith.constant dense<0.000000e+00> : vector<78x128xf32>
    %201 = tpu.matmul %198, %200, %cst_234 {dimension_numbers = #tpu.dot_dimension_numbers<[1], [0], [0], [1], [0, 0, 1, 1], [], []>} : vector<78x128xbf16>, vector<128x128xbf16>, vector<78x128xf32> -> vector<78x128xf32>
    %202 = arith.addf %196, %201 : vector<78x128xf32>
    %c0_235 = arith.constant 0 : index
    %c0_236 = arith.constant 0 : index
    %c11_237 = arith.constant 11 : index
    %c0_238 = arith.constant 0 : index
    %203 = vector.load %arg3[%c0_235, %c0_236, %c11_237, %c0_238] : memref<1x1x100x128xbf16, #tpu.memory_space<vmem>>, vector<1x1x78x128xbf16>
    %204 = vector.shape_cast %203 : vector<1x1x78x128xbf16> to vector<78x128xbf16>
    %c4_239 = arith.constant 4 : index
    %c0_240 = arith.constant 0 : index
    %c0_241 = arith.constant 0 : index
    %205 = vector.load %arg6[%c4_239, %c0_240, %c0_241] : memref<27x128x128xbf16, #tpu.memory_space<vmem>>, vector<1x128x128xbf16>
    %206 = vector.shape_cast %205 : vector<1x128x128xbf16> to vector<128x128xbf16>
    %cst_242 = arith.constant dense<0.000000e+00> : vector<78x128xf32>
    %207 = tpu.matmul %204, %206, %cst_242 {dimension_numbers = #tpu.dot_dimension_numbers<[1], [0], [0], [1], [0, 0, 1, 1], [], []>} : vector<78x128xbf16>, vector<128x128xbf16>, vector<78x128xf32> -> vector<78x128xf32>
    %208 = arith.addf %202, %207 : vector<78x128xf32>
    %c0_243 = arith.constant 0 : index
    %c0_244 = arith.constant 0 : index
    %c12_245 = arith.constant 12 : index
    %c0_246 = arith.constant 0 : index
    %209 = vector.load %arg3[%c0_243, %c0_244, %c12_245, %c0_246] : memref<1x1x100x128xbf16, #tpu.memory_space<vmem>>, vector<1x1x78x128xbf16>
    %210 = vector.shape_cast %209 : vector<1x1x78x128xbf16> to vector<78x128xbf16>
    %c5_247 = arith.constant 5 : index
    %c0_248 = arith.constant 0 : index
    %c0_249 = arith.constant 0 : index
    %211 = vector.load %arg6[%c5_247, %c0_248, %c0_249] : memref<27x128x128xbf16, #tpu.memory_space<vmem>>, vector<1x128x128xbf16>
    %212 = vector.shape_cast %211 : vector<1x128x128xbf16> to vector<128x128xbf16>
    %cst_250 = arith.constant dense<0.000000e+00> : vector<78x128xf32>
    %213 = tpu.matmul %210, %212, %cst_250 {dimension_numbers = #tpu.dot_dimension_numbers<[1], [0], [0], [1], [0, 0, 1, 1], [], []>} : vector<78x128xbf16>, vector<128x128xbf16>, vector<78x128xf32> -> vector<78x128xf32>
    %214 = arith.addf %208, %213 : vector<78x128xf32>
    %c0_251 = arith.constant 0 : index
    %c0_252 = arith.constant 0 : index
    %c20_253 = arith.constant 20 : index
    %c0_254 = arith.constant 0 : index
    %215 = vector.load %arg3[%c0_251, %c0_252, %c20_253, %c0_254] : memref<1x1x100x128xbf16, #tpu.memory_space<vmem>>, vector<1x1x78x128xbf16>
    %216 = vector.shape_cast %215 : vector<1x1x78x128xbf16> to vector<78x128xbf16>
    %c6_255 = arith.constant 6 : index
    %c0_256 = arith.constant 0 : index
    %c0_257 = arith.constant 0 : index
    %217 = vector.load %arg6[%c6_255, %c0_256, %c0_257] : memref<27x128x128xbf16, #tpu.memory_space<vmem>>, vector<1x128x128xbf16>
    %218 = vector.shape_cast %217 : vector<1x128x128xbf16> to vector<128x128xbf16>
    %cst_258 = arith.constant dense<0.000000e+00> : vector<78x128xf32>
    %219 = tpu.matmul %216, %218, %cst_258 {dimension_numbers = #tpu.dot_dimension_numbers<[1], [0], [0], [1], [0, 0, 1, 1], [], []>} : vector<78x128xbf16>, vector<128x128xbf16>, vector<78x128xf32> -> vector<78x128xf32>
    %220 = arith.addf %214, %219 : vector<78x128xf32>
    %c0_259 = arith.constant 0 : index
    %c0_260 = arith.constant 0 : index
    %c21_261 = arith.constant 21 : index
    %c0_262 = arith.constant 0 : index
    %221 = vector.load %arg3[%c0_259, %c0_260, %c21_261, %c0_262] : memref<1x1x100x128xbf16, #tpu.memory_space<vmem>>, vector<1x1x78x128xbf16>
    %222 = vector.shape_cast %221 : vector<1x1x78x128xbf16> to vector<78x128xbf16>
    %c7_263 = arith.constant 7 : index
    %c0_264 = arith.constant 0 : index
    %c0_265 = arith.constant 0 : index
    %223 = vector.load %arg6[%c7_263, %c0_264, %c0_265] : memref<27x128x128xbf16, #tpu.memory_space<vmem>>, vector<1x128x128xbf16>
    %224 = vector.shape_cast %223 : vector<1x128x128xbf16> to vector<128x128xbf16>
    %cst_266 = arith.constant dense<0.000000e+00> : vector<78x128xf32>
    %225 = tpu.matmul %222, %224, %cst_266 {dimension_numbers = #tpu.dot_dimension_numbers<[1], [0], [0], [1], [0, 0, 1, 1], [], []>} : vector<78x128xbf16>, vector<128x128xbf16>, vector<78x128xf32> -> vector<78x128xf32>
    %226 = arith.addf %220, %225 : vector<78x128xf32>
    %c0_267 = arith.constant 0 : index
    %c0_268 = arith.constant 0 : index
    %c22_269 = arith.constant 22 : index
    %c0_270 = arith.constant 0 : index
    %227 = vector.load %arg3[%c0_267, %c0_268, %c22_269, %c0_270] : memref<1x1x100x128xbf16, #tpu.memory_space<vmem>>, vector<1x1x78x128xbf16>
    %228 = vector.shape_cast %227 : vector<1x1x78x128xbf16> to vector<78x128xbf16>
    %c8_271 = arith.constant 8 : index
    %c0_272 = arith.constant 0 : index
    %c0_273 = arith.constant 0 : index
    %229 = vector.load %arg6[%c8_271, %c0_272, %c0_273] : memref<27x128x128xbf16, #tpu.memory_space<vmem>>, vector<1x128x128xbf16>
    %230 = vector.shape_cast %229 : vector<1x128x128xbf16> to vector<128x128xbf16>
    %cst_274 = arith.constant dense<0.000000e+00> : vector<78x128xf32>
    %231 = tpu.matmul %228, %230, %cst_274 {dimension_numbers = #tpu.dot_dimension_numbers<[1], [0], [0], [1], [0, 0, 1, 1], [], []>} : vector<78x128xbf16>, vector<128x128xbf16>, vector<78x128xf32> -> vector<78x128xf32>
    %232 = arith.addf %226, %231 : vector<78x128xf32>
    %c0_275 = arith.constant 0 : index
    %c0_276 = arith.constant 0 : index
    %c0_277 = arith.constant 0 : index
    %c0_278 = arith.constant 0 : index
    %233 = vector.load %arg4[%c0_275, %c0_276, %c0_277, %c0_278] : memref<1x1x100x128xbf16, #tpu.memory_space<vmem>>, vector<1x1x78x128xbf16>
    %234 = vector.shape_cast %233 : vector<1x1x78x128xbf16> to vector<78x128xbf16>
    %c9_279 = arith.constant 9 : index
    %c0_280 = arith.constant 0 : index
    %c0_281 = arith.constant 0 : index
    %235 = vector.load %arg6[%c9_279, %c0_280, %c0_281] : memref<27x128x128xbf16, #tpu.memory_space<vmem>>, vector<1x128x128xbf16>
    %236 = vector.shape_cast %235 : vector<1x128x128xbf16> to vector<128x128xbf16>
    %cst_282 = arith.constant dense<0.000000e+00> : vector<78x128xf32>
    %237 = tpu.matmul %234, %236, %cst_282 {dimension_numbers = #tpu.dot_dimension_numbers<[1], [0], [0], [1], [0, 0, 1, 1], [], []>} : vector<78x128xbf16>, vector<128x128xbf16>, vector<78x128xf32> -> vector<78x128xf32>
    %238 = arith.addf %232, %237 : vector<78x128xf32>
    %c0_283 = arith.constant 0 : index
    %c0_284 = arith.constant 0 : index
    %c1_285 = arith.constant 1 : index
    %c0_286 = arith.constant 0 : index
    %239 = vector.load %arg4[%c0_283, %c0_284, %c1_285, %c0_286] : memref<1x1x100x128xbf16, #tpu.memory_space<vmem>>, vector<1x1x78x128xbf16>
    %240 = vector.shape_cast %239 : vector<1x1x78x128xbf16> to vector<78x128xbf16>
    %c10_287 = arith.constant 10 : index
    %c0_288 = arith.constant 0 : index
    %c0_289 = arith.constant 0 : index
    %241 = vector.load %arg6[%c10_287, %c0_288, %c0_289] : memref<27x128x128xbf16, #tpu.memory_space<vmem>>, vector<1x128x128xbf16>
    %242 = vector.shape_cast %241 : vector<1x128x128xbf16> to vector<128x128xbf16>
    %cst_290 = arith.constant dense<0.000000e+00> : vector<78x128xf32>
    %243 = tpu.matmul %240, %242, %cst_290 {dimension_numbers = #tpu.dot_dimension_numbers<[1], [0], [0], [1], [0, 0, 1, 1], [], []>} : vector<78x128xbf16>, vector<128x128xbf16>, vector<78x128xf32> -> vector<78x128xf32>
    %244 = arith.addf %238, %243 : vector<78x128xf32>
    %c0_291 = arith.constant 0 : index
    %c0_292 = arith.constant 0 : index
    %c2_293 = arith.constant 2 : index
    %c0_294 = arith.constant 0 : index
    %245 = vector.load %arg4[%c0_291, %c0_292, %c2_293, %c0_294] : memref<1x1x100x128xbf16, #tpu.memory_space<vmem>>, vector<1x1x78x128xbf16>
    %246 = vector.shape_cast %245 : vector<1x1x78x128xbf16> to vector<78x128xbf16>
    %c11_295 = arith.constant 11 : index
    %c0_296 = arith.constant 0 : index
    %c0_297 = arith.constant 0 : index
    %247 = vector.load %arg6[%c11_295, %c0_296, %c0_297] : memref<27x128x128xbf16, #tpu.memory_space<vmem>>, vector<1x128x128xbf16>
    %248 = vector.shape_cast %247 : vector<1x128x128xbf16> to vector<128x128xbf16>
    %cst_298 = arith.constant dense<0.000000e+00> : vector<78x128xf32>
    %249 = tpu.matmul %246, %248, %cst_298 {dimension_numbers = #tpu.dot_dimension_numbers<[1], [0], [0], [1], [0, 0, 1, 1], [], []>} : vector<78x128xbf16>, vector<128x128xbf16>, vector<78x128xf32> -> vector<78x128xf32>
    %250 = arith.addf %244, %249 : vector<78x128xf32>
    %c0_299 = arith.constant 0 : index
    %c0_300 = arith.constant 0 : index
    %c10_301 = arith.constant 10 : index
    %c0_302 = arith.constant 0 : index
    %251 = vector.load %arg4[%c0_299, %c0_300, %c10_301, %c0_302] : memref<1x1x100x128xbf16, #tpu.memory_space<vmem>>, vector<1x1x78x128xbf16>
    %252 = vector.shape_cast %251 : vector<1x1x78x128xbf16> to vector<78x128xbf16>
    %c12_303 = arith.constant 12 : index
    %c0_304 = arith.constant 0 : index
    %c0_305 = arith.constant 0 : index
    %253 = vector.load %arg6[%c12_303, %c0_304, %c0_305] : memref<27x128x128xbf16, #tpu.memory_space<vmem>>, vector<1x128x128xbf16>
    %254 = vector.shape_cast %253 : vector<1x128x128xbf16> to vector<128x128xbf16>
    %cst_306 = arith.constant dense<0.000000e+00> : vector<78x128xf32>
    %255 = tpu.matmul %252, %254, %cst_306 {dimension_numbers = #tpu.dot_dimension_numbers<[1], [0], [0], [1], [0, 0, 1, 1], [], []>} : vector<78x128xbf16>, vector<128x128xbf16>, vector<78x128xf32> -> vector<78x128xf32>
    %256 = arith.addf %250, %255 : vector<78x128xf32>
    %c0_307 = arith.constant 0 : index
    %c0_308 = arith.constant 0 : index
    %c11_309 = arith.constant 11 : index
    %c0_310 = arith.constant 0 : index
    %257 = vector.load %arg4[%c0_307, %c0_308, %c11_309, %c0_310] : memref<1x1x100x128xbf16, #tpu.memory_space<vmem>>, vector<1x1x78x128xbf16>
    %258 = vector.shape_cast %257 : vector<1x1x78x128xbf16> to vector<78x128xbf16>
    %c13_311 = arith.constant 13 : index
    %c0_312 = arith.constant 0 : index
    %c0_313 = arith.constant 0 : index
    %259 = vector.load %arg6[%c13_311, %c0_312, %c0_313] : memref<27x128x128xbf16, #tpu.memory_space<vmem>>, vector<1x128x128xbf16>
    %260 = vector.shape_cast %259 : vector<1x128x128xbf16> to vector<128x128xbf16>
    %cst_314 = arith.constant dense<0.000000e+00> : vector<78x128xf32>
    %261 = tpu.matmul %258, %260, %cst_314 {dimension_numbers = #tpu.dot_dimension_numbers<[1], [0], [0], [1], [0, 0, 1, 1], [], []>} : vector<78x128xbf16>, vector<128x128xbf16>, vector<78x128xf32> -> vector<78x128xf32>
    %262 = arith.addf %256, %261 : vector<78x128xf32>
    %c0_315 = arith.constant 0 : index
    %c0_316 = arith.constant 0 : index
    %c12_317 = arith.constant 12 : index
    %c0_318 = arith.constant 0 : index
    %263 = vector.load %arg4[%c0_315, %c0_316, %c12_317, %c0_318] : memref<1x1x100x128xbf16, #tpu.memory_space<vmem>>, vector<1x1x78x128xbf16>
    %264 = vector.shape_cast %263 : vector<1x1x78x128xbf16> to vector<78x128xbf16>
    %c14_319 = arith.constant 14 : index
    %c0_320 = arith.constant 0 : index
    %c0_321 = arith.constant 0 : index
    %265 = vector.load %arg6[%c14_319, %c0_320, %c0_321] : memref<27x128x128xbf16, #tpu.memory_space<vmem>>, vector<1x128x128xbf16>
    %266 = vector.shape_cast %265 : vector<1x128x128xbf16> to vector<128x128xbf16>
    %cst_322 = arith.constant dense<0.000000e+00> : vector<78x128xf32>
    %267 = tpu.matmul %264, %266, %cst_322 {dimension_numbers = #tpu.dot_dimension_numbers<[1], [0], [0], [1], [0, 0, 1, 1], [], []>} : vector<78x128xbf16>, vector<128x128xbf16>, vector<78x128xf32> -> vector<78x128xf32>
    %268 = arith.addf %262, %267 : vector<78x128xf32>
    %c0_323 = arith.constant 0 : index
    %c0_324 = arith.constant 0 : index
    %c20_325 = arith.constant 20 : index
    %c0_326 = arith.constant 0 : index
    %269 = vector.load %arg4[%c0_323, %c0_324, %c20_325, %c0_326] : memref<1x1x100x128xbf16, #tpu.memory_space<vmem>>, vector<1x1x78x128xbf16>
    %270 = vector.shape_cast %269 : vector<1x1x78x128xbf16> to vector<78x128xbf16>
    %c15_327 = arith.constant 15 : index
    %c0_328 = arith.constant 0 : index
    %c0_329 = arith.constant 0 : index
    %271 = vector.load %arg6[%c15_327, %c0_328, %c0_329] : memref<27x128x128xbf16, #tpu.memory_space<vmem>>, vector<1x128x128xbf16>
    %272 = vector.shape_cast %271 : vector<1x128x128xbf16> to vector<128x128xbf16>
    %cst_330 = arith.constant dense<0.000000e+00> : vector<78x128xf32>
    %273 = tpu.matmul %270, %272, %cst_330 {dimension_numbers = #tpu.dot_dimension_numbers<[1], [0], [0], [1], [0, 0, 1, 1], [], []>} : vector<78x128xbf16>, vector<128x128xbf16>, vector<78x128xf32> -> vector<78x128xf32>
    %274 = arith.addf %268, %273 : vector<78x128xf32>
    %c0_331 = arith.constant 0 : index
    %c0_332 = arith.constant 0 : index
    %c21_333 = arith.constant 21 : index
    %c0_334 = arith.constant 0 : index
    %275 = vector.load %arg4[%c0_331, %c0_332, %c21_333, %c0_334] : memref<1x1x100x128xbf16, #tpu.memory_space<vmem>>, vector<1x1x78x128xbf16>
    %276 = vector.shape_cast %275 : vector<1x1x78x128xbf16> to vector<78x128xbf16>
    %c16_335 = arith.constant 16 : index
    %c0_336 = arith.constant 0 : index
    %c0_337 = arith.constant 0 : index
    %277 = vector.load %arg6[%c16_335, %c0_336, %c0_337] : memref<27x128x128xbf16, #tpu.memory_space<vmem>>, vector<1x128x128xbf16>
    %278 = vector.shape_cast %277 : vector<1x128x128xbf16> to vector<128x128xbf16>
    %cst_338 = arith.constant dense<0.000000e+00> : vector<78x128xf32>
    %279 = tpu.matmul %276, %278, %cst_338 {dimension_numbers = #tpu.dot_dimension_numbers<[1], [0], [0], [1], [0, 0, 1, 1], [], []>} : vector<78x128xbf16>, vector<128x128xbf16>, vector<78x128xf32> -> vector<78x128xf32>
    %280 = arith.addf %274, %279 : vector<78x128xf32>
    %c0_339 = arith.constant 0 : index
    %c0_340 = arith.constant 0 : index
    %c22_341 = arith.constant 22 : index
    %c0_342 = arith.constant 0 : index
    %281 = vector.load %arg4[%c0_339, %c0_340, %c22_341, %c0_342] : memref<1x1x100x128xbf16, #tpu.memory_space<vmem>>, vector<1x1x78x128xbf16>
    %282 = vector.shape_cast %281 : vector<1x1x78x128xbf16> to vector<78x128xbf16>
    %c17_343 = arith.constant 17 : index
    %c0_344 = arith.constant 0 : index
    %c0_345 = arith.constant 0 : index
    %283 = vector.load %arg6[%c17_343, %c0_344, %c0_345] : memref<27x128x128xbf16, #tpu.memory_space<vmem>>, vector<1x128x128xbf16>
    %284 = vector.shape_cast %283 : vector<1x128x128xbf16> to vector<128x128xbf16>
    %cst_346 = arith.constant dense<0.000000e+00> : vector<78x128xf32>
    %285 = tpu.matmul %282, %284, %cst_346 {dimension_numbers = #tpu.dot_dimension_numbers<[1], [0], [0], [1], [0, 0, 1, 1], [], []>} : vector<78x128xbf16>, vector<128x128xbf16>, vector<78x128xf32> -> vector<78x128xf32>
    %286 = arith.addf %280, %285 : vector<78x128xf32>
    %c0_347 = arith.constant 0 : index
    %c0_348 = arith.constant 0 : index
    %c0_349 = arith.constant 0 : index
    %c0_350 = arith.constant 0 : index
    %287 = vector.load %arg5[%c0_347, %c0_348, %c0_349, %c0_350] : memref<1x1x100x128xbf16, #tpu.memory_space<vmem>>, vector<1x1x78x128xbf16>
    %288 = vector.shape_cast %287 : vector<1x1x78x128xbf16> to vector<78x128xbf16>
    %c18_351 = arith.constant 18 : index
    %c0_352 = arith.constant 0 : index
    %c0_353 = arith.constant 0 : index
    %289 = vector.load %arg6[%c18_351, %c0_352, %c0_353] : memref<27x128x128xbf16, #tpu.memory_space<vmem>>, vector<1x128x128xbf16>
    %290 = vector.shape_cast %289 : vector<1x128x128xbf16> to vector<128x128xbf16>
    %cst_354 = arith.constant dense<0.000000e+00> : vector<78x128xf32>
    %291 = tpu.matmul %288, %290, %cst_354 {dimension_numbers = #tpu.dot_dimension_numbers<[1], [0], [0], [1], [0, 0, 1, 1], [], []>} : vector<78x128xbf16>, vector<128x128xbf16>, vector<78x128xf32> -> vector<78x128xf32>
    %292 = arith.addf %286, %291 : vector<78x128xf32>
    %c0_355 = arith.constant 0 : index
    %c0_356 = arith.constant 0 : index
    %c1_357 = arith.constant 1 : index
    %c0_358 = arith.constant 0 : index
    %293 = vector.load %arg5[%c0_355, %c0_356, %c1_357, %c0_358] : memref<1x1x100x128xbf16, #tpu.memory_space<vmem>>, vector<1x1x78x128xbf16>
    %294 = vector.shape_cast %293 : vector<1x1x78x128xbf16> to vector<78x128xbf16>
    %c19_359 = arith.constant 19 : index
    %c0_360 = arith.constant 0 : index
    %c0_361 = arith.constant 0 : index
    %295 = vector.load %arg6[%c19_359, %c0_360, %c0_361] : memref<27x128x128xbf16, #tpu.memory_space<vmem>>, vector<1x128x128xbf16>
    %296 = vector.shape_cast %295 : vector<1x128x128xbf16> to vector<128x128xbf16>
    %cst_362 = arith.constant dense<0.000000e+00> : vector<78x128xf32>
    %297 = tpu.matmul %294, %296, %cst_362 {dimension_numbers = #tpu.dot_dimension_numbers<[1], [0], [0], [1], [0, 0, 1, 1], [], []>} : vector<78x128xbf16>, vector<128x128xbf16>, vector<78x128xf32> -> vector<78x128xf32>
    %298 = arith.addf %292, %297 : vector<78x128xf32>
    %c0_363 = arith.constant 0 : index
    %c0_364 = arith.constant 0 : index
    %c2_365 = arith.constant 2 : index
    %c0_366 = arith.constant 0 : index
    %299 = vector.load %arg5[%c0_363, %c0_364, %c2_365, %c0_366] : memref<1x1x100x128xbf16, #tpu.memory_space<vmem>>, vector<1x1x78x128xbf16>
    %300 = vector.shape_cast %299 : vector<1x1x78x128xbf16> to vector<78x128xbf16>
    %c20_367 = arith.constant 20 : index
    %c0_368 = arith.constant 0 : index
    %c0_369 = arith.constant 0 : index
    %301 = vector.load %arg6[%c20_367, %c0_368, %c0_369] : memref<27x128x128xbf16, #tpu.memory_space<vmem>>, vector<1x128x128xbf16>
    %302 = vector.shape_cast %301 : vector<1x128x128xbf16> to vector<128x128xbf16>
    %cst_370 = arith.constant dense<0.000000e+00> : vector<78x128xf32>
    %303 = tpu.matmul %300, %302, %cst_370 {dimension_numbers = #tpu.dot_dimension_numbers<[1], [0], [0], [1], [0, 0, 1, 1], [], []>} : vector<78x128xbf16>, vector<128x128xbf16>, vector<78x128xf32> -> vector<78x128xf32>
    %304 = arith.addf %298, %303 : vector<78x128xf32>
    %c0_371 = arith.constant 0 : index
    %c0_372 = arith.constant 0 : index
    %c10_373 = arith.constant 10 : index
    %c0_374 = arith.constant 0 : index
    %305 = vector.load %arg5[%c0_371, %c0_372, %c10_373, %c0_374] : memref<1x1x100x128xbf16, #tpu.memory_space<vmem>>, vector<1x1x78x128xbf16>
    %306 = vector.shape_cast %305 : vector<1x1x78x128xbf16> to vector<78x128xbf16>
    %c21_375 = arith.constant 21 : index
    %c0_376 = arith.constant 0 : index
    %c0_377 = arith.constant 0 : index
    %307 = vector.load %arg6[%c21_375, %c0_376, %c0_377] : memref<27x128x128xbf16, #tpu.memory_space<vmem>>, vector<1x128x128xbf16>
    %308 = vector.shape_cast %307 : vector<1x128x128xbf16> to vector<128x128xbf16>
    %cst_378 = arith.constant dense<0.000000e+00> : vector<78x128xf32>
    %309 = tpu.matmul %306, %308, %cst_378 {dimension_numbers = #tpu.dot_dimension_numbers<[1], [0], [0], [1], [0, 0, 1, 1], [], []>} : vector<78x128xbf16>, vector<128x128xbf16>, vector<78x128xf32> -> vector<78x128xf32>
    %310 = arith.addf %304, %309 : vector<78x128xf32>
    %c0_379 = arith.constant 0 : index
    %c0_380 = arith.constant 0 : index
    %c11_381 = arith.constant 11 : index
    %c0_382 = arith.constant 0 : index
    %311 = vector.load %arg5[%c0_379, %c0_380, %c11_381, %c0_382] : memref<1x1x100x128xbf16, #tpu.memory_space<vmem>>, vector<1x1x78x128xbf16>
    %312 = vector.shape_cast %311 : vector<1x1x78x128xbf16> to vector<78x128xbf16>
    %c22_383 = arith.constant 22 : index
    %c0_384 = arith.constant 0 : index
    %c0_385 = arith.constant 0 : index
    %313 = vector.load %arg6[%c22_383, %c0_384, %c0_385] : memref<27x128x128xbf16, #tpu.memory_space<vmem>>, vector<1x128x128xbf16>
    %314 = vector.shape_cast %313 : vector<1x128x128xbf16> to vector<128x128xbf16>
    %cst_386 = arith.constant dense<0.000000e+00> : vector<78x128xf32>
    %315 = tpu.matmul %312, %314, %cst_386 {dimension_numbers = #tpu.dot_dimension_numbers<[1], [0], [0], [1], [0, 0, 1, 1], [], []>} : vector<78x128xbf16>, vector<128x128xbf16>, vector<78x128xf32> -> vector<78x128xf32>
    %316 = arith.addf %310, %315 : vector<78x128xf32>
    %c0_387 = arith.constant 0 : index
    %c0_388 = arith.constant 0 : index
    %c12_389 = arith.constant 12 : index
    %c0_390 = arith.constant 0 : index
    %317 = vector.load %arg5[%c0_387, %c0_388, %c12_389, %c0_390] : memref<1x1x100x128xbf16, #tpu.memory_space<vmem>>, vector<1x1x78x128xbf16>
    %318 = vector.shape_cast %317 : vector<1x1x78x128xbf16> to vector<78x128xbf16>
    %c23_391 = arith.constant 23 : index
    %c0_392 = arith.constant 0 : index
    %c0_393 = arith.constant 0 : index
    %319 = vector.load %arg6[%c23_391, %c0_392, %c0_393] : memref<27x128x128xbf16, #tpu.memory_space<vmem>>, vector<1x128x128xbf16>
    %320 = vector.shape_cast %319 : vector<1x128x128xbf16> to vector<128x128xbf16>
    %cst_394 = arith.constant dense<0.000000e+00> : vector<78x128xf32>
    %321 = tpu.matmul %318, %320, %cst_394 {dimension_numbers = #tpu.dot_dimension_numbers<[1], [0], [0], [1], [0, 0, 1, 1], [], []>} : vector<78x128xbf16>, vector<128x128xbf16>, vector<78x128xf32> -> vector<78x128xf32>
    %322 = arith.addf %316, %321 : vector<78x128xf32>
    %c0_395 = arith.constant 0 : index
    %c0_396 = arith.constant 0 : index
    %c20_397 = arith.constant 20 : index
    %c0_398 = arith.constant 0 : index
    %323 = vector.load %arg5[%c0_395, %c0_396, %c20_397, %c0_398] : memref<1x1x100x128xbf16, #tpu.memory_space<vmem>>, vector<1x1x78x128xbf16>
    %324 = vector.shape_cast %323 : vector<1x1x78x128xbf16> to vector<78x128xbf16>
    %c24_399 = arith.constant 24 : index
    %c0_400 = arith.constant 0 : index
    %c0_401 = arith.constant 0 : index
    %325 = vector.load %arg6[%c24_399, %c0_400, %c0_401] : memref<27x128x128xbf16, #tpu.memory_space<vmem>>, vector<1x128x128xbf16>
    %326 = vector.shape_cast %325 : vector<1x128x128xbf16> to vector<128x128xbf16>
    %cst_402 = arith.constant dense<0.000000e+00> : vector<78x128xf32>
    %327 = tpu.matmul %324, %326, %cst_402 {dimension_numbers = #tpu.dot_dimension_numbers<[1], [0], [0], [1], [0, 0, 1, 1], [], []>} : vector<78x128xbf16>, vector<128x128xbf16>, vector<78x128xf32> -> vector<78x128xf32>
    %328 = arith.addf %322, %327 : vector<78x128xf32>
    %c0_403 = arith.constant 0 : index
    %c0_404 = arith.constant 0 : index
    %c21_405 = arith.constant 21 : index
    %c0_406 = arith.constant 0 : index
    %329 = vector.load %arg5[%c0_403, %c0_404, %c21_405, %c0_406] : memref<1x1x100x128xbf16, #tpu.memory_space<vmem>>, vector<1x1x78x128xbf16>
    %330 = vector.shape_cast %329 : vector<1x1x78x128xbf16> to vector<78x128xbf16>
    %c25_407 = arith.constant 25 : index
    %c0_408 = arith.constant 0 : index
    %c0_409 = arith.constant 0 : index
    %331 = vector.load %arg6[%c25_407, %c0_408, %c0_409] : memref<27x128x128xbf16, #tpu.memory_space<vmem>>, vector<1x128x128xbf16>
    %332 = vector.shape_cast %331 : vector<1x128x128xbf16> to vector<128x128xbf16>
    %cst_410 = arith.constant dense<0.000000e+00> : vector<78x128xf32>
    %333 = tpu.matmul %330, %332, %cst_410 {dimension_numbers = #tpu.dot_dimension_numbers<[1], [0], [0], [1], [0, 0, 1, 1], [], []>} : vector<78x128xbf16>, vector<128x128xbf16>, vector<78x128xf32> -> vector<78x128xf32>
    %334 = arith.addf %328, %333 : vector<78x128xf32>
    %c0_411 = arith.constant 0 : index
    %c0_412 = arith.constant 0 : index
    %c22_413 = arith.constant 22 : index
    %c0_414 = arith.constant 0 : index
    %335 = vector.load %arg5[%c0_411, %c0_412, %c22_413, %c0_414] : memref<1x1x100x128xbf16, #tpu.memory_space<vmem>>, vector<1x1x78x128xbf16>
    %336 = vector.shape_cast %335 : vector<1x1x78x128xbf16> to vector<78x128xbf16>
    %c26_415 = arith.constant 26 : index
    %c0_416 = arith.constant 0 : index
    %c0_417 = arith.constant 0 : index
    %337 = vector.load %arg6[%c26_415, %c0_416, %c0_417] : memref<27x128x128xbf16, #tpu.memory_space<vmem>>, vector<1x128x128xbf16>
    %338 = vector.shape_cast %337 : vector<1x128x128xbf16> to vector<128x128xbf16>
    %cst_418 = arith.constant dense<0.000000e+00> : vector<78x128xf32>
    %339 = tpu.matmul %336, %338, %cst_418 {dimension_numbers = #tpu.dot_dimension_numbers<[1], [0], [0], [1], [0, 0, 1, 1], [], []>} : vector<78x128xbf16>, vector<128x128xbf16>, vector<78x128xf32> -> vector<78x128xf32>
    %340 = arith.addf %334, %339 : vector<78x128xf32>
    %c0_419 = arith.constant 0 : index
    %c0_420 = arith.constant 0 : index
    %341 = vector.load %arg7[%c0_419, %c0_420] : memref<1x128xf32, #tpu.memory_space<vmem>>, vector<1x128xf32>
    %342 = vector.broadcast %341 : vector<1x128xf32> to vector<78x128xf32>
    %343 = arith.mulf %340, %342 : vector<78x128xf32>
    %c0_421 = arith.constant 0 : index
    %c0_422 = arith.constant 0 : index
    %344 = vector.load %arg8[%c0_421, %c0_422] : memref<1x128xf32, #tpu.memory_space<vmem>>, vector<1x128xf32>
    %345 = vector.broadcast %344 : vector<1x128xf32> to vector<78x128xf32>
    %346 = arith.addf %343, %345 : vector<78x128xf32>
    %cst_423 = arith.constant 0.000000e+00 : f32
    %347 = vector.broadcast %cst_423 : f32 to vector<78x128xf32>
    %348 = arith.maximumf %346, %347 : vector<78x128xf32>
    %c0_424 = arith.constant 0 : index
    %c1_425 = arith.constant 1 : index
    %c0_426 = arith.constant 0 : index
    %c0_427 = arith.constant 0 : index
    %349 = vector.load %arg9[%c0_424, %c1_425, %c0_426, %c0_427] : memref<1x2x80x128xf32, #tpu.memory_space<vmem>>, vector<1x1x78x128xf32>
    %350 = vector.shape_cast %349 : vector<1x1x78x128xf32> to vector<78x128xf32>
    %351 = vector.shape_cast %348 : vector<78x128xf32> to vector<1x1x78x128xf32>
    tpu.vector_store %arg9[%c0_424, %c1_425, %c0_426, %c0_427], %351 {strides = array<i32>} : memref<1x2x80x128xf32, #tpu.memory_space<vmem>>, vector<1x1x78x128xf32>,
    %cst_428 = arith.constant 0.000000e+00 : f32
    %352 = vector.broadcast %cst_428 : f32 to vector<2x128xf32>
    %c0_429 = arith.constant 0 : index
    %c1_430 = arith.constant 1 : index
    %c78_431 = arith.constant 78 : index
    %c0_432 = arith.constant 0 : index
    %353 = vector.load %arg9[%c0_429, %c1_430, %c78_431, %c0_432] : memref<1x2x80x128xf32, #tpu.memory_space<vmem>>, vector<1x1x2x128xf32>
    %354 = vector.shape_cast %353 : vector<1x1x2x128xf32> to vector<2x128xf32>
    %355 = vector.shape_cast %352 : vector<2x128xf32> to vector<1x1x2x128xf32>
    tpu.vector_store %arg9[%c0_429, %c1_430, %c78_431, %c0_432], %355 {strides = array<i32>} : memref<1x2x80x128xf32, #tpu.memory_space<vmem>>, vector<1x1x2x128xf32>,
    %c0_433 = arith.constant 0 : index
    %c0_434 = arith.constant 0 : index
    %c0_435 = arith.constant 0 : index
    %c0_436 = arith.constant 0 : index
    %356 = vector.load %arg9[%c0_433, %c0_434, %c0_435, %c0_436] : memref<1x2x80x128xf32, #tpu.memory_space<vmem>>, vector<1x1x80x128xf32>
    %357 = vector.shape_cast %356 : vector<1x1x80x128xf32> to vector<80x128xf32>
    %c0_437 = arith.constant 0 : index
    %c1_438 = arith.constant 1 : index
    %c0_439 = arith.constant 0 : index
    %c0_440 = arith.constant 0 : index
    %358 = vector.load %arg9[%c0_437, %c1_438, %c0_439, %c0_440] : memref<1x2x80x128xf32, #tpu.memory_space<vmem>>, vector<1x1x80x128xf32>
    %359 = vector.shape_cast %358 : vector<1x1x80x128xf32> to vector<80x128xf32>
    %360 = arith.maximumf %357, %359 : vector<80x128xf32>
    %361 = vector.shape_cast %360 : vector<80x128xf32> to vector<40x2x128xf32>
    %362 = vector.extract_strided_slice %361 {offsets = [0, 0, 0], sizes = [40, 1, 128], strides = [1, 1, 1]} : vector<40x2x128xf32> to vector<40x1x128xf32>
    %363 = vector.shape_cast %362 : vector<40x1x128xf32> to vector<40x128xf32>
    %364 = vector.extract_strided_slice %361 {offsets = [0, 1, 0], sizes = [40, 1, 128], strides = [1, 1, 1]} : vector<40x2x128xf32> to vector<40x1x128xf32>
    %365 = vector.shape_cast %364 : vector<40x1x128xf32> to vector<40x128xf32>
    %366 = arith.maximumf %363, %365 : vector<40x128xf32>
    %367 = vector.shape_cast %366 : vector<40x128xf32> to vector<4x2x5x128xf32>
    %368 = vector.extract_strided_slice %367 {offsets = [0, 0, 0, 0], sizes = [4, 1, 5, 128], strides = [1, 1, 1, 1]} : vector<4x2x5x128xf32> to vector<4x1x5x128xf32>
    %369 = vector.shape_cast %368 : vector<4x1x5x128xf32> to vector<4x5x128xf32>
    %370 = vector.extract_strided_slice %367 {offsets = [0, 1, 0, 0], sizes = [4, 1, 5, 128], strides = [1, 1, 1, 1]} : vector<4x2x5x128xf32> to vector<4x1x5x128xf32>
    %371 = vector.shape_cast %370 : vector<4x1x5x128xf32> to vector<4x5x128xf32>
    %372 = arith.maximumf %369, %371 : vector<4x5x128xf32>
    %373 = vector.shape_cast %372 : vector<4x5x128xf32> to vector<20x128xf32>
    %c0_441 = arith.constant 0 : index
    %c0_442 = arith.constant 0 : index
    %c0_443 = arith.constant 0 : index
    %c0_444 = arith.constant 0 : index
    %374 = vector.load %arg10[%c0_441, %c0_442, %c0_443, %c0_444] : memref<1x1x20x128xf32, #tpu.memory_space<vmem>>, vector<1x1x20x128xf32>
    %375 = vector.shape_cast %374 : vector<1x1x20x128xf32> to vector<20x128xf32>
    %376 = vector.shape_cast %373 : vector<20x128xf32> to vector<1x1x20x128xf32>
    tpu.vector_store %arg10[%c0_441, %c0_442, %c0_443, %c0_444], %376 {strides = array<i32>} : memref<1x1x20x128xf32, #tpu.memory_space<vmem>>, vector<1x1x20x128xf32>,
    return
  }
  func.func @transform_0(%arg0: i32, %arg1: i32) -> (i32, i32, i32, i32) {
    %c2_i32 = arith.constant 2 : i32
    %0 = arith.muli %c2_i32, %arg1 : i32
    %c0_i32 = arith.constant 0 : i32
    %1 = arith.addi %0, %c0_i32 : i32
    %c0_i32_0 = arith.constant 0 : i32
    %c0_i32_1 = arith.constant 0 : i32
    %c0_i32_2 = arith.constant 0 : i32
    return %arg0, %1, %c0_i32_0, %c0_i32_1 : i32, i32, i32, i32
  }
  func.func @transform_1(%arg0: i32, %arg1: i32) -> (i32, i32, i32, i32) {
    %c2_i32 = arith.constant 2 : i32
    %0 = arith.muli %c2_i32, %arg1 : i32
    %c1_i32 = arith.constant 1 : i32
    %1 = arith.addi %0, %c1_i32 : i32
    %c0_i32 = arith.constant 0 : i32
    %c0_i32_0 = arith.constant 0 : i32
    %c0_i32_1 = arith.constant 0 : i32
    return %arg0, %1, %c0_i32, %c0_i32_0 : i32, i32, i32, i32
  }
  func.func @transform_2(%arg0: i32, %arg1: i32) -> (i32, i32, i32, i32) {
    %c2_i32 = arith.constant 2 : i32
    %0 = arith.muli %c2_i32, %arg1 : i32
    %c2_i32_0 = arith.constant 2 : i32
    %1 = arith.addi %0, %c2_i32_0 : i32
    %c0_i32 = arith.constant 0 : i32
    %c0_i32_1 = arith.constant 0 : i32
    %c0_i32_2 = arith.constant 0 : i32
    return %arg0, %1, %c0_i32, %c0_i32_1 : i32, i32, i32, i32
  }
  func.func @transform_3(%arg0: i32, %arg1: i32) -> (i32, i32, i32, i32) {
    %c2_i32 = arith.constant 2 : i32
    %0 = arith.muli %c2_i32, %arg1 : i32
    %c3_i32 = arith.constant 3 : i32
    %1 = arith.addi %0, %c3_i32 : i32
    %c0_i32 = arith.constant 0 : i32
    %c0_i32_0 = arith.constant 0 : i32
    %c0_i32_1 = arith.constant 0 : i32
    return %arg0, %1, %c0_i32, %c0_i32_0 : i32, i32, i32, i32
  }
  func.func @transform_4(%arg0: i32, %arg1: i32) -> (i32, i32, i32) {
    %c0_i32 = arith.constant 0 : i32
    %c0_i32_0 = arith.constant 0 : i32
    %c0_i32_1 = arith.constant 0 : i32
    %c0_i32_2 = arith.constant 0 : i32
    return %c0_i32, %c0_i32_0, %c0_i32_1 : i32, i32, i32
  }
  func.func @transform_5(%arg0: i32, %arg1: i32) -> (i32, i32) {
    %c0_i32 = arith.constant 0 : i32
    %c0_i32_0 = arith.constant 0 : i32
    %c0_i32_1 = arith.constant 0 : i32
    return %c0_i32, %c0_i32_0 : i32, i32
  }
  func.func @transform_6(%arg0: i32, %arg1: i32) -> (i32, i32) {
    %c0_i32 = arith.constant 0 : i32
    %c0_i32_0 = arith.constant 0 : i32
    %c0_i32_1 = arith.constant 0 : i32
    return %c0_i32, %c0_i32_0 : i32, i32
  }
  func.func @transform_7(%arg0: i32, %arg1: i32) -> (i32, i32, i32, i32) {
    %c0_i32 = arith.constant 0 : i32
    %c0_i32_0 = arith.constant 0 : i32
    %c0_i32_1 = arith.constant 0 : i32
    return %arg0, %arg1, %c0_i32, %c0_i32_0 : i32, i32, i32, i32
  }
  func.func @transform_8(%arg0: i32, %arg1: i32) -> (i32, i32, i32, i32) {
    %c0_i32 = arith.constant 0 : i32
    %c0_i32_0 = arith.constant 0 : i32
    %c0_i32_1 = arith.constant 0 : i32
    return %arg0, %arg1, %c0_i32, %c0_i32_0 : i32, i32, i32, i32
  }
}

</mosaic_0001>

<bundles_post_ra>
// kernel: _lambda_.2
= control target key start
LH: loop header
LB: loop body
LE: loop exit
PB: predicated region body
PF: predicated region fallthrough
CT: control target
= control target key end

     0   :  { %s5889_s21 = smov 0   ;;  %s5891_s22 = smov 0   ;;  %s7123_s0 = inlined_call_operand.vmem [shape: f32[2,10,100,4], index: 0, kind: input, shape index: {}, may-alias: {0,1,2}]   ;;  %s7124_s1 = inlined_call_operand.vmem [shape: f32[2,10,100,4], index: 1, kind: input, shape index: {}, may-alias: {0,1,2}]   ;;  %s7125_s2 = inlined_call_operand.vmem [shape: f32[2,10,100,4], index: 2, kind: input, shape index: {}, may-alias: {0,1,2}]   ;;  %s7126_s3 = inlined_call_operand.vmem [shape: bf16[27,4,128], index: 3, kind: input, shape index: {}]   ;;  %s7127_s4 = inlined_call_operand.vmem [shape: f32[1,128], index: 4, kind: input, shape index: {}]   ;;  %s7128_s5 = inlined_call_operand.vmem [shape: f32[1,128], index: 5, kind: input, shape index: {}]   ;;  %s7129_s6 = inlined_call_operand.vmem [shape: bf16[2,10,100,128], index: 6, kind: output, shape index: {}]  }
   0x1   :  { %7130 = sst [smem:[#allocation2_spill]] %s7123_s0  ;;  %s5893_s23 = smov 0  }
   0x2   :  { %s5895_s24 = smov 0   ;;  %s5897_s25 = smov 0  }
   0x3 LB: > { %s25_s26 = sadd.s32 1, %s5840_s23  ;;  %s28_s27 = sadd.s32 1, %s5844_s24  ;;  %s5848_s25 = sphi %s5897_s25, %s16_s25   ;;  %s5844_s24 = sphi %s5895_s24, %s7176_s24   ;;  %s5840_s23 = sphi %s5893_s23, %s7175_s23   ;;  %s5836_s22 = sphi %s5891_s22, %s7174_s22   ;;  %s5832_s21 = sphi %s5889_s21, %s7173_s21  }
   0x4   : > { %p26_p0 = scmp.ge.s32.totalorder %s25_s26, 10  ;;  %p4249_p1 = scmp.ge.s32.totalorder %s5848_s25, 1 }
   0x5   : > { %p320_p2 = scmp.lt.s32.totalorder %s5848_s25, 21 }
   0x6   : > { %s7178_s26 = smov (%p26_p0, %s25_s26), 0  ;;  %s7180_s27 = smov (!%p26_p0, %s28_s27), %s5844_s24 }
   0x7   : > { %p321_p3 = pnand %p4249_p1, %p320_p2  ;;  %p30_p4 = scmp.ge.s32.totalorder %s7180_s27, 2 }
   0x8   : > { %s4250_s28 = sadd.s32 (!%p321_p3), 4294967295, %s5832_s21  ;;  %p395_p5 = scmp.lt.s32.totalorder (!%p321_p3), %s5836_s22, 1 }
   0x9   : > { %s7182_s27 = smov (%p30_p4, %s7180_s27), 0  ;;  %324 = sbr.rel (%p321_p3) target bundleno = 818 (0x332), region = 44 }
   0xa   : > { %p391_p6 = scmp.gt.s32.totalorder (!%p321_p3), %s4250_s28, 0  ;;  %p4251_p7 = scmp.lt.s32.totalorder (!%p321_p3), %s4250_s28, 9 }
   0xb   : > { %p409_p8 = scmp.gt.s32.totalorder (!%p321_p3), %s5832_s21, 0  ;;  %p4257_p10 = scmp.lt.s32.totalorder (!%p321_p3), %s5832_s21, 9 }
   0xc   : > { %s426_s7 = sadd.s32 (!%p321_p3), 1, %s5832_s21  ;;  %p455_p11 = scmp.ge.s32.totalorder (!%p321_p3), %s5832_s21, 1 }
   0xd   : > { %p427_p13 = scmp.gt.s32.totalorder (!%p321_p3), %s426_s7, 0  ;;  %p456_p0 = scmp.le.s32.totalorder (!%p321_p3), %s5832_s21, 8 }
   0xe   : > { %p4263_p1 = scmp.lt.s32.totalorder (!%p321_p3), %s426_s7, 9  ;;  %s7131_s0 = sld [smem:[#allocation2_spill]] (!%p321_p3) }
   0xf   : > { %p5935_p2 = pnand (!%p321_p3), %p456_p0, %p455_p11 }
  0x10   : > { %s7184_s22 = smov (!%p395_p5, %s5836_s22), 1  ;;  %s7186_s28 = smov (!%p391_p6, %s4250_s28), 0 }
  0x11   : > { %s7188_s28 = smov (!%p4251_p7, %s7186_s28), 9  ;;  %s5742_s30 = smul.u32 130, %s7184_s22  ;;  %v4270_v0 = vld [vmem:[%s7126_s3 + $0x2] sm:$0x3] (!%p5935_p2)  ;;  %vm510_vm0 = vcmask (!%p5935_p2), 1041408   ;;  %v5850_v2 = vmov (!%p5935_p2), 0.0  }
  0x12   : > { %s410_s29 = scalar_select %p409_p8, %s5832_s21, 0 }
  0x13   : > { %p397_p9 = scmp.lt.s32.totalorder %s7188_s28, 9  ;;  %s7196_s7 = smov (!%p427_p13, %s426_s7), 0  ;;  %v4347_v1 = vld [vmem:[%s7126_s3 + $0x1a] sm:$0x3] (!%p5935_p2)  ;;  %4635 = vmatprep.subr.bf16.mxu1 (!%p5935_p2), %v5850_v2  ;;  %4921 = vmatprep.subr.bf16.mxu0 (!%p5935_p2), %v5850_v2  ;;  %v512_v3 = vsel (!%p5935_p2), %vm510_vm0, %v4270_v0, 0  ;;  %vm494_vm1 = vcmask (!%p5935_p2), 31744  }
  0x14   : > { %s7192_s29 = smov (!%p4257_p10, %s410_s29), 9  ;;  %s7198_s7 = smov (!%p4263_p1, %s7196_s7), 9 }
  0x15   : > { %s7190_s28 = smov (!%p397_p9, %s7188_s28), 9  ;;  %p415_p12 = scmp.lt.s32.totalorder %s7192_s29, 9  ;;  %v5969_v4 = vsel (!%p5935_p2), %vm510_vm0, %v4347_v1, 0  ;;  %4636 = vmatpush3.bf16.msra.mxu1 (!%p5935_p2), %v512_v3  ;;  %v4353_v10 = vld [vmem:[%s7126_s3 + $0x1c] sm:$0x3] (!%p5935_p2)  ;;  %vm5851_vm2 = vmmov (!%p5935_p2), 0  }
  0x16   : > { %s5741_s8 = smul.u32 13, %s7190_s28  ;;  %p433_p3 = scmp.lt.s32.totalorder %s7198_s7, 9  ;;  %4922 = vmatpush3.bf16.msra.mxu0 (!%p5935_p2), %v5969_v4  ;;  %4637 = vmatprep.mubr.msk.bf16.mxu1 (!%p5935_p2), %vm5851_vm2, %v5850_v2  ;;  %v2127_v12 = vsel (!%p5935_p2), %vm510_vm0, %v4353_v10, 0  ;;  %v476_v13 = vld [vmem:[%s7126_s3] sm:$0x3] (!%p5935_p2) }
  0x17   : > { %s7194_s29 = smov (!%p415_p12, %s7192_s29), 9  ;;  %s7202_s21 = smov (!%p4257_p10, %s5832_s21), 9 }
  0x18   : > { %s401_s9 = sadd.s32 %s5742_s30, %s5741_s8  ;;  %s5743_s15 = smul.u32 13, %s7194_s29  ;;  %4923 = vmatprep.mubr.msk.bf16.mxu0 (!%p5935_p2), %vm5851_vm2, %v5850_v2  ;;  %4943 = vmatprep.subr.bf16.mxu0 (!%p5935_p2), %v5850_v2  ;;  %v603_v15 = vsel (!%p5935_p2), %vm510_vm0, %v476_v13, 0  ;;  %v4359_v31 = vld [vmem:[%s7126_s3 + $0x1e] sm:$0x3] (!%p5935_p2)  ;;  %v4281_v47 = vld [vmem:[%s7126_s3 + $0x4] sm:$0x3] (!%p5935_p2) }
  0x19   : > { %s4256_s10 = sshll.u32 %s401_s9, 3  ;;  %s7200_s7 = smov (!%p433_p3, %s7198_s7), 9  ;;  %4657 = vmatprep.subr.bf16.mxu1 (!%p5935_p2), %v5850_v2  ;;  %v2245_v34 = vsel (!%p5935_p2), %vm510_vm0, %v4359_v31, 0  ;;  %v711_v48 = vsel (!%p5935_p2), %vm510_vm0, %v4281_v47, 0  ;;  %v4365_v63 = vld [vmem:[%s7126_s3 + $0x20] sm:$0x3] (!%p5935_p2) }
  0x1a   : > { %s5933_s13 = scalar_lea.vmem %s7131_s0, %s4256_s10  ;;  %s419_s16 = sadd.s32 %s5743_s15, %s5742_s30  ;;  %v2363_v3 = vsel (!%p5935_p2), %vm510_vm0, %v4365_v63, 0  ;;  %v4287_v13 = vld [vmem:[%s7126_s3 + $0x6] sm:$0x3] (!%p5935_p2)  ;;  %vm3885_vm3 = vsmask.f32 (!%p5935_p2), 1280 }
  0x1b   : > { %s4262_s17 = sshll.u32 %s419_s16, 3  ;;  %s5744_s22 = smul.u32 13, %s7200_s7  ;;  %v477_v5 = vld [vmem:[%s5933_s13 + $0x1] sm:$0xff] (!%p5935_p2)  ;;  %v478_v6 = vld [vmem:[%s5933_s13 + $0x9] sm:$0xff] (!%p5935_p2)  ;;  %v479_v14 = vld [vmem:[%s5933_s13 + $0x11] sm:$0xff] (!%p5935_p2) }
  0x1c   : > { %s5942_s20 = scalar_lea.vmem %s7124_s1, %s4262_s17  ;;  %s5745_s28 = smul.u32 13, %s7202_s21  ;;  %v487_v7 = vpack.c.bf16 (!%p5935_p2), %v478_v6, %v477_v5  ;;  %v480_v16 = vld [vmem:[%s5933_s13 + $0x19] sm:$0xff] (!%p5935_p2)  ;;  %v481_v21 = vld [vmem:[%s5933_s13 + $0x21] sm:$0xff] (!%p5935_p2)  ;;  %v482_v22 = vld [vmem:[%s5933_s13 + $0x29] sm:$0xff] (!%p5935_p2) }
  0x1d   : > { %s437_s8 = sadd.s32 %s5744_s22, %s5742_s30  ;;  %460 = sbr.rel (%p5935_p2) target bundleno = 810 (0x32a), region = 48  ;;  %v1976_v8 = vld [vmem:[%s5942_s20 + $0xb] sm:$0xff] (!%p5935_p2)  ;;  %v1977_v9 = vld [vmem:[%s5942_s20 + $0x13] sm:$0xff] (!%p5935_p2)  ;;  %v1978_v17 = vld [vmem:[%s5942_s20 + $0x1b] sm:$0xff] (!%p5935_p2)  ;;  %v488_v19 = vpack.c.bf16 (!%p5935_p2), %v480_v16, %v479_v14  ;;  %v489_v25 = vpack.c.bf16 (!%p5935_p2), %v482_v22, %v481_v21  ;;  %v829_v14 = vsel (!%p5935_p2), %vm510_vm0, %v4287_v13, 0 }
  0x1e   : > { %s4268_s9 = sshll.u32 %s437_s8, 3  ;;  %s451_s10 = sadd.s32 %s5745_s28, %s5742_s30  ;;  %v1986_v11 = vpack.c.bf16 (!%p5935_p2), %v1977_v9, %v1976_v8  ;;  %4638 = vmatmul.mubr.msk.bf16.vlgmr.msra.gmra.mrb[0].mxu1 (!%p5935_p2), %vm494_vm1, %v487_v7  ;;  %v1979_v18 = vld [vmem:[%s5942_s20 + $0x23] sm:$0xff] (!%p5935_p2)  ;;  %v1980_v23 = vld [vmem:[%s5942_s20 + $0x2b] sm:$0xff] (!%p5935_p2)  ;;  %v1981_v24 = vld [vmem:[%s5942_s20 + $0x33] sm:$0xff] (!%p5935_p2) }
  0x1f   : > { %s5950_s29 = scalar_lea.vmem %s7125_s2, %s4268_s9  ;;  %s4269_s15 = sshll.u32 %s451_s10, 2  ;;  %4641 = vmatprep.mubr.msk.bf16.mxu1 (!%p5935_p2), %vm5851_vm2, %v5850_v2  ;;  %4658 = vmatpush3.bf16.msra.mxu1 (!%p5935_p2), %v603_v15  ;;  %v1987_v20 = vpack.c.bf16 (!%p5935_p2), %v1979_v18, %v1978_v17  ;;  %v1988_v26 = vpack.c.bf16 (!%p5935_p2), %v1981_v24, %v1980_v23  ;;  %v483_v27 = vld [vmem:[%s5933_s13 + $0x31] sm:$0xff] (!%p5935_p2)  ;;  %v484_v28 = vld [vmem:[%s5933_s13 + $0x39] sm:$0xff] (!%p5935_p2)  ;;  %v485_v35 = vld [vmem:[%s5933_s13 + $0x41] sm:$0xff] (!%p5935_p2) }
  0x20   : > { %s5955_s18 = scalar_lea.vmem %s7129_s6, %s4269_s15  ;;  %4924 = vmatmul.mubr.msk.bf16.vlgmr.msra.gmra.mrb[0].mxu0 (!%p5935_p2), %vm494_vm1, %v1986_v11  ;;  %4679 = vmatprep.subr.bf16.mxu1 (!%p5935_p2), %v5850_v2  ;;  %v2094_v29 = vld [vmem:[%s5942_s20 + $0xc] sm:$0xff] (!%p5935_p2)  ;;  %v6022_v30 = vld [vmem:[%s5942_s20 + $0x14] sm:$0xff] (!%p5935_p2)  ;;  %v490_v32 = vpack.c.bf16 (!%p5935_p2), %v484_v28, %v483_v27  ;;  %v2096_v37 = vld [vmem:[%s5942_s20 + $0x1c] sm:$0xff] (!%p5935_p2) }
  0x21   : > { %4944 = vmatpush3.bf16.msra.mxu0 (!%p5935_p2), %v2127_v12  ;;  %4927 = vmatprep.mubr.msk.bf16.mxu0 (!%p5935_p2), %vm5851_vm2, %v5850_v2  ;;  %v2104_v33 = vpack.c.bf16 (!%p5935_p2), %v6022_v30, %v2094_v29  ;;  %v486_v36 = vld [vmem:[%s5933_s13 + $0x49] sm:$0x3f] (!%p5935_p2)  ;;  %v461_v41 = vld [vmem:[%s5933_s13] sm:$0xff] (!%p5935_p2)  ;;  %v2099_v44 = vld [vmem:[%s5942_s20 + $0x34] sm:$0xff] (!%p5935_p2)  ;;  %v2222_v1 = vpack.c.bf16 (!%p5935_p2), %v2096_v37, %v6022_v30 }
  0x22   : > { %4965 = vmatprep.subr.bf16.mxu0 (!%p5935_p2), %v5850_v2  ;;  %v2097_v38 = vld [vmem:[%s5942_s20 + $0x24] sm:$0xff] (!%p5935_p2)  ;;  %v491_v39 = vpack.c.bf16 (!%p5935_p2), %v486_v36, %v485_v35  ;;  %v2098_v43 = vld [vmem:[%s5942_s20 + $0x2c] sm:$0xff] (!%p5935_p2)  ;;  %v464_v50 = vld [vmem:[%s5933_s13 + $0x18] sm:$0xff] (!%p5935_p2) }
  0x23   : > { %v2105_v40 = vpack.c.bf16 (!%p5935_p2), %v2097_v38, %v2096_v37  ;;  %v462_v42 = vld [vmem:[%s5933_s13 + $0x8] sm:$0xff] (!%p5935_p2)  ;;  %v2106_v46 = vpack.c.bf16 (!%p5935_p2), %v2099_v44, %v2098_v43  ;;  %v463_v49 = vld [vmem:[%s5933_s13 + $0x10] sm:$0xff] (!%p5935_p2)  ;;  %v2100_v51 = vld [vmem:[%s5942_s20 + $0x3c] sm:$0xff] (!%p5935_p2)  ;;  %v2223_v8 = vpack.c.bf16 (!%p5935_p2), %v2098_v43, %v2097_v38 }
  0x24   : > { %v471_v45 = vpack.c.bf16 %v462_v42, %v461_v41  ;;  %v2101_v52 = vld [vmem:[%s5942_s20 + $0x44] sm:$0xff]  ;;  %v472_v53 = vpack.c.bf16 %v464_v50, %v463_v49  ;;  %v2102_v57 = vld [vmem:[%s5942_s20 + $0x4c] sm:$0xff]  ;;  %v2103_v58 = vld [vmem:[%s5942_s20 + $0x54] sm:$0x3f]  ;;  %v2224_v12 = vpack.c.bf16 %v2100_v51, %v2099_v44 }
  0x25   : > { %v2107_v54 = vpack.c.bf16 %v2101_v52, %v2100_v51  ;;  %v465_v55 = vld [vmem:[%s5933_s13 + $0x20] sm:$0xff]  ;;  %v466_v56 = vld [vmem:[%s5933_s13 + $0x28] sm:$0xff]  ;;  %v2108_v60 = vpack.c.bf16 %v2103_v58, %v2102_v57  ;;  %v467_v61 = vld [vmem:[%s5933_s13 + $0x30] sm:$0xff]  ;;  %v2225_v18 = vpack.c.bf16 %v2102_v57, %v2101_v52 }
  0x26   : > { %4642 = vmatmul.mubr.msk.bf16.gmra.mrb[4].mxu1 %vm494_vm1, %v488_v19  ;;  %v473_v59 = vpack.c.bf16 %v466_v56, %v465_v55  ;;  %v468_v62 = vld [vmem:[%s5933_s13 + $0x38] sm:$0xff]  ;;  %v469_v5 = vld [vmem:[%s5933_s13 + $0x40] sm:$0xff]  ;;  %v470_v6 = vld [vmem:[%s5933_s13 + $0x48] sm:$0x3f] }
  0x27   : > { %4645 = vmatprep.mubr.msk.bf16.mxu1 %vm5851_vm2, %v5850_v2  ;;  %v474_v0 = vpack.c.bf16 %v468_v62, %v467_v61  ;;  %v475_v7 = vpack.c.bf16 %v470_v6, %v469_v5  ;;  %v678_v9 = vld [vmem:[%s5933_s13 + $0x2] sm:$0xff]  ;;  %v679_v10 = vld [vmem:[%s5933_s13 + $0xa] sm:$0xff]  ;;  %v680_v15 = vld [vmem:[%s5933_s13 + $0x12] sm:$0xff] }
  0x28   : > { %4928 = vmatmul.mubr.msk.bf16.gmra.mrb[4].mxu0 %vm494_vm1, %v1987_v20  ;;  %v688_v11 = vpack.c.bf16 %v679_v10, %v678_v9  ;;  %v681_v16 = vld [vmem:[%s5933_s13 + $0x1a] sm:$0xff]  ;;  %v682_v19 = vld [vmem:[%s5933_s13 + $0x22] sm:$0xff]  ;;  %v683_v20 = vld [vmem:[%s5933_s13 + $0x2a] sm:$0xff]  ;;  %v806_v41 = vpack.c.bf16 %v680_v15, %v679_v10 }
  0x29   : > { %4931 = vmatprep.mubr.msk.bf16.mxu0 %vm5851_vm2, %v5850_v2  ;;  %v689_v17 = vpack.c.bf16 %v681_v16, %v680_v15  ;;  %v2220_v21 = vld [vmem:[%s5942_s20 + $0x54] sm:$0xff]  ;;  %v2221_v22 = vld [vmem:[%s5942_s20 + $0x5c] sm:$0x3f]  ;;  %v690_v23 = vpack.c.bf16 %v683_v20, %v682_v19  ;;  %v4371_v29 = vld [vmem:[%s7126_s3 + $0x22] sm:$0x3]  ;;  %v807_v47 = vpack.c.bf16 %v682_v19, %v681_v16 }
  0x2a   : > { %v2226_v24 = vpack.c.bf16 %v2221_v22, %v2220_v21  ;;  %v2330_v27 = vld [vmem:[%s5942_s20 + $0x15] sm:$0xff]  ;;  %v2331_v28 = vld [vmem:[%s5942_s20 + $0x1d] sm:$0xff]  ;;  %v2332_v35 = vld [vmem:[%s5942_s20 + $0x25] sm:$0xff] }
  0x2b   : > { %v2340_v31 = vpack.c.bf16 %v2331_v28, %v2330_v27  ;;  %v2333_v36 = vld [vmem:[%s5942_s20 + $0x2d] sm:$0xff]  ;;  %v4293_v43 = vld [vmem:[%s7126_s3 + $0x8] sm:$0x3]  ;;  %v2338_v49 = vld [vmem:[%s5942_s20 + $0x55] sm:$0xff] }
  0x2c   : > { %v2341_v38 = vpack.c.bf16 %v2333_v36, %v2332_v35  ;;  %v947_v44 = vsel %vm510_vm0, %v4293_v43, 0  ;;  %v2339_v50 = vld [vmem:[%s5942_s20 + $0x5d] sm:$0x3f]  ;;  %v4377_v55 = vld [vmem:[%s7126_s3 + $0x24] sm:$0x3]  ;;  %v2450_v61 = vld [vmem:[%s5942_s20 + $0x26] sm:$0xff] }
  0x2d   : > { %v2344_v52 = vpack.c.bf16 %v2339_v50, %v2338_v49  ;;  %v2599_v58 = vsel %vm510_vm0, %v4377_v55, 0  ;;  %v2451_v62 = vld [vmem:[%s5942_s20 + $0x2e] sm:$0xff]  ;;  %v2452_v5 = vld [vmem:[%s5942_s20 + $0x36] sm:$0xff]  ;;  %v2453_v6 = vld [vmem:[%s5942_s20 + $0x3e] sm:$0xff] }
  0x2e   : > { %4646 = vmatmul.mubr.msk.bf16.gmra.mrb[8].mxu1 %vm494_vm1, %v489_v25  ;;  %v684_v25 = vld [vmem:[%s5933_s13 + $0x32] sm:$0xff]  ;;  %v4299_v9 = vld [vmem:[%s7126_s3 + $0xa] sm:$0x3]  ;;  %v4383_v27 = vld [vmem:[%s7126_s3 + $0x26] sm:$0x3] }
  0x2f   : > { %4649 = vmatprep.mubr.msk.bf16.mxu1 %vm5851_vm2, %v5850_v2  ;;  %v808_v51 = vpack.c.bf16 %v684_v25, %v683_v20  ;;  %v1065_v10 = vsel %vm510_vm0, %v4299_v9, 0  ;;  %v2454_v13 = vld [vmem:[%s5942_s20 + $0x46] sm:$0xff]  ;;  %v2456_v19 = vld [vmem:[%s5942_s20 + $0x56] sm:$0xff]  ;;  %v2457_v20 = vld [vmem:[%s5942_s20 + $0x5e] sm:$0x3f] }
  0x30   : > { %4932 = vmatmul.mubr.msk.bf16.gmra.mrb[8].mxu0 %vm494_vm1, %v1988_v26  ;;  %v685_v26 = vld [vmem:[%s5933_s13 + $0x3a] sm:$0xff]  ;;  %v2462_v22 = vpack.c.bf16 %v2457_v20, %v2456_v19  ;;  %v4305_v43 = vld [vmem:[%s7126_s3 + $0xc] sm:$0x3]  ;;  %vm3886_vm4 = vmand %vm510_vm0, %vm3885_vm3 }
  0x31   : > { %4945 = vmatprep.mubr.msk.bf16.mxu0 %vm5851_vm2, %v5850_v2  ;;  %v691_v30 = vpack.c.bf16 %v685_v26, %v684_v25  ;;  %v2566_v25 = vld [vmem:[%s5950_s29] sm:$0xff]  ;;  %v2693_v20 = vld [vmem:[%s5950_s29 + $0x49] sm:$0x3f] }
  0x32   : > { %v2688_v9 = vld [vmem:[%s5950_s29 + $0x21] sm:$0xff] }
  0x33   : > { %v2692_v19 = vld [vmem:[%s5950_s29 + $0x41] sm:$0xff] }
  0x36   : > { %4650 = vmatmul.mubr.msk.bf16.gmra.mrb[12].mxu1 %vm494_vm1, %v490_v32  ;;  %v2481_v32 = vsel %vm510_vm0, %v4371_v29, 0 }
  0x37   : > { %4653 = vmatprep.mubr.msk.bf16.mxu1 %vm5851_vm2, %v5850_v2 }
  0x38   : > { %4946 = vmatmul.mubr.msk.bf16.vlgmr.msra.gmra.mrb[0].mxu0 %vm494_vm1, %v2104_v33  ;;  %v686_v33 = vld [vmem:[%s5933_s13 + $0x42] sm:$0xff] }
  0x39   : > { %4966 = vmatpush3.bf16.msra.mxu0 %v2245_v34  ;;  %4949 = vmatprep.mubr.msk.bf16.mxu0 %vm5851_vm2, %v5850_v2  ;;  %v687_v34 = vld [vmem:[%s5933_s13 + $0x4a] sm:$0x3f]  ;;  %v809_v56 = vpack.c.bf16 %v686_v33, %v685_v26 }
  0x3a   : > { %4987 = vmatprep.subr.bf16.mxu0 %v5850_v2  ;;  %v692_v37 = vpack.c.bf16 %v687_v34, %v686_v33  ;;  %v2567_v26 = vld [vmem:[%s5950_s29 + $0x8] sm:$0xff]  ;;  %v2568_v33 = vld [vmem:[%s5950_s29 + $0x10] sm:$0xff]  ;;  %v2569_v34 = vld [vmem:[%s5950_s29 + $0x18] sm:$0xff] }
  0x3b   : > { %v2576_v29 = vpack.c.bf16 %v2567_v26, %v2566_v25  ;;  %v2577_v36 = vpack.c.bf16 %v2569_v34, %v2568_v33  ;;  %v4395_v25 = vld [vmem:[%s7126_s3 + $0x2a] sm:$0x3] }
  0x3e   : > { %4654 = vmatmul.mubr.msk.bf16.gmra.mrb[16].mxu1 %vm494_vm1, %v491_v39  ;;  %v2334_v39 = vld [vmem:[%s5942_s20 + $0x35] sm:$0xff] }
  0x3f   : > { %4659 = vmatprep.mubr.msk.bf16.mxu1 %vm5851_vm2, %v5850_v2 }
  0x40   : > { %4950 = vmatmul.mubr.msk.bf16.gmra.mrb[4].mxu0 %vm494_vm1, %v2105_v40  ;;  %v2335_v40 = vld [vmem:[%s5942_s20 + $0x3d] sm:$0xff] }
  0x41   : > { %4953 = vmatprep.mubr.msk.bf16.mxu0 %vm5851_vm2, %v5850_v2  ;;  %v2342_v42 = vpack.c.bf16 %v2335_v40, %v2334_v39  ;;  %v2570_v39 = vld [vmem:[%s5950_s29 + $0x20] sm:$0xff]  ;;  %v2571_v40 = vld [vmem:[%s5950_s29 + $0x28] sm:$0xff] }
  0x46   : > { %4660 = vmatmul.mubr.msk.bf16.vlgmr.msra.gmra.mrb[0].mxu1 %vm494_vm1, %v471_v45  ;;  %v2336_v45 = vld [vmem:[%s5942_s20 + $0x45] sm:$0xff] }
  0x47   : > { %4663 = vmatprep.mubr.msk.bf16.mxu1 %vm5851_vm2, %v5850_v2  ;;  %4680 = vmatpush3.bf16.msra.mxu1 %v711_v48 }
  0x48   : > { %4954 = vmatmul.mubr.msk.bf16.gmra.mrb[8].mxu0 %vm494_vm1, %v2106_v46  ;;  %4701 = vmatprep.subr.bf16.mxu1 %v5850_v2  ;;  %v2337_v46 = vld [vmem:[%s5942_s20 + $0x4d] sm:$0xff] }
  0x49   : > { %4957 = vmatprep.mubr.msk.bf16.mxu0 %vm5851_vm2, %v5850_v2  ;;  %v2343_v48 = vpack.c.bf16 %v2337_v46, %v2336_v45  ;;  %v1034_v45 = vld [vmem:[%s5933_s13 + $0x1c] sm:$0xff]  ;;  %v1035_v46 = vld [vmem:[%s5933_s13 + $0x24] sm:$0xff] }
  0x4a   : > { %v1043_v49 = vpack.c.bf16 %v1035_v46, %v1034_v45 }
  0x4e   : > { %4664 = vmatmul.mubr.msk.bf16.gmra.mrb[4].mxu1 %vm494_vm1, %v472_v53  ;;  %v2448_v53 = vld [vmem:[%s5942_s20 + $0x16] sm:$0xff] }
  0x4f   : > { %4667 = vmatprep.mubr.msk.bf16.mxu1 %vm5851_vm2, %v5850_v2 }
  0x50   : > { %4958 = vmatmul.mubr.msk.bf16.gmra.mrb[12].mxu0 %vm494_vm1, %v2107_v54  ;;  %v2449_v54 = vld [vmem:[%s5942_s20 + $0x1e] sm:$0xff] }
  0x51   : > { %4961 = vmatprep.mubr.msk.bf16.mxu0 %vm5851_vm2, %v5850_v2  ;;  %v2458_v57 = vpack.c.bf16 %v2449_v54, %v2448_v53  ;;  %v2574_v53 = vld [vmem:[%s5950_s29 + $0x40] sm:$0xff]  ;;  %v2575_v54 = vld [vmem:[%s5950_s29 + $0x48] sm:$0x3f] }
  0x56   : > { %4668 = vmatmul.mubr.msk.bf16.gmra.mrb[8].mxu1 %vm494_vm1, %v473_v59  ;;  %v804_v59 = vld [vmem:[%s5933_s13 + $0x4a] sm:$0xff] }
  0x57   : > { %4671 = vmatprep.mubr.msk.bf16.mxu1 %vm5851_vm2, %v5850_v2 }
  0x58   : > { %4962 = vmatmul.mubr.msk.bf16.gmra.mrb[16].mxu0 %vm494_vm1, %v2108_v60  ;;  %v805_v60 = vld [vmem:[%s5933_s13 + $0x52] sm:$0x3f] }
  0x59   : > { %4967 = vmatprep.mubr.msk.bf16.mxu0 %vm5851_vm2, %v5850_v2  ;;  %v810_v63 = vpack.c.bf16 %v805_v60, %v804_v59  ;;  %v2684_v59 = vld [vmem:[%s5950_s29 + $0x1] sm:$0xff]  ;;  %v2685_v60 = vld [vmem:[%s5950_s29 + $0x9] sm:$0xff] }
  0x5e   : > { %4672 = vmatmul.mubr.msk.bf16.gmra.mrb[12].mxu1 %vm494_vm1, %v474_v0  ;;  %v2459_v0 = vpack.c.bf16 %v2451_v62, %v2450_v61  ;;  %v4389_v61 = vld [vmem:[%s7126_s3 + $0x28] sm:$0x3] }
  0x5f   : > { %4675 = vmatprep.mubr.msk.bf16.mxu1 %vm5851_vm2, %v5850_v2 }
  0x60   : > { %4968 = vmatmul.mubr.msk.bf16.vlgmr.msra.gmra.mrb[0].mxu0 %vm494_vm1, %v2222_v1  ;;  %v914_v1 = vld [vmem:[%s5933_s13 + $0xb] sm:$0xff] }
  0x61   : > { %4988 = vmatpush3.bf16.msra.mxu0 %v2363_v3  ;;  %4971 = vmatprep.mubr.msk.bf16.mxu0 %vm5851_vm2, %v5850_v2  ;;  %v915_v3 = vld [vmem:[%s5933_s13 + $0x13] sm:$0xff] }
  0x62   : > { %5009 = vmatprep.subr.bf16.mxu0 %v5850_v2 }
  0x66   : > { %4676 = vmatmul.mubr.msk.bf16.gmra.mrb[16].mxu1 %vm494_vm1, %v475_v7  ;;  %v924_v7 = vpack.c.bf16 %v915_v3, %v914_v1  ;;  %v1040_v1 = vld [vmem:[%s5933_s13 + $0x4c] sm:$0xff]  ;;  %v1041_v3 = vld [vmem:[%s5933_s13 + $0x54] sm:$0x3f] }
  0x67   : > { %4681 = vmatprep.mubr.msk.bf16.mxu1 %vm5851_vm2, %v5850_v2 }
  0x68   : > { %4972 = vmatmul.mubr.msk.bf16.gmra.mrb[4].mxu0 %vm494_vm1, %v2223_v8  ;;  %v2460_v8 = vpack.c.bf16 %v2453_v6, %v2452_v5  ;;  %v2686_v5 = vld [vmem:[%s5950_s29 + $0x11] sm:$0xff]  ;;  %v2687_v6 = vld [vmem:[%s5950_s29 + $0x19] sm:$0xff] }
  0x69   : > { %4975 = vmatprep.mubr.msk.bf16.mxu0 %vm5851_vm2, %v5850_v2 }
  0x6e   : > { %4682 = vmatmul.mubr.msk.bf16.vlgmr.msra.gmra.mrb[0].mxu1 %vm494_vm1, %v688_v11  ;;  %v916_v11 = vld [vmem:[%s5933_s13 + $0x1b] sm:$0xff] }
  0x6f   : > { %4685 = vmatprep.mubr.msk.bf16.mxu1 %vm5851_vm2, %v5850_v2  ;;  %4702 = vmatpush3.bf16.msra.mxu1 %v829_v14  ;;  %v2455_v14 = vld [vmem:[%s5942_s20 + $0x4e] sm:$0xff] }
  0x70   : > { %4976 = vmatmul.mubr.msk.bf16.gmra.mrb[8].mxu0 %vm494_vm1, %v2224_v12  ;;  %4723 = vmatprep.subr.bf16.mxu1 %v5850_v2  ;;  %v917_v12 = vld [vmem:[%s5933_s13 + $0x23] sm:$0xff]  ;;  %v2461_v16 = vpack.c.bf16 %v2455_v14, %v2454_v13  ;;  %v4311_v13 = vld [vmem:[%s7126_s3 + $0xe] sm:$0x3] }
  0x71   : > { %4979 = vmatprep.mubr.msk.bf16.mxu0 %vm5851_vm2, %v5850_v2  ;;  %v925_v15 = vpack.c.bf16 %v917_v12, %v916_v11  ;;  %v1301_v14 = vsel %vm510_vm0, %v4311_v13, 0  ;;  %v1390_v13 = vld [vmem:[%s5933_s13 + $0x36] sm:$0xff] }
  0x76   : > { %4686 = vmatmul.mubr.msk.bf16.gmra.mrb[4].mxu1 %vm494_vm1, %v689_v17  ;;  %v918_v17 = vld [vmem:[%s5933_s13 + $0x2b] sm:$0xff] }
  0x77   : > { %4689 = vmatprep.mubr.msk.bf16.mxu1 %vm5851_vm2, %v5850_v2 }
  0x78   : > { %4980 = vmatmul.mubr.msk.bf16.gmra.mrb[12].mxu0 %vm494_vm1, %v2225_v18  ;;  %v919_v18 = vld [vmem:[%s5933_s13 + $0x33] sm:$0xff] }
  0x79   : > { %4983 = vmatprep.mubr.msk.bf16.mxu0 %vm5851_vm2, %v5850_v2  ;;  %v926_v21 = vpack.c.bf16 %v919_v18, %v918_v17 }
  0x7e   : > { %4690 = vmatmul.mubr.msk.bf16.gmra.mrb[8].mxu1 %vm494_vm1, %v690_v23  ;;  %v920_v23 = vld [vmem:[%s5933_s13 + $0x3b] sm:$0xff] }
  0x7f   : > { %4693 = vmatprep.mubr.msk.bf16.mxu1 %vm5851_vm2, %v5850_v2 }
  0x80   : > { %4984 = vmatmul.mubr.msk.bf16.gmra.mrb[16].mxu0 %vm494_vm1, %v2226_v24  ;;  %v921_v24 = vld [vmem:[%s5933_s13 + $0x43] sm:$0xff] }
  0x81   : > { %4989 = vmatprep.mubr.msk.bf16.mxu0 %vm5851_vm2, %v5850_v2  ;;  %v927_v28 = vpack.c.bf16 %v921_v24, %v920_v23  ;;  %v2802_v23 = vld [vmem:[%s5950_s29 + $0x2] sm:$0xff]  ;;  %v6366_v24 = vld [vmem:[%s5950_s29 + $0xa] sm:$0xff] }
  0x86   : > { %4694 = vmatmul.mubr.msk.bf16.gmra.mrb[12].mxu1 %vm494_vm1, %v691_v30  ;;  %v2717_v30 = vsel %vm510_vm0, %v4383_v27, 0  ;;  %v2812_v27 = vpack.c.bf16 %v6366_v24, %v2802_v23  ;;  %v4407_v23 = vld [vmem:[%s7126_s3 + $0x2e] sm:$0x3] }
  0x87   : > { %4697 = vmatprep.mubr.msk.bf16.mxu1 %vm5851_vm2, %v5850_v2 }
  0x88   : > { %4990 = vmatmul.mubr.msk.bf16.vlgmr.msra.gmra.mrb[0].mxu0 %vm494_vm1, %v2340_v31  ;;  %v922_v31 = vld [vmem:[%s5933_s13 + $0x4b] sm:$0xff] }
  0x89   : > { %5010 = vmatpush3.bf16.msra.mxu0 %v2481_v32  ;;  %4993 = vmatprep.mubr.msk.bf16.mxu0 %vm5851_vm2, %v5850_v2  ;;  %v923_v32 = vld [vmem:[%s5933_s13 + $0x53] sm:$0x3f] }
  0x8a   : > { %5031 = vmatprep.subr.bf16.mxu0 %v5850_v2  ;;  %v928_v35 = vpack.c.bf16 %v923_v32, %v922_v31  ;;  %v2804_v31 = vld [vmem:[%s5950_s29 + $0x12] sm:$0xff]  ;;  %v2805_v32 = vld [vmem:[%s5950_s29 + $0x1a] sm:$0xff] }
  0x8b   : > { %v2813_v34 = vpack.c.bf16 %v2805_v32, %v2804_v31 }
  0x8e   : > { %4698 = vmatmul.mubr.msk.bf16.gmra.mrb[16].mxu1 %vm494_vm1, %v692_v37  ;;  %v1032_v37 = vld [vmem:[%s5933_s13 + $0xc] sm:$0xff] }
  0x8f   : > { %4703 = vmatprep.mubr.msk.bf16.mxu1 %vm5851_vm2, %v5850_v2 }
  0x90   : > { %4994 = vmatmul.mubr.msk.bf16.gmra.mrb[4].mxu0 %vm494_vm1, %v2341_v38  ;;  %v6273_v38 = vld [vmem:[%s5933_s13 + $0x14] sm:$0xff] }
  0x91   : > { %4997 = vmatprep.mubr.msk.bf16.mxu0 %vm5851_vm2, %v5850_v2  ;;  %v1160_v11 = vpack.c.bf16 %v1034_v45, %v6273_v38  ;;  %v2808_v45 = vld [vmem:[%s5950_s29 + $0x32] sm:$0xff] }
  0x96   : > { %4704 = vmatmul.mubr.msk.bf16.vlgmr.msra.gmra.mrb[0].mxu1 %vm494_vm1, %v806_v41  ;;  %v1042_v41 = vpack.c.bf16 %v6273_v38, %v1032_v37  ;;  %v2806_v37 = vld [vmem:[%s5950_s29 + $0x22] sm:$0xff]  ;;  %v2807_v38 = vld [vmem:[%s5950_s29 + $0x2a] sm:$0xff] }
  0x97   : > { %4707 = vmatprep.mubr.msk.bf16.mxu1 %vm5851_vm2, %v5850_v2  ;;  %4724 = vmatpush3.bf16.msra.mxu1 %v947_v44  ;;  %v1183_v44 = vsel %vm510_vm0, %v4305_v43, 0  ;;  %v1270_v43 = vld [vmem:[%s5933_s13 + $0x25] sm:$0xff] }
  0x98   : > { %4998 = vmatmul.mubr.msk.bf16.gmra.mrb[8].mxu0 %vm494_vm1, %v2342_v42  ;;  %4745 = vmatprep.subr.bf16.mxu1 %v5850_v2  ;;  %v2578_v42 = vpack.c.bf16 %v2571_v40, %v2570_v39  ;;  %v2814_v40 = vpack.c.bf16 %v2807_v38, %v2806_v37 }
  0x99   : > { %5001 = vmatprep.mubr.msk.bf16.mxu0 %vm5851_vm2, %v5850_v2 }
  0x9e   : > { %4708 = vmatmul.mubr.msk.bf16.gmra.mrb[4].mxu1 %vm494_vm1, %v807_v47  ;;  %v2572_v47 = vld [vmem:[%s5950_s29 + $0x30] sm:$0xff] }
  0x9f   : > { %4711 = vmatprep.mubr.msk.bf16.mxu1 %vm5851_vm2, %v5850_v2 }
  0xa0   : > { %5002 = vmatmul.mubr.msk.bf16.gmra.mrb[12].mxu0 %vm494_vm1, %v2343_v48  ;;  %v2573_v48 = vld [vmem:[%s5950_s29 + $0x38] sm:$0xff] }
  0xa1   : > { %5005 = vmatprep.mubr.msk.bf16.mxu0 %vm5851_vm2, %v5850_v2  ;;  %v2579_v50 = vpack.c.bf16 %v2573_v48, %v2572_v47 }
  0xa6   : > { %4712 = vmatmul.mubr.msk.bf16.gmra.mrb[8].mxu1 %vm494_vm1, %v808_v51  ;;  %v1036_v51 = vld [vmem:[%s5933_s13 + $0x2c] sm:$0xff] }
  0xa7   : > { %4715 = vmatprep.mubr.msk.bf16.mxu1 %vm5851_vm2, %v5850_v2  ;;  %v1161_v17 = vpack.c.bf16 %v1036_v51, %v1035_v46  ;;  %v2809_v46 = vld [vmem:[%s5950_s29 + $0x3a] sm:$0xff] }
  0xa8   : > { %5006 = vmatmul.mubr.msk.bf16.gmra.mrb[16].mxu0 %vm494_vm1, %v2344_v52  ;;  %v1037_v52 = vld [vmem:[%s5933_s13 + $0x34] sm:$0xff]  ;;  %v2815_v48 = vpack.c.bf16 %v2809_v46, %v2808_v45 }
  0xa9   : > { %5011 = vmatprep.mubr.msk.bf16.mxu0 %vm5851_vm2, %v5850_v2  ;;  %v1044_v55 = vpack.c.bf16 %v1037_v52, %v1036_v51  ;;  %v2810_v51 = vld [vmem:[%s5950_s29 + $0x42] sm:$0xff] }
  0xae   : > { %4716 = vmatmul.mubr.msk.bf16.gmra.mrb[12].mxu1 %vm494_vm1, %v809_v56  ;;  %v2580_v56 = vpack.c.bf16 %v2575_v54, %v2574_v53 }
  0xaf   : > { %4719 = vmatprep.mubr.msk.bf16.mxu1 %vm5851_vm2, %v5850_v2 }
  0xb0   : > { %5012 = vmatmul.mubr.msk.bf16.vlgmr.msra.gmra.mrb[0].mxu0 %vm494_vm1, %v2458_v57  ;;  %v1038_v57 = vld [vmem:[%s5933_s13 + $0x3c] sm:$0xff] }
  0xb1   : > { %5032 = vmatpush3.bf16.msra.mxu0 %v2599_v58  ;;  %5015 = vmatprep.mubr.msk.bf16.mxu0 %vm5851_vm2, %v5850_v2  ;;  %v1039_v58 = vld [vmem:[%s5933_s13 + $0x44] sm:$0xff] }
  0xb2   : > { %5053 = vmatprep.subr.bf16.mxu0 %v5850_v2  ;;  %v1045_v62 = vpack.c.bf16 %v1039_v58, %v1038_v57  ;;  %v1163_v26 = vpack.c.bf16 %v1040_v1, %v1039_v58 }
  0xb6   : > { %4720 = vmatmul.mubr.msk.bf16.gmra.mrb[16].mxu1 %vm494_vm1, %v810_v63  ;;  %v2694_v63 = vpack.c.bf16 %v2685_v60, %v2684_v59  ;;  %v2930_v59 = vpack.c.bf16 %v2804_v31, %v6366_v24 }
  0xb7   : > { %4725 = vmatprep.mubr.msk.bf16.mxu1 %vm5851_vm2, %v5850_v2 }
  0xb8   : > { %5016 = vmatmul.mubr.msk.bf16.gmra.mrb[4].mxu0 %vm494_vm1, %v2459_v0  ;;  %v2835_v0 = vsel %vm510_vm0, %v4389_v61, 0  ;;  %v1276_v61 = vld [vmem:[%s5933_s13 + $0x55] sm:$0xff] }
  0xb9   : > { %5019 = vmatprep.mubr.msk.bf16.mxu0 %vm5851_vm2, %v5850_v2 }
  0xbe   : > { %4726 = vmatmul.mubr.msk.bf16.vlgmr.msra.gmra.mrb[0].mxu1 %vm494_vm1, %v924_v7  ;;  %v1046_v7 = vpack.c.bf16 %v1041_v3, %v1040_v1  ;;  %v1386_v1 = vld [vmem:[%s5933_s13 + $0x16] sm:$0xff]  ;;  %v1387_v3 = vld [vmem:[%s5933_s13 + $0x1e] sm:$0xff] }
  0xbf   : > { %4729 = vmatprep.mubr.msk.bf16.mxu1 %vm5851_vm2, %v5850_v2  ;;  %4746 = vmatpush3.bf16.msra.mxu1 %v1065_v10  ;;  %v2689_v10 = vld [vmem:[%s5950_s29 + $0x29] sm:$0xff] }
  0xc0   : > { %5020 = vmatmul.mubr.msk.bf16.gmra.mrb[8].mxu0 %vm494_vm1, %v2460_v8  ;;  %4767 = vmatprep.subr.bf16.mxu1 %v5850_v2  ;;  %v2695_v8 = vpack.c.bf16 %v2687_v6, %v2686_v5  ;;  %v2696_v12 = vpack.c.bf16 %v2689_v10, %v2688_v9  ;;  %v1396_v5 = vpack.c.bf16 %v1387_v3, %v1386_v1  ;;  %v1388_v9 = vld [vmem:[%s5933_s13 + $0x26] sm:$0xff]  ;;  %v1389_v10 = vld [vmem:[%s5933_s13 + $0x2e] sm:$0xff] }
  0xc1   : > { %5023 = vmatprep.mubr.msk.bf16.mxu0 %vm5851_vm2, %v5850_v2  ;;  %v2932_v6 = vpack.c.bf16 %v2808_v45, %v2807_v38 }
  0xc6   : > { %4730 = vmatmul.mubr.msk.bf16.gmra.mrb[4].mxu1 %vm494_vm1, %v925_v15  ;;  %v2690_v15 = vld [vmem:[%s5950_s29 + $0x31] sm:$0xff] }
  0xc7   : > { %4733 = vmatprep.mubr.msk.bf16.mxu1 %vm5851_vm2, %v5850_v2 }
  0xc8   : > { %5024 = vmatmul.mubr.msk.bf16.gmra.mrb[12].mxu0 %vm494_vm1, %v2461_v16  ;;  %v2691_v16 = vld [vmem:[%s5950_s29 + $0x39] sm:$0xff] }
  0xc9   : > { %5027 = vmatprep.mubr.msk.bf16.mxu0 %vm5851_vm2, %v5850_v2  ;;  %v2697_v18 = vpack.c.bf16 %v2691_v16, %v2690_v15  ;;  %v2928_v15 = vld [vmem:[%s5950_s29 + $0x4a] sm:$0xff]  ;;  %v2929_v16 = vld [vmem:[%s5950_s29 + $0x52] sm:$0x3f] }
  0xce   : > { %4734 = vmatmul.mubr.msk.bf16.gmra.mrb[8].mxu1 %vm494_vm1, %v926_v21  ;;  %v1162_v21 = vpack.c.bf16 %v1038_v57, %v1037_v52  ;;  %v2811_v52 = vld [vmem:[%s5950_s29 + $0x4a] sm:$0x3f] }
  0xcf   : > { %4737 = vmatprep.mubr.msk.bf16.mxu1 %vm5851_vm2, %v5850_v2  ;;  %v2816_v54 = vpack.c.bf16 %v2811_v52, %v2810_v51  ;;  %v4401_v57 = vld [vmem:[%s7126_s3 + $0x2c] sm:$0x3] }
  0xd0   : > { %5028 = vmatmul.mubr.msk.bf16.gmra.mrb[16].mxu0 %vm494_vm1, %v2462_v22  ;;  %v2698_v22 = vpack.c.bf16 %v2693_v20, %v2692_v19  ;;  %v3071_v60 = vsel %vm510_vm0, %v4401_v57, 0  ;;  %v1392_v19 = vld [vmem:[%s5933_s13 + $0x46] sm:$0xff]  ;;  %v1393_v20 = vld [vmem:[%s5933_s13 + $0x4e] sm:$0xff] }
  0xd1   : > { %5033 = vmatprep.mubr.msk.bf16.mxu0 %vm5851_vm2, %v5850_v2  ;;  %v1399_v24 = vpack.c.bf16 %v1393_v20, %v1392_v19  ;;  %v4413_v57 = vld [vmem:[%s7126_s3 + $0x30] sm:$0x3]  ;;  %v1626_v19 = vld [vmem:[%s5942_s20 + $0x21] sm:$0xff] }
  0xd2   : > { %v1627_v20 = vld [vmem:[%s5942_s20 + $0x29] sm:$0xff] }
  0xd6   : > { %4738 = vmatmul.mubr.msk.bf16.gmra.mrb[12].mxu1 %vm494_vm1, %v927_v28  ;;  %v2953_v28 = vsel %vm510_vm0, %v4395_v25, 0 }
  0xd7   : > { %4741 = vmatprep.mubr.msk.bf16.mxu1 %vm5851_vm2, %v5850_v2 }
  0xd8   : > { %5034 = vmatmul.mubr.msk.bf16.vlgmr.msra.gmra.mrb[0].mxu0 %vm494_vm1, %v2576_v29  ;;  %v1158_v29 = vld [vmem:[%s5933_s13 + $0x54] sm:$0xff] }
  0xd9   : > { %5054 = vmatpush3.bf16.msra.mxu0 %v2717_v30  ;;  %5037 = vmatprep.mubr.msk.bf16.mxu0 %vm5851_vm2, %v5850_v2  ;;  %v1159_v30 = vld [vmem:[%s5933_s13 + $0x5c] sm:$0x3f] }
  0xda   : > { %5075 = vmatprep.subr.bf16.mxu0 %v5850_v2  ;;  %v1164_v33 = vpack.c.bf16 %v1159_v30, %v1158_v29  ;;  %v3040_v29 = vld [vmem:[%s5950_s29 + $0x1b] sm:$0xff]  ;;  %v3041_v30 = vld [vmem:[%s5950_s29 + $0x23] sm:$0xff] }
  0xde   : > { %4742 = vmatmul.mubr.msk.bf16.gmra.mrb[16].mxu1 %vm494_vm1, %v928_v35  ;;  %v1268_v35 = vld [vmem:[%s5933_s13 + $0x15] sm:$0xff] }
  0xdf   : > { %4747 = vmatprep.mubr.msk.bf16.mxu1 %vm5851_vm2, %v5850_v2 }
  0xe0   : > { %5038 = vmatmul.mubr.msk.bf16.gmra.mrb[4].mxu0 %vm494_vm1, %v2577_v36  ;;  %v1269_v36 = vld [vmem:[%s5933_s13 + $0x1d] sm:$0xff] }
  0xe1   : > { %5041 = vmatprep.mubr.msk.bf16.mxu0 %vm5851_vm2, %v5850_v2  ;;  %v1278_v39 = vpack.c.bf16 %v1269_v36, %v1268_v35  ;;  %v3042_v35 = vld [vmem:[%s5950_s29 + $0x2b] sm:$0xff]  ;;  %v3043_v36 = vld [vmem:[%s5950_s29 + $0x33] sm:$0xff] }
  0xe2   : > { %v3050_v38 = vpack.c.bf16 %v3043_v36, %v3042_v35  ;;  %v1740_v35 = vld [vmem:[%s5942_s20 + $0x2] sm:$0xff]  ;;  %v1741_v36 = vld [vmem:[%s5942_s20 + $0xa] sm:$0xff] }
  0xe6   : > { %4748 = vmatmul.mubr.msk.bf16.vlgmr.msra.gmra.mrb[0].mxu1 %vm494_vm1, %v1042_v41  ;;  %v4317_v41 = vld [vmem:[%s7126_s3 + $0x10] sm:$0x3] }
  0xe7   : > { %4751 = vmatprep.mubr.msk.bf16.mxu1 %vm5851_vm2, %v5850_v2  ;;  %4768 = vmatpush3.bf16.msra.mxu1 %v1183_v44  ;;  %v1271_v44 = vld [vmem:[%s5933_s13 + $0x2d] sm:$0xff] }
  0xe8   : > { %5042 = vmatmul.mubr.msk.bf16.gmra.mrb[8].mxu0 %vm494_vm1, %v2578_v42  ;;  %4789 = vmatprep.subr.bf16.mxu1 %v5850_v2  ;;  %v1419_v42 = vsel %vm510_vm0, %v4317_v41, 0  ;;  %v1279_v47 = vpack.c.bf16 %v1271_v44, %v1270_v43  ;;  %v1506_v41 = vld [vmem:[%s5942_s20 + $0x10] sm:$0xff]  ;;  %v3044_v43 = vld [vmem:[%s5950_s29 + $0x3b] sm:$0xff]  ;;  %v3045_v44 = vld [vmem:[%s5950_s29 + $0x43] sm:$0xff] }
  0xe9   : > { %5045 = vmatprep.mubr.msk.bf16.mxu0 %vm5851_vm2, %v5850_v2 }
  0xee   : > { %4752 = vmatmul.mubr.msk.bf16.gmra.mrb[4].mxu1 %vm494_vm1, %v1043_v49  ;;  %v1272_v49 = vld [vmem:[%s5933_s13 + $0x35] sm:$0xff] }
  0xef   : > { %4755 = vmatprep.mubr.msk.bf16.mxu1 %vm5851_vm2, %v5850_v2 }
  0xf0   : > { %5046 = vmatmul.mubr.msk.bf16.gmra.mrb[12].mxu0 %vm494_vm1, %v2579_v50  ;;  %v1273_v50 = vld [vmem:[%s5933_s13 + $0x3d] sm:$0xff] }
  0xf1   : > { %5049 = vmatprep.mubr.msk.bf16.mxu0 %vm5851_vm2, %v5850_v2  ;;  %v1280_v53 = vpack.c.bf16 %v1273_v50, %v1272_v49  ;;  %v3046_v49 = vld [vmem:[%s5950_s29 + $0x4b] sm:$0xff]  ;;  %v3047_v50 = vld [vmem:[%s5950_s29 + $0x53] sm:$0x3f] }
  0xf2   : > { %v3052_v52 = vpack.c.bf16 %v3047_v50, %v3046_v49 }
  0xf6   : > { %4756 = vmatmul.mubr.msk.bf16.gmra.mrb[8].mxu1 %vm494_vm1, %v1044_v55  ;;  %v1274_v55 = vld [vmem:[%s5933_s13 + $0x45] sm:$0xff] }
  0xf7   : > { %4759 = vmatprep.mubr.msk.bf16.mxu1 %vm5851_vm2, %v5850_v2 }
  0xf8   : > { %5050 = vmatmul.mubr.msk.bf16.gmra.mrb[16].mxu0 %vm494_vm1, %v2580_v56  ;;  %v1275_v56 = vld [vmem:[%s5933_s13 + $0x4d] sm:$0xff] }
  0xf9   : > { %5055 = vmatprep.mubr.msk.bf16.mxu0 %vm5851_vm2, %v5850_v2  ;;  %v1281_v58 = vpack.c.bf16 %v1275_v56, %v1274_v55  ;;  %v3156_v55 = vld [vmem:[%s5950_s29 + $0xc] sm:$0xff]  ;;  %v6542_v56 = vld [vmem:[%s5950_s29 + $0x14] sm:$0xff] }
  0xfe   : > { %4760 = vmatmul.mubr.msk.bf16.gmra.mrb[12].mxu1 %vm494_vm1, %v1045_v62  ;;  %v1277_v62 = vld [vmem:[%s5933_s13 + $0x5d] sm:$0x3f] }
  0xff   : > { %4763 = vmatprep.mubr.msk.bf16.mxu1 %vm5851_vm2, %v5850_v2 }
 0x100   : > { %5056 = vmatmul.mubr.msk.bf16.vlgmr.msra.gmra.mrb[0].mxu0 %vm494_vm1, %v2694_v63  ;;  %v1282_v63 = vpack.c.bf16 %v1277_v62, %v1276_v61  ;;  %v1512_v61 = vld [vmem:[%s5942_s20 + $0x40] sm:$0xff]  ;;  %v1513_v62 = vld [vmem:[%s5942_s20 + $0x48] sm:$0x3f] }
 0x101   : > { %5076 = vmatpush3.bf16.msra.mxu0 %v2835_v0  ;;  %5059 = vmatprep.mubr.msk.bf16.mxu0 %vm5851_vm2, %v5850_v2  ;;  %v2931_v0 = vpack.c.bf16 %v2806_v37, %v2805_v32  ;;  %v3049_v32 = vpack.c.bf16 %v3041_v30, %v3040_v29  ;;  %v1518_v1 = vpack.c.bf16 %v1513_v62, %v1512_v61  ;;  %v3394_v61 = vld [vmem:[%s5950_s29 + $0x25] sm:$0xff]  ;;  %v3395_v62 = vld [vmem:[%s5950_s29 + $0x2d] sm:$0xff] }
 0x102   : > { %5097 = vmatprep.subr.bf16.mxu0 %v5850_v2 }
 0x106   : > { %4764 = vmatmul.mubr.msk.bf16.gmra.mrb[16].mxu1 %vm494_vm1, %v1046_v7  ;;  %v4323_v7 = vld [vmem:[%s7126_s3 + $0x12] sm:$0x3] }
 0x107   : > { %4769 = vmatprep.mubr.msk.bf16.mxu1 %vm5851_vm2, %v5850_v2 }
 0x108   : > { %5060 = vmatmul.mubr.msk.bf16.gmra.mrb[4].mxu0 %vm494_vm1, %v2695_v8  ;;  %v1537_v8 = vsel %vm510_vm0, %v4323_v7, 0  ;;  %v3160_v7 = vld [vmem:[%s5950_s29 + $0x2c] sm:$0xff] }
 0x109   : > { %5063 = vmatprep.mubr.msk.bf16.mxu0 %vm5851_vm2, %v5850_v2 }
 0x10e   : > { %4770 = vmatmul.mubr.msk.bf16.vlgmr.msra.gmra.mrb[0].mxu1 %vm494_vm1, %v1160_v11  ;;  %v1397_v11 = vpack.c.bf16 %v1389_v10, %v1388_v9 }
 0x10f   : > { %4773 = vmatprep.mubr.msk.bf16.mxu1 %vm5851_vm2, %v5850_v2  ;;  %4790 = vmatpush3.bf16.msra.mxu1 %v1301_v14  ;;  %v1391_v14 = vld [vmem:[%s5933_s13 + $0x3e] sm:$0xff] }
 0x110   : > { %5064 = vmatmul.mubr.msk.bf16.gmra.mrb[8].mxu0 %vm494_vm1, %v2696_v12  ;;  %4811 = vmatprep.subr.bf16.mxu1 %v5850_v2  ;;  %v2933_v12 = vpack.c.bf16 %v2810_v51, %v2809_v46  ;;  %v3051_v46 = vpack.c.bf16 %v3045_v44, %v3044_v43 }
 0x111   : > { %5067 = vmatprep.mubr.msk.bf16.mxu0 %vm5851_vm2, %v5850_v2 }
 0x116   : > { %4774 = vmatmul.mubr.msk.bf16.gmra.mrb[4].mxu1 %vm494_vm1, %v1161_v17  ;;  %v1398_v17 = vpack.c.bf16 %v1391_v14, %v1390_v13  ;;  %v1624_v13 = vld [vmem:[%s5942_s20 + $0x11] sm:$0xff]  ;;  %v1625_v14 = vld [vmem:[%s5942_s20 + $0x19] sm:$0xff] }
 0x117   : > { %4777 = vmatprep.mubr.msk.bf16.mxu1 %vm5851_vm2, %v5850_v2 }
 0x118   : > { %5068 = vmatmul.mubr.msk.bf16.gmra.mrb[12].mxu0 %vm494_vm1, %v2697_v18  ;;  %v2934_v18 = vpack.c.bf16 %v2929_v16, %v2928_v15  ;;  %v3162_v15 = vld [vmem:[%s5950_s29 + $0x3c] sm:$0xff]  ;;  %v3163_v16 = vld [vmem:[%s5950_s29 + $0x44] sm:$0xff] }
 0x119   : > { %5071 = vmatprep.mubr.msk.bf16.mxu0 %vm5851_vm2, %v5850_v2 }
 0x11e   : > { %4778 = vmatmul.mubr.msk.bf16.gmra.mrb[8].mxu1 %vm494_vm1, %v1162_v21  ;;  %v3038_v21 = vld [vmem:[%s5950_s29 + $0xb] sm:$0xff] }
 0x11f   : > { %4781 = vmatprep.mubr.msk.bf16.mxu1 %vm5851_vm2, %v5850_v2 }
 0x120   : > { %5072 = vmatmul.mubr.msk.bf16.gmra.mrb[16].mxu0 %vm494_vm1, %v2698_v22  ;;  %v3039_v22 = vld [vmem:[%s5950_s29 + $0x13] sm:$0xff] }
 0x121   : > { %5077 = vmatprep.mubr.msk.bf16.mxu0 %vm5851_vm2, %v5850_v2  ;;  %v3048_v25 = vpack.c.bf16 %v3039_v22, %v3038_v21  ;;  %v3164_v21 = vld [vmem:[%s5950_s29 + $0x4c] sm:$0xff]  ;;  %v3165_v22 = vld [vmem:[%s5950_s29 + $0x54] sm:$0x3f] }
 0x122   : > { %v3287_v44 = vpack.c.bf16 %v3164_v21, %v3163_v16 }
 0x126   : > { %4782 = vmatmul.mubr.msk.bf16.gmra.mrb[12].mxu1 %vm494_vm1, %v1163_v26  ;;  %v3189_v26 = vsel %vm510_vm0, %v4407_v23, 0  ;;  %v1634_v23 = vpack.c.bf16 %v1627_v20, %v1626_v19  ;;  %v1867_v19 = vld [vmem:[%s5942_s20 + $0x52] sm:$0x3f]  ;;  %v3512_v20 = vld [vmem:[%s5950_s29 + $0x26] sm:$0xff] }
 0x127   : > { %4785 = vmatprep.mubr.msk.bf16.mxu1 %vm5851_vm2, %v5850_v2 }
 0x128   : > { %5078 = vmatmul.mubr.msk.bf16.vlgmr.msra.gmra.mrb[0].mxu0 %vm494_vm1, %v2812_v27  ;;  %v1394_v27 = vld [vmem:[%s5933_s13 + $0x56] sm:$0xff] }
 0x129   : > { %5098 = vmatpush3.bf16.msra.mxu0 %v2953_v28  ;;  %5081 = vmatprep.mubr.msk.bf16.mxu0 %vm5851_vm2, %v5850_v2  ;;  %v1395_v28 = vld [vmem:[%s5933_s13 + $0x5e] sm:$0x3f] }
 0x12a   : > { %5119 = vmatprep.subr.bf16.mxu0 %v5850_v2  ;;  %v1400_v31 = vpack.c.bf16 %v1395_v28, %v1394_v27  ;;  %v4419_v27 = vld [vmem:[%s7126_s3 + $0x32] sm:$0x3] }
 0x12b   : > { %v3425_v30 = vsel %vm510_vm0, %v4419_v27, 0  ;;  %v3515_v27 = vld [vmem:[%s5950_s29 + $0x3e] sm:$0xff] }
 0x12e   : > { %4786 = vmatmul.mubr.msk.bf16.gmra.mrb[16].mxu1 %vm494_vm1, %v1164_v33  ;;  %v1504_v33 = vld [vmem:[%s5942_s20] sm:$0xff] }
 0x12f   : > { %4791 = vmatprep.mubr.msk.bf16.mxu1 %vm5851_vm2, %v5850_v2 }
 0x130   : > { %5082 = vmatmul.mubr.msk.bf16.gmra.mrb[4].mxu0 %vm494_vm1, %v2813_v34  ;;  %v1505_v34 = vld [vmem:[%s5942_s20 + $0x8] sm:$0xff] }
 0x131   : > { %5085 = vmatprep.mubr.msk.bf16.mxu0 %vm5851_vm2, %v5850_v2  ;;  %v1514_v37 = vpack.c.bf16 %v1505_v34, %v1504_v33 }
 0x136   : > { %4792 = vmatmul.mubr.msk.bf16.vlgmr.msra.gmra.mrb[0].mxu1 %vm494_vm1, %v1278_v39  ;;  %v4329_v39 = vld [vmem:[%s7126_s3 + $0x14] sm:$0x3] }
 0x137   : > { %4795 = vmatprep.mubr.msk.bf16.mxu1 %vm5851_vm2, %v5850_v2  ;;  %4812 = vmatpush3.bf16.msra.mxu1 %v1419_v42  ;;  %v1507_v42 = vld [vmem:[%s5942_s20 + $0x18] sm:$0xff] }
 0x138   : > { %5086 = vmatmul.mubr.msk.bf16.gmra.mrb[8].mxu0 %vm494_vm1, %v2814_v40  ;;  %4833 = vmatprep.subr.bf16.mxu1 %v5850_v2  ;;  %v1655_v40 = vsel %vm510_vm0, %v4329_v39, 0  ;;  %v1515_v45 = vpack.c.bf16 %v1507_v42, %v1506_v41  ;;  %v4341_v39 = vld [vmem:[%s7126_s3 + $0x18] sm:$0x3]  ;;  %v1743_v42 = vld [vmem:[%s5942_s20 + $0x1a] sm:$0xff] }
 0x139   : > { %5089 = vmatprep.mubr.msk.bf16.mxu0 %vm5851_vm2, %v5850_v2  ;;  %v1742_v41 = vld [vmem:[%s5942_s20 + $0x12] sm:$0xff] }
 0x13a   : > { %v1751_v43 = vpack.c.bf16 %v1743_v42, %v1742_v41 }
 0x13e   : > { %4796 = vmatmul.mubr.msk.bf16.gmra.mrb[4].mxu1 %vm494_vm1, %v1279_v47  ;;  %v1508_v47 = vld [vmem:[%s5942_s20 + $0x20] sm:$0xff] }
 0x13f   : > { %4799 = vmatprep.mubr.msk.bf16.mxu1 %vm5851_vm2, %v5850_v2 }
 0x140   : > { %5090 = vmatmul.mubr.msk.bf16.gmra.mrb[12].mxu0 %vm494_vm1, %v2815_v48  ;;  %v1509_v48 = vld [vmem:[%s5942_s20 + $0x28] sm:$0xff] }
 0x141   : > { %5093 = vmatprep.mubr.msk.bf16.mxu0 %vm5851_vm2, %v5850_v2  ;;  %v1516_v51 = vpack.c.bf16 %v1509_v48, %v1508_v47  ;;  %v3282_v47 = vld [vmem:[%s5950_s29 + $0x54] sm:$0xff]  ;;  %v3283_v48 = vld [vmem:[%s5950_s29 + $0x5c] sm:$0x3f] }
 0x142   : > { %v3288_v50 = vpack.c.bf16 %v3283_v48, %v3282_v47 }
 0x146   : > { %4800 = vmatmul.mubr.msk.bf16.gmra.mrb[8].mxu1 %vm494_vm1, %v1280_v53  ;;  %v1510_v53 = vld [vmem:[%s5942_s20 + $0x30] sm:$0xff] }
 0x147   : > { %4803 = vmatprep.mubr.msk.bf16.mxu1 %vm5851_vm2, %v5850_v2 }
 0x148   : > { %5094 = vmatmul.mubr.msk.bf16.gmra.mrb[16].mxu0 %vm494_vm1, %v2816_v54  ;;  %v1511_v54 = vld [vmem:[%s5942_s20 + $0x38] sm:$0xff] }
 0x149   : > { %5099 = vmatprep.mubr.msk.bf16.mxu0 %vm5851_vm2, %v5850_v2 }
 0x14e   : > { %4804 = vmatmul.mubr.msk.bf16.gmra.mrb[12].mxu1 %vm494_vm1, %v1281_v58  ;;  %v1517_v58 = vpack.c.bf16 %v1511_v54, %v1510_v53  ;;  %v3392_v53 = vld [vmem:[%s5950_s29 + $0x15] sm:$0xff]  ;;  %v3393_v54 = vld [vmem:[%s5950_s29 + $0x1d] sm:$0xff] }
 0x14f   : > { %4807 = vmatprep.mubr.msk.bf16.mxu1 %vm5851_vm2, %v5850_v2 }
 0x150   : > { %5100 = vmatmul.mubr.msk.bf16.vlgmr.msra.gmra.mrb[0].mxu0 %vm494_vm1, %v2930_v59  ;;  %v3166_v59 = vpack.c.bf16 %v6542_v56, %v3156_v55  ;;  %v4425_v55 = vld [vmem:[%s7126_s3 + $0x34] sm:$0x3] }
 0x151   : > { %5120 = vmatpush3.bf16.msra.mxu0 %v3071_v60  ;;  %5103 = vmatprep.mubr.msk.bf16.mxu0 %vm5851_vm2, %v5850_v2  ;;  %v3307_v60 = vsel %vm510_vm0, %v4413_v57, 0  ;;  %v3402_v57 = vpack.c.bf16 %v3393_v54, %v3392_v53 }
 0x152   : > { %5141 = vmatprep.subr.bf16.mxu0 %v5850_v2 }
 0x156   : > { %4808 = vmatmul.mubr.msk.bf16.gmra.mrb[16].mxu1 %vm494_vm1, %v1282_v63  ;;  %v3158_v63 = vld [vmem:[%s5950_s29 + $0x1c] sm:$0xff] }
 0x157   : > { %4813 = vmatprep.mubr.msk.bf16.mxu1 %vm5851_vm2, %v5850_v2  ;;  %v3284_v29 = vpack.c.bf16 %v3158_v63, %v6542_v56 }
 0x158   : > { %5104 = vmatmul.mubr.msk.bf16.gmra.mrb[4].mxu0 %vm494_vm1, %v2931_v0  ;;  %v3159_v0 = vld [vmem:[%s5950_s29 + $0x24] sm:$0xff] }
 0x159   : > { %5107 = vmatprep.mubr.msk.bf16.mxu0 %vm5851_vm2, %v5850_v2  ;;  %v3167_v3 = vpack.c.bf16 %v3159_v0, %v3158_v63  ;;  %v3285_v34 = vpack.c.bf16 %v3160_v7, %v3159_v0  ;;  %v3403_v0 = vpack.c.bf16 %v3395_v62, %v3394_v61 }
 0x15e   : > { %4814 = vmatmul.mubr.msk.bf16.vlgmr.msra.gmra.mrb[0].mxu1 %vm494_vm1, %v1396_v5  ;;  %v1622_v5 = vld [vmem:[%s5942_s20 + $0x1] sm:$0xff] }
 0x15f   : > { %4817 = vmatprep.mubr.msk.bf16.mxu1 %vm5851_vm2, %v5850_v2  ;;  %4834 = vmatpush3.bf16.msra.mxu1 %v1537_v8  ;;  %v3161_v8 = vld [vmem:[%s5950_s29 + $0x34] sm:$0xff] }
 0x160   : > { %5108 = vmatmul.mubr.msk.bf16.gmra.mrb[8].mxu0 %vm494_vm1, %v2932_v6  ;;  %4855 = vmatprep.subr.bf16.mxu1 %v5850_v2  ;;  %v1623_v6 = vld [vmem:[%s5942_s20 + $0x9] sm:$0xff]  ;;  %v3168_v10 = vpack.c.bf16 %v3161_v8, %v3160_v7 }
 0x161   : > { %5111 = vmatprep.mubr.msk.bf16.mxu0 %vm5851_vm2, %v5850_v2  ;;  %v1632_v9 = vpack.c.bf16 %v1623_v6, %v1622_v5  ;;  %v1868_v5 = vpack.c.bf16 %v1742_v41, %v1741_v36  ;;  %v3398_v7 = vld [vmem:[%s5950_s29 + $0x45] sm:$0xff]  ;;  %v5852_v41 = vmov 0  }
 0x162   : > { %3883 = vst [vmem:[%s5955_s18] sm:$0xf] %v5852_v41  ;;  %4059 = vst [vmem:[%s5955_s18 + $0x30] sm:$0x3] %v5852_v41 }
 0x166   : > { %4818 = vmatmul.mubr.msk.bf16.gmra.mrb[4].mxu1 %vm494_vm1, %v1397_v11  ;;  %v4335_v11 = vld [vmem:[%s7126_s3 + $0x16] sm:$0x3] }
 0x167   : > { %4821 = vmatprep.mubr.msk.bf16.mxu1 %vm5851_vm2, %v5850_v2 }
 0x168   : > { %5112 = vmatmul.mubr.msk.bf16.gmra.mrb[12].mxu0 %vm494_vm1, %v2933_v12  ;;  %v1773_v12 = vsel %vm510_vm0, %v4335_v11, 0  ;;  %v3400_v11 = vld [vmem:[%s5950_s29 + $0x55] sm:$0xff] }
 0x169   : > { %5115 = vmatprep.mubr.msk.bf16.mxu0 %vm5851_vm2, %v5850_v2 }
 0x16e   : > { %4822 = vmatmul.mubr.msk.bf16.gmra.mrb[8].mxu1 %vm494_vm1, %v1398_v17  ;;  %v1633_v17 = vpack.c.bf16 %v1625_v14, %v1624_v13  ;;  %v3510_v14 = vld [vmem:[%s5950_s29 + $0x16] sm:$0xff] }
 0x16f   : > { %4825 = vmatprep.mubr.msk.bf16.mxu1 %vm5851_vm2, %v5850_v2 }
 0x170   : > { %5116 = vmatmul.mubr.msk.bf16.gmra.mrb[16].mxu0 %vm494_vm1, %v2934_v18  ;;  %v3169_v18 = vpack.c.bf16 %v3163_v16, %v3162_v15 }
 0x171   : > { %5121 = vmatprep.mubr.msk.bf16.mxu0 %vm5851_vm2, %v5850_v2 }
 0x176   : > { %4826 = vmatmul.mubr.msk.bf16.gmra.mrb[12].mxu1 %vm494_vm1, %v1399_v24  ;;  %v3170_v24 = vpack.c.bf16 %v3165_v22, %v3164_v21  ;;  %v3513_v21 = vld [vmem:[%s5950_s29 + $0x2e] sm:$0xff] }
 0x177   : > { %4829 = vmatprep.mubr.msk.bf16.mxu1 %vm5851_vm2, %v5850_v2 }
 0x178   : > { %5122 = vmatmul.mubr.msk.bf16.vlgmr.msra.gmra.mrb[0].mxu0 %vm494_vm1, %v3048_v25  ;;  %v1628_v25 = vld [vmem:[%s5942_s20 + $0x31] sm:$0xff] }
 0x179   : > { %5142 = vmatpush3.bf16.msra.mxu0 %v3189_v26  ;;  %5125 = vmatprep.mubr.msk.bf16.mxu0 %vm5851_vm2, %v5850_v2  ;;  %v1629_v26 = vld [vmem:[%s5942_s20 + $0x39] sm:$0xff] }
 0x17a   : > { %5163 = vmatprep.subr.bf16.mxu0 %v5850_v2  ;;  %v1635_v28 = vpack.c.bf16 %v1629_v26, %v1628_v25  ;;  %v1983_v25 = vld [vmem:[%s5942_s20 + $0x43] sm:$0xff]  ;;  %v3514_v26 = vld [vmem:[%s5950_s29 + $0x36] sm:$0xff] }
 0x17e   : > { %4830 = vmatmul.mubr.msk.bf16.gmra.mrb[16].mxu1 %vm494_vm1, %v1400_v31  ;;  %v1630_v31 = vld [vmem:[%s5942_s20 + $0x41] sm:$0xff] }
 0x17f   : > { %4835 = vmatprep.mubr.msk.bf16.mxu1 %vm5851_vm2, %v5850_v2 }
 0x180   : > { %5126 = vmatmul.mubr.msk.bf16.gmra.mrb[4].mxu0 %vm494_vm1, %v3049_v32  ;;  %v1631_v32 = vld [vmem:[%s5942_s20 + $0x49] sm:$0x3f] }
 0x181   : > { %5129 = vmatprep.mubr.msk.bf16.mxu0 %vm5851_vm2, %v5850_v2  ;;  %v1636_v33 = vpack.c.bf16 %v1631_v32, %v1630_v31  ;;  %v1985_v31 = vld [vmem:[%s5942_s20 + $0x53] sm:$0x3f]  ;;  %v3516_v32 = vld [vmem:[%s5950_s29 + $0x46] sm:$0xff] }
 0x186   : > { %4836 = vmatmul.mubr.msk.bf16.vlgmr.msra.gmra.mrb[0].mxu1 %vm494_vm1, %v1514_v37  ;;  %v1750_v37 = vpack.c.bf16 %v1741_v36, %v1740_v35  ;;  %v3518_v36 = vld [vmem:[%s5950_s29 + $0x56] sm:$0xff] }
 0x187   : > { %4839 = vmatprep.mubr.msk.bf16.mxu1 %vm5851_vm2, %v5850_v2  ;;  %4856 = vmatpush3.bf16.msra.mxu1 %v1655_v40  ;;  %v1891_v40 = vsel %vm510_vm0, %v4341_v39, 0  ;;  %v3887_v39 = vld [vmem:[%s5955_s18 + $0x4] sm:$0x3] }
 0x188   : > { %5130 = vmatmul.mubr.msk.bf16.gmra.mrb[8].mxu0 %vm494_vm1, %v3050_v38  ;;  %4877 = vmatprep.subr.bf16.mxu1 %v5850_v2  ;;  %v3286_v38 = vpack.c.bf16 %v3162_v15, %v3161_v8  ;;  %v3399_v8 = vld [vmem:[%s5950_s29 + $0x4d] sm:$0xff]  ;;  %v3511_v15 = vld [vmem:[%s5950_s29 + $0x1e] sm:$0xff] }
 0x189   : > { %5133 = vmatprep.mubr.msk.bf16.mxu0 %vm5851_vm2, %v5850_v2 }
 0x18e   : > { %4840 = vmatmul.mubr.msk.bf16.gmra.mrb[4].mxu1 %vm494_vm1, %v1515_v45  ;;  %v1744_v45 = vld [vmem:[%s5942_s20 + $0x22] sm:$0xff] }
 0x18f   : > { %4843 = vmatprep.mubr.msk.bf16.mxu1 %vm5851_vm2, %v5850_v2 }
 0x190   : > { %5134 = vmatmul.mubr.msk.bf16.gmra.mrb[12].mxu0 %vm494_vm1, %v3051_v46  ;;  %v1745_v46 = vld [vmem:[%s5942_s20 + $0x2a] sm:$0xff] }
 0x191   : > { %5137 = vmatprep.mubr.msk.bf16.mxu0 %vm5851_vm2, %v5850_v2  ;;  %v1752_v49 = vpack.c.bf16 %v1745_v46, %v1744_v45 }
 0x196   : > { %4844 = vmatmul.mubr.msk.bf16.gmra.mrb[8].mxu1 %vm494_vm1, %v1516_v51  ;;  %v1746_v51 = vld [vmem:[%s5942_s20 + $0x32] sm:$0xff] }
 0x197   : > { %4847 = vmatprep.mubr.msk.bf16.mxu1 %vm5851_vm2, %v5850_v2  ;;  %v1870_v13 = vpack.c.bf16 %v1746_v51, %v1745_v46 }
 0x198   : > { %5138 = vmatmul.mubr.msk.bf16.gmra.mrb[16].mxu0 %vm494_vm1, %v3052_v52  ;;  %v1747_v52 = vld [vmem:[%s5942_s20 + $0x3a] sm:$0xff] }
 0x199   : > { %5143 = vmatprep.mubr.msk.bf16.mxu0 %vm5851_vm2, %v5850_v2  ;;  %v1753_v56 = vpack.c.bf16 %v1747_v52, %v1746_v51 }
 0x19e   : > { %4848 = vmatmul.mubr.msk.bf16.gmra.mrb[12].mxu1 %vm494_vm1, %v1517_v58  ;;  %v3543_v58 = vsel %vm510_vm0, %v4425_v55, 0 }
 0x19f   : > { %4851 = vmatprep.mubr.msk.bf16.mxu1 %vm5851_vm2, %v5850_v2 }
 0x1a0   : > { %5144 = vmatmul.mubr.msk.bf16.vlgmr.msra.gmra.mrb[0].mxu0 %vm494_vm1, %v3166_v59  ;;  %v1748_v59 = vld [vmem:[%s5942_s20 + $0x42] sm:$0xff] }
 0x1a1   : > { %5164 = vmatpush3.bf16.msra.mxu0 %v3307_v60  ;;  %5147 = vmatprep.mubr.msk.bf16.mxu0 %vm5851_vm2, %v5850_v2  ;;  %v1749_v60 = vld [vmem:[%s5942_s20 + $0x4a] sm:$0x3f]  ;;  %v1871_v16 = vpack.c.bf16 %v1748_v59, %v1747_v52 }
 0x1a2   : > { %5185 = vmatprep.subr.bf16.mxu0 %v5850_v2  ;;  %v1754_v63 = vpack.c.bf16 %v1749_v60, %v1748_v59 }
 0x1a6   : > { %4852 = vmatmul.mubr.msk.bf16.gmra.mrb[16].mxu1 %vm494_vm1, %v1518_v1  ;;  %v3396_v1 = vld [vmem:[%s5950_s29 + $0x35] sm:$0xff] }
 0x1a7   : > { %4857 = vmatprep.mubr.msk.bf16.mxu1 %vm5851_vm2, %v5850_v2 }
 0x1a8   : > { %5148 = vmatmul.mubr.msk.bf16.gmra.mrb[4].mxu0 %vm494_vm1, %v3167_v3  ;;  %v3397_v3 = vld [vmem:[%s5950_s29 + $0x3d] sm:$0xff] }
 0x1a9   : > { %5151 = vmatprep.mubr.msk.bf16.mxu0 %vm5851_vm2, %v5850_v2  ;;  %v3404_v6 = vpack.c.bf16 %v3397_v3, %v3396_v1 }
 0x1ae   : > { %4858 = vmatmul.mubr.msk.bf16.vlgmr.msra.gmra.mrb[0].mxu1 %vm494_vm1, %v1632_v9  ;;  %v1869_v9 = vpack.c.bf16 %v1744_v45, %v1743_v42  ;;  %v3672_v42 = vlaneseq }
 0x1af   : > { %4861 = vmatprep.mubr.msk.bf16.mxu1 %vm5851_vm2, %v5850_v2  ;;  %4878 = vmatpush3.bf16.msra.mxu1 %v1773_v12  ;;  %v3401_v12 = vld [vmem:[%s5950_s29 + $0x5d] sm:$0x3f] }
 0x1b0   : > { %5152 = vmatmul.mubr.msk.bf16.gmra.mrb[8].mxu0 %vm494_vm1, %v3168_v10  ;;  %4899 = vmatprep.subr.bf16.mxu1 %v5850_v2  ;;  %v3405_v10 = vpack.c.bf16 %v3399_v8, %v3398_v7 }
 0x1b1   : > { %5155 = vmatprep.mubr.msk.bf16.mxu0 %vm5851_vm2, %v5850_v2 }
 0x1b6   : > { %4862 = vmatmul.mubr.msk.bf16.gmra.mrb[4].mxu1 %vm494_vm1, %v1633_v17  ;;  %v3520_v17 = vpack.c.bf16 %v3511_v15, %v3510_v14 }
 0x1b7   : > { %4865 = vmatprep.mubr.msk.bf16.mxu1 %vm5851_vm2, %v5850_v2 }
 0x1b8   : > { %5156 = vmatmul.mubr.msk.bf16.gmra.mrb[12].mxu0 %vm494_vm1, %v3169_v18  ;;  %v1866_v18 = vld [vmem:[%s5942_s20 + $0x4a] sm:$0xff] }
 0x1b9   : > { %5159 = vmatprep.mubr.msk.bf16.mxu0 %vm5851_vm2, %v5850_v2  ;;  %v1872_v22 = vpack.c.bf16 %v1867_v19, %v1866_v18 }
 0x1be   : > { %4866 = vmatmul.mubr.msk.bf16.gmra.mrb[8].mxu1 %vm494_vm1, %v1634_v23  ;;  %v3521_v23 = vpack.c.bf16 %v3513_v21, %v3512_v20 }
 0x1bf   : > { %4869 = vmatprep.mubr.msk.bf16.mxu1 %vm5851_vm2, %v5850_v2 }
 0x1c0   : > { %5160 = vmatmul.mubr.msk.bf16.gmra.mrb[16].mxu0 %vm494_vm1, %v3170_v24  ;;  %v1982_v24 = vld [vmem:[%s5942_s20 + $0x3b] sm:$0xff] }
 0x1c1   : > { %5165 = vmatprep.mubr.msk.bf16.mxu0 %vm5851_vm2, %v5850_v2 }
 0x1c6   : > { %4870 = vmatmul.mubr.msk.bf16.gmra.mrb[12].mxu1 %vm494_vm1, %v1635_v28  ;;  %v1989_v28 = vpack.c.bf16 %v1983_v25, %v1982_v24 }
 0x1c7   : > { %4873 = vmatprep.mubr.msk.bf16.mxu1 %vm5851_vm2, %v5850_v2 }
 0x1c8   : > { %5166 = vmatmul.mubr.msk.bf16.vlgmr.msra.gmra.mrb[0].mxu0 %vm494_vm1, %v3284_v29  ;;  %v3522_v29 = vpack.c.bf16 %v3515_v27, %v3514_v26 }
 0x1c9   : > { %5186 = vmatpush3.bf16.msra.mxu0 %v3425_v30  ;;  %5169 = vmatprep.mubr.msk.bf16.mxu0 %vm5851_vm2, %v5850_v2  ;;  %v1984_v30 = vld [vmem:[%s5942_s20 + $0x4b] sm:$0xff] }
 0x1ca   : > { %5207 = vmatprep.subr.bf16.mxu0 %v5850_v2 }
 0x1ce   : > { %4874 = vmatmul.mubr.msk.bf16.gmra.mrb[16].mxu1 %vm494_vm1, %v1636_v33  ;;  %v3517_v33 = vld [vmem:[%s5950_s29 + $0x4e] sm:$0xff] }
 0x1cf   : > { %4879 = vmatprep.mubr.msk.bf16.mxu1 %vm5851_vm2, %v5850_v2  ;;  %v3523_v35 = vpack.c.bf16 %v3517_v33, %v3516_v32 }
 0x1d0   : > { %5170 = vmatmul.mubr.msk.bf16.gmra.mrb[4].mxu0 %vm494_vm1, %v3285_v34  ;;  %v1990_v34 = vpack.c.bf16 %v1985_v31, %v1984_v30 }
 0x1d1   : > { %5173 = vmatprep.mubr.msk.bf16.mxu0 %vm5851_vm2, %v5850_v2 }
 0x1d6   : > { %4880 = vmatmul.mubr.msk.bf16.vlgmr.msra.gmra.mrb[0].mxu1 %vm494_vm1, %v1750_v37  ;;  %v3519_v37 = vld [vmem:[%s5950_s29 + $0x5e] sm:$0x3f] }
 0x1d7   : > { %4883 = vmatprep.mubr.msk.bf16.mxu1 %vm5851_vm2, %v5850_v2  ;;  %4900 = vmatpush3.bf16.msra.mxu1 %v1891_v40  ;;  %v3888_v40 = vsel %vm3886_vm4, 0, %v3887_v39 }
 0x1d8   : > { %5174 = vmatmul.mubr.msk.bf16.gmra.mrb[8].mxu0 %vm494_vm1, %v3286_v38  ;;  %5229 = vmatprep.subr.bf16.mxu1 %v5850_v2  ;;  %v3524_v38 = vpack.c.bf16 %v3519_v37, %v3518_v36  ;;  %3889 = vst [vmem:[%s5955_s18 + $0x4] sm:$0x3] %v3888_v40 }
 0x1d9   : > { %5177 = vmatprep.mubr.msk.bf16.mxu0 %vm5851_vm2, %v5850_v2 }
 0x1de   : > { %4884 = vmatmul.mubr.msk.bf16.gmra.mrb[4].mxu1 %vm494_vm1, %v1751_v43  ;;  %v6748_v43 = vshrl.u32 %v3672_v42, 7  ;;  %v6835_v42 = vld [vmem:[%s7127_s4] ss:$0 sm:$0xff] }
 0x1df   : > { %4887 = vmatprep.mubr.msk.bf16.mxu1 %vm5851_vm2, %v5850_v2 }
 0x1e0   : > { %5178 = vmatmul.mubr.msk.bf16.gmra.mrb[12].mxu0 %vm494_vm1, %v3287_v44  ;;  %v3675_v44 = vadd.s32 16, %v6748_v43  ;;  %v6753_v45 = vmul.u32.u64.low 3435973837, %v6748_v43  ;;  %v6754_v46 = vmul.u32.u64.high 3435973837, %v6748_v43, %v6753_v45  ;;  %v3678_v59 = vadd.s32 40, %v6748_v43 }
 0x1e1   : > { %5181 = vmatprep.mubr.msk.bf16.mxu0 %vm5851_vm2, %v5850_v2  ;;  %v6816_v33 = vadd.s32 64, %v6748_v43 }
 0x1e2   : > { %v6762_v51 = vmul.u32.u64.low 3435973837, %v3675_v44  ;;  %v6763_v52 = vmul.u32.u64.high 3435973837, %v3675_v44, %v6762_v51  ;;  %v3689_v60 = vshrl.u32 %v6754_v46, 3 }
 0x1e3   : > { %v6848_v51 = vld [vmem:[%s7128_s5] ss:$0 sm:$0xff] }
 0x1e4   : > { %v3711_v1 = vshrl.u32 %v6763_v52, 3  ;;  %v3690_v7 = vmul.u32 10, %v3689_v60 }
 0x1e6   : > { %4888 = vmatmul.mubr.msk.bf16.gmra.mrb[8].mxu1 %vm494_vm1, %v1752_v49  ;;  %v3676_v49 = vadd.s32 24, %v6748_v43  ;;  %v3691_v14 = vsub.s32 %v6748_v43, %v3690_v7 }
 0x1e7   : > { %4891 = vmatprep.mubr.msk.bf16.mxu1 %vm5851_vm2, %v5850_v2 }
 0x1e8   : > { %5182 = vmatmul.mubr.msk.bf16.gmra.mrb[16].mxu0 %vm494_vm1, %v3288_v50  ;;  %vm3793_vm5 = vcmp.ne.s32.totalorder %v3691_v14, 0  ;;  %vm3803_vm6 = vcmp.lt.s32.totalorder %v3691_v14, 0  ;;  %v3823_v27 = vadd.s32 10, %v3691_v14 }
 0x1e9   : > { %5187 = vmatprep.mubr.msk.bf16.mxu0 %vm5851_vm2, %v5850_v2  ;;  %vm6809_vm9 = vmand %vm3803_vm6, %vm3793_vm5 }
 0x1ee   : > { %4892 = vmatmul.mubr.msk.bf16.gmra.mrb[12].mxu1 %vm494_vm1, %v1753_v56 }
 0x1ef   : > { %4895 = vmatprep.mubr.msk.bf16.mxu1 %vm5851_vm2, %v5850_v2 }
 0x1f0   : > { %5188 = vmatmul.mubr.msk.bf16.vlgmr.msra.gmra.mrb[0].mxu0 %vm494_vm1, %v3402_v57  ;;  %v6767_v56 = vmul.u32.u64.low 3435973837, %v3676_v49  ;;  %v6768_v57 = vmul.u32.u64.high 3435973837, %v3676_v49, %v6767_v56 }
 0x1f1   : > { %5208 = vmatpush3.bf16.msra.mxu0 %v3543_v58  ;;  %5191 = vmatprep.mubr.msk.bf16.mxu0 %vm5851_vm2, %v5850_v2  ;;  %v3677_v58 = vadd.s32 32, %v6748_v43 }
 0x1f6   : > { %4896 = vmatmul.mubr.msk.bf16.gmra.mrb[16].mxu1 %vm494_vm1, %v1754_v63  ;;  %v6774_v62 = vmul.u32.u64.low 3435973837, %v3677_v58  ;;  %v6775_v63 = vmul.u32.u64.high 3435973837, %v3677_v58, %v6774_v62 }
 0x1f7   : > { %4901 = vmatprep.mubr.msk.bf16.mxu1 %vm5851_vm2, %v5850_v2  ;;  %v6872_v62 = vadd.s32 72, %v6748_v43 }
 0x1f8   : > { %5192 = vmatmul.mubr.msk.bf16.gmra.mrb[4].mxu0 %vm494_vm1, %v3403_v0  ;;  %v3733_v19 = vshrl.u32 %v6775_v63, 3 }
 0x1f9   : > { %5195 = vmatprep.mubr.msk.bf16.mxu0 %vm5851_vm2, %v5850_v2 }
 0x1fa   : > { %v3734_v30 = vmul.u32 10, %v3733_v19 }
 0x1fc   : > { %v6830_v40 = vsub.s32 %v3677_v58, %v3734_v30 }
 0x1fe   : > { %4902 = vmatmul.mubr.msk.bf16.vlgmr.msra.gmra.mrb[0].mxu1 %vm494_vm1, %v1868_v5  ;;  %v6780_v3 = vmul.u32.u64.low 3435973837, %v3678_v59  ;;  %v6781_v5 = vmul.u32.u64.high 3435973837, %v3678_v59, %v6780_v3  ;;  %vm3807_vm4 = vcmp.lt.s32.totalorder %v6830_v40, 0 }
 0x1ff   : > { %4905 = vmatprep.mubr.msk.bf16.mxu1 %vm5851_vm2, %v5850_v2  ;;  %5230 = vmatpush3.bf16.msra.mxu1 %v5969_v4  ;;  %v3406_v4 = vpack.c.bf16 %v3401_v12, %v3400_v11  ;;  %v3722_v12 = vshrl.u32 %v6768_v57, 3 }
 0x200   : > { %5196 = vmatmul.mubr.msk.bf16.gmra.mrb[8].mxu0 %vm494_vm1, %v3404_v6 }
 0x201   : > { %5199 = vmatprep.mubr.msk.bf16.mxu0 %vm5851_vm2, %v5850_v2  ;;  %v3723_v18 = vmul.u32 10, %v3722_v12 }
 0x206   : > { %4906 = vmatmul.mubr.msk.bf16.gmra.mrb[4].mxu1 %vm494_vm1, %v1869_v9  ;;  %v6786_v9 = vadd.s32 48, %v6748_v43 }
 0x207   : > { %4909 = vmatprep.mubr.msk.bf16.mxu1 %vm5851_vm2, %v5850_v2 }
 0x208   : > { %5200 = vmatmul.mubr.msk.bf16.gmra.mrb[12].mxu0 %vm494_vm1, %v3405_v10 }
 0x209   : > { %5203 = vmatprep.mubr.msk.bf16.mxu0 %vm5851_vm2, %v5850_v2 }
 0x20e   : > { %4910 = vmatmul.mubr.msk.bf16.gmra.mrb[8].mxu1 %vm494_vm1, %v1870_v13  ;;  %v3712_v13 = vmul.u32 10, %v3711_v1 }
 0x20f   : > { %4913 = vmatprep.mubr.msk.bf16.mxu1 %vm5851_vm2, %v5850_v2 }
 0x210   : > { %5204 = vmatmul.mubr.msk.bf16.gmra.mrb[16].mxu0 %vm494_vm1, %v3406_v4  ;;  %v6790_v4 = vadd.s32 56, %v6748_v43  ;;  %v6800_v21 = vsub.s32 %v3675_v44, %v3712_v13 }
 0x211   : > { %5209 = vmatprep.mubr.msk.bf16.mxu0 %vm5851_vm2, %v5850_v2 }
 0x212   : > { %vm3795_vm10 = vcmp.ne.s32.totalorder %v6800_v21, 0  ;;  %vm3805_vm11 = vcmp.lt.s32.totalorder %v6800_v21, 0  ;;  %v3825_v36 = vadd.s32 10, %v6800_v21 }
 0x213   : > { %vm6826_vm13 = vmand %vm3805_vm11, %vm3795_vm10  ;;  %vm4033_vm11 = vsmask.f32 7942 }
 0x216   : > { %4914 = vmatmul.mubr.msk.bf16.gmra.mrb[12].mxu1 %vm494_vm1, %v1871_v16  ;;  %v6794_v15 = vmul.u32.u64.low 3435973837, %v6786_v9  ;;  %v6795_v16 = vmul.u32.u64.high 3435973837, %v6786_v9, %v6794_v15 }
 0x217   : > { %4917 = vmatprep.mubr.msk.bf16.mxu1 %vm5851_vm2, %v5850_v2 }
 0x218   : > { %5210 = vmatmul.mubr.msk.bf16.vlgmr.msra.gmra.mrb[0].mxu0 %vm494_vm1, %v3520_v17  ;;  %v3755_v37 = vshrl.u32 %v6795_v16, 3 }
 0x219   : > { %5213 = vmatprep.mubr.msk.bf16.mxu0 %vm5851_vm2, %v5850_v2 }
 0x21a   : > { %v3756_v57 = vmul.u32 10, %v3755_v37 }
 0x21c   : > { %v6891_v7 = vsub.s32 %v6786_v9, %v3756_v57 }
 0x21e   : > { %4918 = vmatmul.mubr.msk.bf16.gmra.mrb[16].mxu1 %vm494_vm1, %v1872_v22  ;;  %v3744_v22 = vshrl.u32 %v6781_v5, 3 }
 0x21f   : > { %4935 = vmatprep.mubr.msk.bf16.mxu1 %vm5851_vm2, %v5850_v2 }
 0x220   : > { %5214 = vmatmul.mubr.msk.bf16.gmra.mrb[4].mxu0 %vm494_vm1, %v3521_v23  ;;  %v6804_v23 = vmul.u32.u64.low 3435973837, %v6790_v4  ;;  %v6805_v24 = vmul.u32.u64.high 3435973837, %v6790_v4, %v6804_v23  ;;  %v3745_v32 = vmul.u32 10, %v3744_v22 }
 0x221   : > { %5217 = vmatprep.mubr.msk.bf16.mxu0 %vm5851_vm2, %v5850_v2 }
 0x222   : > { %v3766_v44 = vshrl.u32 %v6805_v24, 3 }
 0x226   : > { %4936 = vmatmul.mubr.msk.bf16.vlgmr.msra.gmra.mrb[12].mxu1 %vm494_vm1, %v1989_v28 }
 0x227   : > { %4939 = vmatprep.mubr.msk.bf16.mxu1 %vm5851_vm2, %v5850_v2 }
 0x228   : > { %5218 = vmatmul.mubr.msk.bf16.gmra.mrb[8].mxu0 %vm494_vm1, %v3522_v29  ;;  %v3724_v29 = vsub.s32 %v3676_v49, %v3723_v18 }
 0x229   : > { %5221 = vmatprep.mubr.msk.bf16.mxu0 %vm5851_vm2, %v5850_v2 }
 0x22a   : > { %vm3796_vm14 = vcmp.ne.s32.totalorder %v3724_v29, 0  ;;  %vm3806_vm15 = vcmp.lt.s32.totalorder %v3724_v29, 0 }
 0x22e   : > { %4940 = vmatmul.mubr.msk.bf16.gmra.mrb[16].mxu1 %vm494_vm1, %v1990_v34 }
 0x230   : > { %5222 = vmatmul.mubr.msk.bf16.gmra.mrb[12].mxu0 %vm494_vm1, %v3523_v35 }
 0x231   : > { %5225 = vmatprep.mubr.msk.bf16.mxu0 %vm5851_vm2, %v5850_v2  ;;  %v3674_v2 = vadd.s32 8, %v6748_v43  ;;  %vm3797_vm2 = vcmp.ne.s32.totalorder %v6830_v40, 0  ;;  %v3827_v43 = vadd.s32 10, %v6830_v40 }
 0x232   : > { %vm6882_vm10 = vmand %vm3807_vm4, %vm3797_vm2 }
 0x233   : > { %v6756_v47 = vmul.u32.u64.low 3435973837, %v3674_v2  ;;  %v6757_v48 = vmul.u32.u64.high 3435973837, %v3674_v2, %v6756_v47 }
 0x234   : > { %v3826_v47 = vadd.s32 10, %v3724_v29 }
 0x235   : > { %v3700_v61 = vshrl.u32 %v6757_v48, 3  ;;  %v6842_v48 = vmul.u32.u64.low 3435973837, %v6816_v33  ;;  %v6843_v49 = vmul.u32.u64.high 3435973837, %v6816_v33, %v6842_v48 }
 0x237   : > { %v3701_v11 = vmul.u32 10, %v3700_v61  ;;  %v3767_v61 = vmul.u32 10, %v3766_v44  ;;  %v3777_v23 = vshrl.u32 %v6843_v49, 3 }
 0x238   : > { %5226 = vmatmul.mubr.msk.bf16.gmra.mrb[16].mxu0 %vm494_vm1, %v3524_v38  ;;  %v3833_v38 = vsel %vm6809_vm9, %v3823_v27, %v3691_v14  ;;  %vm6861_vm1 = vmand %vm3806_vm15, %vm3796_vm14  ;;  %vm4032_vm9 = vcmask 1043457   ;;  %vm3799_vm15 = vcmp.ne.s32.totalorder %v6891_v7, 0 }
 0x239   : > { %v3702_v17 = vsub.s32 %v3674_v2, %v3701_v11  ;;  %v6837_v2 = vsub.s32 %v3678_v59, %v3745_v32  ;;  %vm6850_vm0 = vcmp.lt.s32.totalorder %v3833_v38, 8  ;;  %v6911_v15 = vsub.s32 %v6790_v4, %v3767_v61  ;;  %vm6946_vm4 = vmand %vm4032_vm9, %vm4033_vm11 }
 0x23a   : > { %v3837_v4 = vsel %vm6882_vm10, %v3827_v43, %v6830_v40  ;;  %v3778_v38 = vmul.u32 10, %v3777_v23 }
 0x23b   : > { %vm3794_vm7 = vcmp.ne.s32.totalorder %v3702_v17, 0  ;;  %vm3804_vm8 = vcmp.lt.s32.totalorder %v3702_v17, 0  ;;  %v3824_v35 = vadd.s32 10, %v3702_v17  ;;  %vm3798_vm5 = vcmp.ne.s32.totalorder %v6837_v2, 0 }
 0x23c   : > { %vm6818_vm12 = vmand %vm3804_vm8, %vm3794_vm7  ;;  %vm3808_vm6 = vcmp.lt.s32.totalorder %v6837_v2, 0  ;;  %vm3920_vm8 = vsmask.f32 5392  ;;  %vm6940_vm2 = vcmp.lt.s32.totalorder %v3837_v4, 8  ;;  %v6954_v48 = vadd.s32 10, %v6911_v15 }
 0x2d1   : > { %v6760_v50 = vpop.f32.mrb[0].mxu1 }
 0x2d2   : > { %v4903_v53 = vpop.f32.mrb[1].mxu1 }
 0x2d3   : > { %v6765_v54 = vpop.f32.mrb[2].mxu1 }
 0x2d4   : > { %v4904_v55 = vpop.f32.mrb[3].mxu1 }
 0x2d5   : > { %v3834_v55 = vsel %vm6818_vm12, %v3824_v35, %v3702_v17  ;;  %v6914_v16 = vmul.u32.u64.low 3435973837, %v6872_v62  ;;  %v6915_v17 = vmul.u32.u64.high 3435973837, %v6872_v62, %v6914_v16  ;;  %v6935_v35 = vadd.s32 10, %v6891_v7 }
 0x2d6   : > { %vm6876_vm7 = vcmp.lt.s32.totalorder %v3834_v55, 8 }
 0x2d7   : > { %v3788_v56 = vshrl.u32 %v6915_v17, 3 }
 0x2d9   : > { %v6777_v0 = vpop.f32.mrb[4].mxu1 }
 0x2da   : > { %v4907_v6 = vpop.f32.mrb[5].mxu1 }
 0x2db   : > { %v6783_v8 = vpop.f32.mrb[6].mxu1  ;;  %v6888_v6 = vadd.s32 10, %v6837_v2 }
 0x2dc   : > { %v4908_v10 = vpop.f32.mrb[7].mxu1 }
 0x2e1   : > { %v6798_v20 = vpop.f32.mrb[8].mxu1 }
 0x2e2   : > { %v4911_v25 = vpop.f32.mrb[9].mxu1 }
 0x2e3   : > { %v6807_v26 = vpop.f32.mrb[10].mxu1 }
 0x2e4   : > { %v4912_v28 = vpop.f32.mrb[11].mxu1 }
 0x2eb   : > { %v3579_v41 = vpop.f32.mrb[0].mxu0 }
 0x2ec   : > { %v5231_v45 = vadd.f32 %v3579_v41, %v6760_v50  ;;  %v5211_v46 = vpop.f32.mrb[1].mxu0  ;;  %v3835_v50 = vsel %vm6826_vm13, %v3825_v36, %v6800_v21  ;;  %vm6902_vm13 = vmand %vm3808_vm6, %vm3798_vm5  ;;  %vm3810_vm5 = vcmp.lt.s32.totalorder %v6911_v15, 0 }
 0x2ed   : > { %v3582_v53 = vpop.f32.mrb[2].mxu0  ;;  %vm6894_vm12 = vcmp.lt.s32.totalorder %v3835_v50, 8  ;;  %v3838_v27 = vsel %vm6902_vm13, %v6888_v6, %v6837_v2  ;;  %vm6959_vm6 = vmor %vm3885_vm3, %vm3920_vm8 }
 0x2ee   : > { %v3635_v58 = vmul.f32 %v5231_v45, %v6835_v42  ;;  %v5232_v59 = vadd.f32 %v3582_v53, %v6765_v54  ;;  %v5212_v60 = vpop.f32.mrb[3].mxu0  ;;  %v3836_v54 = vsel %vm6861_vm1, %v3826_v47, %v3724_v29  ;;  %vm3800_vm1 = vcmp.ne.s32.totalorder %v6911_v15, 0  ;;  %v4035_v45 = vld [vmem:[%s5955_s18 + $0x4] sm:$0xe] }
 0x2ef   : > { %vm6906_vm14 = vcmp.lt.s32.totalorder %v3836_v54, 8  ;;  %vm6992_vm8 = vmand %vm3810_vm5, %vm3800_vm1  ;;  %vm4048_vm5 = vsmask.f32 256 }
 0x2f0   : > { %v3652_v63 = vadd.f32 %v6848_v51, %v3635_v58  ;;  %v3636_v1 = vmul.f32 %v5232_v59, %v6835_v42 }
 0x2f2   : > { %v3662_v10 = vmax.f32 %v3652_v63, 0.0  ;;  %v3653_v11 = vadd.f32 %v6848_v51, %v3636_v1  ;;  %v6967_v1 = vsub.s32 %v6816_v33, %v3778_v38 }
 0x2f3   : > { %v3587_v14 = vpop.f32.mrb[4].mxu0 }
 0x2f4   : > { %v3873_v18 = vsel %vm6850_vm0, %v3662_v10, 0.0  ;;  %v3663_v19 = vmax.f32 %v3653_v11, 0.0  ;;  %v5233_v21 = vadd.f32 %v3587_v14, %v6777_v0  ;;  %v5215_v22 = vpop.f32.mrb[5].mxu0  ;;  %vm3809_vm0 = vcmp.lt.s32.totalorder %v6891_v7, 0 }
 0x2f5   : > { %v4463_v24 = vpack.c.bf16 %v3873_v18, %v3873_v18  ;;  %v3590_v25 = vpop.f32.mrb[6].mxu0  ;;  %vm6975_vm3 = vmand %vm3809_vm0, %vm3799_vm15  ;;  %vm3801_vm9 = vcmp.ne.s32.totalorder %v6967_v1, 0  ;;  %vm3811_vm11 = vcmp.lt.s32.totalorder %v6967_v1, 0 }
 0x2f6   : > { %v3874_v28 = vsel %vm6876_vm7, %v3663_v19, 0.0  ;;  %v3637_v0 = vmul.f32 %v5233_v21, %v6835_v42  ;;  %v5234_v29 = vadd.f32 %v3590_v25, %v6783_v8  ;;  %v5216_v30 = vpop.f32.mrb[7].mxu0  ;;  %vm6984_vm7 = vcmp.lt.s32.totalorder %v3838_v27, 8  ;;  %vm7044_vm15 = vmand %vm3811_vm11, %vm3801_vm9 }
 0x2f7   : > { %v3923_v31 = vshrl.u32 %v4463_v24, 16  ;;  %v3926_v32 = vshll.u32 %v4463_v24, 16  ;;  %v4464_v34 = vpack.c.bf16 %v3874_v28, %v3874_v28  ;;  %v3839_v24 = vsel %vm6975_vm3, %v6935_v35, %v6891_v7 }
 0x2f8   : > { %v3654_v36 = vadd.f32 %v6848_v51, %v3637_v0  ;;  %v3638_v37 = vmul.f32 %v5234_v29, %v6835_v42  ;;  %v3840_v27 = vsel %vm6992_vm8, %v6954_v48, %v6911_v15  ;;  %vm7011_vm10 = vcmp.lt.s32.totalorder %v3839_v24, 8 }
 0x2f9   : > { %v3925_v39 = vrot.slane %v3923_v31, 6  ;;  %v3928_v40 = vrot.slane %v3926_v32, 7  ;;  %v3932_v8 = vshrl.u32 %v4464_v34, 16  ;;  %v3935_v41 = vshll.u32 %v4464_v34, 16  ;;  %v2069_v55 = vpop.f32.mrb[12].mxu1 }
 0x2fa   : > { %v3664_v46 = vmax.f32 %v3654_v36, 0.0  ;;  %v3655_v47 = vadd.f32 %v6848_v51, %v3638_v37  ;;  %v4937_v61 = vpop.f32.mrb[13].mxu1  ;;  %vm4054_vm8 = vsmask.f32 7938 }
 0x2fb   : > { %v3929_v49 = vor.u32 %v3928_v40, %v3925_v39  ;;  %v3934_v52 = vrot.slane %v3932_v8, 6  ;;  %v3937_v53 = vrot.slane %v3935_v41, 7  ;;  %v3595_v50 = vpop.f32.mrb[8].mxu0  ;;  %v2072_v6 = vpop.f32.mrb[14].mxu1 }
 0x2fc   : > { %v3875_v58 = vsel %vm6894_vm12, %v3664_v46, 0.0  ;;  %v3665_v59 = vmax.f32 %v3655_v47, 0.0  ;;  %v5235_v60 = vadd.f32 %v3595_v50, %v6798_v20  ;;  %v5219_v63 = vpop.f32.mrb[9].mxu0  ;;  %v4938_v14 = vpop.f32.mrb[15].mxu1  ;;  %v3831_v50 = vadd.s32 10, %v6967_v1 }
 0x2fd   : > { %v3930_v3 = vrot.slane %v3929_v49, 4  ;;  %v4036_v54 = vsel %vm6946_vm4, %v3929_v49, %v4035_v45  ;;  %v3938_v5 = vor.u32 %v3937_v53, %v3934_v52  ;;  %v4465_v43 = vpack.c.bf16 %v3875_v58, %v3875_v58  ;;  %v3598_v10 = vpop.f32.mrb[10].mxu0 }
 0x2fe   : > { %4037 = vst [vmem:[%s5955_s18 + $0x4] sm:$0xe] %v4036_v54  ;;  %v3876_v33 = vsel %vm6906_vm14, %v3665_v59, 0.0  ;;  %v3639_v11 = vmul.f32 %v5235_v60, %v6835_v42  ;;  %v5236_v12 = vadd.f32 %v3598_v10, %v6807_v26  ;;  %v5220_v16 = vpop.f32.mrb[11].mxu0  ;;  %v3789_v26 = vmul.u32 10, %v3788_v56 }
 0x2ff   : > { %v3939_v9 = vsel %vm6959_vm6, %v3930_v3, %v3938_v5  ;;  %v3942_v18 = vshrl.u32 %v4465_v43, 16  ;;  %v3945_v19 = vshll.u32 %v4465_v43, 16  ;;  %v4466_v21 = vpack.c.bf16 %v3876_v33, %v3876_v33 }
 0x300   : > { %4038 = vst [vmem:[%s5955_s18 + $0x8] sm:$0xf] %v3939_v9  ;;  %v3656_v22 = vadd.f32 %v6848_v51, %v3639_v11  ;;  %v3640_v23 = vmul.f32 %v5236_v12, %v6835_v42  ;;  %v3940_v31 = vrot.slane %v3938_v5, 4  ;;  %v7017_v15 = vsub.s32 %v6872_v62, %v3789_v26 }
 0x301   : > { %v3944_v25 = vrot.slane %v3942_v18, 6  ;;  %v3947_v4 = vrot.slane %v3945_v19, 7  ;;  %v3952_v28 = vshrl.u32 %v4466_v21, 16  ;;  %v3955_v0 = vshll.u32 %v4466_v21, 16  ;;  %v2077_v34 = vpop.f32.mrb[16].mxu1 }
 0x302   : > { %v3666_v29 = vmax.f32 %v3656_v22, 0.0  ;;  %v3657_v30 = vadd.f32 %v6848_v51, %v3640_v23  ;;  %v4941_v40 = vpop.f32.mrb[17].mxu1  ;;  %vm3802_vm12 = vcmp.ne.s32.totalorder %v7017_v15, 0  ;;  %vm3812_vm13 = vcmp.lt.s32.totalorder %v7017_v15, 0 }
 0x303   : > { %v3948_v32 = vor.u32 %v3947_v4, %v3944_v25  ;;  %v3603_v36 = vpop.f32.mrb[12].mxu0  ;;  %v3954_v35 = vrot.slane %v3952_v28, 6  ;;  %v3957_v37 = vrot.slane %v3955_v0, 7  ;;  %v2080_v47 = vpop.f32.mrb[18].mxu1  ;;  %vm7036_vm14 = vcmp.lt.s32.totalorder %v3840_v27, 8  ;;  %vm7053_vm0 = vmand %vm3812_vm13, %vm3802_vm12 }
 0x304   : > { %v3877_v38 = vsel %vm6940_vm2, %v3666_v29, 0.0  ;;  %v3667_v39 = vmax.f32 %v3657_v30, 0.0  ;;  %v5223_v8 = vpop.f32.mrb[13].mxu0  ;;  %v5237_v46 = vadd.f32 %v3603_v36, %v2069_v55  ;;  %v4942_v2 = vpop.f32.mrb[19].mxu1  ;;  %v3832_v33 = vadd.s32 10, %v7017_v15 }
 0x305   : > { %v3949_v41 = vsel %vm6959_vm6, %v3940_v31, %v3948_v32  ;;  %v3950_v44 = vrot.slane %v3948_v32, 4  ;;  %v4467_v45 = vpack.c.bf16 %v3877_v38, %v3877_v38  ;;  %v3606_v48 = vpop.f32.mrb[14].mxu0  ;;  %v3958_v62 = vor.u32 %v3957_v37, %v3954_v35 }
 0x306   : > { %4039 = vst [vmem:[%s5955_s18 + $0xc] sm:$0xf] %v3949_v41  ;;  %v3878_v49 = vsel %vm6984_vm7, %v3667_v39, 0.0  ;;  %v5238_v52 = vadd.f32 %v3606_v48, %v2072_v6  ;;  %v5224_v53 = vpop.f32.mrb[15].mxu0  ;;  %v3641_v60 = vmul.f32 %v5237_v46, %v6835_v42  ;;  %v3841_v24 = vsel %vm7044_vm15, %v3831_v50, %v6967_v1 }
 0x307   : > { %v3962_v56 = vshrl.u32 %v4467_v45, 16  ;;  %v3965_v58 = vshll.u32 %v4467_v45, 16  ;;  %v4468_v59 = vpack.c.bf16 %v3878_v49, %v3878_v49  ;;  %v3959_v55 = vsel %vm6959_vm6, %v3950_v44, %v3958_v62 }
 0x308   : > { %v3642_v61 = vmul.f32 %v5238_v52, %v6835_v42  ;;  %4040 = vst [vmem:[%s5955_s18 + $0x10] sm:$0xf] %v3959_v55  ;;  %v3658_v43 = vadd.f32 %v6848_v51, %v3641_v60  ;;  %v3960_v11 = vrot.slane %v3958_v62, 4  ;;  %v3842_v1 = vsel %vm7053_vm0, %v3832_v33, %v7017_v15 }
 0x309   : > { %v3964_v63 = vrot.slane %v3962_v56, 6  ;;  %v3967_v3 = vrot.slane %v3965_v58, 7  ;;  %v3972_v54 = vshrl.u32 %v4468_v59, 16  ;;  %v3975_v5 = vshll.u32 %v4468_v59, 16 }
 0x30a   : > { %v3659_v6 = vadd.f32 %v6848_v51, %v3642_v61  ;;  %v3668_v17 = vmax.f32 %v3658_v43, 0.0  ;;  %vm3851_vm1 = vcmp.lt.s32.totalorder %v3841_v24, 8  ;;  %vm3852_vm2 = vcmp.lt.s32.totalorder %v3842_v1, 8 }
 0x30b   : > { %v3968_v12 = vor.u32 %v3967_v3, %v3964_v63  ;;  %v3974_v13 = vrot.slane %v3972_v54, 6  ;;  %v3977_v14 = vrot.slane %v3975_v5, 7  ;;  %v3611_v16 = vpop.f32.mrb[16].mxu0  ;;  %vm4047_vm4 = vcmask 1040384   ;;  %v4050_v5 = vld [vmem:[%s5955_s18 + $0x2c] sm:$0x1] }
 0x30c   : > { %v3669_v9 = vmax.f32 %v3659_v6, 0.0  ;;  %v5239_v18 = vadd.f32 %v3611_v16, %v2077_v34  ;;  %v5227_v19 = vpop.f32.mrb[17].mxu0  ;;  %v3879_v4 = vsel %vm7011_vm10, %v3668_v17, 0.0  ;;  %vm4049_vm3 = vmand %vm4047_vm4, %vm4048_vm5  ;;  %vm4053_vm7 = vcmask 1043456  }
 0x30d   : > { %v3969_v21 = vsel %vm6959_vm6, %v3960_v11, %v3968_v12  ;;  %v3970_v22 = vrot.slane %v3968_v12, 4  ;;  %v3978_v23 = vor.u32 %v3977_v14, %v3974_v13  ;;  %v3614_v25 = vpop.f32.mrb[18].mxu0  ;;  %v4469_v31 = vpack.c.bf16 %v3879_v4, %v3879_v4  ;;  %vm4055_vm9 = vmand %vm4053_vm7, %vm4054_vm8 }
 0x30e   : > { %4041 = vst [vmem:[%s5955_s18 + $0x14] sm:$0xf] %v3969_v21  ;;  %v3880_v27 = vsel %vm7036_vm14, %v3669_v9, 0.0  ;;  %v3643_v28 = vmul.f32 %v5239_v18, %v6835_v42  ;;  %v5240_v0 = vadd.f32 %v3614_v25, %v2080_v47  ;;  %v5228_v29 = vpop.f32.mrb[19].mxu0 }
 0x30f   : > { %v3979_v30 = vsel %vm6959_vm6, %v3970_v22, %v3978_v23  ;;  %v4470_v32 = vpack.c.bf16 %v3880_v27, %v3880_v27  ;;  %v3982_v7 = vshrl.u32 %v4469_v31, 16  ;;  %v3985_v35 = vshll.u32 %v4469_v31, 16 }
 0x310   : > { %4042 = vst [vmem:[%s5955_s18 + $0x18] sm:$0xf] %v3979_v30  ;;  %v3660_v34 = vadd.f32 %v6848_v51, %v3643_v28  ;;  %v3644_v36 = vmul.f32 %v5240_v0, %v6835_v42  ;;  %v3980_v47 = vrot.slane %v3978_v23, 4 }
 0x311   : > { %v3992_v37 = vshrl.u32 %v4470_v32, 16  ;;  %v3995_v38 = vshll.u32 %v4470_v32, 16  ;;  %v3984_v8 = vrot.slane %v3982_v7, 6  ;;  %v3987_v41 = vrot.slane %v3985_v35, 7 }
 0x312   : > { %v3670_v39 = vmax.f32 %v3660_v34, 0.0  ;;  %v3661_v40 = vadd.f32 %v6848_v51, %v3644_v36 }
 0x313   : > { %v3994_v44 = vrot.slane %v3992_v37, 6  ;;  %v3997_v45 = vrot.slane %v3995_v38, 7  ;;  %v3988_v48 = vor.u32 %v3987_v41, %v3984_v8 }
 0x314   : > { %v3881_v15 = vsel %vm3851_vm1, %v3670_v39, 0.0  ;;  %v3671_v46 = vmax.f32 %v3661_v40, 0.0 }
 0x315   : > { %v3998_v62 = vor.u32 %v3997_v45, %v3994_v44  ;;  %v4471_v42 = vpack.c.bf16 %v3881_v15, %v3881_v15  ;;  %v3989_v52 = vsel %vm6959_vm6, %v3980_v47, %v3988_v48  ;;  %v3990_v2 = vrot.slane %v3988_v48, 4 }
 0x316   : > { %v3882_v49 = vsel %vm3852_vm2, %v3671_v46, 0.0  ;;  %4043 = vst [vmem:[%s5955_s18 + $0x1c] sm:$0xf] %v3989_v52 }
 0x317   : > { %v4002_v53 = vshrl.u32 %v4471_v42, 16  ;;  %v4005_v51 = vshll.u32 %v4471_v42, 16  ;;  %v4472_v50 = vpack.c.bf16 %v3882_v49, %v3882_v49  ;;  %v3999_v56 = vsel %vm6959_vm6, %v3990_v2, %v3998_v62 }
 0x318   : > { %4044 = vst [vmem:[%s5955_s18 + $0x20] sm:$0xf] %v3999_v56  ;;  %v4000_v61 = vrot.slane %v3998_v62, 4 }
 0x319   : > { %v4004_v58 = vrot.slane %v4002_v53, 6  ;;  %v4007_v59 = vrot.slane %v4005_v51, 7  ;;  %v4012_v60 = vshrl.u32 %v4472_v50, 16  ;;  %v4015_v55 = vshll.u32 %v4472_v50, 16 }
 0x31b   : > { %v4008_v63 = vor.u32 %v4007_v59, %v4004_v58  ;;  %v4014_v3 = vrot.slane %v4012_v60, 6  ;;  %v4017_v54 = vrot.slane %v4015_v55, 7 }
 0x31d   : > { %v4009_v43 = vsel %vm6959_vm6, %v4000_v61, %v4008_v63  ;;  %v4010_v6 = vrot.slane %v4008_v63, 4  ;;  %v4018_v10 = vor.u32 %v4017_v54, %v4014_v3  ;;  %v4020_v20 = vrot.slane %v4014_v3, 4 }
 0x31e   : > { %4045 = vst [vmem:[%s5955_s18 + $0x24] sm:$0xf] %v4009_v43 }
 0x31f   : > { %v4019_v33 = vsel %vm6959_vm6, %v4010_v6, %v4018_v10  ;;  %v4051_v11 = vsel %vm4049_vm3, %v4020_v20, %v4050_v5 }
 0x320   : > { %4046 = vst [vmem:[%s5955_s18 + $0x28] sm:$0xf] %v4019_v33  ;;  %4052 = vst [vmem:[%s5955_s18 + $0x2c] sm:$0x1] %v4051_v11 }
 0x327   : > { %v4056_v12 = vld [vmem:[%s5955_s18 + $0x2c] sm:$0xf] }
 0x328   : > { %v4057_v13 = vsel %vm4055_vm9, 0, %v4056_v12 }
 0x329   : > { %4058 = vst [vmem:[%s5955_s18 + $0x2c] sm:$0xf] %v4057_v13 }
 0x32a PF: > { %4062 = sbr.rel (!%p5935_p2) target bundleno = 818 (0x332), region = 52  ;;  %v5853_v14 = vmov (%p5935_p2), 0  }
 0x32b   : > { %4063 = vst [vmem:[%s5955_s18] sm:$0xf] (%p5935_p2), %v5853_v14  ;;  %4064 = vst [vmem:[%s5955_s18 + $0x4] sm:$0xf] (%p5935_p2), %v5853_v14 }
 0x32c   : > { %4065 = vst [vmem:[%s5955_s18 + $0x8] sm:$0xf] (%p5935_p2), %v5853_v14  ;;  %4066 = vst [vmem:[%s5955_s18 + $0xc] sm:$0xf] (%p5935_p2), %v5853_v14 }
 0x32d   : > { %4067 = vst [vmem:[%s5955_s18 + $0x10] sm:$0xf] (%p5935_p2), %v5853_v14  ;;  %4068 = vst [vmem:[%s5955_s18 + $0x14] sm:$0xf] (%p5935_p2), %v5853_v14 }
 0x32e   : > { %4069 = vst [vmem:[%s5955_s18 + $0x18] sm:$0xf] (%p5935_p2), %v5853_v14  ;;  %4070 = vst [vmem:[%s5955_s18 + $0x1c] sm:$0xf] (%p5935_p2), %v5853_v14 }
 0x32f   : > { %4071 = vst [vmem:[%s5955_s18 + $0x20] sm:$0xf] (%p5935_p2), %v5853_v14  ;;  %4072 = vst [vmem:[%s5955_s18 + $0x24] sm:$0xf] (%p5935_p2), %v5853_v14 }
 0x330   : > { %4073 = vst [vmem:[%s5955_s18 + $0x28] sm:$0xf] (%p5935_p2), %v5853_v14  ;;  %4074 = vst [vmem:[%s5955_s18 + $0x2c] sm:$0xf] (%p5935_p2), %v5853_v14 }
 0x331   : > { %4075 = vst [vmem:[%s5955_s18 + $0x30] sm:$0x3] %v5853_v14 }
 0x332 PF: > { %s16_s25 = sadd.s32 1, %s5848_s25   ;;  %s7173_s21 = smov %s5840_s23 }
 0x333   : > { %p13_p4 = scmp.ge.s32.totalorder %s16_s25, 22   ;;  %s7174_s22 = smov %s5844_s24 }
 0x334   : > { %s7175_s23 = smov %s7178_s26  ;;  %s7176_s24 = smov %s7182_s27 }
 0x335   :  { %15 = sbr.rel (!%p13_p4) target bundleno = 3 (0x3), region = 114 }

// kernel: _lambda_.3
= control target key start
LH: loop header
LB: loop body
LE: loop exit
PB: predicated region body
PF: predicated region fallthrough
CT: control target
= control target key end

     0   :  { %s17703_s27 = smov 0   ;;  %s17705_s28 = smov 0   ;;  %s21351_s0 = inlined_call_operand.vmem [shape: bf16[2,10,100,128], index: 0, kind: input, shape index: {}, may-alias: {0,1,2,3}]   ;;  %s21352_s1 = inlined_call_operand.vmem [shape: bf16[2,10,100,128], index: 1, kind: input, shape index: {}, may-alias: {0,1,2,3}]   ;;  %s21353_s2 = inlined_call_operand.vmem [shape: bf16[2,10,100,128], index: 2, kind: input, shape index: {}, may-alias: {0,1,2,3}]   ;;  %s21354_s3 = inlined_call_operand.vmem [shape: bf16[2,10,100,128], index: 3, kind: input, shape index: {}, may-alias: {0,1,2,3}]   ;;  %s21355_s4 = inlined_call_operand.vmem [shape: bf16[27,128,128], index: 4, kind: input, shape index: {}]   ;;  %s21356_s5 = inlined_call_operand.vmem [shape: f32[1,128], index: 5, kind: input, shape index: {}]   ;;  %s21357_s6 = inlined_call_operand.vmem [shape: f32[1,128], index: 6, kind: input, shape index: {}]   ;;  %s21358_s7 = inlined_call_operand.vmem [shape: f32[2,8,80,128], index: 7, kind: output, shape index: {0}]   ;;  %s21359_s8 = inlined_call_operand.vmem [shape: f32[2,4,20,128], index: 8, kind: output, shape index: {1}]  }
   0x1   :  { %s17707_s29 = smov 0   ;;  %s17709_s30 = smov 0  }
   0x2   :  { %s17711_s9 = smov 0  }
   0x3 LB: > { %s28_s10 = sadd.s32 1, %s17645_s29  ;;  %s31_s11 = sadd.s32 1, %s17649_s30  ;;  %s17653_s9 = sphi %s17711_s9, %s19_s9   ;;  %s17649_s30 = sphi %s17709_s30, %s21364_s30   ;;  %s17645_s29 = sphi %s17707_s29, %s21363_s29   ;;  %s17641_s28 = sphi %s17705_s28, %s21362_s28   ;;  %s17637_s27 = sphi %s17703_s27, %s21361_s27  }
   0x4   : > { %p29_p0 = scmp.ge.s32.totalorder %s28_s10, 4  ;;  %p11778_p1 = scmp.ge.s32.totalorder %s17653_s9, 1 }
   0x5   : > { %p363_p2 = scmp.lt.s32.totalorder %s17653_s9, 9 }
   0x6   : > { %s21366_s10 = smov (%p29_p0, %s28_s10), 0  ;;  %s21368_s11 = smov (!%p29_p0, %s31_s11), %s17649_s30 }
   0x7   : > { %p364_p3 = pnand %p11778_p1, %p363_p2  ;;  %p33_p4 = scmp.ge.s32.totalorder %s21368_s11, 2 }
   0x8   : > { %v17021_v0 = vld [vmem:[%s21355_s4 + $0x40] sm:$0xff] (!%p364_p3)   ;;  %v17655_v1 = vmov (!%p364_p3), 0.0   ;;  %v17023_v3 = vld [vmem:[%s21355_s4 + $0x48] sm:$0xff] (!%p364_p3)   ;;  %vm17656_vm0 = vmmov (!%p364_p3), 0   ;;  %s17751_s18 = sshll.u32 (!%p364_p3), %s17637_s27, 1  ;;  %p450_p5 = scmp.lt.s32.totalorder (!%p364_p3), %s17641_s28, 1 }
   0x9   : > { %s21370_s11 = smov (%p33_p4, %s21368_s11), 0  ;;  %367 = sbr.rel (%p364_p3) target bundleno = 1381 (0x565), region = 48 }
   0xa   : > { %13985 = vmatprep.subr.bf16.mxu0 (!%p364_p3), %v17655_v1  ;;  %14957 = vmatprep.subr.bf16.mxu1 (!%p364_p3), %v17655_v1  ;;  %v17022_v2 = vld [vmem:[%s21355_s4 + $0x40] sm:$0xff] (!%p364_p3)   ;;  %v17024_v4 = vld [vmem:[%s21355_s4 + $0x48] sm:$0xff] (!%p364_p3)   ;;  %p452_p6 = scmp.lt.s32.totalorder (!%p364_p3), %s17751_s18, 9  ;;  %v17025_v5 = vld [vmem:[%s21355_s4 + $0x50] sm:$0xff] (!%p364_p3)   ;;  %s461_s13 = sadd.s32 (!%p364_p3), 1, %s17751_s18  ;;  %vm905_vm2 = vcmask (!%p364_p3), 1046528  }
   0xb   : > { %13986 = vmatpush3.bf16.msra.mxu0 (!%p364_p3), %v17021_v0  ;;  %14001 = vmatprep.mubr.msk.bf16.mxu0 (!%p364_p3), %vm17656_vm0, %v17655_v1  ;;  %v17026_v6 = vld [vmem:[%s21355_s4 + $0x50] sm:$0xff] (!%p364_p3)   ;;  %v17027_v7 = vld [vmem:[%s21355_s4 + $0x58] sm:$0xff] (!%p364_p3)   ;;  %p464_p7 = scmp.lt.s32.totalorder (!%p364_p3), %s461_s13, 9  ;;  %v17029_v9 = vld [vmem:[%s21355_s4 + $0x60] sm:$0xff] (!%p364_p3)   ;;  %vm589_vm1 = vsmask.f32 (!%p364_p3), 7424 }
   0xc   : > { %14958 = vmatpush3.bf16.msra.mxu1 (!%p364_p3), %v17022_v2  ;;  %13987 = vmatprep.subr.bf16.mxu0 (!%p364_p3), %v17655_v1  ;;  %v17028_v8 = vld [vmem:[%s21355_s4 + $0x58] sm:$0xff] (!%p364_p3)   ;;  %v17030_v10 = vld [vmem:[%s21355_s4 + $0x60] sm:$0xff] (!%p364_p3)   ;;  %v17031_v15 = vld [vmem:[%s21355_s4 + $0x68] sm:$0xff] (!%p364_p3)   ;;  %vm1304_vm3 = vsmask.f32 (!%p364_p3), 6400  ;;  %vm1511_vm4 = vcmask (!%p364_p3), 1045504  }
   0xd   : > { %14959 = vmatprep.subr.bf16.mxu1 (!%p364_p3), %v17655_v1  ;;  %14973 = vmatprep.mubr.msk.bf16.mxu1 (!%p364_p3), %vm17656_vm0, %v17655_v1  ;;  %v17032_v16 = vld [vmem:[%s21355_s4 + $0x68] sm:$0xff] (!%p364_p3)   ;;  %v17033_v21 = vld [vmem:[%s21355_s4 + $0x70] sm:$0xff] (!%p364_p3)   ;;  %v17035_v30 = vld [vmem:[%s21355_s4 + $0x78] sm:$0xff] (!%p364_p3)   ;;  %vm1883_vm5 = vsmask.f32 (!%p364_p3), 5376  ;;  %vm2094_vm6 = vcmask (!%p364_p3), 1044480  }
   0xe   : > { %v17034_v26 = vld [vmem:[%s21355_s4 + $0x70] sm:$0xff] (!%p364_p3)   ;;  %v17036_v31 = vld [vmem:[%s21355_s4 + $0x78] sm:$0xff] (!%p364_p3)   ;;  %v17041_v39 = vld [vmem:[%s21355_s4] sm:$0xff] (!%p364_p3)   ;;  %s487_s17 = sadd.s32 (!%p364_p3), 3, %s17751_s18  ;;  %p502_p10 = scmp.lt.s32.totalorder (!%p364_p3), %s17751_s18, 7  ;;  %vm11521_vm7 = vcmask (!%p364_p3), 1041409  }
   0xf   : > { %13988 = vmatpush3.bf16.msra.mxu0 (!%p364_p3), %v17023_v3  ;;  %v17042_v40 = vld [vmem:[%s21355_s4] sm:$0xff] (!%p364_p3)   ;;  %v17043_v47 = vld [vmem:[%s21355_s4 + $0x8] sm:$0xff] (!%p364_p3)   ;;  %v17047_v55 = vld [vmem:[%s21355_s4 + $0x10] sm:$0xff] (!%p364_p3)   ;;  %p490_p9 = scmp.lt.s32.totalorder (!%p364_p3), %s487_s17, 9  ;;  %vm11523_vm8 = vcmask (!%p364_p3), 1042434   ;;  %vm11525_vm9 = vcmask (!%p364_p3), 1043459  }
  0x10   : > { %s21372_s28 = smov (!%p450_p5, %s17641_s28), 1  ;;  %14960 = vmatpush3.bf16.msra.mxu1 %v17024_v4  ;;  %13989 = vmatprep.subr.bf16.mxu0 %v17655_v1  ;;  %s21374_s13 = smov (!%p464_p7, %s461_s13), 9  ;;  %v17044_v52 = vld [vmem:[%s21355_s4 + $0x8] sm:$0xff]   ;;  %v17048_v59 = vld [vmem:[%s21355_s4 + $0x10] sm:$0xff]   ;;  %vm11527_vm10 = vcmask 1044484   ;;  %vm11529_vm11 = vcmask 1045509  }
  0x11   : > { %s453_s23 = scalar_select %p452_p6, %s17751_s18, 9  ;;  %14961 = vmatprep.subr.bf16.mxu1 %v17655_v1  ;;  %vm11531_vm12 = vcmask 1046534   ;;  %vm11533_vm13 = vcmask 1047559  }
  0x12   : > { %s17774_s26 = smul.u32 130, %s21372_s28  ;;  %s21378_s17 = smov (!%p490_p9, %s487_s17), 9 }
  0x13   : > { %s16969_s12 = smul.u32 13, %s453_s23  ;;  %13990 = vmatpush3.bf16.msra.mxu0 %v17025_v5  ;;  %v17050_v5 = vld [vmem:[%s21355_s4 + $0x18] sm:$0xff]   ;;  %p512_p11 = scmp.lt.s32.totalorder %s17637_s27, 3 }
  0x14   : > { %14962 = vmatpush3.bf16.msra.mxu1 %v17026_v6  ;;  %13991 = vmatprep.subr.bf16.mxu0 %v17655_v1  ;;  %s16971_s15 = smul.u32 13, %s21374_s13 }
  0x15   : > { %s456_s16 = sadd.s32 %s17774_s26, %s16969_s12  ;;  %14963 = vmatprep.subr.bf16.mxu1 %v17655_v1  ;;  %s16973_s12 = smul.u32 13, %s21378_s17 }
  0x16   : > { %s11780_s20 = sshll.u32 %s456_s16, 2  ;;  %s468_s16 = sadd.s32 %s16971_s15, %s17774_s26 }
  0x17   : > { %s17790_s23 = scalar_lea.vmem %s21351_s0, %s11780_s20  ;;  %13992 = vmatpush3.bf16.msra.mxu0 %v17027_v7  ;;  %s11782_s20 = sshll.u32 %s468_s16, 2 }
  0x18   : > { %14964 = vmatpush3.bf16.msra.mxu1 %v17028_v8  ;;  %13993 = vmatprep.subr.bf16.mxu0 %v17655_v1  ;;  %v520_v11 = vld [vmem:[%s17790_s23] sm:$0xf]  ;;  %v17802_v12 = vld [vmem:[%s17790_s23 + $0x4] sm:$0xf]  ;;  %v17809_v14 = vld [vmem:[%s17790_s23 + $0x8] sm:$0xff]   ;;  %s17821_s25 = scalar_lea.vmem %s21352_s1, %s11782_s20  ;;  %s474_s15 = sadd.s32 2, %s17751_s18 }
  0x19   : > { %14965 = vmatprep.subr.bf16.mxu1 %v17655_v1  ;;  %v17806_v13 = vcombine.low %v520_v11, %v17802_v12  ;;  %v5771_v18 = vld [vmem:[%s17821_s25] sm:$0xf]  ;;  %v17827_v19 = vld [vmem:[%s17821_s25 + $0x4] sm:$0xf]  ;;  %v17830_v20 = vld [vmem:[%s17821_s25 + $0x8] sm:$0xff]   ;;  %v598_v22 = vshll.u32 %v17809_v14, 16  ;;  %s494_s16 = sadd.s32 %s16973_s12, %s17774_s26 }
  0x1a   : > { %v17837_v23 = vcombine.low %v5771_v18, %v17827_v19  ;;  %v5847_v29 = vshll.u32 %v17830_v20, 16  ;;  %v17855_v35 = vld [vmem:[%s17790_s23 + $0x10] sm:$0xff]   ;;  %v602_v42 = vshrl.u32 %v17809_v14, 16  ;;  %v5851_v45 = vshrl.u32 %v17830_v20, 16  ;;  %v17880_v50 = vld [vmem:[%s17790_s23 + $0x18] sm:$0xff]   ;;  %v17054_v18 = vld [vmem:[%s21355_s4 + $0x20] sm:$0xff]  }
  0x1b   : > { %13994 = vmatpush3.bf16.msra.mxu0 %v17029_v9  ;;  %v593_v17 = vshll.u32 %v17806_v13, 16  ;;  %v591_v24 = vshrl.u32 %v17806_v13, 16  ;;  %v600_v34 = vrot.slane %v598_v22, 1  ;;  %v17859_v38 = vld [vmem:[%s17821_s25 + $0x10] sm:$0xff]   ;;  %v606_v43 = vshll.u32 %v17855_v35, 16  ;;  %v17883_v51 = vld [vmem:[%s17821_s25 + $0x18] sm:$0xff]  }
  0x1c   : > { %14966 = vmatpush3.bf16.msra.mxu1 %v17030_v10  ;;  %13995 = vmatprep.subr.bf16.mxu0 %v17655_v1  ;;  %v5840_v27 = vshrl.u32 %v17837_v23, 16  ;;  %v5842_v28 = vshll.u32 %v17837_v23, 16  ;;  %v5849_v37 = vrot.slane %v5847_v29, 1  ;;  %v5855_v46 = vshll.u32 %v17859_v38, 16  ;;  %v17898_v58 = vld [vmem:[%s17790_s23 + $0x20] sm:$0xf] }
  0x1d   : > { %14967 = vmatprep.subr.bf16.mxu1 %v17655_v1  ;;  %v595_v25 = vrot.slane %v593_v17, 1  ;;  %v604_v48 = vor.u32 %v602_v42, %v600_v34  ;;  %v608_v49 = vrot.slane %v606_v43, 1  ;;  %v610_v56 = vshrl.u32 %v17855_v35, 16  ;;  %v546_v60 = vld [vmem:[%s17790_s23 + $0x24] sm:$0xf]  ;;  %v17052_v8 = vld [vmem:[%s21355_s4 + $0x18] sm:$0xff]  }
  0x1e   : > { %v5844_v32 = vrot.slane %v5842_v28, 1  ;;  %v5853_v53 = vor.u32 %v5851_v45, %v5849_v37  ;;  %v5857_v54 = vrot.slane %v5855_v46, 1  ;;  %v5859_v57 = vshrl.u32 %v17859_v38, 16  ;;  %v17912_v2 = vld [vmem:[%s17821_s25 + $0x20] sm:$0xf]  ;;  %v17058_v42 = vld [vmem:[%s21355_s4 + $0x28] sm:$0xff]  }
  0x1f   : > { %13996 = vmatpush3.bf16.msra.mxu0 %v17031_v15  ;;  %v596_v33 = vor.u32 %v595_v25, %v591_v24  ;;  %v609_v61 = vsel %vm589_vm1, %v604_v48, %v608_v49  ;;  %v614_v62 = vshll.u32 %v17880_v50, 16  ;;  %v5863_v63 = vshll.u32 %v17883_v51, 16  ;;  %v5797_v4 = vld [vmem:[%s17821_s25 + $0x24] sm:$0xf]  ;;  %v17059_v46 = vld [vmem:[%s21355_s4 + $0x30] sm:$0xff]   ;;  %p18377_p8 = scmp.lt.s32.totalorder %s474_s15, 9 }
  0x20   : > { %14968 = vmatpush3.bf16.msra.mxu1 %v17032_v16  ;;  %13997 = vmatprep.subr.bf16.mxu0 %v17655_v1  ;;  %v5845_v36 = vor.u32 %v5844_v32, %v5840_v27  ;;  %v5858_v0 = vsel %vm589_vm1, %v5853_v53, %v5857_v54  ;;  %v17916_v3 = vcombine.low %v17898_v58, %v546_v60  ;;  %v618_v11 = vshrl.u32 %v17880_v50, 16  ;;  %v17053_v16 = vld [vmem:[%s21355_s4 + $0x20] sm:$0xff]   ;;  %v17062_v53 = vld [vmem:[%s21355_s4 + $0x38] sm:$0xff]   ;;  %s11786_s17 = sshll.u32 %s494_s16, 2  ;;  %s16975_s22 = smul.u32 80, %s21372_s28 }
  0x21   : > { %14969 = vmatprep.subr.bf16.mxu1 %v17655_v1  ;;  %v601_v41 = vsel %vm589_vm1, %v596_v33, %v600_v34  ;;  %v612_v6 = vor.u32 %v610_v56, %v608_v49  ;;  %v616_v7 = vrot.slane %v614_v62, 1  ;;  %v5861_v9 = vor.u32 %v5859_v57, %v5857_v54  ;;  %v17057_v33 = vld [vmem:[%s21355_s4 + $0x28] sm:$0xff]   ;;  %v884_v54 = vld [vmem:[%s17790_s23] sm:$0xe]  ;;  %s21376_s15 = smov (!%p18377_p8, %s474_s15), 9  ;;  %s21380_s18 = smov (!%p502_p10, %s17751_s18), 7 }
  0x22   : > { %v5850_v44 = vsel %vm589_vm1, %v5845_v36, %v5849_v37  ;;  %v5865_v10 = vrot.slane %v5863_v63, 1  ;;  %v17929_v15 = vcombine.low %v17912_v2, %v5797_v4  ;;  %v622_v17 = vshll.u32 %v17916_v3, 16  ;;  %v17065_v4 = vld [vmem:[%s21355_s4 + $0x88] sm:$0xff]   ;;  %s16972_s24 = smul.u32 13, %s21376_s15  ;;  %s21382_s27 = smov (!%p512_p11, %s17637_s27), 3 }
  0x23   : > { %13998 = vmatpush3.bf16.msra.mxu0 %v17033_v21  ;;  %v907_v21 = vrot.slane %v17809_v14, 1  ;;  %v909_v22 = vrot.slane %v17855_v35, 1  ;;  %v617_v24 = vsel %vm589_vm1, %v612_v6, %v616_v7  ;;  %v6154_v25 = vrot.slane %v17830_v20, 1  ;;  %v17069_v6 = vld [vmem:[%s21355_s4 + $0x98] sm:$0xff]   ;;  %s16977_s14 = smul.u32 12, %s21372_s28 }
  0x24   : > { %14970 = vmatpush3.bf16.msra.mxu1 %v17034_v26  ;;  %13999 = vmatprep.subr.bf16.mxu0 %v17655_v1  ;;  %v6156_v26 = vrot.slane %v17859_v38, 1  ;;  %v5866_v27 = vsel %vm589_vm1, %v5861_v9, %v5865_v10  ;;  %v5867_v28 = vshrl.u32 %v17883_v51, 16  ;;  %v5871_v29 = vshll.u32 %v17929_v15, 16  ;;  %v17074_v9 = vld [vmem:[%s21355_s4 + $0xa8] sm:$0xff]   ;;  %s18463_s20 = sadd.s32 %s16972_s24, %s17774_s26  ;;  %s19743_s26 = scalar_lea.vmem %s21354_s3, %s11786_s17 }
  0x25   : > { %14971 = vmatprep.subr.bf16.mxu1 %v17655_v1  ;;  %v6158_v32 = vrot.slane %v17883_v51, 1  ;;  %v620_v34 = vor.u32 %v618_v11, %v616_v7  ;;  %v624_v36 = vrot.slane %v622_v17, 1  ;;  %v626_v48 = vshrl.u32 %v17916_v3, 16  ;;  %v17070_v7 = vld [vmem:[%s21355_s4 + $0x98] sm:$0xff]   ;;  %v529_v11 = vld [vmem:[%s17790_s23 + $0x24] sm:$0x7] }
  0x26   : > { %v5875_v49 = vshrl.u32 %v17929_v15, 16  ;;  %v11844_v57 = vcombine.low %v884_v54, %v17802_v12  ;;  %v17079_v17 = vld [vmem:[%s21355_s4 + $0xb8] sm:$0xff]   ;;  %s11784_s24 = sshll.u32 %s18463_s20, 2 }
  0x27   : > { %14000 = vmatpush3.bf16.msra.mxu0 %v17035_v30  ;;  %v17956_v30 = vsel %vm905_vm2, %v907_v21, %v909_v22  ;;  %v17969_v37 = vsel %vm905_vm2, %v6156_v26, %v6158_v32  ;;  %v628_v56 = vor.u32 %v626_v48, %v624_v36  ;;  %v17108_v54 = vld [vmem:[%s17821_s25 + $0x14] sm:$0xff]   ;;  %s18496_s13 = scalar_lea.vmem %s21353_s2, %s11784_s24  ;;  %s16974_s24 = smul.u32 10, %s21380_s18 }
  0x28   : > { %14972 = vmatpush3.bf16.msra.mxu1 %v17036_v31  ;;  %14021 = vmatprep.subr.bf16.mxu0 %v17655_v1  ;;  %v17962_v31 = vsel %vm905_vm2, %v6154_v25, %v6156_v26  ;;  %v17087_v26 = vld [vmem:[%s21355_s4 + $0xd0] sm:$0xff]  }
  0x29   : > { %14993 = vmatprep.subr.bf16.mxu1 %v17655_v1  ;;  %s506_s16 = sadd.s32 %s16975_s22, %s16974_s24  ;;  %s16976_s24 = smul.u32 3, %s21382_s27 }
  0x2a   : > { %14002 = vmatmul.mubr.bf16.vlgmr.msra.gmra.mrb[0].mxu0 %v601_v41  ;;  %v5873_v41 = vrot.slane %v5871_v29, 1  ;;  %v17089_v29 = vld [vmem:[%s21355_s4 + $0xd8] sm:$0xff]   ;;  %s11788_s17 = sshll.u32 %s506_s16, 3 }
  0x2b   : > { %14974 = vmatmul.mubr.bf16.vlgmr.msra.gmra.mrb[0].mxu1 %v5850_v44  ;;  %14022 = vmatpush3.bf16.msra.mxu0 %v17041_v39  ;;  %v6160_v39 = vrot.slane %v17929_v15, 1  ;;  %v625_v44 = vsel %vm589_vm1, %v620_v34, %v624_v36  ;;  %v17095_v34 = vld [vmem:[%s21355_s4 + $0xf0] sm:$0xff]   ;;  %s20860_s15 = scalar_lea.vmem %s21358_s7, %s11788_s17  ;;  %s21247_s27 = sadd.s32 %s16977_s14, %s16976_s24 }
  0x2c   : > { %14994 = vmatpush3.bf16.msra.mxu1 %v17042_v40  ;;  %14023 = vmatprep.subr.bf16.mxu0 %v17655_v1  ;;  %v5869_v40 = vor.u32 %v5867_v28, %v5865_v10  ;;  %v5877_v60 = vor.u32 %v5875_v49, %v5873_v41  ;;  %v17076_v10 = vld [vmem:[%s21355_s4 + $0xb0] sm:$0xff]   ;;  %v911_v28 = vrot.slane %v17880_v50, 1  ;;  %v17103_v49 = vld [vmem:[%s21355_s4 + $0x100] sm:$0xff]   ;;  %5770 = vst [vmem:[%s20860_s15 + $0x4e] sm:$0x3] %v17655_v1  ;;  %s11789_s28 = sshll.u32 %s21247_s27, 3 }
  0x2d   : > { %14995 = vmatprep.subr.bf16.mxu1 %v17655_v1  ;;  %14005 = vmatprep.mubr.msk.bf16.mxu0 %vm17656_vm0, %v17655_v1  ;;  %v17983_v43 = vsel %vm905_vm2, %v6158_v32, %v6160_v39  ;;  %v17090_v32 = vld [vmem:[%s21355_s4 + $0xd8] sm:$0xff]   ;;  %v17096_v36 = vld [vmem:[%s21355_s4 + $0xf0] sm:$0xff]   ;;  %13230 = vst [vmem:[%s20860_s15 + $0x9e] sm:$0x3] %v17655_v1  ;;  %s21271_s18 = scalar_lea.vmem %s21359_s8, %s11789_s28 }
  0x2e   : > { %14977 = vmatprep.mubr.msk.bf16.mxu1 %vm17656_vm0, %v17655_v1  ;;  %v5874_v45 = vsel %vm589_vm1, %v5869_v40, %v5873_v41  ;;  %v17098_v40 = vld [vmem:[%s21355_s4 + $0xf8] sm:$0xff]   ;;  %v17099_v41 = vld [vmem:[%s17790_s23 + $0x4] sm:$0xfe]  }
  0x2f   : > { %14024 = vmatpush3.bf16.msra.mxu0 %v17043_v47  ;;  %v17060_v47 = vld [vmem:[%s21355_s4 + $0x30] sm:$0xff]  }
  0x30   : > { %14996 = vmatpush3.bf16.msra.mxu1 %v17044_v52  ;;  %14025 = vmatprep.subr.bf16.mxu0 %v17655_v1  ;;  %v17061_v52 = vld [vmem:[%s21355_s4 + $0x38] sm:$0xff]  }
  0x31   : > { %14997 = vmatprep.subr.bf16.mxu1 %v17655_v1 }
  0x32   : > { %14006 = vmatmul.mubr.bf16.gmra.mrb[4].mxu0 %v609_v61  ;;  %v906_v61 = vrot.slane %v11844_v57, 1 }
  0x33   : > { %14978 = vmatmul.mubr.bf16.gmra.mrb[4].mxu1 %v5858_v0  ;;  %14026 = vmatpush3.bf16.msra.mxu0 %v17047_v55  ;;  %v6133_v55 = vld [vmem:[%s17821_s25] sm:$0xe] }
  0x34   : > { %14998 = vmatpush3.bf16.msra.mxu1 %v17048_v59  ;;  %14009 = vmatprep.mubr.msk.bf16.mxu0 %vm17656_vm0, %v17655_v1  ;;  %v12559_v59 = vcombine.low %v6133_v55, %v17827_v19  ;;  %v18019_v63 = vsel %vm905_vm2, %v906_v61, %v907_v21  ;;  %v17063_v19 = vld [vmem:[%s21355_s4 + $0x80] sm:$0xff]   ;;  %v17105_v55 = vld [vmem:[%s21355_s4 + $0x108] sm:$0xff]   ;;  %v17110_v61 = vld [vmem:[%s21355_s4 + $0x110] sm:$0xff]  }
  0x35   : > { %14027 = vmatprep.subr.bf16.mxu0 %v17655_v1  ;;  %14981 = vmatprep.mubr.msk.bf16.mxu1 %vm17656_vm0, %v17655_v1  ;;  %v17064_v0 = vld [vmem:[%s21355_s4 + $0x80] sm:$0xff]  }
  0x36   : > { %14999 = vmatprep.subr.bf16.mxu1 %v17655_v1  ;;  %v6153_v62 = vrot.slane %v12559_v59, 1  ;;  %v6352_v59 = vrot.slane %v17108_v54, 1  ;;  %v18363_v54 = vld [vmem:[%s17790_s23 + $0x1c] sm:$0xff]  }
  0x37   : > { %14028 = vmatpush3.bf16.msra.mxu0 %v17050_v5  ;;  %v17066_v5 = vld [vmem:[%s21355_s4 + $0x88] sm:$0xff]  }
  0x38   : > { %15000 = vmatpush3.bf16.msra.mxu1 %v17052_v8  ;;  %14029 = vmatprep.subr.bf16.mxu0 %v17655_v1  ;;  %v18024_v12 = vsel %vm905_vm2, %v6153_v62, %v6154_v25  ;;  %v17073_v8 = vld [vmem:[%s21355_s4 + $0xa8] sm:$0xff]  }
  0x39   : > { %15001 = vmatprep.subr.bf16.mxu1 %v17655_v1  ;;  %v17086_v25 = vld [vmem:[%s21355_s4 + $0xc8] sm:$0xff]  }
  0x3a   : > { %14010 = vmatmul.mubr.bf16.gmra.mrb[8].mxu0 %v617_v24  ;;  %v17085_v24 = vld [vmem:[%s21355_s4 + $0xc8] sm:$0xff]  }
  0x3b   : > { %14982 = vmatmul.mubr.bf16.gmra.mrb[8].mxu1 %v5866_v27  ;;  %14030 = vmatpush3.bf16.msra.mxu0 %v17053_v16  ;;  %v5780_v16 = vld [vmem:[%s17821_s25 + $0x24] sm:$0x7]  ;;  %v17088_v27 = vld [vmem:[%s21355_s4 + $0xd0] sm:$0xff]  }
  0x3c   : > { %15002 = vmatpush3.bf16.msra.mxu1 %v17054_v18  ;;  %14013 = vmatprep.mubr.msk.bf16.mxu0 %vm17656_vm0, %v17655_v1  ;;  %v17080_v18 = vld [vmem:[%s21355_s4 + $0xb8] sm:$0xff]   ;;  %v12534_v21 = vcombine.low %v17912_v2, %v5780_v16  ;;  %v17084_v2 = vld [vmem:[%s21355_s4 + $0xc0] sm:$0xff]   ;;  %v17120_v16 = vld [vmem:[%s21355_s4 + $0x128] sm:$0xff]  }
  0x3d   : > { %14985 = vmatprep.mubr.msk.bf16.mxu1 %vm17656_vm0, %v17655_v1  ;;  %14031 = vmatprep.subr.bf16.mxu0 %v17655_v1 }
  0x3e   : > { %15003 = vmatprep.subr.bf16.mxu1 %v17655_v1 }
  0x3f   : > { %14032 = vmatpush3.bf16.msra.mxu0 %v17057_v33  ;;  %v913_v33 = vrot.slane %v17916_v3, 1 }
  0x40   : > { %15004 = vmatpush3.bf16.msra.mxu1 %v17058_v42  ;;  %14033 = vmatprep.subr.bf16.mxu0 %v17655_v1  ;;  %v17100_v42 = vld [vmem:[%s17790_s23 + $0xc] sm:$0xff]  }
  0x41   : > { %15005 = vmatprep.subr.bf16.mxu1 %v17655_v1  ;;  %v914_v3 = vsel %vm905_vm2, %v911_v28, %v913_v33 }
  0x42   : > { %14014 = vmatmul.mubr.bf16.gmra.mrb[12].mxu0 %v625_v44  ;;  %v17102_v44 = vld [vmem:[%s17821_s25 + $0xc] sm:$0xff]  }
  0x43   : > { %14986 = vmatmul.mubr.bf16.gmra.mrb[12].mxu1 %v5874_v45  ;;  %14017 = vmatprep.mubr.msk.bf16.mxu0 %vm17656_vm0, %v17655_v1  ;;  %v1103_v45 = vrot.slane %v17099_v41, 1  ;;  %v6350_v48 = vrot.slane %v17102_v44, 1 }
  0x44   : > { %14034 = vmatpush3.bf16.msra.mxu0 %v17059_v46  ;;  %14989 = vmatprep.mubr.msk.bf16.mxu1 %vm17656_vm0, %v17655_v1  ;;  %v1104_v46 = vrot.slane %v17100_v42, 1 }
  0x45   : > { %15006 = vmatpush3.bf16.msra.mxu1 %v17060_v47  ;;  %14035 = vmatprep.subr.bf16.mxu0 %v17655_v1 }
  0x46   : > { %15007 = vmatprep.subr.bf16.mxu1 %v17655_v1 }
  0x48   : > { %14036 = vmatpush3.bf16.msra.mxu0 %v17061_v52  ;;  %v17107_v52 = vld [vmem:[%s17790_s23 + $0x14] sm:$0xff]  }
  0x49   : > { %15008 = vmatpush3.bf16.msra.mxu1 %v17062_v53  ;;  %14057 = vmatprep.subr.bf16.mxu0 %v17655_v1  ;;  %v1105_v53 = vsel %vm905_vm2, %v1103_v45, %v1104_v46  ;;  %v1106_v57 = vrot.slane %v17107_v52, 1 }
  0x4a   : > { %14018 = vmatmul.mubr.bf16.gmra.mrb[16].mxu0 %v628_v56  ;;  %15029 = vmatprep.subr.bf16.mxu1 %v17655_v1  ;;  %v17106_v56 = vld [vmem:[%s21355_s4 + $0x108] sm:$0xff]  }
  0x4b   : > { %14990 = vmatmul.mubr.bf16.gmra.mrb[16].mxu1 %v5877_v60  ;;  %14037 = vmatprep.mubr.msk.bf16.mxu0 %vm17656_vm0, %v17655_v1  ;;  %v17109_v60 = vld [vmem:[%s21355_s4 + $0x110] sm:$0xff]   ;;  %v1107_v62 = vsel %vm905_vm2, %v1104_v46, %v1106_v57 }
  0x4c   : > { %15009 = vmatprep.mubr.msk.bf16.mxu1 %vm17656_vm0, %v17655_v1 }
  0x52   : > { %14038 = vmatmul.mubr.bf16.vlgmr.msra.gmra.mrb[0].mxu0 %v17806_v13  ;;  %v17067_v13 = vld [vmem:[%s21355_s4 + $0x90] sm:$0xff]  }
  0x53   : > { %15010 = vmatmul.mubr.bf16.vlgmr.msra.gmra.mrb[0].mxu1 %v17837_v23  ;;  %14058 = vmatpush3.bf16.msra.mxu0 %v17063_v19  ;;  %v17068_v23 = vld [vmem:[%s21355_s4 + $0x90] sm:$0xff]   ;;  %v17113_v19 = vld [vmem:[%s17821_s25 + $0x1c] sm:$0xff]  }
  0x54   : > { %15030 = vmatpush3.bf16.msra.mxu1 %v17064_v0  ;;  %14059 = vmatprep.subr.bf16.mxu0 %v17655_v1  ;;  %v17112_v0 = vld [vmem:[%s21355_s4 + $0x118] sm:$0xff]  }
  0x55   : > { %15031 = vmatprep.subr.bf16.mxu1 %v17655_v1  ;;  %14041 = vmatprep.mubr.msk.bf16.mxu0 %vm17656_vm0, %v17655_v1 }
  0x56   : > { %15013 = vmatprep.mubr.msk.bf16.mxu1 %vm17656_vm0, %v17655_v1 }
  0x57   : > { %14060 = vmatpush3.bf16.msra.mxu0 %v17065_v4  ;;  %v17114_v4 = vld [vmem:[%s21355_s4 + $0x118] sm:$0xff]  }
  0x58   : > { %15032 = vmatpush3.bf16.msra.mxu1 %v17066_v5  ;;  %14061 = vmatprep.subr.bf16.mxu0 %v17655_v1 }
  0x59   : > { %15033 = vmatprep.subr.bf16.mxu1 %v17655_v1 }
  0x5a   : > { %14042 = vmatmul.mubr.bf16.gmra.mrb[4].mxu0 %v17809_v14  ;;  %v17071_v14 = vld [vmem:[%s21355_s4 + $0xa0] sm:$0xff]  }
  0x5b   : > { %15014 = vmatmul.mubr.bf16.gmra.mrb[4].mxu1 %v17830_v20  ;;  %14062 = vmatpush3.bf16.msra.mxu0 %v17067_v13  ;;  %v17072_v20 = vld [vmem:[%s21355_s4 + $0xa0] sm:$0xff]  }
  0x5c   : > { %15034 = vmatpush3.bf16.msra.mxu1 %v17068_v23  ;;  %14045 = vmatprep.mubr.msk.bf16.mxu0 %vm17656_vm0, %v17655_v1  ;;  %v18269_v13 = vld [vmem:[%s17790_s23 + $0x24] sm:$0xff]   ;;  %v6354_v23 = vrot.slane %v17113_v19, 1  ;;  %v1332_v19 = vshrl.u32 %v18363_v54, 16 }
  0x5d   : > { %14063 = vmatprep.subr.bf16.mxu0 %v17655_v1  ;;  %15017 = vmatprep.mubr.msk.bf16.mxu1 %vm17656_vm0, %v17655_v1 }
  0x5e   : > { %15035 = vmatprep.subr.bf16.mxu1 %v17655_v1 }
  0x5f   : > { %14064 = vmatpush3.bf16.msra.mxu0 %v17069_v6  ;;  %v18274_v6 = vld [vmem:[%s17821_s25 + $0x24] sm:$0xff]  }
  0x60   : > { %15036 = vmatpush3.bf16.msra.mxu1 %v17070_v7  ;;  %14065 = vmatprep.subr.bf16.mxu0 %v17655_v1  ;;  %v17115_v7 = vld [vmem:[%s21355_s4 + $0x120] sm:$0xff]  }
  0x61   : > { %15037 = vmatprep.subr.bf16.mxu1 %v17655_v1 }
  0x62   : > { %14046 = vmatmul.mubr.bf16.gmra.mrb[8].mxu0 %v17855_v35  ;;  %v17093_v35 = vld [vmem:[%s21355_s4 + $0xe8] sm:$0xff]  }
  0x63   : > { %15018 = vmatmul.mubr.bf16.gmra.mrb[8].mxu1 %v17859_v38  ;;  %14066 = vmatpush3.bf16.msra.mxu0 %v17071_v14  ;;  %v17075_v38 = vld [vmem:[%s21355_s4 + $0xb0] sm:$0xff]  }
  0x64   : > { %15038 = vmatpush3.bf16.msra.mxu1 %v17072_v20  ;;  %14049 = vmatprep.mubr.msk.bf16.mxu0 %vm17656_vm0, %v17655_v1  ;;  %v17116_v20 = vld [vmem:[%s21355_s4 + $0x120] sm:$0xff]  }
  0x65   : > { %15021 = vmatprep.mubr.msk.bf16.mxu1 %vm17656_vm0, %v17655_v1  ;;  %14067 = vmatprep.subr.bf16.mxu0 %v17655_v1 }
  0x66   : > { %15039 = vmatprep.subr.bf16.mxu1 %v17655_v1 }
  0x67   : > { %14068 = vmatpush3.bf16.msra.mxu0 %v17073_v8  ;;  %v6355_v8 = vsel %vm905_vm2, %v6352_v59, %v6354_v23 }
  0x68   : > { %15040 = vmatpush3.bf16.msra.mxu1 %v17074_v9  ;;  %14069 = vmatprep.subr.bf16.mxu0 %v17655_v1  ;;  %v1110_v9 = vrot.slane %v18269_v13, 1 }
  0x69   : > { %15041 = vmatprep.subr.bf16.mxu1 %v17655_v1 }
  0x6a   : > { %14050 = vmatmul.mubr.bf16.gmra.mrb[12].mxu0 %v17880_v50  ;;  %v912_v50 = vsel %vm905_vm2, %v909_v22, %v911_v28  ;;  %v17094_v22 = vld [vmem:[%s21355_s4 + $0xe8] sm:$0xff]   ;;  %v17122_v28 = vld [vmem:[%s21355_s4 + $0x130] sm:$0xff]  }
  0x6b   : > { %15022 = vmatmul.mubr.bf16.gmra.mrb[12].mxu1 %v17883_v51  ;;  %14053 = vmatprep.mubr.msk.bf16.mxu0 %vm17656_vm0, %v17655_v1  ;;  %v11819_v51 = vcombine.low %v17898_v58, %v529_v11  ;;  %v17083_v58 = vld [vmem:[%s21355_s4 + $0xc0] sm:$0xff]  }
  0x6c   : > { %14070 = vmatpush3.bf16.msra.mxu0 %v17075_v38  ;;  %15025 = vmatprep.mubr.msk.bf16.mxu1 %vm17656_vm0, %v17655_v1  ;;  %v6356_v38 = vrot.slane %v18274_v6, 1  ;;  %v1248_v11 = vld [vmem:[%s17790_s23 + $0x4] sm:$0xe] }
  0x6d   : > { %15042 = vmatpush3.bf16.msra.mxu1 %v17076_v10  ;;  %14071 = vmatprep.subr.bf16.mxu0 %v17655_v1  ;;  %v17119_v10 = vld [vmem:[%s21355_s4 + $0x128] sm:$0xff]  }
  0x6e   : > { %15043 = vmatprep.subr.bf16.mxu1 %v17655_v1  ;;  %v18396_v6 = vld [vmem:[%s17790_s23 + $0x24] sm:$0xff]  }
  0x70   : > { %14072 = vmatpush3.bf16.msra.mxu0 %v17079_v17  ;;  %v18300_v17 = vld [vmem:[%s17790_s23 + $0x8] sm:$0xf] }
  0x71   : > { %15044 = vmatpush3.bf16.msra.mxu1 %v17080_v18  ;;  %14093 = vmatprep.subr.bf16.mxu0 %v17655_v1  ;;  %v6494_v18 = vld [vmem:[%s17821_s25 + $0x4] sm:$0xe] }
  0x72   : > { %14054 = vmatmul.mubr.bf16.gmra.mrb[16].mxu0 %v11819_v51  ;;  %15065 = vmatprep.subr.bf16.mxu1 %v17655_v1  ;;  %v18306_v51 = vld [vmem:[%s17821_s25 + $0x8] sm:$0xf] }
  0x73   : > { %15026 = vmatmul.mubr.bf16.gmra.mrb[16].mxu1 %v12534_v21  ;;  %14073 = vmatprep.mubr.msk.bf16.mxu0 %vm17656_vm0, %v17655_v1  ;;  %v11898_v21 = vcombine.low %v1248_v11, %v18300_v17  ;;  %v17135_v11 = vld [vmem:[%s21355_s4 + $0x150] sm:$0xff]  }
  0x74   : > { %15045 = vmatprep.mubr.msk.bf16.mxu1 %vm17656_vm0, %v17655_v1 }
  0x7a   : > { %14074 = vmatmul.mubr.bf16.vlgmr.msra.gmra.mrb[0].mxu0 %v18019_v63  ;;  %v17111_v63 = vld [vmem:[%s17790_s23 + $0x1c] sm:$0xff]  }
  0x7b   : > { %15046 = vmatmul.mubr.bf16.vlgmr.msra.gmra.mrb[0].mxu1 %v18024_v12  ;;  %14094 = vmatpush3.bf16.msra.mxu0 %v17083_v58  ;;  %v6353_v12 = vsel %vm905_vm2, %v6350_v48, %v6352_v59  ;;  %v1108_v5 = vrot.slane %v17111_v63, 1  ;;  %v18313_v58 = vld [vmem:[%s17790_s23 + $0xc] sm:$0xff]   ;;  %v17129_v59 = vld [vmem:[%s21355_s4 + $0x140] sm:$0xff]  }
  0x7c   : > { %15066 = vmatpush3.bf16.msra.mxu1 %v17084_v2  ;;  %14095 = vmatprep.subr.bf16.mxu0 %v17655_v1  ;;  %v18317_v2 = vld [vmem:[%s17821_s25 + $0xc] sm:$0xff]  }
  0x7d   : > { %15067 = vmatprep.subr.bf16.mxu1 %v17655_v1  ;;  %14077 = vmatprep.mubr.msk.bf16.mxu0 %vm17656_vm0, %v17655_v1  ;;  %v1109_v14 = vsel %vm905_vm2, %v1106_v57, %v1108_v5 }
  0x7e   : > { %15049 = vmatprep.mubr.msk.bf16.mxu1 %vm17656_vm0, %v17655_v1 }
  0x7f   : > { %14096 = vmatpush3.bf16.msra.mxu0 %v17085_v24  ;;  %v1111_v24 = vsel %vm905_vm2, %v1108_v5, %v1110_v9 }
  0x80   : > { %15068 = vmatpush3.bf16.msra.mxu1 %v17086_v25  ;;  %14097 = vmatprep.subr.bf16.mxu0 %v17655_v1  ;;  %v12613_v25 = vcombine.low %v6494_v18, %v18306_v51 }
  0x81   : > { %15069 = vmatprep.subr.bf16.mxu1 %v17655_v1 }
  0x82   : > { %14078 = vmatmul.mubr.bf16.gmra.mrb[4].mxu0 %v17956_v30  ;;  %v17091_v30 = vld [vmem:[%s21355_s4 + $0xe0] sm:$0xff]  }
  0x83   : > { %15050 = vmatmul.mubr.bf16.gmra.mrb[4].mxu1 %v17962_v31  ;;  %14098 = vmatpush3.bf16.msra.mxu0 %v17087_v26  ;;  %v17092_v31 = vld [vmem:[%s21355_s4 + $0xe0] sm:$0xff]   ;;  %v6357_v26 = vsel %vm905_vm2, %v6354_v23, %v6356_v38 }
  0x84   : > { %15070 = vmatpush3.bf16.msra.mxu1 %v17088_v27  ;;  %14081 = vmatprep.mubr.msk.bf16.mxu0 %vm17656_vm0, %v17655_v1  ;;  %v17121_v27 = vld [vmem:[%s21355_s4 + $0x130] sm:$0xff]  }
  0x85   : > { %14099 = vmatprep.subr.bf16.mxu0 %v17655_v1  ;;  %15053 = vmatprep.mubr.msk.bf16.mxu1 %vm17656_vm0, %v17655_v1 }
  0x86   : > { %15071 = vmatprep.subr.bf16.mxu1 %v17655_v1 }
  0x87   : > { %14100 = vmatpush3.bf16.msra.mxu0 %v17089_v29  ;;  %v1306_v29 = vshrl.u32 %v11898_v21, 16 }
  0x88   : > { %15072 = vmatpush3.bf16.msra.mxu1 %v17090_v32  ;;  %14101 = vmatprep.subr.bf16.mxu0 %v17655_v1  ;;  %v1309_v32 = vshll.u32 %v11898_v21, 16  ;;  %v1341_v21 = vshrl.u32 %v18396_v6, 16 }
  0x89   : > { %15073 = vmatprep.subr.bf16.mxu1 %v17655_v1 }
  0x8a   : > { %14082 = vmatmul.mubr.bf16.gmra.mrb[8].mxu0 %v912_v50  ;;  %v1314_v50 = vshrl.u32 %v18313_v58, 16  ;;  %v1311_v41 = vrot.slane %v1309_v32, 2 }
  0x8b   : > { %15054 = vmatmul.mubr.bf16.gmra.mrb[8].mxu1 %v17969_v37  ;;  %14102 = vmatpush3.bf16.msra.mxu0 %v17091_v30  ;;  %v17097_v37 = vld [vmem:[%s21355_s4 + $0xf8] sm:$0xff]   ;;  %v1317_v30 = vshll.u32 %v18313_v58, 16 }
  0x8c   : > { %15074 = vmatpush3.bf16.msra.mxu1 %v17092_v31  ;;  %14085 = vmatprep.mubr.msk.bf16.mxu0 %vm17656_vm0, %v17655_v1  ;;  %v6558_v31 = vshrl.u32 %v18317_v2, 16  ;;  %v1316_v42 = vrot.slane %v1314_v50, 1  ;;  %v17138_v50 = vld [vmem:[%s21355_s4 + $0x158] sm:$0xff]  }
  0x8d   : > { %15057 = vmatprep.mubr.msk.bf16.mxu1 %vm17656_vm0, %v17655_v1  ;;  %14103 = vmatprep.subr.bf16.mxu0 %v17655_v1 }
  0x8e   : > { %15075 = vmatprep.subr.bf16.mxu1 %v17655_v1  ;;  %v6560_v44 = vrot.slane %v6558_v31, 1  ;;  %v17140_v31 = vld [vmem:[%s21355_s4 + $0x158] sm:$0xff]  }
  0x8f   : > { %14104 = vmatpush3.bf16.msra.mxu0 %v17093_v35  ;;  %v6553_v35 = vshll.u32 %v12613_v25, 16 }
  0x90   : > { %15076 = vmatpush3.bf16.msra.mxu1 %v17094_v22  ;;  %14105 = vmatprep.subr.bf16.mxu0 %v17655_v1  ;;  %v6561_v22 = vshll.u32 %v18317_v2, 16 }
  0x91   : > { %15077 = vmatprep.subr.bf16.mxu1 %v17655_v1  ;;  %v6555_v46 = vrot.slane %v6553_v35, 2  ;;  %v17142_v35 = vld [vmem:[%s21355_s4 + $0x160] sm:$0xff]  }
  0x92   : > { %14086 = vmatmul.mubr.bf16.gmra.mrb[12].mxu0 %v914_v3  ;;  %v18341_v3 = vld [vmem:[%s17790_s23 + $0x14] sm:$0xff]  }
  0x93   : > { %15058 = vmatmul.mubr.bf16.gmra.mrb[12].mxu1 %v17983_v43  ;;  %14089 = vmatprep.mubr.msk.bf16.mxu0 %vm17656_vm0, %v17655_v1  ;;  %v17101_v43 = vld [vmem:[%s17821_s25 + $0x4] sm:$0xfe]  }
  0x94   : > { %14106 = vmatpush3.bf16.msra.mxu0 %v17095_v34  ;;  %15061 = vmatprep.mubr.msk.bf16.mxu1 %vm17656_vm0, %v17655_v1  ;;  %v6349_v47 = vrot.slane %v17101_v43, 1  ;;  %v17123_v34 = vld [vmem:[%s21355_s4 + $0x138] sm:$0xff]   ;;  %v1319_v43 = vrot.slane %v1317_v30, 2 }
  0x95   : > { %15078 = vmatpush3.bf16.msra.mxu1 %v17096_v36  ;;  %14107 = vmatprep.subr.bf16.mxu0 %v17655_v1  ;;  %v18349_v36 = vld [vmem:[%s17821_s25 + $0x14] sm:$0xff]  }
  0x96   : > { %15079 = vmatprep.subr.bf16.mxu1 %v17655_v1  ;;  %v6351_v15 = vsel %vm905_vm2, %v6349_v47, %v6350_v48  ;;  %v6563_v47 = vrot.slane %v6561_v22, 2  ;;  %v1323_v48 = vshrl.u32 %v18341_v3, 16  ;;  %v6567_v52 = vshrl.u32 %v18349_v36, 16 }
  0x97   : > { %v1343_v22 = vrot.slane %v1341_v21, 1  ;;  %v17162_v21 = vld [vmem:[%s21355_s4 + $0x198] sm:$0xff]  }
  0x98   : > { %14108 = vmatpush3.bf16.msra.mxu0 %v17097_v37  ;;  %v17124_v37 = vld [vmem:[%s21355_s4 + $0x138] sm:$0xff]   ;;  %v6564_v57 = vor.u32 %v6563_v47, %v6560_v44  ;;  %v6569_v63 = vrot.slane %v6567_v52, 1  ;;  %v18460_v44 = vld [vmem:[%s17821_s25 + $0x2c] ss:$0 sps:$4 sm:$0x11]  }
  0x99   : > { %15080 = vmatpush3.bf16.msra.mxu1 %v17098_v40  ;;  %14129 = vmatprep.subr.bf16.mxu0 %v17655_v1  ;;  %v1308_v40 = vrot.slane %v1306_v29, 1 }
  0x9a   : > { %14090 = vmatmul.mubr.bf16.gmra.mrb[16].mxu0 %v913_v33  ;;  %15101 = vmatprep.subr.bf16.mxu1 %v17655_v1  ;;  %v6550_v33 = vshrl.u32 %v12613_v25, 16  ;;  %v18425_v25 = vld [vmem:[%s17821_s25 + $0x24] sm:$0xff]  }
  0x9b   : > { %15062 = vmatmul.mubr.bf16.gmra.mrb[16].mxu1 %v6160_v39  ;;  %14109 = vmatprep.mubr.msk.bf16.mxu0 %vm17656_vm0, %v17655_v1  ;;  %v17104_v39 = vld [vmem:[%s21355_s4 + $0x100] sm:$0xff]   ;;  %v6588_v29 = vshll.u32 %v18425_v25, 16 }
  0x9c   : > { %15081 = vmatprep.mubr.msk.bf16.mxu1 %vm17656_vm0, %v17655_v1  ;;  %v6552_v45 = vrot.slane %v6550_v33, 1  ;;  %v17141_v33 = vld [vmem:[%s21355_s4 + $0x160] sm:$0xff]  }
  0xa2   : > { %14110 = vmatmul.mubr.bf16.vlgmr.msra.gmra.mrb[0].mxu0 %v1105_v53  ;;  %v6570_v53 = vshll.u32 %v18349_v36, 16 }
  0xa3   : > { %15082 = vmatmul.mubr.bf16.vlgmr.msra.gmra.mrb[0].mxu1 %v6351_v15  ;;  %14130 = vmatpush3.bf16.msra.mxu0 %v17103_v49  ;;  %v1326_v49 = vshll.u32 %v18341_v3, 16  ;;  %v1312_v15 = vor.u32 %v1311_v41, %v1308_v40  ;;  %v6590_v40 = vrot.slane %v6588_v29, 2  ;;  %v6761_v29 = vrot.slane %v18425_v25, 2 }
  0xa4   : > { %15102 = vmatpush3.bf16.msra.mxu1 %v17104_v39  ;;  %14131 = vmatprep.subr.bf16.mxu0 %v17655_v1  ;;  %v1320_v39 = vor.u32 %v1319_v43, %v1316_v42  ;;  %v18457_v43 = vld [vmem:[%s17790_s23 + $0x2c] ss:$0 sps:$4 sm:$0x11]  }
  0xa5   : > { %15103 = vmatprep.subr.bf16.mxu1 %v17655_v1  ;;  %14113 = vmatprep.mubr.msk.bf16.mxu0 %vm17656_vm0, %v17655_v1  ;;  %v1350_v52 = vshll.u32 %v18457_v43, 16 }
  0xa6   : > { %15085 = vmatprep.mubr.msk.bf16.mxu1 %vm17656_vm0, %v17655_v1 }
  0xa7   : > { %14132 = vmatpush3.bf16.msra.mxu0 %v17105_v55  ;;  %v18373_v55 = vld [vmem:[%s17821_s25 + $0x1c] sm:$0xff]  }
  0xa8   : > { %15104 = vmatpush3.bf16.msra.mxu1 %v17106_v56  ;;  %14133 = vmatprep.subr.bf16.mxu0 %v17655_v1  ;;  %v6556_v56 = vor.u32 %v6555_v46, %v6552_v45  ;;  %v6576_v5 = vshrl.u32 %v18373_v55, 16  ;;  %v6579_v13 = vshll.u32 %v18373_v55, 16  ;;  %v17145_v46 = vld [vmem:[%s21355_s4 + $0x168] sm:$0xff]  }
  0xa9   : > { %15105 = vmatprep.subr.bf16.mxu1 %v17655_v1 }
  0xaa   : > { %14114 = vmatmul.mubr.bf16.gmra.mrb[4].mxu0 %v1107_v62  ;;  %v17130_v62 = vld [vmem:[%s21355_s4 + $0x140] sm:$0xff]   ;;  %v6565_v23 = vsel %vm1304_vm3, %v6556_v56, %v6564_v57  ;;  %v6581_v18 = vrot.slane %v6579_v13, 2  ;;  %v1513_v13 = vrot.slane %v18313_v58, 2  ;;  %v17157_v58 = vld [vmem:[%s21355_s4 + $0x188] sm:$0xff]  }
  0xab   : > { %15086 = vmatmul.mubr.bf16.gmra.mrb[4].mxu1 %v6353_v12  ;;  %14134 = vmatpush3.bf16.msra.mxu0 %v17109_v60  ;;  %v1325_v60 = vrot.slane %v1323_v48, 1  ;;  %v6572_v12 = vrot.slane %v6570_v53, 2  ;;  %v17146_v48 = vld [vmem:[%s21355_s4 + $0x168] sm:$0xff]   ;;  %v6594_v53 = vshll.u32 %v18460_v44, 16 }
  0xac   : > { %15106 = vmatpush3.bf16.msra.mxu1 %v17110_v61  ;;  %14117 = vmatprep.mubr.msk.bf16.mxu0 %vm17656_vm0, %v17655_v1  ;;  %v1328_v61 = vrot.slane %v1326_v49, 2  ;;  %v17147_v49 = vld [vmem:[%s21355_s4 + $0x170] sm:$0xff]  }
  0xad   : > { %14135 = vmatprep.subr.bf16.mxu0 %v17655_v1  ;;  %15089 = vmatprep.mubr.msk.bf16.mxu1 %vm17656_vm0, %v17655_v1 }
  0xae   : > { %15107 = vmatprep.subr.bf16.mxu1 %v17655_v1 }
  0xaf   : > { %14136 = vmatpush3.bf16.msra.mxu0 %v17112_v0  ;;  %v1335_v0 = vshll.u32 %v18363_v54, 16 }
  0xb0   : > { %15108 = vmatpush3.bf16.msra.mxu1 %v17114_v4  ;;  %14137 = vmatprep.subr.bf16.mxu0 %v17655_v1  ;;  %v1321_v4 = vsel %vm1304_vm3, %v1312_v15, %v1320_v39 }
  0xb1   : > { %15109 = vmatprep.subr.bf16.mxu1 %v17655_v1 }
  0xb2   : > { %14118 = vmatmul.mubr.bf16.gmra.mrb[8].mxu0 %v1109_v14  ;;  %v1329_v14 = vor.u32 %v1328_v61, %v1325_v60  ;;  %v6596_v60 = vrot.slane %v6594_v53, 2  ;;  %v17151_v61 = vld [vmem:[%s21355_s4 + $0x178] sm:$0xff]  }
  0xb3   : > { %15090 = vmatmul.mubr.bf16.gmra.mrb[8].mxu1 %v6355_v8  ;;  %14138 = vmatpush3.bf16.msra.mxu0 %v17115_v7  ;;  %v17131_v7 = vld [vmem:[%s21355_s4 + $0x148] sm:$0xff]   ;;  %v6573_v8 = vor.u32 %v6572_v12, %v6569_v63  ;;  %v17152_v63 = vld [vmem:[%s21355_s4 + $0x178] sm:$0xff]  }
  0xb4   : > { %15110 = vmatpush3.bf16.msra.mxu1 %v17116_v20  ;;  %14121 = vmatprep.mubr.msk.bf16.mxu0 %vm17656_vm0, %v17655_v1  ;;  %v17132_v20 = vld [vmem:[%s21355_s4 + $0x148] sm:$0xff]  }
  0xb5   : > { %15093 = vmatprep.mubr.msk.bf16.mxu1 %vm17656_vm0, %v17655_v1  ;;  %14139 = vmatprep.subr.bf16.mxu0 %v17655_v1 }
  0xb6   : > { %15111 = vmatprep.subr.bf16.mxu1 %v17655_v1 }
  0xb7   : > { %14140 = vmatpush3.bf16.msra.mxu0 %v17119_v10  ;;  %v6578_v10 = vrot.slane %v6576_v5, 1 }
  0xb8   : > { %15112 = vmatpush3.bf16.msra.mxu1 %v17120_v16  ;;  %14141 = vmatprep.subr.bf16.mxu0 %v17655_v1  ;;  %v17136_v16 = vld [vmem:[%s21355_s4 + $0x150] sm:$0xff]  }
  0xb9   : > { %15113 = vmatprep.subr.bf16.mxu1 %v17655_v1  ;;  %v6582_v30 = vor.u32 %v6581_v18, %v6578_v10  ;;  %v17160_v10 = vld [vmem:[%s21355_s4 + $0x190] sm:$0xff]   ;;  %v6759_v18 = vrot.slane %v18373_v55, 2 }
  0xba   : > { %14122 = vmatmul.mubr.bf16.gmra.mrb[12].mxu0 %v1111_v24  ;;  %v1344_v24 = vshll.u32 %v18396_v6, 16 }
  0xbb   : > { %15094 = vmatmul.mubr.bf16.gmra.mrb[12].mxu1 %v6357_v26  ;;  %14125 = vmatprep.mubr.msk.bf16.mxu0 %vm17656_vm0, %v17655_v1  ;;  %v1330_v26 = vsel %vm1304_vm3, %v1320_v39, %v1329_v14  ;;  %v6583_v42 = vsel %vm1304_vm3, %v6573_v8, %v6582_v30  ;;  %v17148_v39 = vld [vmem:[%s21355_s4 + $0x170] sm:$0xff]  }
  0xbc   : > { %14142 = vmatpush3.bf16.msra.mxu0 %v17121_v27  ;;  %15097 = vmatprep.mubr.msk.bf16.mxu1 %vm17656_vm0, %v17655_v1  ;;  %v6574_v27 = vsel %vm1304_vm3, %v6564_v57, %v6573_v8  ;;  %v1352_v57 = vrot.slane %v1350_v52, 2  ;;  %v1515_v8 = vrot.slane %v18341_v3, 2 }
  0xbd   : > { %15114 = vmatpush3.bf16.msra.mxu1 %v17122_v28  ;;  %14143 = vmatprep.subr.bf16.mxu0 %v17655_v1  ;;  %v6585_v28 = vshrl.u32 %v18425_v25, 16 }
  0xbe   : > { %15115 = vmatprep.subr.bf16.mxu1 %v17655_v1  ;;  %v1516_v3 = vsel %vm1511_vm4, %v1513_v13, %v1515_v8 }
  0xc0   : > { %14144 = vmatpush3.bf16.msra.mxu0 %v17123_v34  ;;  %v1346_v34 = vrot.slane %v1344_v24, 2 }
  0xc1   : > { %15116 = vmatpush3.bf16.msra.mxu1 %v17124_v37  ;;  %14165 = vmatprep.subr.bf16.mxu0 %v17655_v1  ;;  %v6587_v37 = vrot.slane %v6585_v28, 1  ;;  %v17165_v28 = vld [vmem:[%s21355_s4 + $0x1a8] sm:$0xff]  }
  0xc2   : > { %14126 = vmatmul.mubr.bf16.gmra.mrb[16].mxu0 %v1110_v9  ;;  %15137 = vmatprep.subr.bf16.mxu1 %v17655_v1  ;;  %v1334_v9 = vrot.slane %v1332_v19, 1  ;;  %v1347_v45 = vor.u32 %v1346_v34, %v1343_v22  ;;  %v17170_v22 = vld [vmem:[%s21355_s4 + $0x1b8] sm:$0xff]   ;;  %v1659_v34 = vld [vmem:[%s17790_s23 + $0x8] sm:$0xc] }
  0xc3   : > { %15098 = vmatmul.mubr.bf16.gmra.mrb[16].mxu1 %v6356_v38  ;;  %14145 = vmatprep.mubr.msk.bf16.mxu0 %vm17656_vm0, %v17655_v1  ;;  %v1337_v38 = vrot.slane %v1335_v0, 2  ;;  %v6591_v47 = vor.u32 %v6590_v40, %v6587_v37  ;;  %v18613_v37 = vld [vmem:[%s17790_s23 + $0xc] sm:$0xf]  ;;  %v6901_v40 = vld [vmem:[%s17821_s25 + $0x8] sm:$0xc] }
  0xc4   : > { %15117 = vmatprep.mubr.msk.bf16.mxu1 %vm17656_vm0, %v17655_v1  ;;  %v1353_v12 = vsel %vm1304_vm3, %v1347_v45, %v1352_v57  ;;  %v18655_v57 = vld [vmem:[%s17821_s25 + $0x18] sm:$0xff]  }
  0xc5   : > { %v1338_v32 = vor.u32 %v1337_v38, %v1334_v9  ;;  %v6592_v56 = vsel %vm1304_vm3, %v6582_v30, %v6591_v47  ;;  %v6757_v9 = vrot.slane %v18349_v36, 2  ;;  %v17159_v38 = vld [vmem:[%s21355_s4 + $0x190] sm:$0xff]   ;;  %v6762_v30 = vsel %vm1511_vm4, %v6759_v18, %v6761_v29 }
  0xc7   : > { %v1339_v41 = vsel %vm1304_vm3, %v1329_v14, %v1338_v32  ;;  %v1348_v15 = vsel %vm1304_vm3, %v1338_v32, %v1347_v45  ;;  %v6760_v24 = vsel %vm1511_vm4, %v6757_v9, %v6759_v18  ;;  %v17166_v32 = vld [vmem:[%s21355_s4 + $0x1a8] sm:$0xff]   ;;  %v18631_v45 = vcombine.low %v1659_v34, %v18613_v37  ;;  %v17196_v18 = vld [vmem:[%s17821_s25 + $0x30] ss:$0 sps:$4 sm:$0x11]  }
  0xca   : > { %14146 = vmatmul.mubr.bf16.vlgmr.msra.gmra.mrb[0].mxu0 %v1321_v4  ;;  %v6597_v4 = vsel %vm1304_vm3, %v6591_v47, %v6596_v60  ;;  %v17176_v60 = vld [vmem:[%s21355_s4 + $0x1c0] sm:$0xff]  }
  0xcb   : > { %15118 = vmatmul.mubr.bf16.vlgmr.msra.gmra.mrb[0].mxu1 %v6565_v23  ;;  %14166 = vmatpush3.bf16.msra.mxu0 %v17129_v59  ;;  %v1490_v59 = vld [vmem:[%s17790_s23 + $0x4] sm:$0xc] }
  0xcc   : > { %15138 = vmatpush3.bf16.msra.mxu1 %v17130_v62  ;;  %14167 = vmatprep.subr.bf16.mxu0 %v17655_v1  ;;  %v6734_v62 = vld [vmem:[%s17821_s25 + $0x4] sm:$0xc]  ;;  %v11928_v19 = vcombine.low %v1490_v59, %v18300_v17 }
  0xcd   : > { %15139 = vmatprep.subr.bf16.mxu1 %v17655_v1  ;;  %14149 = vmatprep.mubr.msk.bf16.mxu0 %vm17656_vm0, %v17655_v1  ;;  %v12643_v0 = vcombine.low %v6734_v62, %v18306_v51  ;;  %v6755_v51 = vrot.slane %v18317_v2, 2  ;;  %v17158_v2 = vld [vmem:[%s21355_s4 + $0x188] sm:$0xff]  }
  0xce   : > { %15121 = vmatprep.mubr.msk.bf16.mxu1 %vm17656_vm0, %v17655_v1  ;;  %v1512_v5 = vrot.slane %v11928_v19, 2  ;;  %v17178_v62 = vld [vmem:[%s21355_s4 + $0x1c8] sm:$0xff]   ;;  %v17181_v19 = vld [vmem:[%s21355_s4 + $0x1d0] sm:$0xff]  }
  0xcf   : > { %14168 = vmatpush3.bf16.msra.mxu0 %v17131_v7  ;;  %v6754_v17 = vrot.slane %v12643_v0, 2  ;;  %v17155_v7 = vld [vmem:[%s21355_s4 + $0x180] sm:$0xff]   ;;  %v6758_v36 = vsel %vm1511_vm4, %v6755_v51, %v6757_v9 }
  0xd0   : > { %15140 = vmatpush3.bf16.msra.mxu1 %v17132_v20  ;;  %14169 = vmatprep.subr.bf16.mxu0 %v17655_v1  ;;  %v1514_v23 = vsel %vm1511_vm4, %v1512_v5, %v1513_v13  ;;  %v17156_v20 = vld [vmem:[%s21355_s4 + $0x180] sm:$0xff]  }
  0xd1   : > { %15141 = vmatprep.subr.bf16.mxu1 %v17655_v1  ;;  %v6756_v14 = vsel %vm1511_vm4, %v6754_v17, %v6755_v51  ;;  %v18677_v0 = vld [vmem:[%s17790_s23 + $0x20] sm:$0xff]  }
  0xd2   : > { %14150 = vmatmul.mubr.bf16.gmra.mrb[4].mxu0 %v1330_v26  ;;  %v17164_v26 = vld [vmem:[%s21355_s4 + $0x1a0] sm:$0xff]   ;;  %v1720_v51 = vrot.slane %v18677_v0, 2 }
  0xd3   : > { %15122 = vmatmul.mubr.bf16.gmra.mrb[4].mxu1 %v6574_v27  ;;  %14170 = vmatpush3.bf16.msra.mxu0 %v17135_v11  ;;  %v1517_v11 = vrot.slane %v18363_v54, 2  ;;  %v17163_v54 = vld [vmem:[%s21355_s4 + $0x1a0] sm:$0xff]   ;;  %v1519_v27 = vrot.slane %v18396_v6, 2  ;;  %v1521_v6 = vrot.slane %v18457_v43, 2  ;;  %v18626_v43 = vld [vmem:[%s17821_s25 + $0x10] sm:$0xff]  }
  0xd4   : > { %15142 = vmatpush3.bf16.msra.mxu1 %v17136_v16  ;;  %14153 = vmatprep.mubr.msk.bf16.mxu0 %vm17656_vm0, %v17655_v1  ;;  %v17161_v16 = vld [vmem:[%s21355_s4 + $0x198] sm:$0xff]   ;;  %v6957_v53 = vrot.slane %v18626_v43, 2  ;;  %v18685_v5 = vld [vmem:[%s17821_s25 + $0x20] sm:$0xff]  }
  0xd5   : > { %14171 = vmatprep.subr.bf16.mxu0 %v17655_v1  ;;  %15125 = vmatprep.mubr.msk.bf16.mxu1 %vm17656_vm0, %v17655_v1  ;;  %v1518_v55 = vsel %vm1511_vm4, %v1515_v8, %v1517_v11  ;;  %v1520_v25 = vsel %vm1511_vm4, %v1517_v11, %v1519_v27  ;;  %v17188_v8 = vld [vmem:[%s21355_s4 + $0x1e0] sm:$0xff]   ;;  %v17192_v11 = vld [vmem:[%s21355_s4 + $0x1e8] sm:$0xff]  }
  0xd6   : > { %15143 = vmatprep.subr.bf16.mxu1 %v17655_v1 }
  0xd7   : > { %14172 = vmatpush3.bf16.msra.mxu0 %v17138_v50  ;;  %v17167_v50 = vld [vmem:[%s21355_s4 + $0x1b0] sm:$0xff]  }
  0xd8   : > { %15144 = vmatpush3.bf16.msra.mxu1 %v17140_v31  ;;  %14173 = vmatprep.subr.bf16.mxu0 %v17655_v1  ;;  %v17168_v31 = vld [vmem:[%s21355_s4 + $0x1b0] sm:$0xff]  }
  0xd9   : > { %15145 = vmatprep.subr.bf16.mxu1 %v17655_v1 }
  0xda   : > { %14154 = vmatmul.mubr.bf16.gmra.mrb[8].mxu0 %v1339_v41  ;;  %v18619_v41 = vld [vmem:[%s17821_s25 + $0xc] sm:$0xf] }
  0xdb   : > { %15126 = vmatmul.mubr.bf16.gmra.mrb[8].mxu1 %v6583_v42  ;;  %14174 = vmatpush3.bf16.msra.mxu0 %v17141_v33  ;;  %v6763_v33 = vrot.slane %v18460_v44, 2  ;;  %v18623_v42 = vld [vmem:[%s17790_s23 + $0x10] sm:$0xff]   ;;  %v1522_v44 = vsel %vm1511_vm4, %v1519_v27, %v1521_v6  ;;  %v1888_v27 = vshll.u32 %v18631_v45, 16 }
  0xdc   : > { %15146 = vmatpush3.bf16.msra.mxu1 %v17142_v35  ;;  %14157 = vmatprep.mubr.msk.bf16.mxu0 %vm17656_vm0, %v17655_v1  ;;  %v17169_v35 = vld [vmem:[%s21355_s4 + $0x1b8] sm:$0xff]  }
  0xdd   : > { %15129 = vmatprep.mubr.msk.bf16.mxu1 %vm17656_vm0, %v17655_v1  ;;  %14175 = vmatprep.subr.bf16.mxu0 %v17655_v1  ;;  %v6764_v47 = vsel %vm1511_vm4, %v6761_v29, %v6763_v33  ;;  %v1896_v29 = vshll.u32 %v18623_v42, 16  ;;  %v17197_v33 = vld [vmem:[%s21355_s4 + $0x1f8] sm:$0xff]   ;;  %v1890_v34 = vrot.slane %v1888_v27, 3 }
  0xde   : > { %15147 = vmatprep.subr.bf16.mxu1 %v17655_v1  ;;  %v17205_v27 = vld [vmem:[%s21355_s4 + $0x218] sm:$0xff]  }
  0xdf   : > { %14176 = vmatpush3.bf16.msra.mxu0 %v17145_v46  ;;  %v18634_v46 = vcombine.low %v6901_v40, %v18619_v41 }
  0xe0   : > { %15148 = vmatpush3.bf16.msra.mxu1 %v17146_v48  ;;  %14177 = vmatprep.subr.bf16.mxu0 %v17655_v1  ;;  %v1715_v48 = vrot.slane %v18631_v45, 2 }
  0xe1   : > { %15149 = vmatprep.subr.bf16.mxu1 %v17655_v1  ;;  %v6956_v52 = vrot.slane %v18634_v46, 2  ;;  %v7127_v6 = vshll.u32 %v18634_v46, 16 }
  0xe2   : > { %14158 = vmatmul.mubr.bf16.gmra.mrb[12].mxu0 %v1348_v15  ;;  %v17175_v15 = vld [vmem:[%s21355_s4 + $0x1c0] sm:$0xff]  }
  0xe3   : > { %15130 = vmatmul.mubr.bf16.gmra.mrb[12].mxu1 %v6592_v56  ;;  %14161 = vmatprep.mubr.msk.bf16.mxu0 %vm17656_vm0, %v17655_v1  ;;  %v6958_v59 = vsel %vm1511_vm4, %v6956_v52, %v6957_v53 }
  0xe4   : > { %14178 = vmatpush3.bf16.msra.mxu0 %v17147_v49  ;;  %15133 = vmatprep.mubr.msk.bf16.mxu1 %vm17656_vm0, %v17655_v1  ;;  %v1716_v49 = vrot.slane %v18623_v42, 2 }
  0xe5   : > { %15150 = vmatpush3.bf16.msra.mxu1 %v17148_v39  ;;  %14179 = vmatprep.subr.bf16.mxu0 %v17655_v1  ;;  %v18651_v39 = vld [vmem:[%s17790_s23 + $0x18] sm:$0xff]  }
  0xe6   : > { %15151 = vmatprep.subr.bf16.mxu1 %v17655_v1  ;;  %v1717_v56 = vsel %vm1511_vm4, %v1715_v48, %v1716_v49 }
  0xe8   : > { %14180 = vmatpush3.bf16.msra.mxu0 %v17151_v61  ;;  %v17177_v61 = vld [vmem:[%s21355_s4 + $0x1c8] sm:$0xff]  }
  0xe9   : > { %15152 = vmatpush3.bf16.msra.mxu1 %v17152_v63  ;;  %14201 = vmatprep.subr.bf16.mxu0 %v17655_v1  ;;  %v1718_v63 = vrot.slane %v18651_v39, 2 }
  0xea   : > { %14162 = vmatmul.mubr.bf16.gmra.mrb[16].mxu0 %v1353_v12  ;;  %15173 = vmatprep.subr.bf16.mxu1 %v17655_v1  ;;  %v6959_v12 = vrot.slane %v18655_v57, 2 }
  0xeb   : > { %15134 = vmatmul.mubr.bf16.gmra.mrb[16].mxu1 %v6597_v4  ;;  %14181 = vmatprep.mubr.msk.bf16.mxu0 %vm17656_vm0, %v17655_v1  ;;  %v17182_v4 = vld [vmem:[%s21355_s4 + $0x1d0] sm:$0xff]   ;;  %v1719_v13 = vsel %vm1511_vm4, %v1716_v49, %v1718_v63  ;;  %v1721_v9 = vsel %vm1511_vm4, %v1718_v63, %v1720_v51 }
  0xec   : > { %15153 = vmatprep.mubr.msk.bf16.mxu1 %vm17656_vm0, %v17655_v1  ;;  %v6960_v17 = vsel %vm1511_vm4, %v6957_v53, %v6959_v12  ;;  %v1902_v53 = vshrl.u32 %v18651_v39, 16 }
  0xf2   : > { %14182 = vmatmul.mubr.bf16.vlgmr.msra.gmra.mrb[0].mxu0 %v1514_v23  ;;  %v17184_v23 = vld [vmem:[%s21355_s4 + $0x1d8] sm:$0xff]  }
  0xf3   : > { %15154 = vmatmul.mubr.bf16.vlgmr.msra.gmra.mrb[0].mxu1 %v6756_v14  ;;  %14202 = vmatpush3.bf16.msra.mxu0 %v17155_v7  ;;  %v6961_v7 = vrot.slane %v18685_v5, 2  ;;  %v17186_v14 = vld [vmem:[%s21355_s4 + $0x1d8] sm:$0xff]  }
  0xf4   : > { %15174 = vmatpush3.bf16.msra.mxu1 %v17156_v20  ;;  %14203 = vmatprep.subr.bf16.mxu0 %v17655_v1  ;;  %v17187_v20 = vld [vmem:[%s21355_s4 + $0x1e0] sm:$0xff]  }
  0xf5   : > { %15175 = vmatprep.subr.bf16.mxu1 %v17655_v1  ;;  %14185 = vmatprep.mubr.msk.bf16.mxu0 %vm17656_vm0, %v17655_v1 }
  0xf6   : > { %15157 = vmatprep.mubr.msk.bf16.mxu1 %vm17656_vm0, %v17655_v1 }
  0xf7   : > { %14204 = vmatpush3.bf16.msra.mxu0 %v17157_v58  ;;  %v18708_v58 = vld [vmem:[%s17790_s23 + $0x28] sm:$0xff]  }
  0xf8   : > { %15176 = vmatpush3.bf16.msra.mxu1 %v17158_v2  ;;  %14205 = vmatprep.subr.bf16.mxu0 %v17655_v1  ;;  %v18711_v2 = vld [vmem:[%s17821_s25 + $0x28] sm:$0xff]  }
  0xf9   : > { %15177 = vmatprep.subr.bf16.mxu1 %v17655_v1 }
  0xfa   : > { %14186 = vmatmul.mubr.bf16.gmra.mrb[4].mxu0 %v1516_v3  ;;  %v1722_v3 = vrot.slane %v18708_v58, 2 }
  0xfb   : > { %15158 = vmatmul.mubr.bf16.gmra.mrb[4].mxu1 %v6758_v36  ;;  %14206 = vmatpush3.bf16.msra.mxu0 %v17159_v38  ;;  %v6962_v38 = vsel %vm1511_vm4, %v6959_v12, %v6961_v7  ;;  %v6963_v36 = vrot.slane %v18711_v2, 2  ;;  %v17199_v12 = vld [vmem:[%s21355_s4 + $0x200] sm:$0xff]  }
  0xfc   : > { %15178 = vmatpush3.bf16.msra.mxu1 %v17160_v10  ;;  %14189 = vmatprep.mubr.msk.bf16.mxu0 %vm17656_vm0, %v17655_v1  ;;  %v17191_v10 = vld [vmem:[%s21355_s4 + $0x1e8] sm:$0xff]  }
  0xfd   : > { %14207 = vmatprep.subr.bf16.mxu0 %v17655_v1  ;;  %15161 = vmatprep.mubr.msk.bf16.mxu1 %vm17656_vm0, %v17655_v1 }
  0xfe   : > { %15179 = vmatprep.subr.bf16.mxu1 %v17655_v1 }
  0xff   : > { %14208 = vmatpush3.bf16.msra.mxu0 %v17161_v16  ;;  %v17195_v16 = vld [vmem:[%s17790_s23 + $0x30] ss:$0 sps:$4 sm:$0x11]  }
 0x100   : > { %15180 = vmatpush3.bf16.msra.mxu1 %v17162_v21  ;;  %14209 = vmatprep.subr.bf16.mxu0 %v17655_v1  ;;  %v17193_v21 = vld [vmem:[%s21355_s4 + $0x1f0] sm:$0xff]  }
 0x101   : > { %15181 = vmatprep.subr.bf16.mxu1 %v17655_v1 }
 0x102   : > { %14190 = vmatmul.mubr.bf16.gmra.mrb[8].mxu0 %v1518_v55  ;;  %v6964_v55 = vsel %vm1511_vm4, %v6961_v7, %v6963_v36 }
 0x103   : > { %15162 = vmatmul.mubr.bf16.gmra.mrb[8].mxu1 %v6760_v24  ;;  %14210 = vmatpush3.bf16.msra.mxu0 %v17163_v54  ;;  %v1723_v54 = vsel %vm1511_vm4, %v1720_v51, %v1722_v3  ;;  %v17194_v24 = vld [vmem:[%s21355_s4 + $0x1f0] sm:$0xff]  }
 0x104   : > { %15182 = vmatpush3.bf16.msra.mxu1 %v17164_v26  ;;  %14193 = vmatprep.mubr.msk.bf16.mxu0 %vm17656_vm0, %v17655_v1  ;;  %v1885_v26 = vshrl.u32 %v18631_v45, 16 }
 0x105   : > { %15165 = vmatprep.mubr.msk.bf16.mxu1 %vm17656_vm0, %v17655_v1  ;;  %14211 = vmatprep.subr.bf16.mxu0 %v17655_v1 }
 0x106   : > { %15183 = vmatprep.subr.bf16.mxu1 %v17655_v1 }
 0x107   : > { %14212 = vmatpush3.bf16.msra.mxu0 %v17165_v28  ;;  %v1893_v28 = vshrl.u32 %v18623_v42, 16 }
 0x108   : > { %15184 = vmatpush3.bf16.msra.mxu1 %v17166_v32  ;;  %14213 = vmatprep.subr.bf16.mxu0 %v17655_v1  ;;  %v7124_v32 = vshrl.u32 %v18634_v46, 16  ;;  %v7129_v46 = vrot.slane %v7127_v6, 3  ;;  %v17206_v6 = vld [vmem:[%s21355_s4 + $0x218] sm:$0xff]  }
 0x109   : > { %15185 = vmatprep.subr.bf16.mxu1 %v17655_v1  ;;  %v1895_v40 = vrot.slane %v1893_v28, 2  ;;  %v1920_v28 = vshrl.u32 %v18708_v58, 16 }
 0x10a   : > { %14194 = vmatmul.mubr.bf16.gmra.mrb[12].mxu0 %v1520_v25  ;;  %v6965_v25 = vrot.slane %v17196_v18, 2  ;;  %v7126_v45 = vrot.slane %v7124_v32, 2 }
 0x10b   : > { %15166 = vmatmul.mubr.bf16.gmra.mrb[12].mxu1 %v6762_v30  ;;  %14197 = vmatprep.mubr.msk.bf16.mxu0 %vm17656_vm0, %v17655_v1  ;;  %v7132_v30 = vshrl.u32 %v18626_v43, 16 }
 0x10c   : > { %14214 = vmatpush3.bf16.msra.mxu0 %v17167_v50  ;;  %15169 = vmatprep.mubr.msk.bf16.mxu1 %vm17656_vm0, %v17655_v1  ;;  %v1724_v50 = vrot.slane %v17195_v16, 2  ;;  %v6966_v52 = vsel %vm1511_vm4, %v6963_v36, %v6965_v25  ;;  %v7153_v36 = vshll.u32 %v18685_v5, 16  ;;  %v17204_v16 = vld [vmem:[%s21355_s4 + $0x210] sm:$0xff]   ;;  %v7162_v25 = vshll.u32 %v18711_v2, 16 }
 0x10d   : > { %15186 = vmatpush3.bf16.msra.mxu1 %v17168_v31  ;;  %14215 = vmatprep.subr.bf16.mxu0 %v17655_v1  ;;  %v7135_v31 = vshll.u32 %v18626_v43, 16  ;;  %v7134_v48 = vrot.slane %v7132_v30, 2  ;;  %v18824_v30 = vld [vmem:[%s17790_s23 + $0x30] ss:$0 sps:$4 sm:$0x33]  }
 0x10e   : > { %15187 = vmatprep.subr.bf16.mxu1 %v17655_v1 }
 0x10f   : > { %v7137_v49 = vrot.slane %v7135_v31, 3 }
 0x110   : > { %14216 = vmatpush3.bf16.msra.mxu0 %v17169_v35  ;;  %v17198_v35 = vld [vmem:[%s21355_s4 + $0x1f8] sm:$0xff]  }
 0x111   : > { %15188 = vmatpush3.bf16.msra.mxu1 %v17170_v22  ;;  %14237 = vmatprep.subr.bf16.mxu0 %v17655_v1  ;;  %v1887_v22 = vrot.slane %v1885_v26, 2  ;;  %v7138_v63 = vor.u32 %v7137_v49, %v7134_v48  ;;  %v7155_v26 = vrot.slane %v7153_v36, 3  ;;  %v1929_v48 = vshrl.u32 %v18824_v30, 16 }
 0x112   : > { %14198 = vmatmul.mubr.bf16.gmra.mrb[16].mxu0 %v1522_v44  ;;  %15209 = vmatprep.subr.bf16.mxu1 %v17655_v1  ;;  %v1898_v44 = vrot.slane %v1896_v29, 3  ;;  %v1923_v29 = vshll.u32 %v18708_v58, 16  ;;  %v1932_v49 = vshll.u32 %v18824_v30, 16 }
 0x113   : > { %15170 = vmatmul.mubr.bf16.gmra.mrb[16].mxu1 %v6764_v47  ;;  %14217 = vmatprep.mubr.msk.bf16.mxu0 %vm17656_vm0, %v17655_v1  ;;  %v1725_v47 = vsel %vm1511_vm4, %v1722_v3, %v1724_v50  ;;  %v7150_v3 = vshrl.u32 %v18685_v5, 16  ;;  %v7159_v50 = vshrl.u32 %v18711_v2, 16 }
 0x114   : > { %15189 = vmatprep.mubr.msk.bf16.mxu1 %vm17656_vm0, %v17655_v1 }
 0x11a   : > { %14218 = vmatmul.mubr.bf16.vlgmr.msra.gmra.mrb[0].mxu0 %v1717_v56  ;;  %v1891_v56 = vor.u32 %v1890_v34, %v1887_v22  ;;  %v17208_v22 = vld [vmem:[%s21355_s4 + $0x220] sm:$0xff]   ;;  %v1922_v34 = vrot.slane %v1920_v28, 2  ;;  %v2100_v28 = vrot.slane %v18677_v0, 3 }
 0x11b   : > { %15190 = vmatmul.mubr.bf16.vlgmr.msra.gmra.mrb[0].mxu1 %v6958_v59  ;;  %14238 = vmatpush3.bf16.msra.mxu0 %v17175_v15  ;;  %v1905_v15 = vshll.u32 %v18651_v39, 16  ;;  %v1899_v59 = vor.u32 %v1898_v44, %v1895_v40  ;;  %v1925_v40 = vrot.slane %v1923_v29, 3  ;;  %v17225_v29 = vld [vmem:[%s21355_s4 + $0x258] sm:$0xff]  }
 0x11c   : > { %15210 = vmatpush3.bf16.msra.mxu1 %v17176_v60  ;;  %14239 = vmatprep.subr.bf16.mxu0 %v17655_v1  ;;  %v7141_v60 = vshrl.u32 %v18655_v57, 16 }
 0x11d   : > { %15211 = vmatprep.subr.bf16.mxu1 %v17655_v1  ;;  %14221 = vmatprep.mubr.msk.bf16.mxu0 %vm17656_vm0, %v17655_v1 }
 0x11e   : > { %15193 = vmatprep.mubr.msk.bf16.mxu1 %vm17656_vm0, %v17655_v1  ;;  %v7143_v51 = vrot.slane %v7141_v60, 2  ;;  %v17210_v60 = vld [vmem:[%s21355_s4 + $0x228] sm:$0xff]  }
 0x11f   : > { %14240 = vmatpush3.bf16.msra.mxu0 %v17177_v61  ;;  %v7144_v61 = vshll.u32 %v18655_v57, 16 }
 0x120   : > { %15212 = vmatpush3.bf16.msra.mxu1 %v17178_v62  ;;  %14241 = vmatprep.subr.bf16.mxu0 %v17655_v1  ;;  %v7130_v62 = vor.u32 %v7129_v46, %v7126_v45  ;;  %v7161_v45 = vrot.slane %v7159_v50, 2  ;;  %v7164_v46 = vrot.slane %v7162_v25, 3  ;;  %v17228_v25 = vld [vmem:[%s21355_s4 + $0x260] sm:$0xff]  }
 0x121   : > { %15213 = vmatprep.subr.bf16.mxu1 %v17655_v1 }
 0x122   : > { %14222 = vmatmul.mubr.bf16.gmra.mrb[4].mxu0 %v1719_v13  ;;  %v1907_v13 = vrot.slane %v1905_v15, 3  ;;  %v7139_v7 = vsel %vm1883_vm5, %v7130_v62, %v7138_v63  ;;  %v1934_v62 = vrot.slane %v1932_v49, 3 }
 0x123   : > { %15194 = vmatmul.mubr.bf16.gmra.mrb[4].mxu1 %v6960_v17  ;;  %14242 = vmatpush3.bf16.msra.mxu0 %v17181_v19  ;;  %v17200_v19 = vld [vmem:[%s21355_s4 + $0x200] sm:$0xff]   ;;  %v1900_v17 = vsel %vm1883_vm5, %v1891_v56, %v1899_v59 }
 0x124   : > { %15214 = vmatpush3.bf16.msra.mxu1 %v17182_v4  ;;  %14225 = vmatprep.mubr.msk.bf16.mxu0 %vm17656_vm0, %v17655_v1  ;;  %v1904_v4 = vrot.slane %v1902_v53, 2  ;;  %v17209_v53 = vld [vmem:[%s21355_s4 + $0x228] sm:$0xff]  }
 0x125   : > { %14243 = vmatprep.subr.bf16.mxu0 %v17655_v1  ;;  %15197 = vmatprep.mubr.msk.bf16.mxu1 %vm17656_vm0, %v17655_v1 }
 0x126   : > { %15215 = vmatprep.subr.bf16.mxu1 %v17655_v1 }
 0x127   : > { %14244 = vmatpush3.bf16.msra.mxu0 %v17184_v23  ;;  %v7146_v23 = vrot.slane %v7144_v61, 3  ;;  %v1931_v61 = vrot.slane %v1929_v48, 2  ;;  %v17234_v48 = vld [vmem:[%s21355_s4 + $0x278] sm:$0xff]  }
 0x128   : > { %15216 = vmatpush3.bf16.msra.mxu1 %v17186_v14  ;;  %14245 = vmatprep.subr.bf16.mxu0 %v17655_v1  ;;  %v1911_v14 = vshrl.u32 %v18677_v0, 16 }
 0x129   : > { %15217 = vmatprep.subr.bf16.mxu1 %v17655_v1 }
 0x12a   : > { %14226 = vmatmul.mubr.bf16.gmra.mrb[8].mxu0 %v1721_v9  ;;  %v17202_v9 = vld [vmem:[%s21355_s4 + $0x208] sm:$0xff]   ;;  %v1913_v18 = vrot.slane %v1911_v14, 2 }
 0x12b   : > { %15198 = vmatmul.mubr.bf16.gmra.mrb[8].mxu1 %v6962_v38  ;;  %14246 = vmatpush3.bf16.msra.mxu0 %v17187_v20  ;;  %v1914_v20 = vshll.u32 %v18677_v0, 16  ;;  %v1908_v38 = vor.u32 %v1907_v13, %v1904_v4  ;;  %v2073_v14 = vld [vmem:[%s17790_s23 + $0x8] sm:$0x8]  ;;  %v17227_v0 = vld [vmem:[%s21355_s4 + $0x260] sm:$0xff]  }
 0x12c   : > { %15218 = vmatpush3.bf16.msra.mxu1 %v17188_v8  ;;  %14229 = vmatprep.mubr.msk.bf16.mxu0 %vm17656_vm0, %v17655_v1  ;;  %v17201_v8 = vld [vmem:[%s21355_s4 + $0x208] sm:$0xff]  }
 0x12d   : > { %15201 = vmatprep.mubr.msk.bf16.mxu1 %vm17656_vm0, %v17655_v1  ;;  %14247 = vmatprep.subr.bf16.mxu0 %v17655_v1 }
 0x12e   : > { %15219 = vmatprep.subr.bf16.mxu1 %v17655_v1 }
 0x12f   : > { %14248 = vmatpush3.bf16.msra.mxu0 %v17191_v10  ;;  %v7147_v10 = vor.u32 %v7146_v23, %v7143_v51  ;;  %v1935_v51 = vor.u32 %v1934_v62, %v1931_v61  ;;  %v17215_v23 = vld [vmem:[%s21355_s4 + $0x238] sm:$0xff]   ;;  %v17238_v61 = vld [vmem:[%s21355_s4 + $0x280] sm:$0xff]   ;;  %v17239_v62 = vld [vmem:[%s21355_s4 + $0x288] sm:$0xff]  }
 0x130   : > { %15220 = vmatpush3.bf16.msra.mxu1 %v17192_v11  ;;  %14249 = vmatprep.subr.bf16.mxu0 %v17655_v1  ;;  %v17203_v11 = vld [vmem:[%s21355_s4 + $0x210] sm:$0xff]  }
 0x131   : > { %15221 = vmatprep.subr.bf16.mxu1 %v17655_v1 }
 0x132   : > { %14230 = vmatmul.mubr.bf16.gmra.mrb[12].mxu0 %v1723_v54  ;;  %v1909_v54 = vsel %vm1883_vm5, %v1899_v59, %v1908_v38  ;;  %v7165_v59 = vor.u32 %v7164_v46, %v7161_v45  ;;  %v2104_v45 = vrot.slane %v18824_v30, 3 }
 0x133   : > { %15202 = vmatmul.mubr.bf16.gmra.mrb[12].mxu1 %v6964_v55  ;;  %14233 = vmatprep.mubr.msk.bf16.mxu0 %vm17656_vm0, %v17655_v1  ;;  %v7148_v55 = vsel %vm1883_vm5, %v7138_v63, %v7147_v10  ;;  %v17211_v63 = vld [vmem:[%s21355_s4 + $0x230] sm:$0xff]  }
 0x134   : > { %14250 = vmatpush3.bf16.msra.mxu0 %v17193_v21  ;;  %15205 = vmatprep.mubr.msk.bf16.mxu1 %vm17656_vm0, %v17655_v1  ;;  %v1916_v21 = vrot.slane %v1914_v20, 3  ;;  %v7312_v20 = vld [vmem:[%s17821_s25 + $0x8] sm:$0x8] }
 0x135   : > { %15222 = vmatpush3.bf16.msra.mxu1 %v17194_v24  ;;  %14251 = vmatprep.subr.bf16.mxu0 %v17655_v1  ;;  %v7152_v24 = vrot.slane %v7150_v3, 2  ;;  %v12723_v3 = vcombine.low %v7312_v20, %v18619_v41  ;;  %v7333_v41 = vrot.slane %v18626_v43, 3  ;;  %v17222_v43 = vld [vmem:[%s21355_s4 + $0x248] sm:$0xff]   ;;  %v17250_v20 = vld [vmem:[%s21355_s4 + $0x2a0] sm:$0xff]  }
 0x136   : > { %15223 = vmatprep.subr.bf16.mxu1 %v17655_v1  ;;  %v1917_v32 = vor.u32 %v1916_v21, %v1913_v18  ;;  %v17219_v18 = vld [vmem:[%s21355_s4 + $0x240] sm:$0xff]  }
 0x137   : > { %v7156_v31 = vor.u32 %v7155_v26, %v7152_v24  ;;  %v7335_v24 = vrot.slane %v18655_v57, 3  ;;  %v17223_v26 = vld [vmem:[%s21355_s4 + $0x250] sm:$0xff]  }
 0x138   : > { %14252 = vmatpush3.bf16.msra.mxu0 %v17197_v33  ;;  %v17207_v33 = vld [vmem:[%s21355_s4 + $0x220] sm:$0xff]   ;;  %v1918_v44 = vsel %vm1883_vm5, %v1908_v38, %v1917_v32  ;;  %v12008_v38 = vcombine.low %v2073_v14, %v18613_v37  ;;  %v7332_v37 = vrot.slane %v12723_v3, 3  ;;  %v19091_v3 = vld [vmem:[%s18496_s13 + $0x18] sm:$0xff]  }
 0x139   : > { %15224 = vmatpush3.bf16.msra.mxu1 %v17198_v35  ;;  %14273 = vmatprep.subr.bf16.mxu0 %v17655_v1  ;;  %v18835_v35 = vld [vmem:[%s17821_s25 + $0x30] ss:$0 sps:$4 sm:$0x33]   ;;  %v7336_v57 = vsel %vm2094_vm6, %v7333_v41, %v7335_v24  ;;  %v17249_v14 = vld [vmem:[%s21355_s4 + $0x2a0] sm:$0xff]  }
 0x13a   : > { %14234 = vmatmul.mubr.bf16.gmra.mrb[16].mxu0 %v1725_v47  ;;  %15245 = vmatprep.subr.bf16.mxu1 %v17655_v1  ;;  %v7157_v47 = vsel %vm1883_vm5, %v7147_v10, %v7156_v31  ;;  %v7168_v15 = vshrl.u32 %v18835_v35, 16  ;;  %v7171_v56 = vshll.u32 %v18835_v35, 16  ;;  %v2095_v10 = vrot.slane %v12008_v38, 3  ;;  %v17254_v38 = vld [vmem:[%s21355_s4 + $0x2a8] sm:$0xff]  }
 0x13b   : > { %15206 = vmatmul.mubr.bf16.gmra.mrb[16].mxu1 %v6966_v52  ;;  %14253 = vmatprep.mubr.msk.bf16.mxu0 %vm17656_vm0, %v17655_v1  ;;  %v1926_v52 = vor.u32 %v1925_v40, %v1922_v34  ;;  %v7334_v21 = vsel %vm2094_vm6, %v7332_v37, %v7333_v41  ;;  %v17230_v34 = vld [vmem:[%s21355_s4 + $0x268] sm:$0xff]   ;;  %v7341_v46 = vrot.slane %v18835_v35, 3  ;;  %v2242_v35 = vld [vmem:[%s17821_s25] sm:$0xf]  ;;  %v2251_v37 = vld [vmem:[%s17821_s25 + $0x24] sm:$0x7] }
 0x13c   : > { %15225 = vmatprep.mubr.msk.bf16.mxu1 %vm17656_vm0, %v17655_v1  ;;  %v7170_v4 = vrot.slane %v7168_v15, 2  ;;  %v7173_v13 = vrot.slane %v7171_v56, 3  ;;  %v19003_v15 = vld [vmem:[%s18496_s13 + $0x4] sm:$0xf]  ;;  %v19109_v41 = vld [vmem:[%s18496_s13 + $0x20] sm:$0xf] }
 0x142   : > { %14254 = vmatmul.mubr.bf16.vlgmr.msra.gmra.mrb[0].mxu0 %v1900_v17  ;;  %v7166_v17 = vsel %vm1883_vm5, %v7156_v31, %v7165_v59  ;;  %v2102_v31 = vrot.slane %v18708_v58, 3  ;;  %v17231_v58 = vld [vmem:[%s21355_s4 + $0x270] sm:$0xff]  }
 0x143   : > { %15226 = vmatmul.mubr.bf16.vlgmr.msra.gmra.mrb[0].mxu1 %v7139_v7  ;;  %14274 = vmatpush3.bf16.msra.mxu0 %v17199_v12  ;;  %v1927_v12 = vsel %vm1883_vm5, %v1917_v32, %v1926_v52  ;;  %v7174_v7 = vor.u32 %v7173_v13, %v7170_v4  ;;  %v7337_v32 = vrot.slane %v18685_v5, 3  ;;  %v17243_v4 = vld [vmem:[%s21355_s4 + $0x290] sm:$0xff]  }
 0x144   : > { %15246 = vmatpush3.bf16.msra.mxu1 %v17200_v19  ;;  %14275 = vmatprep.subr.bf16.mxu0 %v17655_v1  ;;  %v17212_v19 = vld [vmem:[%s21355_s4 + $0x230] sm:$0xff]   ;;  %v2103_v40 = vsel %vm2094_vm6, %v2100_v28, %v2102_v31  ;;  %v2105_v30 = vsel %vm2094_vm6, %v2102_v31, %v2104_v45  ;;  %v17266_v45 = vld [vmem:[%s21355_s4 + $0x2c8] sm:$0xff]  }
 0x145   : > { %15247 = vmatprep.subr.bf16.mxu1 %v17655_v1  ;;  %14257 = vmatprep.mubr.msk.bf16.mxu0 %vm17656_vm0, %v17655_v1  ;;  %v7175_v36 = vsel %vm1883_vm5, %v7165_v59, %v7174_v7  ;;  %v7338_v50 = vsel %vm2094_vm6, %v7335_v24, %v7337_v32  ;;  %v17244_v13 = vld [vmem:[%s21355_s4 + $0x290] sm:$0xff]  }
 0x146   : > { %15229 = vmatprep.mubr.msk.bf16.mxu1 %vm17656_vm0, %v17655_v1  ;;  %v19065_v7 = vld [vmem:[%s18496_s13 + $0x10] sm:$0xff]  }
 0x147   : > { %14276 = vmatpush3.bf16.msra.mxu0 %v17201_v8  ;;  %v17216_v8 = vld [vmem:[%s21355_s4 + $0x238] sm:$0xff]  }
 0x148   : > { %15248 = vmatpush3.bf16.msra.mxu1 %v17202_v9  ;;  %14277 = vmatprep.subr.bf16.mxu0 %v17655_v1  ;;  %v1936_v9 = vsel %vm1883_vm5, %v1926_v52, %v1935_v51  ;;  %v18995_v52 = vld [vmem:[%s17821_s25 + $0x4] sm:$0xf]  ;;  %v17248_v51 = vld [vmem:[%s21355_s4 + $0x298] sm:$0xff]  }
 0x149   : > { %15249 = vmatprep.subr.bf16.mxu1 %v17655_v1  ;;  %v19008_v56 = vcombine.low %v2242_v35, %v18995_v52  ;;  %v17268_v35 = vld [vmem:[%s21355_s4 + $0x2d0] sm:$0xff]  }
 0x14a   : > { %14258 = vmatmul.mubr.bf16.gmra.mrb[4].mxu0 %v1909_v54  ;;  %v17220_v54 = vld [vmem:[%s21355_s4 + $0x240] sm:$0xff]  }
 0x14b   : > { %15230 = vmatmul.mubr.bf16.gmra.mrb[4].mxu1 %v7148_v55  ;;  %14278 = vmatpush3.bf16.msra.mxu0 %v17203_v11  ;;  %v2096_v11 = vrot.slane %v18623_v42, 3  ;;  %v17221_v42 = vld [vmem:[%s21355_s4 + $0x248] sm:$0xff]   ;;  %v2098_v55 = vrot.slane %v18651_v39, 3  ;;  %v2452_v24 = vshrl.u32 %v19008_v56, 16 }
 0x14c   : > { %15250 = vmatpush3.bf16.msra.mxu1 %v17204_v16  ;;  %14261 = vmatprep.mubr.msk.bf16.mxu0 %vm17656_vm0, %v17655_v1 }
 0x14d   : > { %14279 = vmatprep.subr.bf16.mxu0 %v17655_v1  ;;  %15233 = vmatprep.mubr.msk.bf16.mxu1 %vm17656_vm0, %v17655_v1  ;;  %v2097_v16 = vsel %vm2094_vm6, %v2095_v10, %v2096_v11  ;;  %v2099_v39 = vsel %vm2094_vm6, %v2096_v11, %v2098_v55  ;;  %v2101_v5 = vsel %vm2094_vm6, %v2098_v55, %v2100_v28  ;;  %v17256_v10 = vld [vmem:[%s21355_s4 + $0x2b0] sm:$0xff]   ;;  %v19105_v11 = vld [vmem:[%s17821_s25 + $0x20] sm:$0xf] }
 0x14e   : > { %15251 = vmatprep.subr.bf16.mxu1 %v17655_v1 }
 0x14f   : > { %14280 = vmatpush3.bf16.msra.mxu0 %v17205_v27  ;;  %v17224_v27 = vld [vmem:[%s21355_s4 + $0x250] sm:$0xff]  }
 0x150   : > { %15252 = vmatpush3.bf16.msra.mxu1 %v17206_v6  ;;  %14281 = vmatprep.subr.bf16.mxu0 %v17655_v1  ;;  %v17226_v6 = vld [vmem:[%s21355_s4 + $0x258] sm:$0xff]  }
 0x151   : > { %15253 = vmatprep.subr.bf16.mxu1 %v17655_v1 }
 0x152   : > { %14262 = vmatmul.mubr.bf16.gmra.mrb[8].mxu0 %v1918_v44 }
 0x153   : > { %15234 = vmatmul.mubr.bf16.gmra.mrb[8].mxu1 %v7157_v47  ;;  %14282 = vmatpush3.bf16.msra.mxu0 %v17207_v33  ;;  %v17229_v33 = vld [vmem:[%s21355_s4 + $0x268] sm:$0xff]   ;;  %v17233_v47 = vld [vmem:[%s21355_s4 + $0x278] sm:$0xff]  }
 0x154   : > { %15254 = vmatpush3.bf16.msra.mxu1 %v17208_v22  ;;  %14265 = vmatprep.mubr.msk.bf16.mxu0 %vm17656_vm0, %v17655_v1  ;;  %v7339_v22 = vrot.slane %v18711_v2, 3  ;;  %v17232_v2 = vld [vmem:[%s21355_s4 + $0x270] sm:$0xff]  }
 0x155   : > { %15237 = vmatprep.mubr.msk.bf16.mxu1 %vm17656_vm0, %v17655_v1  ;;  %14283 = vmatprep.subr.bf16.mxu0 %v17655_v1 }
 0x156   : > { %15255 = vmatprep.subr.bf16.mxu1 %v17655_v1  ;;  %v7340_v44 = vsel %vm2094_vm6, %v7337_v32, %v7339_v22  ;;  %v7342_v49 = vsel %vm2094_vm6, %v7339_v22, %v7341_v46 }
 0x157   : > { %14284 = vmatpush3.bf16.msra.mxu0 %v17209_v53  ;;  %v7479_v53 = vld [vmem:[%s18496_s13] sm:$0xf] }
 0x158   : > { %15256 = vmatpush3.bf16.msra.mxu1 %v17210_v60  ;;  %14285 = vmatprep.subr.bf16.mxu0 %v17655_v1  ;;  %v19011_v59 = vcombine.low %v7479_v53, %v19003_v15  ;;  %v17237_v60 = vld [vmem:[%s21355_s4 + $0x280] sm:$0xff]  }
 0x159   : > { %15257 = vmatprep.subr.bf16.mxu1 %v17655_v1 }
 0x15a   : > { %14266 = vmatmul.mubr.bf16.gmra.mrb[12].mxu0 %v1927_v12  ;;  %v19029_v12 = vld [vmem:[%s17821_s25 + $0x8] sm:$0xff]  }
 0x15b   : > { %15238 = vmatmul.mubr.bf16.gmra.mrb[12].mxu1 %v7166_v17  ;;  %14269 = vmatprep.mubr.msk.bf16.mxu0 %vm17656_vm0, %v17655_v1  ;;  %v17246_v17 = vld [vmem:[%s21355_s4 + $0x298] sm:$0xff]  }
 0x15c   : > { %14286 = vmatpush3.bf16.msra.mxu0 %v17211_v63  ;;  %15241 = vmatprep.mubr.msk.bf16.mxu1 %vm17656_vm0, %v17655_v1  ;;  %v17240_v63 = vld [vmem:[%s21355_s4 + $0x288] sm:$0xff]  }
 0x15d   : > { %15258 = vmatpush3.bf16.msra.mxu1 %v17212_v19  ;;  %14287 = vmatprep.subr.bf16.mxu0 %v17655_v1  ;;  %v19037_v19 = vld [vmem:[%s18496_s13 + $0x8] sm:$0xff]  }
 0x15e   : > { %15259 = vmatprep.subr.bf16.mxu1 %v17655_v1  ;;  %v7694_v28 = vshll.u32 %v19037_v19, 16  ;;  %v7698_v22 = vshrl.u32 %v19037_v19, 16 }
 0x160   : > { %14288 = vmatpush3.bf16.msra.mxu0 %v17215_v23  ;;  %v19061_v23 = vld [vmem:[%s17821_s25 + $0x10] sm:$0xff]  }
 0x161   : > { %15260 = vmatpush3.bf16.msra.mxu1 %v17216_v8  ;;  %14309 = vmatprep.subr.bf16.mxu0 %v17655_v1  ;;  %v17253_v8 = vld [vmem:[%s21355_s4 + $0x2a8] sm:$0xff]   ;;  %v2467_v31 = vshll.u32 %v19061_v23, 16  ;;  %v2471_v53 = vshrl.u32 %v19061_v23, 16 }
 0x162   : > { %14270 = vmatmul.mubr.bf16.gmra.mrb[16].mxu0 %v1936_v9  ;;  %15281 = vmatprep.subr.bf16.mxu1 %v17655_v1  ;;  %v19083_v9 = vld [vmem:[%s17821_s25 + $0x18] sm:$0xff]  }
 0x163   : > { %15242 = vmatmul.mubr.bf16.gmra.mrb[16].mxu1 %v7175_v36  ;;  %14289 = vmatprep.mubr.msk.bf16.mxu0 %vm17656_vm0, %v17655_v1  ;;  %v17255_v36 = vld [vmem:[%s21355_s4 + $0x2b0] sm:$0xff]  }
 0x164   : > { %15261 = vmatprep.mubr.msk.bf16.mxu1 %vm17656_vm0, %v17655_v1 }
 0x16a   : > { %14290 = vmatmul.mubr.bf16.vlgmr.msra.gmra.mrb[0].mxu0 %v2097_v16  ;;  %v7488_v16 = vld [vmem:[%s18496_s13 + $0x24] sm:$0x7] }
 0x16b   : > { %15262 = vmatmul.mubr.bf16.vlgmr.msra.gmra.mrb[0].mxu1 %v7334_v21  ;;  %14310 = vmatpush3.bf16.msra.mxu0 %v17219_v18  ;;  %v2454_v18 = vshll.u32 %v19008_v56, 16  ;;  %v7689_v21 = vshll.u32 %v19011_v59, 16  ;;  %v12752_v55 = vcombine.low %v19109_v41, %v7488_v16 }
 0x16c   : > { %15282 = vmatpush3.bf16.msra.mxu1 %v17220_v54  ;;  %14311 = vmatprep.subr.bf16.mxu0 %v17655_v1  ;;  %v17261_v54 = vld [vmem:[%s21355_s4 + $0x2b8] sm:$0xff]  }
 0x16d   : > { %15283 = vmatprep.subr.bf16.mxu1 %v17655_v1  ;;  %14293 = vmatprep.mubr.msk.bf16.mxu0 %vm17656_vm0, %v17655_v1 }
 0x16e   : > { %15265 = vmatprep.mubr.msk.bf16.mxu1 %vm17656_vm0, %v17655_v1 }
 0x16f   : > { %14312 = vmatpush3.bf16.msra.mxu0 %v17221_v42  ;;  %v17262_v42 = vld [vmem:[%s21355_s4 + $0x2b8] sm:$0xff]  }
 0x170   : > { %15284 = vmatpush3.bf16.msra.mxu1 %v17222_v43  ;;  %14313 = vmatprep.subr.bf16.mxu0 %v17655_v1  ;;  %v12037_v43 = vcombine.low %v19105_v11, %v2251_v37  ;;  %v7714_v37 = vshrl.u32 %v19091_v3, 16 }
 0x171   : > { %15285 = vmatprep.subr.bf16.mxu1 %v17655_v1 }
 0x172   : > { %14294 = vmatmul.mubr.bf16.gmra.mrb[4].mxu0 %v2099_v39  ;;  %v2456_v39 = vrot.slane %v2454_v18, 1 }
 0x173   : > { %15266 = vmatmul.mubr.bf16.gmra.mrb[4].mxu1 %v7336_v57  ;;  %14314 = vmatpush3.bf16.msra.mxu0 %v17223_v26  ;;  %v2459_v26 = vshll.u32 %v19029_v12, 16  ;;  %v7687_v57 = vshrl.u32 %v19011_v59, 16 }
 0x174   : > { %15286 = vmatpush3.bf16.msra.mxu1 %v17224_v27  ;;  %14297 = vmatprep.mubr.msk.bf16.mxu0 %vm17656_vm0, %v17655_v1  ;;  %v7691_v27 = vrot.slane %v7689_v21, 1 }
 0x175   : > { %14315 = vmatprep.subr.bf16.mxu0 %v17655_v1  ;;  %15269 = vmatprep.mubr.msk.bf16.mxu1 %vm17656_vm0, %v17655_v1  ;;  %v2461_v32 = vrot.slane %v2459_v26, 1 }
 0x176   : > { %15287 = vmatprep.subr.bf16.mxu1 %v17655_v1 }
 0x177   : > { %14316 = vmatpush3.bf16.msra.mxu0 %v17225_v29  ;;  %v2457_v29 = vor.u32 %v2456_v39, %v2452_v24  ;;  %v17274_v24 = vld [vmem:[%s21355_s4 + $0x2e8] sm:$0xff]  }
 0x178   : > { %15288 = vmatpush3.bf16.msra.mxu1 %v17226_v6  ;;  %14317 = vmatprep.subr.bf16.mxu0 %v17655_v1  ;;  %v7692_v6 = vor.u32 %v7691_v27, %v7687_v57  ;;  %v17275_v57 = vld [vmem:[%s21355_s4 + $0x2f0] sm:$0xff]  }
 0x179   : > { %15289 = vmatprep.subr.bf16.mxu1 %v17655_v1  ;;  %v17276_v27 = vld [vmem:[%s21355_s4 + $0x2f0] sm:$0xff]  }
 0x17a   : > { %14298 = vmatmul.mubr.bf16.gmra.mrb[8].mxu0 %v2101_v5  ;;  %v17263_v5 = vld [vmem:[%s21355_s4 + $0x2c0] sm:$0xff]  }
 0x17b   : > { %15270 = vmatmul.mubr.bf16.gmra.mrb[8].mxu1 %v7338_v50  ;;  %14318 = vmatpush3.bf16.msra.mxu0 %v17227_v0  ;;  %v7696_v0 = vrot.slane %v7694_v28, 1  ;;  %v17264_v50 = vld [vmem:[%s21355_s4 + $0x2c0] sm:$0xff]  }
 0x17c   : > { %15290 = vmatpush3.bf16.msra.mxu1 %v17228_v25  ;;  %14301 = vmatprep.mubr.msk.bf16.mxu0 %vm17656_vm0, %v17655_v1  ;;  %v2463_v25 = vshrl.u32 %v19029_v12, 16 }
 0x17d   : > { %15273 = vmatprep.mubr.msk.bf16.mxu1 %vm17656_vm0, %v17655_v1  ;;  %14319 = vmatprep.subr.bf16.mxu0 %v17655_v1  ;;  %v7700_v46 = vor.u32 %v7698_v22, %v7696_v0 }
 0x17e   : > { %15291 = vmatprep.subr.bf16.mxu1 %v17655_v1 }
 0x17f   : > { %14320 = vmatpush3.bf16.msra.mxu0 %v17229_v33  ;;  %v2462_v33 = vsel %vm589_vm1, %v2457_v29, %v2461_v32 }
 0x180   : > { %15292 = vmatpush3.bf16.msra.mxu1 %v17230_v34  ;;  %14321 = vmatprep.subr.bf16.mxu0 %v17655_v1  ;;  %v7702_v34 = vshll.u32 %v19065_v7, 16 }
 0x181   : > { %15293 = vmatprep.subr.bf16.mxu1 %v17655_v1 }
 0x182   : > { %14302 = vmatmul.mubr.bf16.gmra.mrb[12].mxu0 %v2103_v40  ;;  %v17265_v40 = vld [vmem:[%s21355_s4 + $0x2c8] sm:$0xff]  }
 0x183   : > { %15274 = vmatmul.mubr.bf16.gmra.mrb[12].mxu1 %v7340_v44  ;;  %14305 = vmatprep.mubr.msk.bf16.mxu0 %vm17656_vm0, %v17655_v1  ;;  %v2469_v44 = vrot.slane %v2467_v31, 1 }
 0x184   : > { %14322 = vmatpush3.bf16.msra.mxu0 %v17231_v58  ;;  %15277 = vmatprep.mubr.msk.bf16.mxu1 %vm17656_vm0, %v17655_v1  ;;  %v7697_v58 = vsel %vm589_vm1, %v7692_v6, %v7696_v0  ;;  %v2626_v6 = vld [vmem:[%s17821_s25] sm:$0xe] }
 0x185   : > { %15294 = vmatpush3.bf16.msra.mxu1 %v17232_v2  ;;  %14323 = vmatprep.subr.bf16.mxu0 %v17655_v1  ;;  %v2465_v2 = vor.u32 %v2463_v25, %v2461_v32  ;;  %v17277_v32 = vld [vmem:[%s21355_s4 + $0x2f8] sm:$0xff]   ;;  %v7861_v0 = vld [vmem:[%s18496_s13] sm:$0xe]  ;;  %v12087_v31 = vcombine.low %v2626_v6, %v18995_v52  ;;  %v17308_v6 = vld [vmem:[%s21355_s4 + $0x350] sm:$0xff]  }
 0x186   : > { %15295 = vmatprep.subr.bf16.mxu1 %v17655_v1 }
 0x187   : > { %v2647_v22 = vrot.slane %v12087_v31, 1  ;;  %v17312_v31 = vld [vmem:[%s21355_s4 + $0x358] sm:$0xff]  }
 0x188   : > { %14324 = vmatpush3.bf16.msra.mxu0 %v17233_v47  ;;  %v7704_v47 = vrot.slane %v7702_v34, 1  ;;  %v2648_v34 = vrot.slane %v19029_v12, 1 }
 0x189   : > { %15296 = vmatpush3.bf16.msra.mxu1 %v17234_v48  ;;  %14345 = vmatprep.subr.bf16.mxu0 %v17655_v1  ;;  %v2430_v48 = vld [vmem:[%s17821_s25 + $0x24] sm:$0xf] }
 0x18a   : > { %14306 = vmatmul.mubr.bf16.gmra.mrb[16].mxu0 %v2105_v30  ;;  %15317 = vmatprep.subr.bf16.mxu1 %v17655_v1  ;;  %v7666_v30 = vld [vmem:[%s18496_s13 + $0x24] sm:$0xf]  ;;  %v2649_v52 = vsel %vm905_vm2, %v2647_v22, %v2648_v34 }
 0x18b   : > { %15278 = vmatmul.mubr.bf16.gmra.mrb[16].mxu1 %v7342_v49  ;;  %14325 = vmatprep.mubr.msk.bf16.mxu0 %vm17656_vm0, %v17655_v1  ;;  %v17267_v49 = vld [vmem:[%s21355_s4 + $0x2d0] sm:$0xff]   ;;  %v17313_v22 = vld [vmem:[%s21355_s4 + $0x360] sm:$0xff]  }
 0x18c   : > { %15297 = vmatprep.mubr.msk.bf16.mxu1 %vm17656_vm0, %v17655_v1 }
 0x192   : > { %14326 = vmatmul.mubr.bf16.vlgmr.msra.gmra.mrb[0].mxu0 %v19008_v56  ;;  %v2475_v56 = vshll.u32 %v19083_v9, 16 }
 0x193   : > { %15298 = vmatmul.mubr.bf16.vlgmr.msra.gmra.mrb[0].mxu1 %v19011_v59  ;;  %14346 = vmatpush3.bf16.msra.mxu0 %v17237_v60  ;;  %v7706_v59 = vshrl.u32 %v19065_v7, 16  ;;  %v7710_v60 = vshll.u32 %v19091_v3, 16 }
 0x194   : > { %15318 = vmatpush3.bf16.msra.mxu1 %v17238_v61  ;;  %14347 = vmatprep.subr.bf16.mxu0 %v17655_v1  ;;  %v2470_v61 = vsel %vm589_vm1, %v2465_v2, %v2469_v44 }
 0x195   : > { %15319 = vmatprep.subr.bf16.mxu1 %v17655_v1  ;;  %14329 = vmatprep.mubr.msk.bf16.mxu0 %vm17656_vm0, %v17655_v1 }
 0x196   : > { %15301 = vmatprep.mubr.msk.bf16.mxu1 %vm17656_vm0, %v17655_v1 }
 0x197   : > { %14348 = vmatpush3.bf16.msra.mxu0 %v17239_v62  ;;  %v7705_v62 = vsel %vm589_vm1, %v7700_v46, %v7704_v47  ;;  %v7884_v46 = vrot.slane %v19065_v7, 1 }
 0x198   : > { %15320 = vmatpush3.bf16.msra.mxu1 %v17240_v63  ;;  %14349 = vmatprep.subr.bf16.mxu0 %v17655_v1  ;;  %v19180_v63 = vcombine.low %v19105_v11, %v2430_v48  ;;  %v17286_v48 = vld [vmem:[%s21355_s4 + $0x310] sm:$0xff]  }
 0x199   : > { %15321 = vmatprep.subr.bf16.mxu1 %v17655_v1 }
 0x19a   : > { %14330 = vmatmul.mubr.bf16.gmra.mrb[4].mxu0 %v19029_v12  ;;  %v2483_v11 = vshll.u32 %v19180_v63, 16  ;;  %v2487_v28 = vshrl.u32 %v19180_v63, 16  ;;  %v17283_v12 = vld [vmem:[%s21355_s4 + $0x308] sm:$0xff]  }
 0x19b   : > { %15302 = vmatmul.mubr.bf16.gmra.mrb[4].mxu1 %v19037_v19  ;;  %14350 = vmatpush3.bf16.msra.mxu0 %v17243_v4  ;;  %v19183_v4 = vcombine.low %v19109_v41, %v7666_v30  ;;  %v2652_v30 = vrot.slane %v19083_v9, 1 }
 0x19c   : > { %15322 = vmatpush3.bf16.msra.mxu1 %v17244_v13  ;;  %14333 = vmatprep.mubr.msk.bf16.mxu0 %vm17656_vm0, %v17655_v1  ;;  %v2473_v13 = vor.u32 %v2471_v53, %v2469_v44  ;;  %v17282_v44 = vld [vmem:[%s21355_s4 + $0x300] sm:$0xff]   ;;  %v17288_v53 = vld [vmem:[%s21355_s4 + $0x318] sm:$0xff]  }
 0x19d   : > { %14351 = vmatprep.subr.bf16.mxu0 %v17655_v1  ;;  %15305 = vmatprep.mubr.msk.bf16.mxu1 %vm17656_vm0, %v17655_v1  ;;  %v7718_v41 = vshll.u32 %v19183_v4, 16  ;;  %v7722_v29 = vshrl.u32 %v19183_v4, 16 }
 0x19e   : > { %15323 = vmatprep.subr.bf16.mxu1 %v17655_v1 }
 0x19f   : > { %14352 = vmatpush3.bf16.msra.mxu0 %v17246_v17  ;;  %v2477_v17 = vrot.slane %v2475_v56, 1 }
 0x1a0   : > { %15324 = vmatpush3.bf16.msra.mxu1 %v17248_v51  ;;  %14353 = vmatprep.subr.bf16.mxu0 %v17655_v1  ;;  %v17269_v51 = vld [vmem:[%s21355_s4 + $0x2d8] sm:$0xff]  }
 0x1a1   : > { %15325 = vmatprep.subr.bf16.mxu1 %v17655_v1  ;;  %v2478_v16 = vsel %vm589_vm1, %v2473_v13, %v2477_v17  ;;  %v17292_v13 = vld [vmem:[%s21355_s4 + $0x328] sm:$0xff]  }
 0x1a2   : > { %14334 = vmatmul.mubr.bf16.gmra.mrb[8].mxu0 %v19061_v23 }
 0x1a3   : > { %15306 = vmatmul.mubr.bf16.gmra.mrb[8].mxu1 %v19065_v7  ;;  %14354 = vmatpush3.bf16.msra.mxu0 %v17249_v14  ;;  %v7708_v14 = vor.u32 %v7706_v59, %v7704_v47  ;;  %v17285_v47 = vld [vmem:[%s21355_s4 + $0x310] sm:$0xff]   ;;  %v17290_v59 = vld [vmem:[%s21355_s4 + $0x320] sm:$0xff]  }
 0x1a4   : > { %15326 = vmatpush3.bf16.msra.mxu1 %v17250_v20  ;;  %14337 = vmatprep.mubr.msk.bf16.mxu0 %vm17656_vm0, %v17655_v1  ;;  %v7712_v20 = vrot.slane %v7710_v60, 1  ;;  %v2654_v60 = vrot.slane %v19180_v63, 1  ;;  %v17293_v63 = vld [vmem:[%s21355_s4 + $0x330] sm:$0xff]  }
 0x1a5   : > { %15309 = vmatprep.mubr.msk.bf16.mxu1 %vm17656_vm0, %v17655_v1  ;;  %14355 = vmatprep.subr.bf16.mxu0 %v17655_v1 }
 0x1a6   : > { %15327 = vmatprep.subr.bf16.mxu1 %v17655_v1  ;;  %v7713_v18 = vsel %vm589_vm1, %v7708_v14, %v7712_v20  ;;  %v17295_v14 = vld [vmem:[%s21355_s4 + $0x338] sm:$0xff]  }
 0x1a7   : > { %14356 = vmatpush3.bf16.msra.mxu0 %v17253_v8  ;;  %v17270_v8 = vld [vmem:[%s21355_s4 + $0x2d8] sm:$0xff]  }
 0x1a8   : > { %15328 = vmatpush3.bf16.msra.mxu1 %v17254_v38  ;;  %14357 = vmatprep.subr.bf16.mxu0 %v17655_v1  ;;  %v17271_v38 = vld [vmem:[%s21355_s4 + $0x2e0] sm:$0xff]  }
 0x1a9   : > { %15329 = vmatprep.subr.bf16.mxu1 %v17655_v1 }
 0x1aa   : > { %14338 = vmatmul.mubr.bf16.gmra.mrb[12].mxu0 %v19083_v9 }
 0x1ab   : > { %15310 = vmatmul.mubr.bf16.gmra.mrb[12].mxu1 %v19091_v3  ;;  %14341 = vmatprep.mubr.msk.bf16.mxu0 %vm17656_vm0, %v17655_v1 }
 0x1ac   : > { %14358 = vmatpush3.bf16.msra.mxu0 %v17255_v36  ;;  %15313 = vmatprep.mubr.msk.bf16.mxu1 %vm17656_vm0, %v17655_v1  ;;  %v17272_v36 = vld [vmem:[%s21355_s4 + $0x2e0] sm:$0xff]  }
 0x1ad   : > { %15330 = vmatpush3.bf16.msra.mxu1 %v17256_v10  ;;  %14359 = vmatprep.subr.bf16.mxu0 %v17655_v1  ;;  %v2479_v10 = vshrl.u32 %v19083_v9, 16  ;;  %v17289_v9 = vld [vmem:[%s21355_s4 + $0x320] sm:$0xff]  }
 0x1ae   : > { %15331 = vmatprep.subr.bf16.mxu1 %v17655_v1 }
 0x1af   : > { %v2481_v21 = vor.u32 %v2479_v10, %v2477_v17  ;;  %v2655_v17 = vsel %vm905_vm2, %v2652_v30, %v2654_v60  ;;  %v17300_v10 = vld [vmem:[%s18496_s13 + $0xc] sm:$0xff]  }
 0x1b0   : > { %14360 = vmatpush3.bf16.msra.mxu0 %v17261_v54  ;;  %v2485_v54 = vrot.slane %v2483_v11, 1 }
 0x1b1   : > { %15332 = vmatpush3.bf16.msra.mxu1 %v17262_v42  ;;  %14381 = vmatprep.subr.bf16.mxu0 %v17655_v1  ;;  %v17273_v42 = vld [vmem:[%s21355_s4 + $0x2e8] sm:$0xff]  }
 0x1b2   : > { %14342 = vmatmul.mubr.bf16.gmra.mrb[16].mxu0 %v12037_v43  ;;  %15353 = vmatprep.subr.bf16.mxu1 %v17655_v1  ;;  %v7716_v43 = vor.u32 %v7714_v37, %v7712_v20  ;;  %v2486_v26 = vsel %vm589_vm1, %v2481_v21, %v2485_v54  ;;  %v17296_v20 = vld [vmem:[%s21355_s4 + $0x338] sm:$0xff]  }
 0x1b3   : > { %15314 = vmatmul.mubr.bf16.gmra.mrb[16].mxu1 %v12752_v55  ;;  %14361 = vmatprep.mubr.msk.bf16.mxu0 %vm17656_vm0, %v17655_v1  ;;  %v7720_v55 = vrot.slane %v7718_v41, 1  ;;  %v17305_v21 = vld [vmem:[%s17821_s25 + $0x14] sm:$0xff]  }
 0x1b4   : > { %15333 = vmatprep.mubr.msk.bf16.mxu1 %vm17656_vm0, %v17655_v1 }
 0x1b5   : > { %v7721_v39 = vsel %vm589_vm1, %v7716_v43, %v7720_v55  ;;  %v7724_v25 = vor.u32 %v7722_v29, %v7720_v55  ;;  %v17302_v55 = vld [vmem:[%s21355_s4 + $0x340] sm:$0xff]  }
 0x1b6   : > { %v17309_v29 = vld [vmem:[%s17821_s25 + $0x1c] sm:$0xff]  }
 0x1ba   : > { %14362 = vmatmul.mubr.bf16.vlgmr.msra.gmra.mrb[0].mxu0 %v2462_v33  ;;  %v12802_v33 = vcombine.low %v7861_v0, %v19003_v15  ;;  %v17281_v15 = vld [vmem:[%s21355_s4 + $0x300] sm:$0xff]  }
 0x1bb   : > { %15334 = vmatmul.mubr.bf16.vlgmr.msra.gmra.mrb[0].mxu1 %v7697_v58  ;;  %14382 = vmatpush3.bf16.msra.mxu0 %v17263_v5  ;;  %v17278_v5 = vld [vmem:[%s21355_s4 + $0x2f8] sm:$0xff]  }
 0x1bc   : > { %15354 = vmatpush3.bf16.msra.mxu1 %v17264_v50  ;;  %14383 = vmatprep.subr.bf16.mxu0 %v17655_v1  ;;  %v2489_v50 = vor.u32 %v2487_v28, %v2485_v54  ;;  %v7881_v58 = vrot.slane %v12802_v33, 1  ;;  %v17307_v28 = vld [vmem:[%s21355_s4 + $0x350] sm:$0xff]   ;;  %v17311_v0 = vld [vmem:[%s18496_s13 + $0x1c] sm:$0xff]  }
 0x1bd   : > { %15355 = vmatprep.subr.bf16.mxu1 %v17655_v1  ;;  %14365 = vmatprep.mubr.msk.bf16.mxu0 %vm17656_vm0, %v17655_v1 }
 0x1be   : > { %15337 = vmatprep.mubr.msk.bf16.mxu1 %vm17656_vm0, %v17655_v1 }
 0x1bf   : > { %14384 = vmatpush3.bf16.msra.mxu0 %v17265_v40  ;;  %v7882_v40 = vrot.slane %v19037_v19, 1  ;;  %v17284_v19 = vld [vmem:[%s21355_s4 + $0x308] sm:$0xff]  }
 0x1c0   : > { %15356 = vmatpush3.bf16.msra.mxu1 %v17266_v45  ;;  %14385 = vmatprep.subr.bf16.mxu0 %v17655_v1  ;;  %v2650_v45 = vrot.slane %v19061_v23, 1 }
 0x1c1   : > { %15357 = vmatprep.subr.bf16.mxu1 %v17655_v1  ;;  %v7883_v2 = vsel %vm905_vm2, %v7881_v58, %v7882_v40  ;;  %v7885_v7 = vsel %vm905_vm2, %v7882_v40, %v7884_v46  ;;  %v17314_v40 = vld [vmem:[%s21355_s4 + $0x360] sm:$0xff]  }
 0x1c2   : > { %14366 = vmatmul.mubr.bf16.gmra.mrb[4].mxu0 %v2470_v61  ;;  %v2651_v23 = vsel %vm905_vm2, %v2648_v34, %v2650_v45  ;;  %v17291_v61 = vld [vmem:[%s21355_s4 + $0x328] sm:$0xff]  }
 0x1c3   : > { %15338 = vmatmul.mubr.bf16.gmra.mrb[4].mxu1 %v7705_v62  ;;  %14386 = vmatpush3.bf16.msra.mxu0 %v17267_v49  ;;  %v17287_v49 = vld [vmem:[%s21355_s4 + $0x318] sm:$0xff]   ;;  %v7888_v62 = vrot.slane %v19183_v4, 1  ;;  %v19412_v34 = vld [vmem:[%s17821_s25 + $0x24] sm:$0xff]  }
 0x1c4   : > { %15358 = vmatpush3.bf16.msra.mxu1 %v17268_v35  ;;  %14369 = vmatprep.mubr.msk.bf16.mxu0 %vm17656_vm0, %v17655_v1  ;;  %v7886_v35 = vrot.slane %v19091_v3, 1  ;;  %v2653_v3 = vsel %vm905_vm2, %v2650_v45, %v2652_v30  ;;  %v19435_v45 = vld [vmem:[%s17821_s25 + $0x8] sm:$0xf] }
 0x1c5   : > { %14387 = vmatprep.subr.bf16.mxu0 %v17655_v1  ;;  %15341 = vmatprep.mubr.msk.bf16.mxu1 %vm17656_vm0, %v17655_v1 }
 0x1c6   : > { %15359 = vmatprep.subr.bf16.mxu1 %v17655_v1  ;;  %v7887_v56 = vsel %vm905_vm2, %v7884_v46, %v7886_v35  ;;  %v7889_v4 = vsel %vm905_vm2, %v7886_v35, %v7888_v62  ;;  %v8222_v46 = vld [vmem:[%s18496_s13 + $0x4] sm:$0xe] }
 0x1c7   : > { %14388 = vmatpush3.bf16.msra.mxu0 %v17269_v51  ;;  %v17294_v51 = vld [vmem:[%s21355_s4 + $0x330] sm:$0xff]  }
 0x1c8   : > { %15360 = vmatpush3.bf16.msra.mxu1 %v17270_v8  ;;  %14389 = vmatprep.subr.bf16.mxu0 %v17655_v1  ;;  %v17297_v8 = vld [vmem:[%s17821_s25 + $0x4] sm:$0xfe]  }
 0x1c9   : > { %15361 = vmatprep.subr.bf16.mxu1 %v17655_v1  ;;  %v2844_v11 = vrot.slane %v17297_v8, 1 }
 0x1ca   : > { %14370 = vmatmul.mubr.bf16.gmra.mrb[8].mxu0 %v2478_v16  ;;  %v8078_v16 = vrot.slane %v17300_v10, 1 }
 0x1cb   : > { %15342 = vmatmul.mubr.bf16.gmra.mrb[8].mxu1 %v7713_v18  ;;  %14390 = vmatpush3.bf16.msra.mxu0 %v17271_v38  ;;  %v17298_v38 = vld [vmem:[%s17821_s25 + $0xc] sm:$0xff]   ;;  %v17301_v18 = vld [vmem:[%s21355_s4 + $0x340] sm:$0xff]  }
 0x1cc   : > { %15362 = vmatpush3.bf16.msra.mxu1 %v17272_v36  ;;  %14373 = vmatprep.mubr.msk.bf16.mxu0 %vm17656_vm0, %v17655_v1  ;;  %v17299_v36 = vld [vmem:[%s18496_s13 + $0x4] sm:$0xfe]   ;;  %v2845_v37 = vrot.slane %v17298_v38, 1  ;;  %v19480_v38 = vld [vmem:[%s17821_s25 + $0x14] sm:$0xff]  }
 0x1cd   : > { %15345 = vmatprep.mubr.msk.bf16.mxu1 %vm17656_vm0, %v17655_v1  ;;  %14391 = vmatprep.subr.bf16.mxu0 %v17655_v1  ;;  %v8077_v41 = vrot.slane %v17299_v36, 1 }
 0x1ce   : > { %15363 = vmatprep.subr.bf16.mxu1 %v17655_v1  ;;  %v2846_v54 = vsel %vm905_vm2, %v2844_v11, %v2845_v37 }
 0x1cf   : > { %14392 = vmatpush3.bf16.msra.mxu0 %v17273_v42  ;;  %v17306_v42 = vld [vmem:[%s18496_s13 + $0x14] sm:$0xff]   ;;  %v8079_v43 = vsel %vm905_vm2, %v8077_v41, %v8078_v16 }
 0x1d0   : > { %15364 = vmatpush3.bf16.msra.mxu1 %v17274_v24  ;;  %14393 = vmatprep.subr.bf16.mxu0 %v17655_v1  ;;  %v17303_v24 = vld [vmem:[%s21355_s4 + $0x348] sm:$0xff]   ;;  %v19483_v41 = vld [vmem:[%s18496_s13 + $0x14] sm:$0xff]  }
 0x1d1   : > { %15365 = vmatprep.subr.bf16.mxu1 %v17655_v1 }
 0x1d2   : > { %14374 = vmatmul.mubr.bf16.gmra.mrb[12].mxu0 %v2486_v26  ;;  %v17304_v26 = vld [vmem:[%s21355_s4 + $0x348] sm:$0xff]  }
 0x1d3   : > { %15346 = vmatmul.mubr.bf16.gmra.mrb[12].mxu1 %v7721_v39  ;;  %14377 = vmatprep.mubr.msk.bf16.mxu0 %vm17656_vm0, %v17655_v1  ;;  %v2847_v39 = vrot.slane %v17305_v21, 1  ;;  %v3063_v21 = vshrl.u32 %v19480_v38, 16 }
 0x1d4   : > { %14394 = vmatpush3.bf16.msra.mxu0 %v17275_v57  ;;  %15349 = vmatprep.mubr.msk.bf16.mxu1 %vm17656_vm0, %v17655_v1  ;;  %v8080_v57 = vrot.slane %v17306_v42, 1 }
 0x1d5   : > { %15366 = vmatpush3.bf16.msra.mxu1 %v17276_v27  ;;  %14395 = vmatprep.subr.bf16.mxu0 %v17655_v1  ;;  %v2848_v27 = vsel %vm905_vm2, %v2845_v37, %v2847_v39 }
 0x1d6   : > { %15367 = vmatprep.subr.bf16.mxu1 %v17655_v1 }
 0x1d8   : > { %14396 = vmatpush3.bf16.msra.mxu0 %v17277_v32  ;;  %v8081_v32 = vsel %vm905_vm2, %v8078_v16, %v8080_v57 }
 0x1d9   : > { %15368 = vmatpush3.bf16.msra.mxu1 %v17278_v5  ;;  %14417 = vmatprep.subr.bf16.mxu0 %v17655_v1  ;;  %v2849_v5 = vrot.slane %v17309_v29, 1 }
 0x1da   : > { %14378 = vmatmul.mubr.bf16.gmra.mrb[16].mxu0 %v2489_v50  ;;  %15389 = vmatprep.subr.bf16.mxu1 %v17655_v1  ;;  %v17310_v50 = vld [vmem:[%s21355_s4 + $0x358] sm:$0xff]  }
 0x1db   : > { %15350 = vmatmul.mubr.bf16.gmra.mrb[16].mxu1 %v7724_v25  ;;  %14397 = vmatprep.mubr.msk.bf16.mxu0 %vm17656_vm0, %v17655_v1  ;;  %v8082_v25 = vrot.slane %v17311_v0, 1  ;;  %v2850_v33 = vsel %vm905_vm2, %v2847_v39, %v2849_v5  ;;  %v17327_v39 = vld [vmem:[%s21355_s4 + $0x380] sm:$0xff]  }
 0x1dc   : > { %15369 = vmatprep.mubr.msk.bf16.mxu1 %vm17656_vm0, %v17655_v1 }
 0x1dd   : > { %v8083_v58 = vsel %vm905_vm2, %v8080_v57, %v8082_v25  ;;  %v3065_v57 = vrot.slane %v3063_v21, 1 }
 0x1e2   : > { %14398 = vmatmul.mubr.bf16.vlgmr.msra.gmra.mrb[0].mxu0 %v2649_v52  ;;  %v19420_v52 = vld [vmem:[%s18496_s13 + $0x24] sm:$0xff]  }
 0x1e3   : > { %15370 = vmatmul.mubr.bf16.vlgmr.msra.gmra.mrb[0].mxu1 %v7883_v2  ;;  %14418 = vmatpush3.bf16.msra.mxu0 %v17281_v15  ;;  %v2851_v15 = vrot.slane %v19412_v34, 1  ;;  %v17317_v2 = vld [vmem:[%s21355_s4 + $0x368] sm:$0xff]  }
 0x1e4   : > { %15390 = vmatpush3.bf16.msra.mxu1 %v17282_v44  ;;  %14419 = vmatprep.subr.bf16.mxu0 %v17655_v1  ;;  %v8084_v44 = vrot.slane %v19420_v52, 1 }
 0x1e5   : > { %15391 = vmatprep.subr.bf16.mxu1 %v17655_v1  ;;  %14401 = vmatprep.mubr.msk.bf16.mxu0 %vm17656_vm0, %v17655_v1 }
 0x1e6   : > { %15373 = vmatprep.mubr.msk.bf16.mxu1 %vm17656_vm0, %v17655_v1  ;;  %v8085_v30 = vsel %vm905_vm2, %v8082_v25, %v8084_v44 }
 0x1e7   : > { %14420 = vmatpush3.bf16.msra.mxu0 %v17283_v12  ;;  %v17318_v12 = vld [vmem:[%s21355_s4 + $0x368] sm:$0xff]  }
 0x1e8   : > { %15392 = vmatpush3.bf16.msra.mxu1 %v17284_v19  ;;  %14421 = vmatprep.subr.bf16.mxu0 %v17655_v1  ;;  %v2989_v19 = vld [vmem:[%s17821_s25 + $0x4] sm:$0xe] }
 0x1e9   : > { %15393 = vmatprep.subr.bf16.mxu1 %v17655_v1 }
 0x1ea   : > { %14402 = vmatmul.mubr.bf16.gmra.mrb[4].mxu0 %v2651_v23  ;;  %v2852_v23 = vsel %vm905_vm2, %v2849_v5, %v2851_v15  ;;  %v19507_v5 = vld [vmem:[%s18496_s13 + $0x1c] sm:$0xff]  }
 0x1eb   : > { %15374 = vmatmul.mubr.bf16.gmra.mrb[4].mxu1 %v7885_v7  ;;  %14422 = vmatpush3.bf16.msra.mxu0 %v17285_v47  ;;  %v19442_v47 = vld [vmem:[%s18496_s13 + $0x8] sm:$0xf]  ;;  %v12141_v7 = vcombine.low %v2989_v19, %v19435_v45 }
 0x1ec   : > { %15394 = vmatpush3.bf16.msra.mxu1 %v17286_v48  ;;  %14405 = vmatprep.mubr.msk.bf16.mxu0 %vm17656_vm0, %v17655_v1  ;;  %v19448_v48 = vld [vmem:[%s17821_s25 + $0xc] sm:$0xff]   ;;  %v12856_v35 = vcombine.low %v8222_v46, %v19442_v47 }
 0x1ed   : > { %14423 = vmatprep.subr.bf16.mxu0 %v17655_v1  ;;  %15377 = vmatprep.mubr.msk.bf16.mxu1 %vm17656_vm0, %v17655_v1  ;;  %v17334_v46 = vld [vmem:[%s21355_s4 + $0x390] sm:$0xff]  }
 0x1ee   : > { %15395 = vmatprep.subr.bf16.mxu1 %v17655_v1 }
 0x1ef   : > { %14424 = vmatpush3.bf16.msra.mxu0 %v17287_v49  ;;  %v17319_v49 = vld [vmem:[%s21355_s4 + $0x370] sm:$0xff]  }
 0x1f0   : > { %15396 = vmatpush3.bf16.msra.mxu1 %v17288_v53  ;;  %14425 = vmatprep.subr.bf16.mxu0 %v17655_v1  ;;  %v19457_v53 = vld [vmem:[%s18496_s13 + $0xc] sm:$0xff]  }
 0x1f1   : > { %15397 = vmatprep.subr.bf16.mxu1 %v17655_v1 }
 0x1f2   : > { %14406 = vmatmul.mubr.bf16.gmra.mrb[8].mxu0 %v2653_v3  ;;  %v3046_v3 = vshrl.u32 %v12141_v7, 16 }
 0x1f3   : > { %15378 = vmatmul.mubr.bf16.gmra.mrb[8].mxu1 %v7887_v56  ;;  %14426 = vmatpush3.bf16.msra.mxu0 %v17289_v9  ;;  %v17320_v9 = vld [vmem:[%s21355_s4 + $0x370] sm:$0xff]   ;;  %v3049_v56 = vshll.u32 %v12141_v7, 16 }
 0x1f4   : > { %15398 = vmatpush3.bf16.msra.mxu1 %v17290_v59  ;;  %14409 = vmatprep.mubr.msk.bf16.mxu0 %vm17656_vm0, %v17655_v1  ;;  %v3054_v59 = vshrl.u32 %v19448_v48, 16 }
 0x1f5   : > { %15381 = vmatprep.mubr.msk.bf16.mxu1 %vm17656_vm0, %v17655_v1  ;;  %14427 = vmatprep.subr.bf16.mxu0 %v17655_v1 }
 0x1f6   : > { %15399 = vmatprep.subr.bf16.mxu1 %v17655_v1 }
 0x1f7   : > { %14428 = vmatpush3.bf16.msra.mxu0 %v17291_v61  ;;  %v17321_v61 = vld [vmem:[%s21355_s4 + $0x378] sm:$0xff]  }
 0x1f8   : > { %15400 = vmatpush3.bf16.msra.mxu1 %v17292_v13  ;;  %14429 = vmatprep.subr.bf16.mxu0 %v17655_v1  ;;  %v8281_v13 = vshll.u32 %v12856_v35, 16 }
 0x1f9   : > { %15401 = vmatprep.subr.bf16.mxu1 %v17655_v1 }
 0x1fa   : > { %14410 = vmatmul.mubr.bf16.gmra.mrb[12].mxu0 %v2655_v17  ;;  %v8289_v17 = vshll.u32 %v19457_v53, 16  ;;  %v8283_v10 = vrot.slane %v8281_v13, 2  ;;  %v17339_v13 = vld [vmem:[%s21355_s4 + $0x3a0] sm:$0xff]  }
 0x1fb   : > { %15382 = vmatmul.mubr.bf16.gmra.mrb[12].mxu1 %v7889_v4  ;;  %14413 = vmatprep.mubr.msk.bf16.mxu0 %vm17656_vm0, %v17655_v1  ;;  %v17322_v4 = vld [vmem:[%s21355_s4 + $0x378] sm:$0xff]  }
 0x1fc   : > { %14430 = vmatpush3.bf16.msra.mxu0 %v17293_v63  ;;  %15385 = vmatprep.mubr.msk.bf16.mxu1 %vm17656_vm0, %v17655_v1  ;;  %v8286_v63 = vshrl.u32 %v19457_v53, 16  ;;  %v8291_v37 = vrot.slane %v8289_v17, 2 }
 0x1fd   : > { %15402 = vmatpush3.bf16.msra.mxu1 %v17294_v51  ;;  %14431 = vmatprep.subr.bf16.mxu0 %v17655_v1  ;;  %v3048_v51 = vrot.slane %v3046_v3, 1 }
 0x1fe   : > { %15403 = vmatprep.subr.bf16.mxu1 %v17655_v1  ;;  %v8288_v11 = vrot.slane %v8286_v63, 1 }
 0x200   : > { %14432 = vmatpush3.bf16.msra.mxu0 %v17295_v14  ;;  %v3051_v14 = vrot.slane %v3049_v56, 2 }
 0x201   : > { %15404 = vmatpush3.bf16.msra.mxu1 %v17296_v20  ;;  %14453 = vmatprep.subr.bf16.mxu0 %v17655_v1  ;;  %v3056_v20 = vrot.slane %v3054_v59, 1  ;;  %v17338_v59 = vld [vmem:[%s21355_s4 + $0x398] sm:$0xff]  }
 0x202   : > { %14414 = vmatmul.mubr.bf16.gmra.mrb[16].mxu0 %v2654_v60  ;;  %15425 = vmatprep.subr.bf16.mxu1 %v17655_v1  ;;  %v3057_v60 = vshll.u32 %v19448_v48, 16  ;;  %v3052_v16 = vor.u32 %v3051_v14, %v3048_v51  ;;  %v17340_v51 = vld [vmem:[%s21355_s4 + $0x3a0] sm:$0xff]  }
 0x203   : > { %15386 = vmatmul.mubr.bf16.gmra.mrb[16].mxu1 %v7888_v62  ;;  %14433 = vmatprep.mubr.msk.bf16.mxu0 %vm17656_vm0, %v17655_v1  ;;  %v8278_v62 = vshrl.u32 %v12856_v35, 16  ;;  %v17336_v35 = vld [vmem:[%s21355_s4 + $0x398] sm:$0xff]  }
 0x204   : > { %15405 = vmatprep.mubr.msk.bf16.mxu1 %vm17656_vm0, %v17655_v1  ;;  %v3059_v8 = vrot.slane %v3057_v60, 2 }
 0x205   : > { %v8280_v36 = vrot.slane %v8278_v62, 1 }
 0x207   : > { %v8284_v42 = vor.u32 %v8283_v10, %v8280_v36  ;;  %v17343_v36 = vld [vmem:[%s21355_s4 + $0x3a8] sm:$0xff]  }
 0x208   : > { %v19571_v10 = vld [vmem:[%s17821_s25 + $0x2c] ss:$0 sps:$4 sm:$0x11]  }
 0x209   : > { %v3090_v21 = vshll.u32 %v19571_v10, 16 }
 0x20a   : > { %14434 = vmatmul.mubr.bf16.vlgmr.msra.gmra.mrb[0].mxu0 %v2846_v54  ;;  %v3066_v54 = vshll.u32 %v19480_v38, 16 }
 0x20b   : > { %15406 = vmatmul.mubr.bf16.vlgmr.msra.gmra.mrb[0].mxu1 %v8079_v43  ;;  %14454 = vmatpush3.bf16.msra.mxu0 %v17301_v18  ;;  %v3060_v18 = vor.u32 %v3059_v8, %v3056_v20  ;;  %v8292_v43 = vor.u32 %v8291_v37, %v8288_v11  ;;  %v17344_v37 = vld [vmem:[%s21355_s4 + $0x3a8] sm:$0xff]  }
 0x20c   : > { %15426 = vmatpush3.bf16.msra.mxu1 %v17302_v55  ;;  %14455 = vmatprep.subr.bf16.mxu0 %v17655_v1  ;;  %v8295_v55 = vshrl.u32 %v19483_v41, 16 }
 0x20d   : > { %15427 = vmatprep.subr.bf16.mxu1 %v17655_v1  ;;  %14437 = vmatprep.mubr.msk.bf16.mxu0 %vm17656_vm0, %v17655_v1  ;;  %v8293_v29 = vsel %vm1304_vm3, %v8284_v42, %v8292_v43  ;;  %v17345_v42 = vld [vmem:[%s21355_s4 + $0x3b0] sm:$0xff]  }
 0x20e   : > { %15409 = vmatprep.mubr.msk.bf16.mxu1 %vm17656_vm0, %v17655_v1 }
 0x20f   : > { %14456 = vmatpush3.bf16.msra.mxu0 %v17303_v24  ;;  %v8298_v24 = vshll.u32 %v19483_v41, 16 }
 0x210   : > { %15428 = vmatpush3.bf16.msra.mxu1 %v17304_v26  ;;  %14457 = vmatprep.subr.bf16.mxu0 %v17655_v1  ;;  %v3061_v26 = vsel %vm1304_vm3, %v3052_v16, %v3060_v18  ;;  %v19579_v16 = vld [vmem:[%s18496_s13 + $0x2c] ss:$0 sps:$4 sm:$0x11]  }
 0x211   : > { %15429 = vmatprep.subr.bf16.mxu1 %v17655_v1  ;;  %v8300_v0 = vrot.slane %v8298_v24, 2  ;;  %v3092_v24 = vrot.slane %v3090_v21, 2 }
 0x212   : > { %14438 = vmatmul.mubr.bf16.gmra.mrb[4].mxu0 %v2848_v27  ;;  %v3068_v27 = vrot.slane %v3066_v54, 2 }
 0x213   : > { %15410 = vmatmul.mubr.bf16.gmra.mrb[4].mxu1 %v8081_v32  ;;  %14458 = vmatpush3.bf16.msra.mxu0 %v17307_v28  ;;  %v19500_v28 = vld [vmem:[%s17821_s25 + $0x1c] sm:$0xff]  }
 0x214   : > { %15430 = vmatpush3.bf16.msra.mxu1 %v17308_v6  ;;  %14441 = vmatprep.mubr.msk.bf16.mxu0 %vm17656_vm0, %v17655_v1  ;;  %v17328_v32 = vld [vmem:[%s21355_s4 + $0x380] sm:$0xff]   ;;  %v8297_v6 = vrot.slane %v8295_v55, 1  ;;  %v3069_v25 = vor.u32 %v3068_v27, %v3065_v57  ;;  %v17346_v55 = vld [vmem:[%s21355_s4 + $0x3b0] sm:$0xff]   ;;  %v17350_v27 = vld [vmem:[%s21355_s4 + $0x3b8] sm:$0xff]  }
 0x215   : > { %14459 = vmatprep.subr.bf16.mxu0 %v17655_v1  ;;  %15413 = vmatprep.mubr.msk.bf16.mxu1 %vm17656_vm0, %v17655_v1  ;;  %v3230_v57 = vld [vmem:[%s17821_s25 + $0x4] sm:$0xc] }
 0x216   : > { %15431 = vmatprep.subr.bf16.mxu1 %v17655_v1  ;;  %v8301_v34 = vor.u32 %v8300_v0, %v8297_v6  ;;  %v3070_v52 = vsel %vm1304_vm3, %v3060_v18, %v3069_v25  ;;  %v12171_v6 = vcombine.low %v3230_v57, %v19435_v45  ;;  %v17375_v57 = vld [vmem:[%s21355_s4 + $0x408] sm:$0xff]  }
 0x217   : > { %14460 = vmatpush3.bf16.msra.mxu0 %v17310_v50  ;;  %v17329_v50 = vld [vmem:[%s21355_s4 + $0x388] sm:$0xff]  }
 0x218   : > { %15432 = vmatpush3.bf16.msra.mxu1 %v17312_v31  ;;  %14461 = vmatprep.subr.bf16.mxu0 %v17655_v1  ;;  %v3072_v31 = vshrl.u32 %v19500_v28, 16  ;;  %v8302_v19 = vsel %vm1304_vm3, %v8292_v43, %v8301_v34  ;;  %v8322_v43 = vshll.u32 %v19579_v16, 16 }
 0x219   : > { %15433 = vmatprep.subr.bf16.mxu1 %v17655_v1 }
 0x21a   : > { %14442 = vmatmul.mubr.bf16.gmra.mrb[8].mxu0 %v2850_v33  ;;  %v3075_v33 = vshll.u32 %v19500_v28, 16 }
 0x21b   : > { %15414 = vmatmul.mubr.bf16.gmra.mrb[8].mxu1 %v8083_v58  ;;  %14462 = vmatpush3.bf16.msra.mxu0 %v17313_v22  ;;  %v17330_v22 = vld [vmem:[%s21355_s4 + $0x388] sm:$0xff]   ;;  %v8304_v58 = vshrl.u32 %v19507_v5, 16 }
 0x21c   : > { %15434 = vmatpush3.bf16.msra.mxu1 %v17314_v40  ;;  %14445 = vmatprep.mubr.msk.bf16.mxu0 %vm17656_vm0, %v17655_v1  ;;  %v8307_v40 = vshll.u32 %v19507_v5, 16 }
 0x21d   : > { %15417 = vmatprep.mubr.msk.bf16.mxu1 %vm17656_vm0, %v17655_v1  ;;  %14463 = vmatprep.subr.bf16.mxu0 %v17655_v1 }
 0x21e   : > { %15435 = vmatprep.subr.bf16.mxu1 %v17655_v1  ;;  %v8309_v7 = vrot.slane %v8307_v40, 2  ;;  %v17356_v40 = vld [vmem:[%s21355_s4 + $0x3c8] sm:$0xff]  }
 0x21f   : > { %14464 = vmatpush3.bf16.msra.mxu0 %v17317_v2  ;;  %v3074_v2 = vrot.slane %v3072_v31, 1  ;;  %v3252_v31 = vrot.slane %v19448_v48, 2  ;;  %v17355_v48 = vld [vmem:[%s21355_s4 + $0x3c8] sm:$0xff]  }
 0x220   : > { %15436 = vmatpush3.bf16.msra.mxu1 %v17318_v12  ;;  %14465 = vmatprep.subr.bf16.mxu0 %v17655_v1  ;;  %v19530_v12 = vld [vmem:[%s17821_s25 + $0x24] sm:$0xff]  }
 0x221   : > { %15437 = vmatprep.subr.bf16.mxu1 %v17655_v1  ;;  %v3084_v3 = vshll.u32 %v19530_v12, 16 }
 0x222   : > { %14446 = vmatmul.mubr.bf16.gmra.mrb[12].mxu0 %v2852_v23  ;;  %v8306_v23 = vrot.slane %v8304_v58, 1  ;;  %v17354_v58 = vld [vmem:[%s21355_s4 + $0x3c0] sm:$0xff]  }
 0x223   : > { %15418 = vmatmul.mubr.bf16.gmra.mrb[12].mxu1 %v8085_v30  ;;  %14449 = vmatprep.mubr.msk.bf16.mxu0 %vm17656_vm0, %v17655_v1  ;;  %v19538_v30 = vld [vmem:[%s18496_s13 + $0x24] sm:$0xff]   ;;  %v3086_v17 = vrot.slane %v3084_v3, 2 }
 0x224   : > { %14466 = vmatpush3.bf16.msra.mxu0 %v17319_v49  ;;  %15421 = vmatprep.mubr.msk.bf16.mxu1 %vm17656_vm0, %v17655_v1  ;;  %v8310_v56 = vor.u32 %v8309_v7, %v8306_v23  ;;  %v8313_v60 = vshrl.u32 %v19538_v30, 16  ;;  %v17360_v23 = vld [vmem:[%s21355_s4 + $0x3d8] sm:$0xff]   ;;  %v17361_v7 = vld [vmem:[%s21355_s4 + $0x3e0] sm:$0xff]   ;;  %v8489_v3 = vrot.slane %v19538_v30, 2 }
 0x225   : > { %15438 = vmatpush3.bf16.msra.mxu1 %v17320_v9  ;;  %14467 = vmatprep.subr.bf16.mxu0 %v17655_v1  ;;  %v3081_v9 = vshrl.u32 %v19530_v12, 16 }
 0x226   : > { %15439 = vmatprep.subr.bf16.mxu1 %v17655_v1  ;;  %v8315_v14 = vrot.slane %v8313_v60, 1  ;;  %v17366_v60 = vld [vmem:[%s21355_s4 + $0x3f0] sm:$0xff]  }
 0x227   : > { %v3083_v63 = vrot.slane %v3081_v9, 1  ;;  %v17363_v9 = vld [vmem:[%s21355_s4 + $0x3e8] sm:$0xff]  }
 0x228   : > { %14468 = vmatpush3.bf16.msra.mxu0 %v17321_v61  ;;  %v8316_v61 = vshll.u32 %v19538_v30, 16  ;;  %v17365_v30 = vld [vmem:[%s21355_s4 + $0x3f0] sm:$0xff]  }
 0x229   : > { %15440 = vmatpush3.bf16.msra.mxu1 %v17322_v4  ;;  %14489 = vmatprep.subr.bf16.mxu0 %v17655_v1  ;;  %v8311_v4 = vsel %vm1304_vm3, %v8301_v34, %v8310_v56  ;;  %v3087_v8 = vor.u32 %v3086_v17, %v3083_v63  ;;  %v3398_v63 = vld [vmem:[%s17821_s25 + $0x8] sm:$0xc]  ;;  %v19715_v17 = vld [vmem:[%s17821_s25 + $0xc] sm:$0xf] }
 0x22a   : > { %14450 = vmatmul.mubr.bf16.gmra.mrb[16].mxu0 %v2851_v15  ;;  %15461 = vmatprep.subr.bf16.mxu1 %v17655_v1  ;;  %v17333_v15 = vld [vmem:[%s21355_s4 + $0x390] sm:$0xff]   ;;  %v8318_v20 = vrot.slane %v8316_v61, 2  ;;  %v3260_v61 = vrot.slane %v19571_v10, 2 }
 0x22b   : > { %15422 = vmatmul.mubr.bf16.gmra.mrb[16].mxu1 %v8084_v44  ;;  %14469 = vmatprep.mubr.msk.bf16.mxu0 %vm17656_vm0, %v17655_v1  ;;  %v3077_v44 = vrot.slane %v3075_v33, 2  ;;  %v8483_v33 = vrot.slane %v19457_v53, 2  ;;  %v3254_v53 = vrot.slane %v19480_v38, 2 }
 0x22c   : > { %15441 = vmatprep.mubr.msk.bf16.mxu1 %vm17656_vm0, %v17655_v1  ;;  %v8319_v11 = vor.u32 %v8318_v20, %v8315_v14  ;;  %v17368_v14 = vld [vmem:[%s21355_s4 + $0x3f8] sm:$0xff]  }
 0x22d   : > { %v3078_v49 = vor.u32 %v3077_v44, %v3074_v2  ;;  %v3255_v38 = vsel %vm1511_vm4, %v3252_v31, %v3254_v53  ;;  %v3256_v44 = vrot.slane %v19500_v28, 2 }
 0x22e   : > { %v8320_v54 = vsel %vm1304_vm3, %v8310_v56, %v8319_v11  ;;  %v17364_v56 = vld [vmem:[%s21355_s4 + $0x3e8] sm:$0xff]  }
 0x22f   : > { %v3079_v62 = vsel %vm1304_vm3, %v3069_v25, %v3078_v49  ;;  %v3088_v18 = vsel %vm1304_vm3, %v3078_v49, %v3087_v8  ;;  %v3251_v25 = vrot.slane %v12171_v6, 2  ;;  %v3257_v28 = vsel %vm1511_vm4, %v3254_v53, %v3256_v44  ;;  %v17362_v49 = vld [vmem:[%s21355_s4 + $0x3e0] sm:$0xff]   ;;  %v19819_v53 = vld [vmem:[%s17821_s25 + $0x28] sm:$0xff]  }
 0x232   : > { %14470 = vmatmul.mubr.bf16.vlgmr.msra.gmra.mrb[0].mxu0 %v3061_v26  ;;  %v8324_v26 = vrot.slane %v8322_v43, 2  ;;  %v19760_v43 = vld [vmem:[%s17821_s25 + $0x18] sm:$0xff]  }
 0x233   : > { %15442 = vmatmul.mubr.bf16.vlgmr.msra.gmra.mrb[0].mxu1 %v8293_v29  ;;  %14490 = vmatpush3.bf16.msra.mxu0 %v17327_v39  ;;  %v17349_v39 = vld [vmem:[%s21355_s4 + $0x3b8] sm:$0xff]   ;;  %v8462_v29 = vld [vmem:[%s18496_s13 + $0x4] sm:$0xc] }
 0x234   : > { %15462 = vmatpush3.bf16.msra.mxu1 %v17328_v32  ;;  %14491 = vmatprep.subr.bf16.mxu0 %v17655_v1  ;;  %v3093_v32 = vsel %vm1304_vm3, %v3087_v8, %v3092_v24  ;;  %v8325_v0 = vsel %vm1304_vm3, %v8319_v11, %v8324_v26  ;;  %v19729_v8 = vcombine.low %v3398_v63, %v19715_v17  ;;  %v19738_v11 = vld [vmem:[%s18496_s13 + $0x10] sm:$0xff]   ;;  %v19764_v24 = vld [vmem:[%s18496_s13 + $0x18] sm:$0xff]  }
 0x235   : > { %15463 = vmatprep.subr.bf16.mxu1 %v17655_v1  ;;  %14473 = vmatprep.mubr.msk.bf16.mxu0 %vm17656_vm0, %v17655_v1 }
 0x236   : > { %15445 = vmatprep.mubr.msk.bf16.mxu1 %vm17656_vm0, %v17655_v1 }
 0x237   : > { %14492 = vmatpush3.bf16.msra.mxu0 %v17329_v50  ;;  %v12886_v50 = vcombine.low %v8462_v29, %v19442_v47  ;;  %v3253_v47 = vsel %vm1511_vm4, %v3251_v25, %v3252_v31  ;;  %v3457_v29 = vrot.slane %v19760_v43, 2  ;;  %v17380_v31 = vld [vmem:[%s21355_s4 + $0x410] sm:$0xff]  }
 0x238   : > { %15464 = vmatpush3.bf16.msra.mxu1 %v17330_v22  ;;  %14493 = vmatprep.subr.bf16.mxu0 %v17655_v1  ;;  %v17353_v22 = vld [vmem:[%s21355_s4 + $0x3c0] sm:$0xff]  }
 0x239   : > { %15465 = vmatprep.subr.bf16.mxu1 %v17655_v1  ;;  %v8482_v45 = vrot.slane %v12886_v50, 2  ;;  %v19789_v50 = vld [vmem:[%s17821_s25 + $0x20] sm:$0xff]  }
 0x23a   : > { %14474 = vmatmul.mubr.bf16.gmra.mrb[4].mxu0 %v3070_v52  ;;  %v8485_v52 = vrot.slane %v19483_v41, 2  ;;  %v17358_v41 = vld [vmem:[%s21355_s4 + $0x3d0] sm:$0xff]  }
 0x23b   : > { %15446 = vmatmul.mubr.bf16.gmra.mrb[4].mxu1 %v8302_v19  ;;  %14494 = vmatpush3.bf16.msra.mxu0 %v17333_v15  ;;  %v8484_v34 = vsel %vm1511_vm4, %v8482_v45, %v8483_v33  ;;  %v17357_v15 = vld [vmem:[%s21355_s4 + $0x3d0] sm:$0xff]   ;;  %v17359_v19 = vld [vmem:[%s21355_s4 + $0x3d8] sm:$0xff]   ;;  %v19797_v45 = vld [vmem:[%s18496_s13 + $0x20] sm:$0xff]  }
 0x23c   : > { %15466 = vmatpush3.bf16.msra.mxu1 %v17334_v46  ;;  %14477 = vmatprep.mubr.msk.bf16.mxu0 %vm17656_vm0, %v17655_v1  ;;  %v8486_v2 = vsel %vm1511_vm4, %v8483_v33, %v8485_v52  ;;  %v8487_v46 = vrot.slane %v19507_v5, 2  ;;  %v3459_v33 = vrot.slane %v19789_v50, 2 }
 0x23d   : > { %14495 = vmatprep.subr.bf16.mxu0 %v17655_v1  ;;  %15449 = vmatprep.mubr.msk.bf16.mxu1 %vm17656_vm0, %v17655_v1 }
 0x23e   : > { %15467 = vmatprep.subr.bf16.mxu1 %v17655_v1  ;;  %v8488_v5 = vsel %vm1511_vm4, %v8485_v52, %v8487_v46  ;;  %v17386_v52 = vld [vmem:[%s21355_s4 + $0x420] sm:$0xff]  }
 0x23f   : > { %14496 = vmatpush3.bf16.msra.mxu0 %v17336_v35  ;;  %v3258_v35 = vrot.slane %v19530_v12, 2 }
 0x240   : > { %15468 = vmatpush3.bf16.msra.mxu1 %v17338_v59  ;;  %14497 = vmatprep.subr.bf16.mxu0 %v17655_v1  ;;  %v8490_v59 = vsel %vm1511_vm4, %v8487_v46, %v8489_v3  ;;  %v17394_v46 = vld [vmem:[%s18496_s13 + $0x30] ss:$0 sps:$4 sm:$0x11]  }
 0x241   : > { %15469 = vmatprep.subr.bf16.mxu1 %v17655_v1  ;;  %v3259_v12 = vsel %vm1511_vm4, %v3256_v44, %v3258_v35  ;;  %v3261_v20 = vsel %vm1511_vm4, %v3258_v35, %v3260_v61  ;;  %v17390_v44 = vld [vmem:[%s21355_s4 + $0x428] sm:$0xff]   ;;  %v8693_v35 = vrot.slane %v17394_v46, 2  ;;  %v8860_v61 = vshrl.u32 %v19738_v11, 16 }
 0x242   : > { %14478 = vmatmul.mubr.bf16.gmra.mrb[8].mxu0 %v3079_v62  ;;  %v8491_v62 = vrot.slane %v19579_v16, 2  ;;  %v3454_v16 = vrot.slane %v19729_v8, 2 }
 0x243   : > { %15450 = vmatmul.mubr.bf16.gmra.mrb[8].mxu1 %v8311_v4  ;;  %14498 = vmatpush3.bf16.msra.mxu0 %v17339_v13  ;;  %v17367_v13 = vld [vmem:[%s21355_s4 + $0x3f8] sm:$0xff]   ;;  %v8629_v4 = vld [vmem:[%s18496_s13 + $0x8] sm:$0xc] }
 0x244   : > { %15470 = vmatpush3.bf16.msra.mxu1 %v17340_v51  ;;  %14481 = vmatprep.mubr.msk.bf16.mxu0 %vm17656_vm0, %v17655_v1  ;;  %v19719_v51 = vld [vmem:[%s18496_s13 + $0xc] sm:$0xf] }
 0x245   : > { %15453 = vmatprep.mubr.msk.bf16.mxu1 %vm17656_vm0, %v17655_v1  ;;  %14499 = vmatprep.subr.bf16.mxu0 %v17655_v1  ;;  %v19735_v10 = vcombine.low %v8629_v4, %v19719_v51 }
 0x246   : > { %15471 = vmatprep.subr.bf16.mxu1 %v17655_v1 }
 0x247   : > { %14500 = vmatpush3.bf16.msra.mxu0 %v17343_v36  ;;  %v19732_v36 = vld [vmem:[%s17821_s25 + $0x10] sm:$0xff]   ;;  %v8684_v21 = vrot.slane %v19735_v10, 2 }
 0x248   : > { %15472 = vmatpush3.bf16.msra.mxu1 %v17344_v37  ;;  %14501 = vmatprep.subr.bf16.mxu0 %v17655_v1  ;;  %v8492_v37 = vsel %vm1511_vm4, %v8489_v3, %v8491_v62  ;;  %v3626_v3 = vshll.u32 %v19729_v8, 16  ;;  %v8863_v62 = vshll.u32 %v19738_v11, 16 }
 0x249   : > { %15473 = vmatprep.subr.bf16.mxu1 %v17655_v1 }
 0x24a   : > { %14482 = vmatmul.mubr.bf16.gmra.mrb[12].mxu0 %v3088_v18  ;;  %v3455_v18 = vrot.slane %v19732_v36, 2 }
 0x24b   : > { %15454 = vmatmul.mubr.bf16.gmra.mrb[12].mxu1 %v8320_v54  ;;  %14485 = vmatprep.mubr.msk.bf16.mxu0 %vm17656_vm0, %v17655_v1  ;;  %v8685_v54 = vrot.slane %v19738_v11, 2 }
 0x24c   : > { %14502 = vmatpush3.bf16.msra.mxu0 %v17345_v42  ;;  %15457 = vmatprep.mubr.msk.bf16.mxu1 %vm17656_vm0, %v17655_v1  ;;  %v17373_v42 = vld [vmem:[%s21355_s4 + $0x400] sm:$0xff]   ;;  %v3458_v6 = vsel %vm1511_vm4, %v3455_v18, %v3457_v29 }
 0x24d   : > { %15474 = vmatpush3.bf16.msra.mxu1 %v17346_v55  ;;  %14503 = vmatprep.subr.bf16.mxu0 %v17655_v1  ;;  %v3456_v55 = vsel %vm1511_vm4, %v3454_v16, %v3455_v18  ;;  %v8686_v26 = vsel %vm1511_vm4, %v8684_v21, %v8685_v54  ;;  %v8862_v18 = vrot.slane %v8860_v61, 2  ;;  %v8865_v21 = vrot.slane %v8863_v62, 3  ;;  %v17405_v62 = vld [vmem:[%s21355_s4 + $0x460] sm:$0xff]  }
 0x24e   : > { %15475 = vmatprep.subr.bf16.mxu1 %v17655_v1 }
 0x250   : > { %14504 = vmatpush3.bf16.msra.mxu0 %v17349_v39  ;;  %v17374_v39 = vld [vmem:[%s21355_s4 + $0x400] sm:$0xff]  }
 0x251   : > { %15476 = vmatpush3.bf16.msra.mxu1 %v17350_v27  ;;  %14525 = vmatprep.subr.bf16.mxu0 %v17655_v1  ;;  %v17376_v27 = vld [vmem:[%s21355_s4 + $0x408] sm:$0xff]  }
 0x252   : > { %14486 = vmatmul.mubr.bf16.gmra.mrb[16].mxu0 %v3093_v32  ;;  %15497 = vmatprep.subr.bf16.mxu1 %v17655_v1  ;;  %v8687_v32 = vrot.slane %v19764_v24, 2 }
 0x253   : > { %15458 = vmatmul.mubr.bf16.gmra.mrb[16].mxu1 %v8325_v0  ;;  %14505 = vmatprep.mubr.msk.bf16.mxu0 %vm17656_vm0, %v17655_v1  ;;  %v17379_v0 = vld [vmem:[%s21355_s4 + $0x410] sm:$0xff]  }
 0x254   : > { %15477 = vmatprep.mubr.msk.bf16.mxu1 %vm17656_vm0, %v17655_v1  ;;  %v8688_v25 = vsel %vm1511_vm4, %v8685_v54, %v8687_v32 }
 0x25a   : > { %14506 = vmatmul.mubr.bf16.vlgmr.msra.gmra.mrb[0].mxu0 %v3253_v47  ;;  %v17382_v47 = vld [vmem:[%s21355_s4 + $0x418] sm:$0xff]  }
 0x25b   : > { %15478 = vmatmul.mubr.bf16.vlgmr.msra.gmra.mrb[0].mxu1 %v8484_v34  ;;  %14526 = vmatpush3.bf16.msra.mxu0 %v17353_v22  ;;  %v8689_v22 = vrot.slane %v19797_v45, 2  ;;  %v17384_v34 = vld [vmem:[%s21355_s4 + $0x418] sm:$0xff]  }
 0x25c   : > { %15498 = vmatpush3.bf16.msra.mxu1 %v17354_v58  ;;  %14527 = vmatprep.subr.bf16.mxu0 %v17655_v1  ;;  %v3460_v58 = vsel %vm1511_vm4, %v3457_v29, %v3459_v33  ;;  %v8872_v29 = vshll.u32 %v19764_v24, 16 }
 0x25d   : > { %15499 = vmatprep.subr.bf16.mxu1 %v17655_v1  ;;  %14509 = vmatprep.mubr.msk.bf16.mxu0 %vm17656_vm0, %v17655_v1 }
 0x25e   : > { %15481 = vmatprep.mubr.msk.bf16.mxu1 %vm17656_vm0, %v17655_v1 }
 0x25f   : > { %14528 = vmatpush3.bf16.msra.mxu0 %v17355_v48  ;;  %v17385_v48 = vld [vmem:[%s21355_s4 + $0x420] sm:$0xff]  }
 0x260   : > { %15500 = vmatpush3.bf16.msra.mxu1 %v17356_v40  ;;  %14529 = vmatprep.subr.bf16.mxu0 %v17655_v1  ;;  %v8690_v40 = vsel %vm1511_vm4, %v8687_v32, %v8689_v22 }
 0x261   : > { %15501 = vmatprep.subr.bf16.mxu1 %v17655_v1 }
 0x262   : > { %14510 = vmatmul.mubr.bf16.gmra.mrb[4].mxu0 %v3255_v38  ;;  %v19827_v38 = vld [vmem:[%s18496_s13 + $0x28] sm:$0xff]  }
 0x263   : > { %15482 = vmatmul.mubr.bf16.gmra.mrb[4].mxu1 %v8486_v2  ;;  %14530 = vmatpush3.bf16.msra.mxu0 %v17357_v15  ;;  %v3461_v15 = vrot.slane %v19819_v53, 2  ;;  %v17389_v2 = vld [vmem:[%s21355_s4 + $0x428] sm:$0xff]  }
 0x264   : > { %15502 = vmatpush3.bf16.msra.mxu1 %v17358_v41  ;;  %14513 = vmatprep.mubr.msk.bf16.mxu0 %vm17656_vm0, %v17655_v1  ;;  %v8691_v41 = vrot.slane %v19827_v38, 2 }
 0x265   : > { %14531 = vmatprep.subr.bf16.mxu0 %v17655_v1  ;;  %15485 = vmatprep.mubr.msk.bf16.mxu1 %vm17656_vm0, %v17655_v1 }
 0x266   : > { %15503 = vmatprep.subr.bf16.mxu1 %v17655_v1  ;;  %v8694_v4 = vsel %vm1511_vm4, %v8691_v41, %v8693_v35 }
 0x267   : > { %14532 = vmatpush3.bf16.msra.mxu0 %v17359_v19  ;;  %v17393_v19 = vld [vmem:[%s17821_s25 + $0x30] ss:$0 sps:$4 sm:$0x11]  }
 0x268   : > { %15504 = vmatpush3.bf16.msra.mxu1 %v17360_v23  ;;  %14533 = vmatprep.subr.bf16.mxu0 %v17655_v1  ;;  %v3462_v23 = vsel %vm1511_vm4, %v3459_v33, %v3461_v15  ;;  %v17398_v33 = vld [vmem:[%s21355_s4 + $0x440] sm:$0xff]  }
 0x269   : > { %15505 = vmatprep.subr.bf16.mxu1 %v17655_v1 }
 0x26a   : > { %14514 = vmatmul.mubr.bf16.gmra.mrb[8].mxu0 %v3257_v28  ;;  %v8692_v28 = vsel %vm1511_vm4, %v8689_v22, %v8691_v41  ;;  %v8874_v22 = vrot.slane %v8872_v29, 3  ;;  %v8881_v41 = vshll.u32 %v19797_v45, 16 }
 0x26b   : > { %15486 = vmatmul.mubr.bf16.gmra.mrb[8].mxu1 %v8488_v5  ;;  %14534 = vmatpush3.bf16.msra.mxu0 %v17361_v7  ;;  %v17391_v7 = vld [vmem:[%s21355_s4 + $0x430] sm:$0xff]  }
 0x26c   : > { %15506 = vmatpush3.bf16.msra.mxu1 %v17362_v49  ;;  %14517 = vmatprep.mubr.msk.bf16.mxu0 %vm17656_vm0, %v17655_v1  ;;  %v17392_v5 = vld [vmem:[%s21355_s4 + $0x430] sm:$0xff]   ;;  %v3463_v49 = vrot.slane %v17393_v19, 2 }
 0x26d   : > { %15489 = vmatprep.mubr.msk.bf16.mxu1 %vm17656_vm0, %v17655_v1  ;;  %14535 = vmatprep.subr.bf16.mxu0 %v17655_v1  ;;  %v17401_v19 = vld [vmem:[%s21355_s4 + $0x450] sm:$0xff]  }
 0x26e   : > { %15507 = vmatprep.subr.bf16.mxu1 %v17655_v1  ;;  %v3464_v63 = vsel %vm1511_vm4, %v3461_v15, %v3463_v49  ;;  %v8883_v49 = vrot.slane %v8881_v41, 3 }
 0x26f   : > { %14536 = vmatpush3.bf16.msra.mxu0 %v17363_v9  ;;  %v3623_v9 = vshrl.u32 %v19729_v8, 16 }
 0x270   : > { %15508 = vmatpush3.bf16.msra.mxu1 %v17364_v56  ;;  %14537 = vmatprep.subr.bf16.mxu0 %v17655_v1  ;;  %v3631_v56 = vshrl.u32 %v19732_v36, 16 }
 0x271   : > { %15509 = vmatprep.subr.bf16.mxu1 %v17655_v1 }
 0x272   : > { %14518 = vmatmul.mubr.bf16.gmra.mrb[12].mxu0 %v3259_v12  ;;  %v3634_v12 = vshll.u32 %v19732_v36, 16  ;;  %v3633_v8 = vrot.slane %v3631_v56, 2  ;;  %v3661_v56 = vshll.u32 %v19819_v53, 16 }
 0x273   : > { %15490 = vmatmul.mubr.bf16.gmra.mrb[12].mxu1 %v8490_v59  ;;  %14521 = vmatprep.mubr.msk.bf16.mxu0 %vm17656_vm0, %v17655_v1  ;;  %v17395_v59 = vld [vmem:[%s21355_s4 + $0x438] sm:$0xff]  }
 0x274   : > { %14538 = vmatpush3.bf16.msra.mxu0 %v17365_v30  ;;  %15493 = vmatprep.mubr.msk.bf16.mxu1 %vm17656_vm0, %v17655_v1  ;;  %v8852_v30 = vshrl.u32 %v19735_v10, 16 }
 0x275   : > { %15510 = vmatpush3.bf16.msra.mxu1 %v17366_v60  ;;  %14539 = vmatprep.subr.bf16.mxu0 %v17655_v1  ;;  %v8855_v60 = vshll.u32 %v19735_v10, 16  ;;  %v3636_v10 = vrot.slane %v3634_v12, 3 }
 0x276   : > { %15511 = vmatprep.subr.bf16.mxu1 %v17655_v1 }
 0x277   : > { %v8857_v16 = vrot.slane %v8855_v60, 3  ;;  %v8890_v60 = vshll.u32 %v19827_v38, 16 }
 0x278   : > { %14540 = vmatpush3.bf16.msra.mxu0 %v17367_v13  ;;  %v17396_v13 = vld [vmem:[%s21355_s4 + $0x438] sm:$0xff]  }
 0x279   : > { %15512 = vmatpush3.bf16.msra.mxu1 %v17368_v14  ;;  %14561 = vmatprep.subr.bf16.mxu0 %v17655_v1  ;;  %v3625_v14 = vrot.slane %v3623_v9, 2  ;;  %v17403_v9 = vld [vmem:[%s21355_s4 + $0x458] sm:$0xff]  }
 0x27a   : > { %14522 = vmatmul.mubr.bf16.gmra.mrb[16].mxu0 %v3261_v20  ;;  %15533 = vmatprep.subr.bf16.mxu1 %v17655_v1  ;;  %v3628_v20 = vrot.slane %v3626_v3, 3  ;;  %v3658_v3 = vshrl.u32 %v19819_v53, 16 }
 0x27b   : > { %15494 = vmatmul.mubr.bf16.gmra.mrb[16].mxu1 %v8492_v37  ;;  %14541 = vmatprep.mubr.msk.bf16.mxu0 %vm17656_vm0, %v17655_v1  ;;  %v8854_v37 = vrot.slane %v8852_v30, 2  ;;  %v8887_v30 = vshrl.u32 %v19827_v38, 16 }
 0x27c   : > { %15513 = vmatprep.mubr.msk.bf16.mxu1 %vm17656_vm0, %v17655_v1  ;;  %v3629_v54 = vor.u32 %v3628_v20, %v3625_v14  ;;  %v17406_v20 = vld [vmem:[%s21355_s4 + $0x460] sm:$0xff]  }
 0x282   : > { %14542 = vmatmul.mubr.bf16.vlgmr.msra.gmra.mrb[0].mxu0 %v3456_v55  ;;  %v3640_v55 = vshrl.u32 %v19760_v43, 16 }
 0x283   : > { %15514 = vmatmul.mubr.bf16.vlgmr.msra.gmra.mrb[0].mxu1 %v8686_v26  ;;  %14562 = vmatpush3.bf16.msra.mxu0 %v17373_v42  ;;  %v3637_v42 = vor.u32 %v3636_v10, %v3633_v8  ;;  %v3643_v26 = vshll.u32 %v19760_v43, 16  ;;  %v8889_v8 = vrot.slane %v8887_v30, 2  ;;  %v8892_v10 = vrot.slane %v8890_v60, 3  ;;  %v17426_v30 = vld [vmem:[%s21355_s4 + $0x4a0] sm:$0xff]  }
 0x284   : > { %15534 = vmatpush3.bf16.msra.mxu1 %v17374_v39  ;;  %14563 = vmatprep.subr.bf16.mxu0 %v17655_v1  ;;  %v8858_v39 = vor.u32 %v8857_v16, %v8854_v37  ;;  %v19951_v37 = vld [vmem:[%s18496_s13 + $0x30] ss:$0 sps:$4 sm:$0x33]   ;;  %v3839_v60 = vrot.slane %v19819_v53, 3 }
 0x285   : > { %15535 = vmatprep.subr.bf16.mxu1 %v17655_v1  ;;  %14545 = vmatprep.mubr.msk.bf16.mxu0 %vm17656_vm0, %v17655_v1  ;;  %v3638_v32 = vsel %vm1883_vm5, %v3629_v54, %v3637_v42 }
 0x286   : > { %15517 = vmatprep.mubr.msk.bf16.mxu1 %vm17656_vm0, %v17655_v1 }
 0x287   : > { %14564 = vmatpush3.bf16.msra.mxu0 %v17375_v57  ;;  %v8866_v57 = vor.u32 %v8865_v21, %v8862_v18  ;;  %v17407_v18 = vld [vmem:[%s21355_s4 + $0x468] sm:$0xff]  }
 0x288   : > { %15536 = vmatpush3.bf16.msra.mxu1 %v17376_v27  ;;  %14565 = vmatprep.subr.bf16.mxu0 %v17655_v1  ;;  %v8869_v27 = vshrl.u32 %v19764_v24, 16 }
 0x289   : > { %15537 = vmatprep.subr.bf16.mxu1 %v17655_v1 }
 0x28a   : > { %14546 = vmatmul.mubr.bf16.gmra.mrb[4].mxu0 %v3458_v6  ;;  %v17397_v6 = vld [vmem:[%s21355_s4 + $0x440] sm:$0xff]  }
 0x28b   : > { %15518 = vmatmul.mubr.bf16.gmra.mrb[4].mxu1 %v8688_v25  ;;  %14566 = vmatpush3.bf16.msra.mxu0 %v17379_v0  ;;  %v3642_v0 = vrot.slane %v3640_v55, 2  ;;  %v3645_v25 = vrot.slane %v3643_v26, 3  ;;  %v17408_v55 = vld [vmem:[%s21355_s4 + $0x468] sm:$0xff]   ;;  %v8896_v26 = vshrl.u32 %v19951_v37, 16 }
 0x28c   : > { %15538 = vmatpush3.bf16.msra.mxu1 %v17380_v31  ;;  %14549 = vmatprep.mubr.msk.bf16.mxu0 %vm17656_vm0, %v17655_v1  ;;  %v8867_v31 = vsel %vm1883_vm5, %v8858_v39, %v8866_v57  ;;  %v8899_v39 = vshll.u32 %v19951_v37, 16 }
 0x28d   : > { %14567 = vmatprep.subr.bf16.mxu0 %v17655_v1  ;;  %15521 = vmatprep.mubr.msk.bf16.mxu1 %vm17656_vm0, %v17655_v1 }
 0x28e   : > { %15539 = vmatprep.subr.bf16.mxu1 %v17655_v1 }
 0x28f   : > { %14568 = vmatpush3.bf16.msra.mxu0 %v17382_v47  ;;  %v8871_v47 = vrot.slane %v8869_v27, 2 }
 0x290   : > { %15540 = vmatpush3.bf16.msra.mxu1 %v17384_v34  ;;  %14569 = vmatprep.subr.bf16.mxu0 %v17655_v1  ;;  %v17399_v34 = vld [vmem:[%s21355_s4 + $0x448] sm:$0xff]  }
 0x291   : > { %15541 = vmatprep.subr.bf16.mxu1 %v17655_v1  ;;  %v8875_v15 = vor.u32 %v8874_v22, %v8871_v47  ;;  %v17413_v22 = vld [vmem:[%s21355_s4 + $0x478] sm:$0xff]  }
 0x292   : > { %14550 = vmatmul.mubr.bf16.gmra.mrb[8].mxu0 %v3460_v58  ;;  %v3646_v58 = vor.u32 %v3645_v25, %v3642_v0  ;;  %v8898_v0 = vrot.slane %v8896_v26, 2  ;;  %v8901_v25 = vrot.slane %v8899_v39, 3  ;;  %v17435_v39 = vld [vmem:[%s21355_s4 + $0x4c0] sm:$0xff]  }
 0x293   : > { %15522 = vmatmul.mubr.bf16.gmra.mrb[8].mxu1 %v8690_v40  ;;  %14570 = vmatpush3.bf16.msra.mxu0 %v17385_v48  ;;  %v3649_v48 = vshrl.u32 %v19789_v50, 16  ;;  %v3652_v40 = vshll.u32 %v19789_v50, 16 }
 0x294   : > { %15542 = vmatpush3.bf16.msra.mxu1 %v17386_v52  ;;  %14553 = vmatprep.mubr.msk.bf16.mxu0 %vm17656_vm0, %v17655_v1  ;;  %v17400_v52 = vld [vmem:[%s21355_s4 + $0x448] sm:$0xff]   ;;  %v8902_v47 = vor.u32 %v8901_v25, %v8898_v0  ;;  %v17441_v0 = vld [vmem:[%s21355_s4 + $0x4d0] sm:$0xff]  }
 0x295   : > { %15525 = vmatprep.mubr.msk.bf16.mxu1 %vm17656_vm0, %v17655_v1  ;;  %14571 = vmatprep.subr.bf16.mxu0 %v17655_v1  ;;  %v3651_v46 = vrot.slane %v3649_v48, 2  ;;  %v9040_v48 = vld [vmem:[%s18496_s13 + $0x8] sm:$0x8]  ;;  %v17442_v25 = vld [vmem:[%s21355_s4 + $0x4d0] sm:$0xff]  }
 0x296   : > { %15543 = vmatprep.subr.bf16.mxu1 %v17655_v1 }
 0x297   : > { %14572 = vmatpush3.bf16.msra.mxu0 %v17389_v2  ;;  %v8878_v2 = vshrl.u32 %v19797_v45, 16 }
 0x298   : > { %15544 = vmatpush3.bf16.msra.mxu1 %v17390_v44  ;;  %14573 = vmatprep.subr.bf16.mxu0 %v17655_v1  ;;  %v3647_v44 = vsel %vm1883_vm5, %v3637_v42, %v3646_v58  ;;  %v8893_v42 = vor.u32 %v8892_v10, %v8889_v8  ;;  %v9069_v8 = vrot.slane %v19951_v37, 3  ;;  %v17431_v10 = vld [vmem:[%s21355_s4 + $0x4b8] sm:$0xff]  }
 0x299   : > { %15545 = vmatprep.subr.bf16.mxu1 %v17655_v1 }
 0x29a   : > { %14554 = vmatmul.mubr.bf16.gmra.mrb[12].mxu0 %v3462_v23  ;;  %v3654_v23 = vrot.slane %v3652_v40, 3 }
 0x29b   : > { %15526 = vmatmul.mubr.bf16.gmra.mrb[12].mxu1 %v8692_v28  ;;  %14557 = vmatprep.mubr.msk.bf16.mxu0 %vm17656_vm0, %v17655_v1  ;;  %v8876_v28 = vsel %vm1883_vm5, %v8866_v57, %v8875_v15 }
 0x29c   : > { %14574 = vmatpush3.bf16.msra.mxu0 %v17391_v7  ;;  %15529 = vmatprep.mubr.msk.bf16.mxu1 %vm17656_vm0, %v17655_v1  ;;  %v17402_v7 = vld [vmem:[%s21355_s4 + $0x450] sm:$0xff]   ;;  %v3655_v35 = vor.u32 %v3654_v23, %v3651_v46  ;;  %v17417_v46 = vld [vmem:[%s21355_s4 + $0x480] sm:$0xff]  }
 0x29d   : > { %15546 = vmatpush3.bf16.msra.mxu1 %v17392_v5  ;;  %14575 = vmatprep.subr.bf16.mxu0 %v17655_v1  ;;  %v8880_v5 = vrot.slane %v8878_v2, 2  ;;  %v12966_v2 = vcombine.low %v9040_v48, %v19719_v51  ;;  %v17451_v48 = vld [vmem:[%s21355_s4 + $0x4e8] sm:$0xff]  }
 0x29e   : > { %15547 = vmatprep.subr.bf16.mxu1 %v17655_v1  ;;  %v3656_v61 = vsel %vm1883_vm5, %v3646_v58, %v3655_v35  ;;  %v17414_v58 = vld [vmem:[%s21355_s4 + $0x478] sm:$0xff]  }
 0x29f   : > { %v8884_v12 = vor.u32 %v8883_v49, %v8880_v5  ;;  %v9063_v5 = vrot.slane %v19764_v24, 3  ;;  %v17421_v49 = vld [vmem:[%s21355_s4 + $0x490] sm:$0xff]  }
 0x2a0   : > { %14576 = vmatpush3.bf16.msra.mxu0 %v17395_v59  ;;  %v17404_v59 = vld [vmem:[%s21355_s4 + $0x458] sm:$0xff]   ;;  %v17422_v24 = vld [vmem:[%s21355_s4 + $0x490] sm:$0xff]  }
 0x2a1   : > { %15548 = vmatpush3.bf16.msra.mxu1 %v17396_v13  ;;  %14597 = vmatprep.subr.bf16.mxu0 %v17655_v1  ;;  %v3660_v13 = vrot.slane %v3658_v3, 2  ;;  %v8885_v14 = vsel %vm1883_vm5, %v8875_v15, %v8884_v12  ;;  %v8903_v15 = vsel %vm1883_vm5, %v8893_v42, %v8902_v47  ;;  %v17423_v3 = vld [vmem:[%s21355_s4 + $0x498] sm:$0xff]   ;;  %v20171_v47 = vld [vmem:[%s18496_s13 + $0x10] sm:$0xff]  }
 0x2a2   : > { %14558 = vmatmul.mubr.bf16.gmra.mrb[16].mxu0 %v3464_v63  ;;  %15569 = vmatprep.subr.bf16.mxu1 %v17655_v1  ;;  %v3663_v63 = vrot.slane %v3661_v56, 3  ;;  %v9065_v56 = vrot.slane %v19797_v45, 3 }
 0x2a3   : > { %15530 = vmatmul.mubr.bf16.gmra.mrb[16].mxu1 %v8694_v4  ;;  %14577 = vmatprep.mubr.msk.bf16.mxu0 %vm17656_vm0, %v17655_v1  ;;  %v19943_v4 = vld [vmem:[%s17821_s25 + $0x30] ss:$0 sps:$4 sm:$0x33]  }
 0x2a4   : > { %15549 = vmatprep.mubr.msk.bf16.mxu1 %vm17656_vm0, %v17655_v1  ;;  %v3664_v16 = vor.u32 %v3663_v63, %v3660_v13  ;;  %v3667_v21 = vshrl.u32 %v19943_v4, 16  ;;  %v3670_v54 = vshll.u32 %v19943_v4, 16  ;;  %v9066_v45 = vsel %vm2094_vm6, %v9063_v5, %v9065_v56  ;;  %v17428_v13 = vld [vmem:[%s21355_s4 + $0x4a8] sm:$0xff]  }
 0x2a6   : > { %v3665_v57 = vsel %vm1883_vm5, %v3655_v35, %v3664_v16  ;;  %v3669_v27 = vrot.slane %v3667_v21, 2  ;;  %v3672_v29 = vrot.slane %v3670_v54, 3  ;;  %v20108_v21 = vld [vmem:[%s18496_s13 + $0x4] sm:$0xf]  ;;  %v9207_v54 = vld [vmem:[%s19743_s26] sm:$0xf] }
 0x2aa   : > { %14578 = vmatmul.mubr.bf16.vlgmr.msra.gmra.mrb[0].mxu0 %v3638_v32  ;;  %v8894_v32 = vsel %vm1883_vm5, %v8884_v12, %v8893_v42  ;;  %v17424_v12 = vld [vmem:[%s21355_s4 + $0x498] sm:$0xff]   ;;  %v20114_v42 = vld [vmem:[%s19743_s26 + $0x4] sm:$0xf] }
 0x2ab   : > { %15550 = vmatmul.mubr.bf16.vlgmr.msra.gmra.mrb[0].mxu1 %v8867_v31  ;;  %14598 = vmatpush3.bf16.msra.mxu0 %v17397_v6  ;;  %v17409_v6 = vld [vmem:[%s21355_s4 + $0x470] sm:$0xff]   ;;  %v20120_v26 = vcombine.low %v9207_v54, %v20114_v42  ;;  %v4167_v54 = vld [vmem:[%s18496_s13 + $0x24] sm:$0xf] }
 0x2ac   : > { %15570 = vmatpush3.bf16.msra.mxu1 %v17398_v33  ;;  %14599 = vmatprep.subr.bf16.mxu0 %v17655_v1  ;;  %v17410_v31 = vld [vmem:[%s21355_s4 + $0x470] sm:$0xff]   ;;  %v3673_v33 = vor.u32 %v3672_v29, %v3669_v27  ;;  %v17437_v27 = vld [vmem:[%s21355_s4 + $0x4c8] sm:$0xff]  }
 0x2ad   : > { %15571 = vmatprep.subr.bf16.mxu1 %v17655_v1  ;;  %14581 = vmatprep.mubr.msk.bf16.mxu0 %vm17656_vm0, %v17655_v1  ;;  %v17438_v29 = vld [vmem:[%s21355_s4 + $0x4c8] sm:$0xff]  }
 0x2ae   : > { %15553 = vmatprep.mubr.msk.bf16.mxu1 %vm17656_vm0, %v17655_v1  ;;  %v3674_v40 = vsel %vm1883_vm5, %v3664_v16, %v3673_v33  ;;  %v17446_v33 = vld [vmem:[%s21355_s4 + $0x4d8] sm:$0xff]  }
 0x2af   : > { %14600 = vmatpush3.bf16.msra.mxu0 %v17399_v34  ;;  %v3811_v34 = vld [vmem:[%s17821_s25 + $0x8] sm:$0x8] }
 0x2b0   : > { %15572 = vmatpush3.bf16.msra.mxu1 %v17400_v52  ;;  %14601 = vmatprep.subr.bf16.mxu0 %v17655_v1  ;;  %v12251_v52 = vcombine.low %v3811_v34, %v19715_v17  ;;  %v9060_v17 = vrot.slane %v12966_v2, 3  ;;  %v17447_v34 = vld [vmem:[%s21355_s4 + $0x4e0] sm:$0xff]   ;;  %v17453_v2 = vld [vmem:[%s21355_s4 + $0x4f0] sm:$0xff]  }
 0x2b1   : > { %15573 = vmatprep.subr.bf16.mxu1 %v17655_v1 }
 0x2b2   : > { %14582 = vmatmul.mubr.bf16.gmra.mrb[4].mxu0 %v3647_v44  ;;  %v3832_v41 = vrot.slane %v12251_v52, 3  ;;  %v3833_v44 = vrot.slane %v19732_v36, 3  ;;  %v17419_v36 = vld [vmem:[%s21355_s4 + $0x488] sm:$0xff]   ;;  %v20198_v52 = vld [vmem:[%s18496_s13 + $0x18] sm:$0xff]  }
 0x2b3   : > { %15554 = vmatmul.mubr.bf16.gmra.mrb[4].mxu1 %v8876_v28  ;;  %14602 = vmatpush3.bf16.msra.mxu0 %v17401_v19  ;;  %v9061_v19 = vrot.slane %v19738_v11, 3  ;;  %v17418_v28 = vld [vmem:[%s21355_s4 + $0x480] sm:$0xff]   ;;  %v3835_v11 = vrot.slane %v19760_v43, 3 }
 0x2b4   : > { %15574 = vmatpush3.bf16.msra.mxu1 %v17402_v7  ;;  %14585 = vmatprep.mubr.msk.bf16.mxu0 %vm17656_vm0, %v17655_v1  ;;  %v3834_v51 = vsel %vm2094_vm6, %v3832_v41, %v3833_v44  ;;  %v17420_v7 = vld [vmem:[%s21355_s4 + $0x488] sm:$0xff]   ;;  %v17454_v41 = vld [vmem:[%s21355_s4 + $0x4f0] sm:$0xff]  }
 0x2b5   : > { %14603 = vmatprep.subr.bf16.mxu0 %v17655_v1  ;;  %15557 = vmatprep.mubr.msk.bf16.mxu1 %vm17656_vm0, %v17655_v1  ;;  %v9062_v23 = vsel %vm2094_vm6, %v9060_v17, %v9061_v19  ;;  %v3836_v43 = vsel %vm2094_vm6, %v3833_v44, %v3835_v11  ;;  %v9064_v35 = vsel %vm2094_vm6, %v9061_v19, %v9063_v5  ;;  %v20217_v44 = vld [vmem:[%s18496_s13 + $0x20] sm:$0xf]  ;;  %v3988_v17 = vld [vmem:[%s18496_s13 + $0x24] sm:$0x7] }
 0x2b6   : > { %15575 = vmatprep.subr.bf16.mxu1 %v17655_v1 }
 0x2b7   : > { %14604 = vmatpush3.bf16.msra.mxu0 %v17403_v9  ;;  %v3837_v9 = vrot.slane %v19789_v50, 3 }
 0x2b8   : > { %15576 = vmatpush3.bf16.msra.mxu1 %v17404_v59  ;;  %14605 = vmatprep.subr.bf16.mxu0 %v17655_v1  ;;  %v17425_v59 = vld [vmem:[%s21355_s4 + $0x4a0] sm:$0xff]  }
 0x2b9   : > { %15577 = vmatprep.subr.bf16.mxu1 %v17655_v1  ;;  %v3838_v50 = vsel %vm2094_vm6, %v3835_v11, %v3837_v9  ;;  %v3840_v53 = vsel %vm2094_vm6, %v3837_v9, %v3839_v60  ;;  %v12280_v11 = vcombine.low %v20217_v44, %v3988_v17 }
 0x2ba   : > { %14586 = vmatmul.mubr.bf16.gmra.mrb[8].mxu0 %v3656_v61  ;;  %v17427_v61 = vld [vmem:[%s21355_s4 + $0x4a8] sm:$0xff]  }
 0x2bb   : > { %15558 = vmatmul.mubr.bf16.gmra.mrb[8].mxu1 %v8885_v14  ;;  %14606 = vmatpush3.bf16.msra.mxu0 %v17405_v62  ;;  %v9067_v62 = vrot.slane %v19827_v38, 3  ;;  %v17429_v38 = vld [vmem:[%s21355_s4 + $0x4b0] sm:$0xff]  }
 0x2bc   : > { %15578 = vmatpush3.bf16.msra.mxu1 %v17406_v20  ;;  %14589 = vmatprep.mubr.msk.bf16.mxu0 %vm17656_vm0, %v17655_v1  ;;  %v17430_v14 = vld [vmem:[%s21355_s4 + $0x4b0] sm:$0xff]   ;;  %v3841_v20 = vrot.slane %v19943_v4, 3  ;;  %v17432_v4 = vld [vmem:[%s21355_s4 + $0x4b8] sm:$0xff]  }
 0x2bd   : > { %15561 = vmatprep.mubr.msk.bf16.mxu1 %vm17656_vm0, %v17655_v1  ;;  %14607 = vmatprep.subr.bf16.mxu0 %v17655_v1  ;;  %v9068_v63 = vsel %vm2094_vm6, %v9065_v56, %v9067_v62  ;;  %v9070_v37 = vsel %vm2094_vm6, %v9067_v62, %v9069_v8  ;;  %v17462_v62 = vld [vmem:[%s21355_s4 + $0x500] sm:$0xff]  }
 0x2be   : > { %15579 = vmatprep.subr.bf16.mxu1 %v17655_v1  ;;  %v3842_v16 = vsel %vm2094_vm6, %v3839_v60, %v3841_v20  ;;  %v4204_v60 = vshll.u32 %v20171_v47, 16  ;;  %v17464_v20 = vld [vmem:[%s21355_s4 + $0x508] sm:$0xff]  }
 0x2bf   : > { %14608 = vmatpush3.bf16.msra.mxu0 %v17407_v18  ;;  %v3979_v18 = vld [vmem:[%s18496_s13] sm:$0xf] }
 0x2c0   : > { %15580 = vmatpush3.bf16.msra.mxu1 %v17408_v55  ;;  %14609 = vmatprep.subr.bf16.mxu0 %v17655_v1  ;;  %v20117_v55 = vcombine.low %v3979_v18, %v20108_v21  ;;  %v4212_v18 = vshll.u32 %v20198_v52, 16 }
 0x2c1   : > { %15581 = vmatprep.subr.bf16.mxu1 %v17655_v1 }
 0x2c2   : > { %14590 = vmatmul.mubr.bf16.gmra.mrb[12].mxu0 %v3665_v57  ;;  %v17436_v57 = vld [vmem:[%s21355_s4 + $0x4c0] sm:$0xff]   ;;  %v4191_v19 = vshll.u32 %v20117_v55, 16  ;;  %v4189_v5 = vshrl.u32 %v20117_v55, 16 }
 0x2c3   : > { %15562 = vmatmul.mubr.bf16.gmra.mrb[12].mxu1 %v8894_v32  ;;  %14593 = vmatprep.mubr.msk.bf16.mxu0 %vm17656_vm0, %v17655_v1  ;;  %v20143_v32 = vld [vmem:[%s18496_s13 + $0x8] sm:$0xff]  }
 0x2c4   : > { %14610 = vmatpush3.bf16.msra.mxu0 %v17409_v6  ;;  %15565 = vmatprep.mubr.msk.bf16.mxu1 %vm17656_vm0, %v17655_v1  ;;  %v20146_v6 = vld [vmem:[%s19743_s26 + $0x8] sm:$0xff]  }
 0x2c5   : > { %15582 = vmatpush3.bf16.msra.mxu1 %v17410_v31  ;;  %14611 = vmatprep.subr.bf16.mxu0 %v17655_v1  ;;  %v17444_v31 = vld [vmem:[%s21355_s4 + $0x4d8] sm:$0xff]   ;;  %v9422_v9 = vshll.u32 %v20146_v6, 16 }
 0x2c6   : > { %15583 = vmatprep.subr.bf16.mxu1 %v17655_v1 }
 0x2c8   : > { %14612 = vmatpush3.bf16.msra.mxu0 %v17413_v22  ;;  %v20174_v22 = vld [vmem:[%s19743_s26 + $0x10] sm:$0xff]  }
 0x2c9   : > { %15584 = vmatpush3.bf16.msra.mxu1 %v17414_v58  ;;  %14633 = vmatprep.subr.bf16.mxu0 %v17655_v1  ;;  %v17448_v58 = vld [vmem:[%s21355_s4 + $0x4e0] sm:$0xff]  }
 0x2ca   : > { %14594 = vmatmul.mubr.bf16.gmra.mrb[16].mxu0 %v3674_v40  ;;  %15605 = vmatprep.subr.bf16.mxu1 %v17655_v1  ;;  %v17452_v40 = vld [vmem:[%s21355_s4 + $0x4e8] sm:$0xff]  }
 0x2cb   : > { %15566 = vmatmul.mubr.bf16.gmra.mrb[16].mxu1 %v8903_v15  ;;  %14613 = vmatprep.mubr.msk.bf16.mxu0 %vm17656_vm0, %v17655_v1  ;;  %v20202_v15 = vld [vmem:[%s19743_s26 + $0x18] sm:$0xff]  }
 0x2cc   : > { %15585 = vmatprep.mubr.msk.bf16.mxu1 %vm17656_vm0, %v17655_v1 }
 0x2d2   : > { %14614 = vmatmul.mubr.bf16.vlgmr.msra.gmra.mrb[0].mxu0 %v3834_v51  ;;  %v20224_v51 = vld [vmem:[%s19743_s26 + $0x20] sm:$0xf] }
 0x2d3   : > { %15586 = vmatmul.mubr.bf16.vlgmr.msra.gmra.mrb[0].mxu1 %v9062_v23  ;;  %14634 = vmatpush3.bf16.msra.mxu0 %v17417_v46  ;;  %v9216_v46 = vld [vmem:[%s19743_s26 + $0x24] sm:$0x7]  ;;  %v17459_v23 = vld [vmem:[%s21355_s4 + $0x4f8] sm:$0xff]  }
 0x2d4   : > { %15606 = vmatpush3.bf16.msra.mxu1 %v17418_v28  ;;  %14635 = vmatprep.subr.bf16.mxu0 %v17655_v1  ;;  %v9417_v28 = vshll.u32 %v20120_v26, 16 }
 0x2d5   : > { %15607 = vmatprep.subr.bf16.mxu1 %v17655_v1  ;;  %14617 = vmatprep.mubr.msk.bf16.mxu0 %vm17656_vm0, %v17655_v1 }
 0x2d6   : > { %15589 = vmatprep.mubr.msk.bf16.mxu1 %vm17656_vm0, %v17655_v1 }
 0x2d7   : > { %14636 = vmatpush3.bf16.msra.mxu0 %v17419_v36  ;;  %v17460_v36 = vld [vmem:[%s21355_s4 + $0x4f8] sm:$0xff]  }
 0x2d8   : > { %15608 = vmatpush3.bf16.msra.mxu1 %v17420_v7  ;;  %14637 = vmatprep.subr.bf16.mxu0 %v17655_v1  ;;  %v12995_v7 = vcombine.low %v20224_v51, %v9216_v46 }
 0x2d9   : > { %15609 = vmatprep.subr.bf16.mxu1 %v17655_v1 }
 0x2da   : > { %14618 = vmatmul.mubr.bf16.gmra.mrb[4].mxu0 %v3836_v43  ;;  %v4193_v43 = vrot.slane %v4191_v19, 1  ;;  %v17470_v19 = vld [vmem:[%s21355_s4 + $0x520] sm:$0xff]  }
 0x2db   : > { %15590 = vmatmul.mubr.bf16.gmra.mrb[4].mxu1 %v9064_v35  ;;  %14638 = vmatpush3.bf16.msra.mxu0 %v17421_v49  ;;  %v4196_v49 = vshll.u32 %v20143_v32, 16  ;;  %v9415_v35 = vshrl.u32 %v20120_v26, 16 }
 0x2dc   : > { %15610 = vmatpush3.bf16.msra.mxu1 %v17422_v24  ;;  %14621 = vmatprep.mubr.msk.bf16.mxu0 %vm17656_vm0, %v17655_v1  ;;  %v9419_v24 = vrot.slane %v9417_v28, 1 }
 0x2dd   : > { %14639 = vmatprep.subr.bf16.mxu0 %v17655_v1  ;;  %15593 = vmatprep.mubr.msk.bf16.mxu1 %vm17656_vm0, %v17655_v1  ;;  %v4198_v56 = vrot.slane %v4196_v49, 1 }
 0x2de   : > { %15611 = vmatprep.subr.bf16.mxu1 %v17655_v1 }
 0x2df   : > { %14640 = vmatpush3.bf16.msra.mxu0 %v17423_v3  ;;  %v4194_v3 = vor.u32 %v4193_v43, %v4189_v5  ;;  %v17472_v5 = vld [vmem:[%s21355_s4 + $0x528] sm:$0xff]  }
 0x2e0   : > { %15612 = vmatpush3.bf16.msra.mxu1 %v17424_v12  ;;  %14641 = vmatprep.subr.bf16.mxu0 %v17655_v1  ;;  %v9420_v12 = vor.u32 %v9419_v24, %v9415_v35  ;;  %v17473_v35 = vld [vmem:[%s21355_s4 + $0x530] sm:$0xff]  }
 0x2e1   : > { %15613 = vmatprep.subr.bf16.mxu1 %v17655_v1  ;;  %v17474_v24 = vld [vmem:[%s21355_s4 + $0x530] sm:$0xff]  }
 0x2e2   : > { %14622 = vmatmul.mubr.bf16.gmra.mrb[8].mxu0 %v3838_v50  ;;  %v9424_v50 = vrot.slane %v9422_v9, 1 }
 0x2e3   : > { %15594 = vmatmul.mubr.bf16.gmra.mrb[8].mxu1 %v9066_v45  ;;  %14642 = vmatpush3.bf16.msra.mxu0 %v17425_v59  ;;  %v4199_v59 = vsel %vm589_vm1, %v4194_v3, %v4198_v56  ;;  %v17461_v45 = vld [vmem:[%s21355_s4 + $0x500] sm:$0xff]  }
 0x2e4   : > { %15614 = vmatpush3.bf16.msra.mxu1 %v17426_v30  ;;  %14625 = vmatprep.mubr.msk.bf16.mxu0 %vm17656_vm0, %v17655_v1  ;;  %v4200_v30 = vshrl.u32 %v20143_v32, 16 }
 0x2e5   : > { %15597 = vmatprep.mubr.msk.bf16.mxu1 %vm17656_vm0, %v17655_v1  ;;  %14643 = vmatprep.subr.bf16.mxu0 %v17655_v1 }
 0x2e6   : > { %15615 = vmatprep.subr.bf16.mxu1 %v17655_v1 }
 0x2e7   : > { %14644 = vmatpush3.bf16.msra.mxu0 %v17427_v61  ;;  %v9425_v61 = vsel %vm589_vm1, %v9420_v12, %v9424_v50  ;;  %v4363_v12 = vld [vmem:[%s18496_s13] sm:$0xe] }
 0x2e8   : > { %15616 = vmatpush3.bf16.msra.mxu1 %v17428_v13  ;;  %14645 = vmatprep.subr.bf16.mxu0 %v17655_v1  ;;  %v9426_v13 = vshrl.u32 %v20146_v6, 16 }
 0x2e9   : > { %15617 = vmatprep.subr.bf16.mxu1 %v17655_v1 }
 0x2ea   : > { %14626 = vmatmul.mubr.bf16.gmra.mrb[12].mxu0 %v3840_v53  ;;  %v9430_v53 = vshll.u32 %v20174_v22, 16  ;;  %v9428_v8 = vor.u32 %v9426_v13, %v9424_v50  ;;  %v17476_v50 = vld [vmem:[%s21355_s4 + $0x538] sm:$0xff]   ;;  %v4385_v13 = vrot.slane %v20143_v32, 1 }
 0x2eb   : > { %15598 = vmatmul.mubr.bf16.gmra.mrb[12].mxu1 %v9068_v63  ;;  %14629 = vmatprep.mubr.msk.bf16.mxu0 %vm17656_vm0, %v17655_v1  ;;  %v17463_v63 = vld [vmem:[%s21355_s4 + $0x508] sm:$0xff]  }
 0x2ec   : > { %14646 = vmatpush3.bf16.msra.mxu0 %v17429_v38  ;;  %15601 = vmatprep.mubr.msk.bf16.mxu1 %vm17656_vm0, %v17655_v1  ;;  %v4202_v38 = vor.u32 %v4200_v30, %v4198_v56  ;;  %v17475_v56 = vld [vmem:[%s21355_s4 + $0x538] sm:$0xff]  }
 0x2ed   : > { %15618 = vmatpush3.bf16.msra.mxu1 %v17430_v14  ;;  %14647 = vmatprep.subr.bf16.mxu0 %v17655_v1  ;;  %v4206_v14 = vrot.slane %v4204_v60, 1  ;;  %v12330_v60 = vcombine.low %v4363_v12, %v20108_v21  ;;  %v17506_v12 = vld [vmem:[%s21355_s4 + $0x590] sm:$0xff]  }
 0x2ee   : > { %15619 = vmatprep.subr.bf16.mxu1 %v17655_v1 }
 0x2f0   : > { %14648 = vmatpush3.bf16.msra.mxu0 %v17431_v10  ;;  %v9432_v10 = vrot.slane %v9430_v53, 1  ;;  %v9610_v53 = vrot.slane %v20146_v6, 1 }
 0x2f1   : > { %15620 = vmatpush3.bf16.msra.mxu1 %v17432_v4  ;;  %14669 = vmatprep.subr.bf16.mxu0 %v17655_v1  ;;  %v4207_v4 = vsel %vm589_vm1, %v4202_v38, %v4206_v14 }
 0x2f2   : > { %14630 = vmatmul.mubr.bf16.gmra.mrb[16].mxu0 %v3842_v16  ;;  %15641 = vmatprep.subr.bf16.mxu1 %v17655_v1  ;;  %v17465_v16 = vld [vmem:[%s21355_s4 + $0x510] sm:$0xff]  }
 0x2f3   : > { %15602 = vmatmul.mubr.bf16.gmra.mrb[16].mxu1 %v9070_v37  ;;  %14649 = vmatprep.mubr.msk.bf16.mxu0 %vm17656_vm0, %v17655_v1  ;;  %v4208_v37 = vshrl.u32 %v20171_v47, 16 }
 0x2f4   : > { %15621 = vmatprep.mubr.msk.bf16.mxu1 %vm17656_vm0, %v17655_v1 }
 0x2fa   : > { %14650 = vmatmul.mubr.bf16.vlgmr.msra.gmra.mrb[0].mxu0 %v20117_v55  ;;  %v9433_v55 = vsel %vm589_vm1, %v9428_v8, %v9432_v10  ;;  %v9612_v8 = vrot.slane %v20174_v22, 1 }
 0x2fb   : > { %15622 = vmatmul.mubr.bf16.vlgmr.msra.gmra.mrb[0].mxu1 %v20120_v26  ;;  %14670 = vmatpush3.bf16.msra.mxu0 %v17435_v39  ;;  %v17466_v26 = vld [vmem:[%s21355_s4 + $0x510] sm:$0xff]   ;;  %v9434_v39 = vshrl.u32 %v20174_v22, 16 }
 0x2fc   : > { %15642 = vmatpush3.bf16.msra.mxu1 %v17436_v57  ;;  %14671 = vmatprep.subr.bf16.mxu0 %v17655_v1  ;;  %v9438_v57 = vshll.u32 %v20202_v15, 16 }
 0x2fd   : > { %15643 = vmatprep.subr.bf16.mxu1 %v17655_v1  ;;  %14653 = vmatprep.mubr.msk.bf16.mxu0 %vm17656_vm0, %v17655_v1 }
 0x2fe   : > { %15625 = vmatprep.mubr.msk.bf16.mxu1 %vm17656_vm0, %v17655_v1 }
 0x2ff   : > { %14672 = vmatpush3.bf16.msra.mxu0 %v17437_v27  ;;  %v9394_v27 = vld [vmem:[%s19743_s26 + $0x24] sm:$0xf] }
 0x300   : > { %15644 = vmatpush3.bf16.msra.mxu1 %v17438_v29  ;;  %14673 = vmatprep.subr.bf16.mxu0 %v17655_v1  ;;  %v20289_v29 = vcombine.low %v20217_v44, %v4167_v54  ;;  %v17486_v54 = vld [vmem:[%s21355_s4 + $0x558] sm:$0xff]  }
 0x301   : > { %15645 = vmatprep.subr.bf16.mxu1 %v17655_v1 }
 0x302   : > { %14654 = vmatmul.mubr.bf16.gmra.mrb[4].mxu0 %v20143_v32  ;;  %v4220_v44 = vshll.u32 %v20289_v29, 16  ;;  %v4224_v9 = vshrl.u32 %v20289_v29, 16  ;;  %v17481_v32 = vld [vmem:[%s21355_s4 + $0x548] sm:$0xff]  }
 0x303   : > { %15626 = vmatmul.mubr.bf16.gmra.mrb[4].mxu1 %v20146_v6  ;;  %14674 = vmatpush3.bf16.msra.mxu0 %v17441_v0  ;;  %v4210_v0 = vor.u32 %v4208_v37, %v4206_v14  ;;  %v17480_v14 = vld [vmem:[%s21355_s4 + $0x540] sm:$0xff]   ;;  %v4387_v6 = vrot.slane %v20171_v47, 1  ;;  %v17485_v37 = vld [vmem:[%s21355_s4 + $0x558] sm:$0xff]  }
 0x304   : > { %15646 = vmatpush3.bf16.msra.mxu1 %v17442_v25  ;;  %14657 = vmatprep.mubr.msk.bf16.mxu0 %vm17656_vm0, %v17655_v1  ;;  %v4214_v25 = vrot.slane %v4212_v18, 1  ;;  %v4222_v28 = vrot.slane %v4220_v44, 1  ;;  %v9614_v18 = vrot.slane %v20202_v15, 1 }
 0x305   : > { %14675 = vmatprep.subr.bf16.mxu0 %v17655_v1  ;;  %15629 = vmatprep.mubr.msk.bf16.mxu1 %vm17656_vm0, %v17655_v1 }
 0x306   : > { %15647 = vmatprep.subr.bf16.mxu1 %v17655_v1 }
 0x307   : > { %14676 = vmatpush3.bf16.msra.mxu0 %v17444_v31  ;;  %v17467_v31 = vld [vmem:[%s21355_s4 + $0x518] sm:$0xff]  }
 0x308   : > { %15648 = vmatpush3.bf16.msra.mxu1 %v17446_v33  ;;  %14677 = vmatprep.subr.bf16.mxu0 %v17655_v1  ;;  %v20295_v33 = vcombine.low %v20224_v51, %v9394_v27  ;;  %v9442_v51 = vshrl.u32 %v20202_v15, 16 }
 0x309   : > { %15649 = vmatprep.subr.bf16.mxu1 %v17655_v1 }
 0x30a   : > { %14658 = vmatmul.mubr.bf16.gmra.mrb[8].mxu0 %v20171_v47  ;;  %v9446_v46 = vshll.u32 %v20295_v33, 16  ;;  %v9450_v3 = vshrl.u32 %v20295_v33, 16  ;;  %v4388_v47 = vsel %vm905_vm2, %v4385_v13, %v4387_v6  ;;  %v9616_v27 = vrot.slane %v20295_v33, 1  ;;  %v17492_v33 = vld [vmem:[%s21355_s4 + $0x570] sm:$0xff]  }
 0x30b   : > { %15630 = vmatmul.mubr.bf16.gmra.mrb[8].mxu1 %v20174_v22  ;;  %14678 = vmatpush3.bf16.msra.mxu0 %v17447_v34  ;;  %v9436_v34 = vor.u32 %v9434_v39, %v9432_v10  ;;  %v17483_v10 = vld [vmem:[%s21355_s4 + $0x550] sm:$0xff]   ;;  %v4391_v39 = vrot.slane %v20289_v29, 1 }
 0x30c   : > { %15650 = vmatpush3.bf16.msra.mxu1 %v17448_v58  ;;  %14661 = vmatprep.mubr.msk.bf16.mxu0 %vm17656_vm0, %v17655_v1  ;;  %v9440_v58 = vrot.slane %v9438_v57, 1  ;;  %v17484_v22 = vld [vmem:[%s21355_s4 + $0x550] sm:$0xff]   ;;  %v17489_v57 = vld [vmem:[%s21355_s4 + $0x568] sm:$0xff]  }
 0x30d   : > { %15633 = vmatprep.mubr.msk.bf16.mxu1 %vm17656_vm0, %v17655_v1  ;;  %14679 = vmatprep.subr.bf16.mxu0 %v17655_v1 }
 0x30e   : > { %15651 = vmatprep.subr.bf16.mxu1 %v17655_v1  ;;  %v9441_v17 = vsel %vm589_vm1, %v9436_v34, %v9440_v58  ;;  %v17493_v34 = vld [vmem:[%s21355_s4 + $0x578] sm:$0xff]  }
 0x30f   : > { %14680 = vmatpush3.bf16.msra.mxu0 %v17451_v48  ;;  %v17468_v48 = vld [vmem:[%s21355_s4 + $0x518] sm:$0xff]  }
 0x310   : > { %15652 = vmatpush3.bf16.msra.mxu1 %v17452_v40  ;;  %14681 = vmatprep.subr.bf16.mxu0 %v17655_v1  ;;  %v4215_v40 = vsel %vm589_vm1, %v4210_v0, %v4214_v25  ;;  %v17490_v0 = vld [vmem:[%s21355_s4 + $0x568] sm:$0xff]  }
 0x311   : > { %15653 = vmatprep.subr.bf16.mxu1 %v17655_v1 }
 0x312   : > { %14662 = vmatmul.mubr.bf16.gmra.mrb[12].mxu0 %v20198_v52 }
 0x313   : > { %15634 = vmatmul.mubr.bf16.gmra.mrb[12].mxu1 %v20202_v15  ;;  %14665 = vmatprep.mubr.msk.bf16.mxu0 %vm17656_vm0, %v17655_v1  ;;  %v9615_v15 = vsel %vm905_vm2, %v9612_v8, %v9614_v18 }
 0x314   : > { %14682 = vmatpush3.bf16.msra.mxu0 %v17453_v2  ;;  %15637 = vmatprep.mubr.msk.bf16.mxu1 %vm17656_vm0, %v17655_v1  ;;  %v17469_v2 = vld [vmem:[%s21355_s4 + $0x520] sm:$0xff]  }
 0x315   : > { %15654 = vmatpush3.bf16.msra.mxu1 %v17454_v41  ;;  %14683 = vmatprep.subr.bf16.mxu0 %v17655_v1  ;;  %v4216_v41 = vshrl.u32 %v20198_v52, 16 }
 0x316   : > { %15655 = vmatprep.subr.bf16.mxu1 %v17655_v1 }
 0x318   : > { %14684 = vmatpush3.bf16.msra.mxu0 %v17459_v23  ;;  %v4218_v23 = vor.u32 %v4216_v41, %v4214_v25  ;;  %v9617_v25 = vsel %vm905_vm2, %v9614_v18, %v9616_v27  ;;  %v17498_v41 = vld [vmem:[%s19743_s26 + $0xc] sm:$0xff]  }
 0x319   : > { %15656 = vmatpush3.bf16.msra.mxu1 %v17460_v36  ;;  %14705 = vmatprep.subr.bf16.mxu0 %v17655_v1  ;;  %v17471_v36 = vld [vmem:[%s21355_s4 + $0x528] sm:$0xff]  }
 0x31a   : > { %14666 = vmatmul.mubr.bf16.gmra.mrb[16].mxu0 %v12280_v11  ;;  %15677 = vmatprep.subr.bf16.mxu1 %v17655_v1  ;;  %v9444_v11 = vor.u32 %v9442_v51, %v9440_v58  ;;  %v4223_v43 = vsel %vm589_vm1, %v4218_v23, %v4222_v28  ;;  %v17494_v58 = vld [vmem:[%s21355_s4 + $0x578] sm:$0xff]   ;;  %v9806_v51 = vrot.slane %v17498_v41, 1  ;;  %v17499_v23 = vld [vmem:[%s21355_s4 + $0x580] sm:$0xff]  }
 0x31b   : > { %15638 = vmatmul.mubr.bf16.gmra.mrb[16].mxu1 %v12995_v7  ;;  %14685 = vmatprep.mubr.msk.bf16.mxu0 %vm17656_vm0, %v17655_v1  ;;  %v9448_v7 = vrot.slane %v9446_v46, 1 }
 0x31c   : > { %15657 = vmatprep.mubr.msk.bf16.mxu1 %vm17656_vm0, %v17655_v1 }
 0x31d   : > { %v9449_v49 = vsel %vm589_vm1, %v9444_v11, %v9448_v7  ;;  %v9452_v30 = vor.u32 %v9450_v3, %v9448_v7  ;;  %v17500_v11 = vld [vmem:[%s21355_s4 + $0x580] sm:$0xff]   ;;  %v17504_v7 = vld [vmem:[%s19743_s26 + $0x14] sm:$0xff]  }
 0x31e   : > { %v17507_v3 = vld [vmem:[%s18496_s13 + $0x1c] sm:$0xff]  }
 0x322   : > { %14686 = vmatmul.mubr.bf16.vlgmr.msra.gmra.mrb[0].mxu0 %v4199_v59  ;;  %v9589_v59 = vld [vmem:[%s19743_s26] sm:$0xe] }
 0x323   : > { %15658 = vmatmul.mubr.bf16.vlgmr.msra.gmra.mrb[0].mxu1 %v9425_v61  ;;  %14706 = vmatpush3.bf16.msra.mxu0 %v17461_v45  ;;  %v4226_v45 = vor.u32 %v4224_v9, %v4222_v28  ;;  %v13045_v61 = vcombine.low %v9589_v59, %v20114_v42  ;;  %v17503_v28 = vld [vmem:[%s18496_s13 + $0x14] sm:$0xff]   ;;  %v4586_v59 = vrot.slane %v17507_v3, 1 }
 0x324   : > { %15678 = vmatpush3.bf16.msra.mxu1 %v17462_v62  ;;  %14707 = vmatprep.subr.bf16.mxu0 %v17655_v1  ;;  %v4384_v62 = vrot.slane %v12330_v60, 1  ;;  %v17505_v9 = vld [vmem:[%s21355_s4 + $0x590] sm:$0xff]   ;;  %v17510_v60 = vld [vmem:[%s21355_s4 + $0x598] sm:$0xff]  }
 0x325   : > { %15679 = vmatprep.subr.bf16.mxu1 %v17655_v1  ;;  %14689 = vmatprep.mubr.msk.bf16.mxu0 %vm17656_vm0, %v17655_v1  ;;  %v9609_v21 = vrot.slane %v13045_v61, 1 }
 0x326   : > { %15661 = vmatprep.mubr.msk.bf16.mxu1 %vm17656_vm0, %v17655_v1  ;;  %v4386_v42 = vsel %vm905_vm2, %v4384_v62, %v4385_v13  ;;  %v17511_v62 = vld [vmem:[%s21355_s4 + $0x5a0] sm:$0xff]  }
 0x327   : > { %14708 = vmatpush3.bf16.msra.mxu0 %v17463_v63  ;;  %v17479_v63 = vld [vmem:[%s21355_s4 + $0x540] sm:$0xff]   ;;  %v9611_v38 = vsel %vm905_vm2, %v9609_v21, %v9610_v53 }
 0x328   : > { %15680 = vmatpush3.bf16.msra.mxu1 %v17464_v20  ;;  %14709 = vmatprep.subr.bf16.mxu0 %v17655_v1  ;;  %v17482_v20 = vld [vmem:[%s21355_s4 + $0x548] sm:$0xff]  }
 0x329   : > { %15681 = vmatprep.subr.bf16.mxu1 %v17655_v1  ;;  %v20521_v13 = vld [vmem:[%s18496_s13 + $0x24] sm:$0xff]  }
 0x32a   : > { %14690 = vmatmul.mubr.bf16.gmra.mrb[4].mxu0 %v4207_v4  ;;  %v9613_v4 = vsel %vm905_vm2, %v9610_v53, %v9612_v8  ;;  %v17512_v53 = vld [vmem:[%s21355_s4 + $0x5a0] sm:$0xff]  }
 0x32b   : > { %15662 = vmatmul.mubr.bf16.gmra.mrb[4].mxu1 %v9433_v55  ;;  %14710 = vmatpush3.bf16.msra.mxu0 %v17465_v16  ;;  %v4389_v16 = vrot.slane %v20198_v52, 1  ;;  %v17487_v55 = vld [vmem:[%s21355_s4 + $0x560] sm:$0xff]  }
 0x32c   : > { %15682 = vmatpush3.bf16.msra.mxu1 %v17466_v26  ;;  %14693 = vmatprep.mubr.msk.bf16.mxu0 %vm17656_vm0, %v17655_v1  ;;  %v17488_v26 = vld [vmem:[%s21355_s4 + $0x560] sm:$0xff]  }
 0x32d   : > { %14711 = vmatprep.subr.bf16.mxu0 %v17655_v1  ;;  %15665 = vmatprep.mubr.msk.bf16.mxu1 %vm17656_vm0, %v17655_v1  ;;  %v4390_v52 = vsel %vm905_vm2, %v4387_v6, %v4389_v16  ;;  %v4392_v29 = vsel %vm905_vm2, %v4389_v16, %v4391_v39  ;;  %v4726_v6 = vld [vmem:[%s18496_s13 + $0x4] sm:$0xe] }
 0x32e   : > { %15683 = vmatprep.subr.bf16.mxu1 %v17655_v1  ;;  %v9950_v8 = vld [vmem:[%s19743_s26 + $0x4] sm:$0xe] }
 0x32f   : > { %14712 = vmatpush3.bf16.msra.mxu0 %v17467_v31  ;;  %v17491_v31 = vld [vmem:[%s21355_s4 + $0x570] sm:$0xff]  }
 0x330   : > { %15684 = vmatpush3.bf16.msra.mxu1 %v17468_v48  ;;  %14713 = vmatprep.subr.bf16.mxu0 %v17655_v1  ;;  %v17495_v48 = vld [vmem:[%s18496_s13 + $0x4] sm:$0xfe]  }
 0x331   : > { %15685 = vmatprep.subr.bf16.mxu1 %v17655_v1  ;;  %v4581_v44 = vrot.slane %v17495_v48, 1 }
 0x332   : > { %14694 = vmatmul.mubr.bf16.gmra.mrb[8].mxu0 %v4215_v40  ;;  %v17496_v40 = vld [vmem:[%s18496_s13 + $0xc] sm:$0xff]  }
 0x333   : > { %15666 = vmatmul.mubr.bf16.gmra.mrb[8].mxu1 %v9441_v17  ;;  %14714 = vmatpush3.bf16.msra.mxu0 %v17469_v2  ;;  %v17497_v2 = vld [vmem:[%s19743_s26 + $0x4] sm:$0xfe]   ;;  %v4582_v17 = vrot.slane %v17496_v40, 1  ;;  %v20589_v40 = vld [vmem:[%s18496_s13 + $0x14] sm:$0xff]  }
 0x334   : > { %15686 = vmatpush3.bf16.msra.mxu1 %v17470_v19  ;;  %14697 = vmatprep.mubr.msk.bf16.mxu0 %vm17656_vm0, %v17655_v1  ;;  %v9805_v19 = vrot.slane %v17497_v2, 1 }
 0x335   : > { %15669 = vmatprep.mubr.msk.bf16.mxu1 %vm17656_vm0, %v17655_v1  ;;  %14715 = vmatprep.subr.bf16.mxu0 %v17655_v1  ;;  %v4583_v46 = vsel %vm905_vm2, %v4581_v44, %v4582_v17 }
 0x336   : > { %15687 = vmatprep.subr.bf16.mxu1 %v17655_v1 }
 0x337   : > { %14716 = vmatpush3.bf16.msra.mxu0 %v17471_v36  ;;  %v9807_v36 = vsel %vm905_vm2, %v9805_v19, %v9806_v51  ;;  %v20592_v19 = vld [vmem:[%s19743_s26 + $0x14] sm:$0xff]  }
 0x338   : > { %15688 = vmatpush3.bf16.msra.mxu1 %v17472_v5  ;;  %14717 = vmatprep.subr.bf16.mxu0 %v17655_v1  ;;  %v17501_v5 = vld [vmem:[%s21355_s4 + $0x588] sm:$0xff]  }
 0x339   : > { %15689 = vmatprep.subr.bf16.mxu1 %v17655_v1 }
 0x33a   : > { %14698 = vmatmul.mubr.bf16.gmra.mrb[12].mxu0 %v4223_v43  ;;  %v4584_v43 = vrot.slane %v17503_v28, 1  ;;  %v4803_v28 = vshll.u32 %v20589_v40, 16 }
 0x33b   : > { %15670 = vmatmul.mubr.bf16.gmra.mrb[12].mxu1 %v9449_v49  ;;  %14701 = vmatprep.mubr.msk.bf16.mxu0 %vm17656_vm0, %v17655_v1  ;;  %v17502_v49 = vld [vmem:[%s21355_s4 + $0x588] sm:$0xff]  }
 0x33c   : > { %14718 = vmatpush3.bf16.msra.mxu0 %v17473_v35  ;;  %15673 = vmatprep.mubr.msk.bf16.mxu1 %vm17656_vm0, %v17655_v1  ;;  %v9808_v35 = vrot.slane %v17504_v7, 1  ;;  %v4587_v61 = vsel %vm905_vm2, %v4584_v43, %v4586_v59  ;;  %v10023_v7 = vshrl.u32 %v20592_v19, 16 }
 0x33d   : > { %15690 = vmatpush3.bf16.msra.mxu1 %v17474_v24  ;;  %14719 = vmatprep.subr.bf16.mxu0 %v17655_v1  ;;  %v4585_v24 = vsel %vm905_vm2, %v4582_v17, %v4584_v43 }
 0x33e   : > { %15691 = vmatprep.subr.bf16.mxu1 %v17655_v1 }
 0x340   : > { %14720 = vmatpush3.bf16.msra.mxu0 %v17475_v56  ;;  %v9809_v56 = vsel %vm905_vm2, %v9806_v51, %v9808_v35 }
 0x341   : > { %15692 = vmatpush3.bf16.msra.mxu1 %v17476_v50  ;;  %14741 = vmatprep.subr.bf16.mxu0 %v17655_v1  ;;  %v17509_v50 = vld [vmem:[%s19743_s26 + $0x1c] sm:$0xff]  }
 0x342   : > { %14702 = vmatmul.mubr.bf16.gmra.mrb[16].mxu0 %v4226_v45  ;;  %15713 = vmatprep.subr.bf16.mxu1 %v17655_v1  ;;  %v17508_v45 = vld [vmem:[%s21355_s4 + $0x598] sm:$0xff]  }
 0x343   : > { %15674 = vmatmul.mubr.bf16.gmra.mrb[16].mxu1 %v9452_v30  ;;  %14721 = vmatprep.mubr.msk.bf16.mxu0 %vm17656_vm0, %v17655_v1  ;;  %v9810_v30 = vrot.slane %v17509_v50, 1 }
 0x344   : > { %15693 = vmatprep.mubr.msk.bf16.mxu1 %vm17656_vm0, %v17655_v1 }
 0x345   : > { %v9811_v21 = vsel %vm905_vm2, %v9808_v35, %v9810_v30 }
 0x34a   : > { %14722 = vmatmul.mubr.bf16.vlgmr.msra.gmra.mrb[0].mxu0 %v4386_v42  ;;  %v20529_v42 = vld [vmem:[%s19743_s26 + $0x24] sm:$0xff]  }
 0x34b   : > { %15694 = vmatmul.mubr.bf16.vlgmr.msra.gmra.mrb[0].mxu1 %v9611_v38  ;;  %14742 = vmatpush3.bf16.msra.mxu0 %v17479_v63  ;;  %v4588_v63 = vrot.slane %v20521_v13, 1  ;;  %v17515_v38 = vld [vmem:[%s21355_s4 + $0x5a8] sm:$0xff]  }
 0x34c   : > { %15714 = vmatpush3.bf16.msra.mxu1 %v17480_v14  ;;  %14743 = vmatprep.subr.bf16.mxu0 %v17655_v1  ;;  %v9812_v14 = vrot.slane %v20529_v42, 1 }
 0x34d   : > { %15715 = vmatprep.subr.bf16.mxu1 %v17655_v1  ;;  %14725 = vmatprep.mubr.msk.bf16.mxu0 %vm17656_vm0, %v17655_v1 }
 0x34e   : > { %15697 = vmatprep.mubr.msk.bf16.mxu1 %vm17656_vm0, %v17655_v1  ;;  %v9813_v16 = vsel %vm905_vm2, %v9810_v30, %v9812_v14 }
 0x34f   : > { %14744 = vmatpush3.bf16.msra.mxu0 %v17481_v32  ;;  %v17516_v32 = vld [vmem:[%s21355_s4 + $0x5a8] sm:$0xff]  }
 0x350   : > { %15716 = vmatpush3.bf16.msra.mxu1 %v17482_v20  ;;  %14745 = vmatprep.subr.bf16.mxu0 %v17655_v1  ;;  %v20544_v20 = vld [vmem:[%s18496_s13 + $0x8] sm:$0xf] }
 0x351   : > { %15717 = vmatprep.subr.bf16.mxu1 %v17655_v1 }
 0x352   : > { %14726 = vmatmul.mubr.bf16.gmra.mrb[4].mxu0 %v4388_v47  ;;  %v20551_v47 = vld [vmem:[%s19743_s26 + $0x8] sm:$0xf] }
 0x353   : > { %15698 = vmatmul.mubr.bf16.gmra.mrb[4].mxu1 %v9613_v4  ;;  %14746 = vmatpush3.bf16.msra.mxu0 %v17483_v10  ;;  %v4589_v10 = vsel %vm905_vm2, %v4586_v59, %v4588_v63  ;;  %v12384_v4 = vcombine.low %v4726_v6, %v20544_v20  ;;  %v13099_v18 = vcombine.low %v9950_v8, %v20551_v47  ;;  %v20616_v59 = vld [vmem:[%s19743_s26 + $0x1c] sm:$0xff]   ;;  %v17532_v8 = vld [vmem:[%s21355_s4 + $0x5d0] sm:$0xff]  }
 0x354   : > { %15718 = vmatpush3.bf16.msra.mxu1 %v17484_v22  ;;  %14729 = vmatprep.mubr.msk.bf16.mxu0 %vm17656_vm0, %v17655_v1  ;;  %v20557_v22 = vld [vmem:[%s18496_s13 + $0xc] sm:$0xff]  }
 0x355   : > { %14747 = vmatprep.subr.bf16.mxu0 %v17655_v1  ;;  %15701 = vmatprep.mubr.msk.bf16.mxu1 %vm17656_vm0, %v17655_v1 }
 0x356   : > { %15719 = vmatprep.subr.bf16.mxu1 %v17655_v1 }
 0x357   : > { %14748 = vmatpush3.bf16.msra.mxu0 %v17485_v37  ;;  %v17517_v37 = vld [vmem:[%s21355_s4 + $0x5b0] sm:$0xff]  }
 0x358   : > { %15720 = vmatpush3.bf16.msra.mxu1 %v17486_v54  ;;  %14749 = vmatprep.subr.bf16.mxu0 %v17655_v1  ;;  %v20566_v54 = vld [vmem:[%s19743_s26 + $0xc] sm:$0xff]  }
 0x359   : > { %15721 = vmatprep.subr.bf16.mxu1 %v17655_v1 }
 0x35a   : > { %14730 = vmatmul.mubr.bf16.gmra.mrb[8].mxu0 %v4390_v52  ;;  %v17518_v52 = vld [vmem:[%s21355_s4 + $0x5b0] sm:$0xff]  }
 0x35b   : > { %15702 = vmatmul.mubr.bf16.gmra.mrb[8].mxu1 %v9615_v15  ;;  %14750 = vmatpush3.bf16.msra.mxu0 %v17487_v55  ;;  %v4783_v55 = vshrl.u32 %v12384_v4, 16  ;;  %v4786_v15 = vshll.u32 %v12384_v4, 16 }
 0x35c   : > { %15722 = vmatpush3.bf16.msra.mxu1 %v17488_v26  ;;  %14733 = vmatprep.mubr.msk.bf16.mxu0 %vm17656_vm0, %v17655_v1  ;;  %v4791_v26 = vshrl.u32 %v20557_v22, 16 }
 0x35d   : > { %15705 = vmatprep.mubr.msk.bf16.mxu1 %vm17656_vm0, %v17655_v1  ;;  %14751 = vmatprep.subr.bf16.mxu0 %v17655_v1 }
 0x35e   : > { %15723 = vmatprep.subr.bf16.mxu1 %v17655_v1 }
 0x35f   : > { %14752 = vmatpush3.bf16.msra.mxu0 %v17489_v57  ;;  %v17519_v57 = vld [vmem:[%s21355_s4 + $0x5b8] sm:$0xff]  }
 0x360   : > { %15724 = vmatpush3.bf16.msra.mxu1 %v17490_v0  ;;  %14753 = vmatprep.subr.bf16.mxu0 %v17655_v1  ;;  %v10009_v0 = vshll.u32 %v13099_v18, 16 }
 0x361   : > { %15725 = vmatprep.subr.bf16.mxu1 %v17655_v1 }
 0x362   : > { %14734 = vmatmul.mubr.bf16.gmra.mrb[12].mxu0 %v4392_v29  ;;  %v10014_v29 = vshrl.u32 %v20566_v54, 16  ;;  %v10011_v41 = vrot.slane %v10009_v0, 2  ;;  %v17537_v0 = vld [vmem:[%s21355_s4 + $0x5e0] sm:$0xff]  }
 0x363   : > { %15706 = vmatmul.mubr.bf16.gmra.mrb[12].mxu1 %v9617_v25  ;;  %14737 = vmatprep.mubr.msk.bf16.mxu0 %vm17656_vm0, %v17655_v1  ;;  %v10017_v25 = vshll.u32 %v20566_v54, 16 }
 0x364   : > { %14754 = vmatpush3.bf16.msra.mxu0 %v17491_v31  ;;  %15709 = vmatprep.mubr.msk.bf16.mxu1 %vm17656_vm0, %v17655_v1  ;;  %v17520_v31 = vld [vmem:[%s21355_s4 + $0x5b8] sm:$0xff]   ;;  %v10016_v44 = vrot.slane %v10014_v29, 1 }
 0x365   : > { %15726 = vmatpush3.bf16.msra.mxu1 %v17492_v33  ;;  %14755 = vmatprep.subr.bf16.mxu0 %v17655_v1  ;;  %v4785_v33 = vrot.slane %v4783_v55, 1  ;;  %v10019_v17 = vrot.slane %v10017_v25, 2 }
 0x366   : > { %15727 = vmatprep.subr.bf16.mxu1 %v17655_v1 }
 0x368   : > { %14756 = vmatpush3.bf16.msra.mxu0 %v17493_v34  ;;  %v4788_v34 = vrot.slane %v4786_v15, 2 }
 0x369   : > { %15728 = vmatpush3.bf16.msra.mxu1 %v17494_v58  ;;  %14777 = vmatprep.subr.bf16.mxu0 %v17655_v1  ;;  %v4793_v58 = vrot.slane %v4791_v26, 1  ;;  %v17536_v26 = vld [vmem:[%s21355_s4 + $0x5d8] sm:$0xff]  }
 0x36a   : > { %14738 = vmatmul.mubr.bf16.gmra.mrb[16].mxu0 %v4391_v39  ;;  %15749 = vmatprep.subr.bf16.mxu1 %v17655_v1  ;;  %v4794_v39 = vshll.u32 %v20557_v22, 16  ;;  %v4789_v51 = vor.u32 %v4788_v34, %v4785_v33  ;;  %v17538_v33 = vld [vmem:[%s21355_s4 + $0x5e0] sm:$0xff]  }
 0x36b   : > { %15710 = vmatmul.mubr.bf16.gmra.mrb[16].mxu1 %v9616_v27  ;;  %14757 = vmatprep.mubr.msk.bf16.mxu0 %vm17656_vm0, %v17655_v1  ;;  %v10006_v27 = vshrl.u32 %v13099_v18, 16  ;;  %v17534_v18 = vld [vmem:[%s21355_s4 + $0x5d8] sm:$0xff]  }
 0x36c   : > { %15729 = vmatprep.mubr.msk.bf16.mxu1 %vm17656_vm0, %v17655_v1  ;;  %v4796_v48 = vrot.slane %v4794_v39, 2 }
 0x36d   : > { %v10008_v2 = vrot.slane %v10006_v27, 1 }
 0x372   : > { %14758 = vmatmul.mubr.bf16.vlgmr.msra.gmra.mrb[0].mxu0 %v4583_v46  ;;  %v4797_v46 = vor.u32 %v4796_v48, %v4793_v58 }
 0x373   : > { %15730 = vmatmul.mubr.bf16.vlgmr.msra.gmra.mrb[0].mxu1 %v9807_v36  ;;  %14778 = vmatpush3.bf16.msra.mxu0 %v17499_v23  ;;  %v4800_v23 = vshrl.u32 %v20589_v40, 16  ;;  %v10012_v36 = vor.u32 %v10011_v41, %v10008_v2  ;;  %v17541_v2 = vld [vmem:[%s21355_s4 + $0x5e8] sm:$0xff]  }
 0x374   : > { %15750 = vmatpush3.bf16.msra.mxu1 %v17500_v11  ;;  %14779 = vmatprep.subr.bf16.mxu0 %v17655_v1  ;;  %v10020_v11 = vor.u32 %v10019_v17, %v10016_v44  ;;  %v4798_v43 = vsel %vm1304_vm3, %v4789_v51, %v4797_v46  ;;  %v20680_v41 = vld [vmem:[%s18496_s13 + $0x2c] ss:$0 sps:$4 sm:$0x11]  }
 0x375   : > { %15751 = vmatprep.subr.bf16.mxu1 %v17655_v1  ;;  %14761 = vmatprep.mubr.msk.bf16.mxu0 %vm17656_vm0, %v17655_v1  ;;  %v4802_v35 = vrot.slane %v4800_v23, 1  ;;  %v17542_v17 = vld [vmem:[%s21355_s4 + $0x5e8] sm:$0xff]   ;;  %v4827_v23 = vshll.u32 %v20680_v41, 16 }
 0x376   : > { %15733 = vmatprep.mubr.msk.bf16.mxu1 %vm17656_vm0, %v17655_v1  ;;  %v10021_v3 = vsel %vm1304_vm3, %v10012_v36, %v10020_v11  ;;  %v20688_v51 = vld [vmem:[%s19743_s26 + $0x2c] ss:$0 sps:$4 sm:$0x11]   ;;  %v17543_v36 = vld [vmem:[%s21355_s4 + $0x5f0] sm:$0xff]  }
 0x377   : > { %14780 = vmatpush3.bf16.msra.mxu0 %v17501_v5  ;;  %v10026_v5 = vshll.u32 %v20592_v19, 16 }
 0x378   : > { %15752 = vmatpush3.bf16.msra.mxu1 %v17502_v49  ;;  %14781 = vmatprep.subr.bf16.mxu0 %v17655_v1  ;;  %v17525_v49 = vld [vmem:[%s21355_s4 + $0x5c0] sm:$0xff]  }
 0x379   : > { %15753 = vmatprep.subr.bf16.mxu1 %v17655_v1  ;;  %v10028_v50 = vrot.slane %v10026_v5, 2  ;;  %v4829_v5 = vrot.slane %v4827_v23, 2 }
 0x37a   : > { %14762 = vmatmul.mubr.bf16.gmra.mrb[4].mxu0 %v4585_v24  ;;  %v4805_v24 = vrot.slane %v4803_v28, 2 }
 0x37b   : > { %15734 = vmatmul.mubr.bf16.gmra.mrb[4].mxu1 %v9809_v56  ;;  %14782 = vmatpush3.bf16.msra.mxu0 %v17505_v9  ;;  %v20609_v9 = vld [vmem:[%s18496_s13 + $0x1c] sm:$0xff]  }
 0x37c   : > { %15754 = vmatpush3.bf16.msra.mxu1 %v17506_v12  ;;  %14765 = vmatprep.mubr.msk.bf16.mxu0 %vm17656_vm0, %v17655_v1  ;;  %v17526_v56 = vld [vmem:[%s21355_s4 + $0x5c0] sm:$0xff]   ;;  %v10025_v12 = vrot.slane %v10023_v7, 1  ;;  %v4806_v30 = vor.u32 %v4805_v24, %v4802_v35  ;;  %v17544_v7 = vld [vmem:[%s21355_s4 + $0x5f0] sm:$0xff]   ;;  %v17548_v24 = vld [vmem:[%s21355_s4 + $0x5f8] sm:$0xff]  }
 0x37d   : > { %14783 = vmatprep.subr.bf16.mxu0 %v17655_v1  ;;  %15737 = vmatprep.mubr.msk.bf16.mxu1 %vm17656_vm0, %v17655_v1  ;;  %v4967_v35 = vld [vmem:[%s18496_s13 + $0x4] sm:$0xc] }
 0x37e   : > { %15755 = vmatprep.subr.bf16.mxu1 %v17655_v1  ;;  %v10029_v13 = vor.u32 %v10028_v50, %v10025_v12  ;;  %v4807_v42 = vsel %vm1304_vm3, %v4797_v46, %v4806_v30  ;;  %v12414_v12 = vcombine.low %v4967_v35, %v20544_v20  ;;  %v17573_v35 = vld [vmem:[%s21355_s4 + $0x648] sm:$0xff]  }
 0x37f   : > { %14784 = vmatpush3.bf16.msra.mxu0 %v17508_v45  ;;  %v17527_v45 = vld [vmem:[%s21355_s4 + $0x5c8] sm:$0xff]  }
 0x380   : > { %15756 = vmatpush3.bf16.msra.mxu1 %v17510_v60  ;;  %14785 = vmatprep.subr.bf16.mxu0 %v17655_v1  ;;  %v4809_v60 = vshrl.u32 %v20609_v9, 16  ;;  %v10030_v6 = vsel %vm1304_vm3, %v10020_v11, %v10029_v13  ;;  %v10050_v11 = vshll.u32 %v20688_v51, 16 }
 0x381   : > { %15757 = vmatprep.subr.bf16.mxu1 %v17655_v1 }
 0x382   : > { %14766 = vmatmul.mubr.bf16.gmra.mrb[8].mxu0 %v4587_v61  ;;  %v4812_v61 = vshll.u32 %v20609_v9, 16 }
 0x383   : > { %15738 = vmatmul.mubr.bf16.gmra.mrb[8].mxu1 %v9811_v21  ;;  %14786 = vmatpush3.bf16.msra.mxu0 %v17511_v62  ;;  %v17528_v62 = vld [vmem:[%s21355_s4 + $0x5c8] sm:$0xff]   ;;  %v10032_v21 = vshrl.u32 %v20616_v59, 16 }
 0x384   : > { %15758 = vmatpush3.bf16.msra.mxu1 %v17512_v53  ;;  %14769 = vmatprep.mubr.msk.bf16.mxu0 %vm17656_vm0, %v17655_v1  ;;  %v10035_v53 = vshll.u32 %v20616_v59, 16 }
 0x385   : > { %15741 = vmatprep.mubr.msk.bf16.mxu1 %vm17656_vm0, %v17655_v1  ;;  %14787 = vmatprep.subr.bf16.mxu0 %v17655_v1 }
 0x386   : > { %15759 = vmatprep.subr.bf16.mxu1 %v17655_v1  ;;  %v10037_v4 = vrot.slane %v10035_v53, 2  ;;  %v17554_v53 = vld [vmem:[%s21355_s4 + $0x608] sm:$0xff]  }
 0x387   : > { %14788 = vmatpush3.bf16.msra.mxu0 %v17515_v38  ;;  %v4811_v38 = vrot.slane %v4809_v60, 1  ;;  %v4989_v60 = vrot.slane %v20557_v22, 2  ;;  %v17553_v22 = vld [vmem:[%s21355_s4 + $0x608] sm:$0xff]  }
 0x388   : > { %15760 = vmatpush3.bf16.msra.mxu1 %v17516_v32  ;;  %14789 = vmatprep.subr.bf16.mxu0 %v17655_v1  ;;  %v20639_v32 = vld [vmem:[%s18496_s13 + $0x24] sm:$0xff]  }
 0x389   : > { %15761 = vmatprep.subr.bf16.mxu1 %v17655_v1  ;;  %v4821_v55 = vshll.u32 %v20639_v32, 16 }
 0x38a   : > { %14770 = vmatmul.mubr.bf16.gmra.mrb[12].mxu0 %v4589_v10  ;;  %v10034_v10 = vrot.slane %v10032_v21, 1  ;;  %v17552_v21 = vld [vmem:[%s21355_s4 + $0x600] sm:$0xff]  }
 0x38b   : > { %15742 = vmatmul.mubr.bf16.gmra.mrb[12].mxu1 %v9813_v16  ;;  %14773 = vmatprep.mubr.msk.bf16.mxu0 %vm17656_vm0, %v17655_v1  ;;  %v20647_v16 = vld [vmem:[%s19743_s26 + $0x24] sm:$0xff]   ;;  %v4823_v25 = vrot.slane %v4821_v55, 2 }
 0x38c   : > { %14790 = vmatpush3.bf16.msra.mxu0 %v17517_v37  ;;  %15745 = vmatprep.mubr.msk.bf16.mxu1 %vm17656_vm0, %v17655_v1  ;;  %v10038_v15 = vor.u32 %v10037_v4, %v10034_v10  ;;  %v10041_v39 = vshrl.u32 %v20647_v16, 16  ;;  %v17558_v10 = vld [vmem:[%s21355_s4 + $0x618] sm:$0xff]   ;;  %v17559_v4 = vld [vmem:[%s21355_s4 + $0x620] sm:$0xff]   ;;  %v10217_v55 = vrot.slane %v20647_v16, 2 }
 0x38d   : > { %15762 = vmatpush3.bf16.msra.mxu1 %v17518_v52  ;;  %14791 = vmatprep.subr.bf16.mxu0 %v17655_v1  ;;  %v4818_v52 = vshrl.u32 %v20639_v32, 16 }
 0x38e   : > { %15763 = vmatprep.subr.bf16.mxu1 %v17655_v1  ;;  %v10043_v34 = vrot.slane %v10041_v39, 1  ;;  %v17564_v39 = vld [vmem:[%s21355_s4 + $0x630] sm:$0xff]  }
 0x38f   : > { %v4820_v29 = vrot.slane %v4818_v52, 1  ;;  %v17561_v52 = vld [vmem:[%s21355_s4 + $0x628] sm:$0xff]  }
 0x390   : > { %14792 = vmatpush3.bf16.msra.mxu0 %v17519_v57  ;;  %v10044_v57 = vshll.u32 %v20647_v16, 16  ;;  %v17563_v16 = vld [vmem:[%s21355_s4 + $0x630] sm:$0xff]  }
 0x391   : > { %15764 = vmatpush3.bf16.msra.mxu1 %v17520_v31  ;;  %14813 = vmatprep.subr.bf16.mxu0 %v17655_v1  ;;  %v10039_v31 = vsel %vm1304_vm3, %v10029_v13, %v10038_v15  ;;  %v4824_v48 = vor.u32 %v4823_v25, %v4820_v29  ;;  %v5135_v29 = vld [vmem:[%s18496_s13 + $0x8] sm:$0xc]  ;;  %v20824_v25 = vld [vmem:[%s18496_s13 + $0xc] sm:$0xf] }
 0x392   : > { %14774 = vmatmul.mubr.bf16.gmra.mrb[16].mxu0 %v4588_v63  ;;  %15785 = vmatprep.subr.bf16.mxu1 %v17655_v1  ;;  %v17531_v63 = vld [vmem:[%s21355_s4 + $0x5d0] sm:$0xff]   ;;  %v10046_v58 = vrot.slane %v10044_v57, 2  ;;  %v4997_v57 = vrot.slane %v20680_v41, 2 }
 0x393   : > { %15746 = vmatmul.mubr.bf16.gmra.mrb[16].mxu1 %v9812_v14  ;;  %14793 = vmatprep.mubr.msk.bf16.mxu0 %vm17656_vm0, %v17655_v1  ;;  %v4814_v14 = vrot.slane %v4812_v61, 2  ;;  %v10211_v61 = vrot.slane %v20566_v54, 2  ;;  %v4991_v54 = vrot.slane %v20589_v40, 2 }
 0x394   : > { %15765 = vmatprep.mubr.msk.bf16.mxu1 %vm17656_vm0, %v17655_v1  ;;  %v10047_v44 = vor.u32 %v10046_v58, %v10043_v34  ;;  %v20833_v34 = vld [vmem:[%s19743_s26 + $0xc] sm:$0xf] }
 0x395   : > { %v4815_v37 = vor.u32 %v4814_v14, %v4811_v38  ;;  %v4992_v40 = vsel %vm1511_vm4, %v4989_v60, %v4991_v54  ;;  %v4993_v14 = vrot.slane %v20609_v9, 2 }
 0x396   : > { %v10048_v28 = vsel %vm1304_vm3, %v10038_v15, %v10047_v44  ;;  %v17562_v15 = vld [vmem:[%s21355_s4 + $0x628] sm:$0xff]  }
 0x397   : > { %v4816_v27 = vsel %vm1304_vm3, %v4806_v30, %v4815_v37  ;;  %v4825_v46 = vsel %vm1304_vm3, %v4815_v37, %v4824_v48  ;;  %v4988_v30 = vrot.slane %v12414_v12, 2  ;;  %v4994_v9 = vsel %vm1511_vm4, %v4991_v54, %v4993_v14  ;;  %v17560_v37 = vld [vmem:[%s21355_s4 + $0x620] sm:$0xff]   ;;  %v20933_v54 = vld [vmem:[%s18496_s13 + $0x28] sm:$0xff]  }
 0x39a   : > { %14794 = vmatmul.mubr.bf16.vlgmr.msra.gmra.mrb[0].mxu0 %v4798_v43  ;;  %v10052_v43 = vrot.slane %v10050_v11, 2  ;;  %v17571_v11 = vld [vmem:[%s21355_s4 + $0x640] sm:$0xff]  }
 0x39b   : > { %15766 = vmatmul.mubr.bf16.vlgmr.msra.gmra.mrb[0].mxu1 %v10021_v3  ;;  %14814 = vmatpush3.bf16.msra.mxu0 %v17525_v49  ;;  %v17547_v49 = vld [vmem:[%s21355_s4 + $0x5f8] sm:$0xff]   ;;  %v10190_v3 = vld [vmem:[%s19743_s26 + $0x4] sm:$0xc] }
 0x39c   : > { %15786 = vmatpush3.bf16.msra.mxu1 %v17526_v56  ;;  %14815 = vmatprep.subr.bf16.mxu0 %v17655_v1  ;;  %v4830_v56 = vsel %vm1304_vm3, %v4824_v48, %v4829_v5  ;;  %v10053_v50 = vsel %vm1304_vm3, %v10047_v44, %v10052_v43  ;;  %v20839_v48 = vcombine.low %v5135_v29, %v20824_v25  ;;  %v17572_v43 = vld [vmem:[%s21355_s4 + $0x640] sm:$0xff]  }
 0x39d   : > { %15787 = vmatprep.subr.bf16.mxu1 %v17655_v1  ;;  %14797 = vmatprep.mubr.msk.bf16.mxu0 %vm17656_vm0, %v17655_v1 }
 0x39e   : > { %15769 = vmatprep.mubr.msk.bf16.mxu1 %vm17656_vm0, %v17655_v1 }
 0x39f   : > { %14816 = vmatpush3.bf16.msra.mxu0 %v17527_v45  ;;  %v13129_v45 = vcombine.low %v10190_v3, %v20551_v47  ;;  %v4990_v47 = vsel %vm1511_vm4, %v4988_v30, %v4989_v60  ;;  %v17574_v3 = vld [vmem:[%s21355_s4 + $0x648] sm:$0xff]   ;;  %v17578_v60 = vld [vmem:[%s21355_s4 + $0x650] sm:$0xff]  }
 0x3a0   : > { %15788 = vmatpush3.bf16.msra.mxu1 %v17528_v62  ;;  %14817 = vmatprep.subr.bf16.mxu0 %v17655_v1  ;;  %v17551_v62 = vld [vmem:[%s21355_s4 + $0x600] sm:$0xff]  }
 0x3a1   : > { %15789 = vmatprep.subr.bf16.mxu1 %v17655_v1  ;;  %v10210_v20 = vrot.slane %v13129_v45, 2  ;;  %v20903_v45 = vld [vmem:[%s18496_s13 + $0x20] sm:$0xff]  }
 0x3a2   : > { %14798 = vmatmul.mubr.bf16.gmra.mrb[4].mxu0 %v4807_v42  ;;  %v10213_v42 = vrot.slane %v20592_v19, 2  ;;  %v17556_v19 = vld [vmem:[%s21355_s4 + $0x610] sm:$0xff]  }
 0x3a3   : > { %15770 = vmatmul.mubr.bf16.gmra.mrb[4].mxu1 %v10030_v6  ;;  %14818 = vmatpush3.bf16.msra.mxu0 %v17531_v63  ;;  %v10212_v13 = vsel %vm1511_vm4, %v10210_v20, %v10211_v61  ;;  %v17555_v63 = vld [vmem:[%s21355_s4 + $0x610] sm:$0xff]   ;;  %v17557_v6 = vld [vmem:[%s21355_s4 + $0x618] sm:$0xff]   ;;  %v20911_v20 = vld [vmem:[%s19743_s26 + $0x20] sm:$0xff]  }
 0x3a4   : > { %15790 = vmatpush3.bf16.msra.mxu1 %v17532_v8  ;;  %14801 = vmatprep.mubr.msk.bf16.mxu0 %vm17656_vm0, %v17655_v1  ;;  %v10214_v38 = vsel %vm1511_vm4, %v10211_v61, %v10213_v42  ;;  %v10215_v8 = vrot.slane %v20616_v59, 2  ;;  %v5196_v61 = vrot.slane %v20903_v45, 2 }
 0x3a5   : > { %14819 = vmatprep.subr.bf16.mxu0 %v17655_v1  ;;  %15773 = vmatprep.mubr.msk.bf16.mxu1 %vm17656_vm0, %v17655_v1 }
 0x3a6   : > { %15791 = vmatprep.subr.bf16.mxu1 %v17655_v1  ;;  %v10216_v59 = vsel %vm1511_vm4, %v10213_v42, %v10215_v8  ;;  %v17584_v42 = vld [vmem:[%s21355_s4 + $0x660] sm:$0xff]  }
 0x3a7   : > { %14820 = vmatpush3.bf16.msra.mxu0 %v17534_v18  ;;  %v4995_v18 = vrot.slane %v20639_v32, 2 }
 0x3a8   : > { %15792 = vmatpush3.bf16.msra.mxu1 %v17536_v26  ;;  %14821 = vmatprep.subr.bf16.mxu0 %v17655_v1  ;;  %v10218_v26 = vsel %vm1511_vm4, %v10215_v8, %v10217_v55  ;;  %v17592_v8 = vld [vmem:[%s19743_s26 + $0x30] ss:$0 sps:$4 sm:$0x11]  }
 0x3a9   : > { %15793 = vmatprep.subr.bf16.mxu1 %v17655_v1  ;;  %v4996_v32 = vsel %vm1511_vm4, %v4993_v14, %v4995_v18  ;;  %v4998_v58 = vsel %vm1511_vm4, %v4995_v18, %v4997_v57  ;;  %v17588_v14 = vld [vmem:[%s21355_s4 + $0x668] sm:$0xff]   ;;  %v10421_v18 = vrot.slane %v17592_v8, 2 }
 0x3aa   : > { %14802 = vmatmul.mubr.bf16.gmra.mrb[8].mxu0 %v4816_v27  ;;  %v10219_v27 = vrot.slane %v20688_v51, 2  ;;  %v5191_v51 = vrot.slane %v20839_v48, 2 }
 0x3ab   : > { %15774 = vmatmul.mubr.bf16.gmra.mrb[8].mxu1 %v10039_v31  ;;  %14822 = vmatpush3.bf16.msra.mxu0 %v17537_v0  ;;  %v17565_v0 = vld [vmem:[%s21355_s4 + $0x638] sm:$0xff]  }
 0x3ac   : > { %15794 = vmatpush3.bf16.msra.mxu1 %v17538_v33  ;;  %14805 = vmatprep.mubr.msk.bf16.mxu0 %vm17656_vm0, %v17655_v1  ;;  %v17566_v31 = vld [vmem:[%s21355_s4 + $0x638] sm:$0xff]   ;;  %v10357_v33 = vld [vmem:[%s19743_s26 + $0x8] sm:$0xc]  ;;  %v10220_v41 = vsel %vm1511_vm4, %v10217_v55, %v10219_v27  ;;  %v5363_v55 = vshll.u32 %v20839_v48, 16 }
 0x3ad   : > { %15777 = vmatprep.mubr.msk.bf16.mxu1 %vm17656_vm0, %v17655_v1  ;;  %14823 = vmatprep.subr.bf16.mxu0 %v17655_v1  ;;  %v20846_v44 = vcombine.low %v10357_v33, %v20833_v34 }
 0x3ae   : > { %15795 = vmatprep.subr.bf16.mxu1 %v17655_v1 }
 0x3af   : > { %14824 = vmatpush3.bf16.msra.mxu0 %v17541_v2  ;;  %v20842_v2 = vld [vmem:[%s18496_s13 + $0x10] sm:$0xff]   ;;  %v10412_v23 = vrot.slane %v20846_v44, 2 }
 0x3b0   : > { %15796 = vmatpush3.bf16.msra.mxu1 %v17542_v17  ;;  %14825 = vmatprep.subr.bf16.mxu0 %v17655_v1  ;;  %v20849_v17 = vld [vmem:[%s19743_s26 + $0x10] sm:$0xff]  }
 0x3b1   : > { %15797 = vmatprep.subr.bf16.mxu1 %v17655_v1  ;;  %v10588_v57 = vshrl.u32 %v20849_v17, 16  ;;  %v10591_v27 = vshll.u32 %v20849_v17, 16 }
 0x3b2   : > { %14806 = vmatmul.mubr.bf16.gmra.mrb[12].mxu0 %v4825_v46  ;;  %v5192_v46 = vrot.slane %v20842_v2, 2 }
 0x3b3   : > { %15778 = vmatmul.mubr.bf16.gmra.mrb[12].mxu1 %v10048_v28  ;;  %14809 = vmatprep.mubr.msk.bf16.mxu0 %vm17656_vm0, %v17655_v1  ;;  %v10413_v28 = vrot.slane %v20849_v17, 2 }
 0x3b4   : > { %14826 = vmatpush3.bf16.msra.mxu0 %v17543_v36  ;;  %15781 = vmatprep.mubr.msk.bf16.mxu1 %vm17656_vm0, %v17655_v1  ;;  %v5193_v36 = vsel %vm1511_vm4, %v5191_v51, %v5192_v46 }
 0x3b5   : > { %15798 = vmatpush3.bf16.msra.mxu1 %v17544_v7  ;;  %14827 = vmatprep.subr.bf16.mxu0 %v17655_v1  ;;  %v20875_v7 = vld [vmem:[%s18496_s13 + $0x18] sm:$0xff]   ;;  %v10414_v5 = vsel %vm1511_vm4, %v10412_v23, %v10413_v28  ;;  %v10593_v23 = vrot.slane %v10591_v27, 3  ;;  %v17603_v27 = vld [vmem:[%s21355_s4 + $0x6a0] sm:$0xff]  }
 0x3b6   : > { %15799 = vmatprep.subr.bf16.mxu1 %v17655_v1 }
 0x3b8   : > { %14828 = vmatpush3.bf16.msra.mxu0 %v17547_v49  ;;  %v20882_v49 = vld [vmem:[%s19743_s26 + $0x18] sm:$0xff]  }
 0x3b9   : > { %15800 = vmatpush3.bf16.msra.mxu1 %v17548_v24  ;;  %14849 = vmatprep.subr.bf16.mxu0 %v17655_v1  ;;  %v5194_v24 = vrot.slane %v20875_v7, 2 }
 0x3ba   : > { %14810 = vmatmul.mubr.bf16.gmra.mrb[16].mxu0 %v4830_v56  ;;  %15821 = vmatprep.subr.bf16.mxu1 %v17655_v1  ;;  %v10415_v56 = vrot.slane %v20882_v49, 2 }
 0x3bb   : > { %15782 = vmatmul.mubr.bf16.gmra.mrb[16].mxu1 %v10053_v50  ;;  %14829 = vmatprep.mubr.msk.bf16.mxu0 %vm17656_vm0, %v17655_v1  ;;  %v5195_v12 = vsel %vm1511_vm4, %v5192_v46, %v5194_v24  ;;  %v17577_v50 = vld [vmem:[%s21355_s4 + $0x650] sm:$0xff]   ;;  %v10590_v46 = vrot.slane %v10588_v57, 2 }
 0x3bc   : > { %15801 = vmatprep.mubr.msk.bf16.mxu1 %vm17656_vm0, %v17655_v1  ;;  %v10416_v30 = vsel %vm1511_vm4, %v10413_v28, %v10415_v56 }
 0x3c2   : > { %14830 = vmatmul.mubr.bf16.vlgmr.msra.gmra.mrb[0].mxu0 %v4990_v47  ;;  %v17580_v47 = vld [vmem:[%s21355_s4 + $0x658] sm:$0xff]  }
 0x3c3   : > { %15802 = vmatmul.mubr.bf16.vlgmr.msra.gmra.mrb[0].mxu1 %v10212_v13  ;;  %14850 = vmatpush3.bf16.msra.mxu0 %v17551_v62  ;;  %v10417_v62 = vrot.slane %v20911_v20, 2  ;;  %v17582_v13 = vld [vmem:[%s21355_s4 + $0x658] sm:$0xff]  }
 0x3c4   : > { %15822 = vmatpush3.bf16.msra.mxu1 %v17552_v21  ;;  %14851 = vmatprep.subr.bf16.mxu0 %v17655_v1  ;;  %v5197_v21 = vsel %vm1511_vm4, %v5194_v24, %v5196_v61  ;;  %v10597_v24 = vshrl.u32 %v20882_v49, 16 }
 0x3c5   : > { %15823 = vmatprep.subr.bf16.mxu1 %v17655_v1  ;;  %14833 = vmatprep.mubr.msk.bf16.mxu0 %vm17656_vm0, %v17655_v1 }
 0x3c6   : > { %15805 = vmatprep.mubr.msk.bf16.mxu1 %vm17656_vm0, %v17655_v1 }
 0x3c7   : > { %14852 = vmatpush3.bf16.msra.mxu0 %v17553_v22  ;;  %v17583_v22 = vld [vmem:[%s21355_s4 + $0x660] sm:$0xff]  }
 0x3c8   : > { %15824 = vmatpush3.bf16.msra.mxu1 %v17554_v53  ;;  %14853 = vmatprep.subr.bf16.mxu0 %v17655_v1  ;;  %v10418_v53 = vsel %vm1511_vm4, %v10415_v56, %v10417_v62 }
 0x3c9   : > { %15825 = vmatprep.subr.bf16.mxu1 %v17655_v1 }
 0x3ca   : > { %14834 = vmatmul.mubr.bf16.gmra.mrb[4].mxu0 %v4992_v40  ;;  %v20941_v40 = vld [vmem:[%s19743_s26 + $0x28] sm:$0xff]  }
 0x3cb   : > { %15806 = vmatmul.mubr.bf16.gmra.mrb[4].mxu1 %v10214_v38  ;;  %14854 = vmatpush3.bf16.msra.mxu0 %v17555_v63  ;;  %v5198_v63 = vrot.slane %v20933_v54, 2  ;;  %v17587_v38 = vld [vmem:[%s21355_s4 + $0x668] sm:$0xff]  }
 0x3cc   : > { %15826 = vmatpush3.bf16.msra.mxu1 %v17556_v19  ;;  %14837 = vmatprep.mubr.msk.bf16.mxu0 %vm17656_vm0, %v17655_v1  ;;  %v10419_v19 = vrot.slane %v20941_v40, 2 }
 0x3cd   : > { %14855 = vmatprep.subr.bf16.mxu0 %v17655_v1  ;;  %15809 = vmatprep.mubr.msk.bf16.mxu1 %vm17656_vm0, %v17655_v1 }
 0x3ce   : > { %15827 = vmatprep.subr.bf16.mxu1 %v17655_v1 }
 0x3cf   : > { %14856 = vmatpush3.bf16.msra.mxu0 %v17557_v6  ;;  %v17591_v6 = vld [vmem:[%s18496_s13 + $0x30] ss:$0 sps:$4 sm:$0x11]  }
 0x3d0   : > { %15828 = vmatpush3.bf16.msra.mxu1 %v17558_v10  ;;  %14857 = vmatprep.subr.bf16.mxu0 %v17655_v1  ;;  %v5199_v10 = vsel %vm1511_vm4, %v5196_v61, %v5198_v63  ;;  %v17596_v61 = vld [vmem:[%s21355_s4 + $0x680] sm:$0xff]  }
 0x3d1   : > { %15829 = vmatprep.subr.bf16.mxu1 %v17655_v1 }
 0x3d2   : > { %14838 = vmatmul.mubr.bf16.gmra.mrb[8].mxu0 %v4994_v9  ;;  %v10420_v9 = vsel %vm1511_vm4, %v10417_v62, %v10419_v19 }
 0x3d3   : > { %15810 = vmatmul.mubr.bf16.gmra.mrb[8].mxu1 %v10216_v59  ;;  %14858 = vmatpush3.bf16.msra.mxu0 %v17559_v4  ;;  %v17589_v4 = vld [vmem:[%s21355_s4 + $0x670] sm:$0xff]  }
 0x3d4   : > { %15830 = vmatpush3.bf16.msra.mxu1 %v17560_v37  ;;  %14841 = vmatprep.mubr.msk.bf16.mxu0 %vm17656_vm0, %v17655_v1  ;;  %v17590_v59 = vld [vmem:[%s21355_s4 + $0x670] sm:$0xff]   ;;  %v5200_v37 = vrot.slane %v17591_v6, 2 }
 0x3d5   : > { %15813 = vmatprep.mubr.msk.bf16.mxu1 %vm17656_vm0, %v17655_v1  ;;  %14859 = vmatprep.subr.bf16.mxu0 %v17655_v1  ;;  %v17599_v6 = vld [vmem:[%s21355_s4 + $0x690] sm:$0xff]  }
 0x3d6   : > { %15831 = vmatprep.subr.bf16.mxu1 %v17655_v1  ;;  %v5201_v29 = vsel %vm1511_vm4, %v5198_v63, %v5200_v37 }
 0x3d7   : > { %14860 = vmatpush3.bf16.msra.mxu0 %v17561_v52  ;;  %v5360_v52 = vshrl.u32 %v20839_v48, 16 }
 0x3d8   : > { %15832 = vmatpush3.bf16.msra.mxu1 %v17562_v15  ;;  %14861 = vmatprep.subr.bf16.mxu0 %v17655_v1  ;;  %v5368_v15 = vshrl.u32 %v20842_v2, 16 }
 0x3d9   : > { %15833 = vmatprep.subr.bf16.mxu1 %v17655_v1  ;;  %v5362_v33 = vrot.slane %v5360_v52, 2  ;;  %v17601_v52 = vld [vmem:[%s21355_s4 + $0x698] sm:$0xff]  }
 0x3da   : > { %14842 = vmatmul.mubr.bf16.gmra.mrb[12].mxu0 %v4996_v32  ;;  %v5371_v32 = vshll.u32 %v20842_v2, 16  ;;  %v5370_v48 = vrot.slane %v5368_v15, 2  ;;  %v5398_v15 = vshll.u32 %v20933_v54, 16 }
 0x3db   : > { %15814 = vmatmul.mubr.bf16.gmra.mrb[12].mxu1 %v10218_v26  ;;  %14845 = vmatprep.mubr.msk.bf16.mxu0 %vm17656_vm0, %v17655_v1  ;;  %v17593_v26 = vld [vmem:[%s21355_s4 + $0x678] sm:$0xff]  }
 0x3dc   : > { %14862 = vmatpush3.bf16.msra.mxu0 %v17563_v16  ;;  %15817 = vmatprep.mubr.msk.bf16.mxu1 %vm17656_vm0, %v17655_v1  ;;  %v10580_v16 = vshrl.u32 %v20846_v44, 16 }
 0x3dd   : > { %15834 = vmatpush3.bf16.msra.mxu1 %v17564_v39  ;;  %14863 = vmatprep.subr.bf16.mxu0 %v17655_v1  ;;  %v10583_v39 = vshll.u32 %v20846_v44, 16 }
 0x3de   : > { %15835 = vmatprep.subr.bf16.mxu1 %v17655_v1  ;;  %v10582_v44 = vrot.slane %v10580_v16, 2  ;;  %v10615_v16 = vshrl.u32 %v20941_v40, 16 }
 0x3df   : > { %v10585_v51 = vrot.slane %v10583_v39, 3  ;;  %v10618_v39 = vshll.u32 %v20941_v40, 16 }
 0x3e0   : > { %14864 = vmatpush3.bf16.msra.mxu0 %v17565_v0  ;;  %v17594_v0 = vld [vmem:[%s21355_s4 + $0x678] sm:$0xff]  }
 0x3e1   : > { %15836 = vmatpush3.bf16.msra.mxu1 %v17566_v31  ;;  %14885 = vmatprep.subr.bf16.mxu0 %v17655_v1  ;;  %v10422_v31 = vsel %vm1511_vm4, %v10419_v19, %v10421_v18  ;;  %v10609_v19 = vshll.u32 %v20911_v20, 16 }
 0x3e2   : > { %14846 = vmatmul.mubr.bf16.gmra.mrb[16].mxu0 %v4998_v58  ;;  %15857 = vmatprep.subr.bf16.mxu1 %v17655_v1  ;;  %v5365_v58 = vrot.slane %v5363_v55, 3  ;;  %v5395_v55 = vshrl.u32 %v20933_v54, 16 }
 0x3e3   : > { %15818 = vmatmul.mubr.bf16.gmra.mrb[16].mxu1 %v10220_v41  ;;  %14865 = vmatprep.mubr.msk.bf16.mxu0 %vm17656_vm0, %v17655_v1  ;;  %v5373_v41 = vrot.slane %v5371_v32, 3  ;;  %v10611_v37 = vrot.slane %v10609_v19, 3 }
 0x3e4   : > { %15837 = vmatprep.mubr.msk.bf16.mxu1 %vm17656_vm0, %v17655_v1  ;;  %v5366_v28 = vor.u32 %v5365_v58, %v5362_v33  ;;  %v17604_v58 = vld [vmem:[%s21355_s4 + $0x6a0] sm:$0xff]  }
 0x3ea   : > { %14866 = vmatmul.mubr.bf16.vlgmr.msra.gmra.mrb[0].mxu0 %v5193_v36  ;;  %v5374_v36 = vor.u32 %v5373_v41, %v5370_v48  ;;  %v10617_v48 = vrot.slane %v10615_v16, 2  ;;  %v10620_v41 = vrot.slane %v10618_v39, 3  ;;  %v11035_v16 = vlaneseq }
 0x3eb   : > { %15838 = vmatmul.mubr.bf16.vlgmr.msra.gmra.mrb[0].mxu1 %v10414_v5  ;;  %14886 = vmatpush3.bf16.msra.mxu0 %v17571_v11  ;;  %v5377_v11 = vshrl.u32 %v20875_v7, 16  ;;  %v5380_v5 = vshll.u32 %v20875_v7, 16 }
 0x3ec   : > { %15858 = vmatpush3.bf16.msra.mxu1 %v17572_v43  ;;  %14887 = vmatprep.subr.bf16.mxu0 %v17655_v1  ;;  %v10586_v43 = vor.u32 %v10585_v51, %v10582_v44  ;;  %v5375_v56 = vsel %vm1883_vm5, %v5366_v28, %v5374_v36  ;;  %v21065_v44 = vld [vmem:[%s19743_s26 + $0x30] ss:$0 sps:$4 sm:$0x33]  }
 0x3ed   : > { %15859 = vmatprep.subr.bf16.mxu1 %v17655_v1  ;;  %14869 = vmatprep.mubr.msk.bf16.mxu0 %vm17656_vm0, %v17655_v1 }
 0x3ee   : > { %15841 = vmatprep.mubr.msk.bf16.mxu1 %vm17656_vm0, %v17655_v1 }
 0x3ef   : > { %14888 = vmatpush3.bf16.msra.mxu0 %v17573_v35  ;;  %v10594_v35 = vor.u32 %v10593_v23, %v10590_v46  ;;  %v17605_v46 = vld [vmem:[%s21355_s4 + $0x6a8] sm:$0xff]  }
 0x3f0   : > { %15860 = vmatpush3.bf16.msra.mxu1 %v17574_v3  ;;  %14889 = vmatprep.subr.bf16.mxu0 %v17655_v1  ;;  %v10600_v3 = vshll.u32 %v20882_v49, 16 }
 0x3f1   : > { %15861 = vmatprep.subr.bf16.mxu1 %v17655_v1 }
 0x3f2   : > { %14870 = vmatmul.mubr.bf16.gmra.mrb[4].mxu0 %v5195_v12  ;;  %v17595_v12 = vld [vmem:[%s21355_s4 + $0x680] sm:$0xff]   ;;  %v10602_v62 = vrot.slane %v10600_v3, 3 }
 0x3f3   : > { %15842 = vmatmul.mubr.bf16.gmra.mrb[4].mxu1 %v10416_v30  ;;  %14890 = vmatpush3.bf16.msra.mxu0 %v17577_v50  ;;  %v5379_v50 = vrot.slane %v5377_v11, 2  ;;  %v5382_v30 = vrot.slane %v5380_v5, 3  ;;  %v17606_v11 = vld [vmem:[%s21355_s4 + $0x6a8] sm:$0xff]   ;;  %v10624_v5 = vshrl.u32 %v21065_v44, 16 }
 0x3f4   : > { %15862 = vmatpush3.bf16.msra.mxu1 %v17578_v60  ;;  %14873 = vmatprep.mubr.msk.bf16.mxu0 %vm17656_vm0, %v17655_v1  ;;  %v10595_v60 = vsel %vm1883_vm5, %v10586_v43, %v10594_v35  ;;  %v10627_v43 = vshll.u32 %v21065_v44, 16 }
 0x3f5   : > { %14891 = vmatprep.subr.bf16.mxu0 %v17655_v1  ;;  %15845 = vmatprep.mubr.msk.bf16.mxu1 %vm17656_vm0, %v17655_v1 }
 0x3f6   : > { %15863 = vmatprep.subr.bf16.mxu1 %v17655_v1 }
 0x3f7   : > { %14892 = vmatpush3.bf16.msra.mxu0 %v17580_v47  ;;  %v10599_v47 = vrot.slane %v10597_v24, 2 }
 0x3f8   : > { %15864 = vmatpush3.bf16.msra.mxu1 %v17582_v13  ;;  %14893 = vmatprep.subr.bf16.mxu0 %v17655_v1  ;;  %v17597_v13 = vld [vmem:[%s21355_s4 + $0x688] sm:$0xff]  }
 0x3f9   : > { %15865 = vmatprep.subr.bf16.mxu1 %v17655_v1  ;;  %v10603_v63 = vor.u32 %v10602_v62, %v10599_v47  ;;  %v17611_v62 = vld [vmem:[%s21355_s4 + $0x6b8] sm:$0xff]  }
 0x3fa   : > { %14874 = vmatmul.mubr.bf16.gmra.mrb[8].mxu0 %v5197_v21  ;;  %v5383_v21 = vor.u32 %v5382_v30, %v5379_v50  ;;  %v10626_v50 = vrot.slane %v10624_v5, 2  ;;  %v10629_v30 = vrot.slane %v10627_v43, 3 }
 0x3fb   : > { %15846 = vmatmul.mubr.bf16.gmra.mrb[8].mxu1 %v10418_v53  ;;  %14894 = vmatpush3.bf16.msra.mxu0 %v17583_v22  ;;  %v5386_v22 = vshrl.u32 %v20903_v45, 16  ;;  %v5389_v53 = vshll.u32 %v20903_v45, 16 }
 0x3fc   : > { %15866 = vmatpush3.bf16.msra.mxu1 %v17584_v42  ;;  %14877 = vmatprep.mubr.msk.bf16.mxu0 %vm17656_vm0, %v17655_v1  ;;  %v17598_v42 = vld [vmem:[%s21355_s4 + $0x688] sm:$0xff]   ;;  %v10630_v47 = vor.u32 %v10629_v30, %v10626_v50 }
 0x3fd   : > { %15849 = vmatprep.mubr.msk.bf16.mxu1 %vm17656_vm0, %v17655_v1  ;;  %14895 = vmatprep.subr.bf16.mxu0 %v17655_v1  ;;  %v5388_v8 = vrot.slane %v5386_v22, 2  ;;  %v10768_v22 = vld [vmem:[%s19743_s26 + $0x8] sm:$0x8] }
 0x3fe   : > { %15867 = vmatprep.subr.bf16.mxu1 %v17655_v1 }
 0x3ff   : > { %14896 = vmatpush3.bf16.msra.mxu0 %v17587_v38  ;;  %v10606_v38 = vshrl.u32 %v20911_v20, 16 }
 0x400   : > { %15868 = vmatpush3.bf16.msra.mxu1 %v17588_v14  ;;  %14897 = vmatprep.subr.bf16.mxu0 %v17655_v1  ;;  %v5384_v14 = vsel %vm1883_vm5, %v5374_v36, %v5383_v21  ;;  %v10621_v36 = vor.u32 %v10620_v41, %v10617_v48 }
 0x401   : > { %15869 = vmatprep.subr.bf16.mxu1 %v17655_v1 }
 0x402   : > { %14878 = vmatmul.mubr.bf16.gmra.mrb[12].mxu0 %v5199_v10  ;;  %v5391_v10 = vrot.slane %v5389_v53, 3 }
 0x403   : > { %15850 = vmatmul.mubr.bf16.gmra.mrb[12].mxu1 %v10420_v9  ;;  %14881 = vmatprep.mubr.msk.bf16.mxu0 %vm17656_vm0, %v17655_v1  ;;  %v10604_v9 = vsel %vm1883_vm5, %v10594_v35, %v10603_v63 }
 0x404   : > { %14898 = vmatpush3.bf16.msra.mxu0 %v17589_v4  ;;  %15853 = vmatprep.mubr.msk.bf16.mxu1 %vm17656_vm0, %v17655_v1  ;;  %v17600_v4 = vld [vmem:[%s21355_s4 + $0x690] sm:$0xff]   ;;  %v5392_v18 = vor.u32 %v5391_v10, %v5388_v8 }
 0x405   : > { %15870 = vmatpush3.bf16.msra.mxu1 %v17590_v59  ;;  %14899 = vmatprep.subr.bf16.mxu0 %v17655_v1  ;;  %v10608_v59 = vrot.slane %v10606_v38, 2  ;;  %v13209_v38 = vcombine.low %v10768_v22, %v20833_v34  ;;  %v5572_v34 = vrot.slane %v20875_v7, 3  ;;  %v10793_v7 = vrot.slane %v20911_v20, 3 }
 0x406   : > { %15871 = vmatprep.subr.bf16.mxu1 %v17655_v1  ;;  %v5393_v57 = vsel %vm1883_vm5, %v5383_v21, %v5392_v18  ;;  %v17612_v21 = vld [vmem:[%s21355_s4 + $0x6b8] sm:$0xff]  }
 0x407   : > { %v10612_v32 = vor.u32 %v10611_v37, %v10608_v59  ;;  %v5576_v37 = vrot.slane %v20933_v54, 3  ;;  %v10797_v54 = vrot.slane %v21065_v44, 3 }
 0x408   : > { %14900 = vmatpush3.bf16.msra.mxu0 %v17593_v26  ;;  %v17602_v26 = vld [vmem:[%s21355_s4 + $0x698] sm:$0xff]  }
 0x409   : > { %15872 = vmatpush3.bf16.msra.mxu1 %v17594_v0  ;;  %14921 = vmatprep.subr.bf16.mxu0 %v17655_v1  ;;  %v5397_v0 = vrot.slane %v5395_v55, 2  ;;  %v10613_v33 = vsel %vm1883_vm5, %v10603_v63, %v10612_v32  ;;  %v10631_v63 = vsel %vm1883_vm5, %v10621_v36, %v10630_v47 }
 0x40a   : > { %14882 = vmatmul.mubr.bf16.gmra.mrb[16].mxu0 %v5201_v29  ;;  %15893 = vmatprep.subr.bf16.mxu1 %v17655_v1  ;;  %v5400_v29 = vrot.slane %v5398_v15, 3  ;;  %v21155_v15 = vld [vmem:[%s21356_s5] ss:$0 sm:$0xff] }
 0x40b   : > { %15854 = vmatmul.mubr.bf16.gmra.mrb[16].mxu1 %v10422_v31  ;;  %14901 = vmatprep.mubr.msk.bf16.mxu0 %vm17656_vm0, %v17655_v1  ;;  %v21057_v31 = vld [vmem:[%s18496_s13 + $0x30] ss:$0 sps:$4 sm:$0x33]  }
 0x40c   : > { %15873 = vmatprep.mubr.msk.bf16.mxu1 %vm17656_vm0, %v17655_v1  ;;  %v5401_v51 = vor.u32 %v5400_v29, %v5397_v0  ;;  %v5404_v23 = vshrl.u32 %v21057_v31, 16  ;;  %v5407_v28 = vshll.u32 %v21057_v31, 16 }
 0x40e   : > { %v5402_v35 = vsel %vm1883_vm5, %v5392_v18, %v5401_v51  ;;  %v5406_v24 = vrot.slane %v5404_v23, 2  ;;  %v5409_v3 = vrot.slane %v5407_v28, 3 }
 0x412   : > { %14902 = vmatmul.mubr.bf16.vlgmr.msra.gmra.mrb[0].mxu0 %v5375_v56  ;;  %v10622_v56 = vsel %vm1883_vm5, %v10612_v32, %v10621_v36  ;;  %v17657_v32 = vmov 1983009808  }
 0x413   : > { %15874 = vmatmul.mubr.bf16.vlgmr.msra.gmra.mrb[0].mxu1 %v10595_v60  ;;  %14922 = vmatpush3.bf16.msra.mxu0 %v17595_v12  ;;  %v17607_v12 = vld [vmem:[%s21355_s4 + $0x6b0] sm:$0xff]  }
 0x414   : > { %15894 = vmatpush3.bf16.msra.mxu1 %v17596_v61  ;;  %14923 = vmatprep.subr.bf16.mxu0 %v17655_v1  ;;  %v17608_v60 = vld [vmem:[%s21355_s4 + $0x6b0] sm:$0xff]   ;;  %v5410_v61 = vor.u32 %v5409_v3, %v5406_v24 }
 0x415   : > { %15895 = vmatprep.subr.bf16.mxu1 %v17655_v1  ;;  %14905 = vmatprep.mubr.msk.bf16.mxu0 %vm17656_vm0, %v17655_v1 }
 0x416   : > { %15877 = vmatprep.mubr.msk.bf16.mxu1 %vm17656_vm0, %v17655_v1  ;;  %v5411_v53 = vsel %vm1883_vm5, %v5401_v51, %v5410_v61 }
 0x417   : > { %14924 = vmatpush3.bf16.msra.mxu0 %v17597_v13  ;;  %v5548_v13 = vld [vmem:[%s18496_s13 + $0x8] sm:$0x8] }
 0x418   : > { %15896 = vmatpush3.bf16.msra.mxu1 %v17598_v42  ;;  %14925 = vmatprep.subr.bf16.mxu0 %v17655_v1  ;;  %v12494_v42 = vcombine.low %v5548_v13, %v20824_v25  ;;  %v10789_v25 = vrot.slane %v20849_v17, 3 }
 0x419   : > { %15897 = vmatprep.subr.bf16.mxu1 %v17655_v1 }
 0x41a   : > { %14906 = vmatmul.mubr.bf16.gmra.mrb[4].mxu0 %v5384_v14  ;;  %v5569_v19 = vrot.slane %v12494_v42, 3  ;;  %v5570_v14 = vrot.slane %v20842_v2, 3  ;;  %v10791_v2 = vrot.slane %v20882_v49, 3 }
 0x41b   : > { %15878 = vmatmul.mubr.bf16.gmra.mrb[4].mxu1 %v10604_v9  ;;  %14926 = vmatpush3.bf16.msra.mxu0 %v17599_v6  ;;  %v10788_v6 = vrot.slane %v13209_v38, 3 }
 0x41c   : > { %15898 = vmatpush3.bf16.msra.mxu1 %v17600_v4  ;;  %14909 = vmatprep.mubr.msk.bf16.mxu0 %vm17656_vm0, %v17655_v1  ;;  %v5571_v8 = vsel %vm2094_vm6, %v5569_v19, %v5570_v14  ;;  %v5573_v9 = vsel %vm2094_vm6, %v5570_v14, %v5572_v34  ;;  %v10792_v17 = vsel %vm2094_vm6, %v10789_v25, %v10791_v2  ;;  %v5574_v4 = vrot.slane %v20903_v45, 3 }
 0x41d   : > { %14927 = vmatprep.subr.bf16.mxu0 %v17655_v1  ;;  %15881 = vmatprep.mubr.msk.bf16.mxu1 %vm17656_vm0, %v17655_v1  ;;  %v10790_v10 = vsel %vm2094_vm6, %v10788_v6, %v10789_v25  ;;  %v10794_v49 = vsel %vm2094_vm6, %v10791_v2, %v10793_v7  ;;  %v10795_v45 = vrot.slane %v20941_v40, 3 }
 0x41e   : > { %15899 = vmatprep.subr.bf16.mxu1 %v17655_v1  ;;  %v5575_v59 = vsel %vm2094_vm6, %v5572_v34, %v5574_v4  ;;  %v5577_v18 = vsel %vm2094_vm6, %v5574_v4, %v5576_v37 }
 0x41f   : > { %14928 = vmatpush3.bf16.msra.mxu0 %v17601_v52  ;;  %v10796_v20 = vsel %vm2094_vm6, %v10793_v7, %v10795_v45  ;;  %v5578_v52 = vrot.slane %v21057_v31, 3  ;;  %v10798_v40 = vsel %vm2094_vm6, %v10795_v45, %v10797_v54 }
 0x420   : > { %15900 = vmatpush3.bf16.msra.mxu1 %v17602_v26  ;;  %14929 = vmatprep.subr.bf16.mxu0 %v17655_v1  ;;  %v11033_v26 = vunpack.c.l.s4 %v17657_v32 }
 0x421   : > { %15901 = vmatprep.subr.bf16.mxu1 %v17655_v1  ;;  %v5579_v55 = vsel %vm2094_vm6, %v5576_v37, %v5578_v52 }
 0x422   : > { %14910 = vmatmul.mubr.bf16.gmra.mrb[8].mxu0 %v5393_v57  ;;  %v11034_v31 = vunpack.c.0.s8 %v11033_v26 }
 0x423   : > { %15882 = vmatmul.mubr.bf16.gmra.mrb[8].mxu1 %v10613_v33  ;;  %14930 = vmatpush3.bf16.msra.mxu0 %v17603_v27  ;;  %v11036_v33 = vshrl.u32 %v11035_v16, 7 }
 0x424   : > { %15902 = vmatpush3.bf16.msra.mxu1 %v17604_v58  ;;  %14913 = vmatprep.mubr.msk.bf16.mxu0 %vm17656_vm0, %v17655_v1 }
 0x425   : > { %15885 = vmatprep.mubr.msk.bf16.mxu1 %vm17656_vm0, %v17655_v1  ;;  %14931 = vmatprep.subr.bf16.mxu0 %v17655_v1  ;;  %v21179_v42 = vsub.s32 0, %v11036_v33 }
 0x426   : > { %15903 = vmatprep.subr.bf16.mxu1 %v17655_v1 }
 0x427   : > { %14932 = vmatpush3.bf16.msra.mxu0 %v17605_v46 }
 0x428   : > { %15904 = vmatpush3.bf16.msra.mxu1 %v17606_v11  ;;  %14933 = vmatprep.subr.bf16.mxu0 %v17655_v1 }
 0x429   : > { %15905 = vmatprep.subr.bf16.mxu1 %v17655_v1 }
 0x42a   : > { %14914 = vmatmul.mubr.bf16.gmra.mrb[12].mxu0 %v5402_v35  ;;  %v21169_v35 = vsub.s32 %v11034_v31, %v11036_v33 }
 0x42b   : > { %15886 = vmatmul.mubr.bf16.gmra.mrb[12].mxu1 %v10622_v56  ;;  %14917 = vmatprep.mubr.msk.bf16.mxu0 %vm17656_vm0, %v17655_v1 }
 0x42c   : > { %14934 = vmatpush3.bf16.msra.mxu0 %v17607_v12  ;;  %15889 = vmatprep.mubr.msk.bf16.mxu1 %vm17656_vm0, %v17655_v1 }
 0x42d   : > { %15906 = vmatpush3.bf16.msra.mxu1 %v17608_v60  ;;  %14935 = vmatprep.subr.bf16.mxu0 %v17655_v1 }
 0x42e   : > { %15907 = vmatprep.subr.bf16.mxu1 %v17655_v1 }
 0x430   : > { %14936 = vmatpush3.bf16.msra.mxu0 %v17611_v62 }
 0x431   : > { %15908 = vmatpush3.bf16.msra.mxu1 %v17612_v21 }
 0x432   : > { %14918 = vmatmul.mubr.bf16.gmra.mrb[16].mxu0 %v5411_v53 }
 0x433   : > { %15890 = vmatmul.mubr.bf16.gmra.mrb[16].mxu1 %v10631_v63  ;;  %14937 = vmatprep.mubr.msk.bf16.mxu0 %vm17656_vm0, %v17655_v1 }
 0x434   : > { %15909 = vmatprep.mubr.msk.bf16.mxu1 %vm17656_vm0, %v17655_v1 }
 0x43a   : > { %14938 = vmatmul.mubr.bf16.vlgmr.msra.gmra.mrb[0].mxu0 %v5571_v8 }
 0x43b   : > { %15910 = vmatmul.mubr.bf16.vlgmr.msra.gmra.mrb[0].mxu1 %v10790_v10  ;;  %14941 = vmatprep.mubr.msk.bf16.mxu0 %vm17656_vm0, %v17655_v1 }
 0x43c   : > { %15913 = vmatprep.mubr.msk.bf16.mxu1 %vm17656_vm0, %v17655_v1 }
 0x442   : > { %14942 = vmatmul.mubr.bf16.gmra.mrb[4].mxu0 %v5573_v9 }
 0x443   : > { %15914 = vmatmul.mubr.bf16.gmra.mrb[4].mxu1 %v10792_v17  ;;  %14945 = vmatprep.mubr.msk.bf16.mxu0 %vm17656_vm0, %v17655_v1 }
 0x444   : > { %15917 = vmatprep.mubr.msk.bf16.mxu1 %vm17656_vm0, %v17655_v1 }
 0x44a   : > { %14946 = vmatmul.mubr.bf16.gmra.mrb[8].mxu0 %v5575_v59 }
 0x44b   : > { %15918 = vmatmul.mubr.bf16.gmra.mrb[8].mxu1 %v10794_v49  ;;  %14949 = vmatprep.mubr.msk.bf16.mxu0 %vm17656_vm0, %v17655_v1 }
 0x44c   : > { %15921 = vmatprep.mubr.msk.bf16.mxu1 %vm17656_vm0, %v17655_v1 }
 0x452   : > { %14950 = vmatmul.mubr.bf16.gmra.mrb[12].mxu0 %v5577_v18 }
 0x453   : > { %15922 = vmatmul.mubr.bf16.gmra.mrb[12].mxu1 %v10796_v20  ;;  %14953 = vmatprep.mubr.msk.bf16.mxu0 %vm17656_vm0, %v17655_v1 }
 0x454   : > { %15925 = vmatprep.mubr.msk.bf16.mxu1 %vm17656_vm0, %v17655_v1  ;;  %v21160_v1 = vld [vmem:[%s21357_s6] ss:$0 sm:$0xff] }
 0x45a   : > { %14954 = vmatmul.mubr.bf16.gmra.mrb[16].mxu0 %v5579_v55 }
 0x45b   : > { %15926 = vmatmul.mubr.bf16.gmra.mrb[16].mxu1 %v10798_v40 }
 0x50d   : > { %v5667_v39 = vpop.f32.mrb[0].mxu0 }
 0x50e   : > { %v5723_v57 = vmul.f32 %v21155_v15, %v5667_v39  ;;  %v10886_v27 = vpop.f32.mrb[0].mxu1  ;;  %v14939_v0 = vpop.f32.mrb[1].mxu0 }
 0x50f   : > { %v10942_v29 = vmul.f32 %v21155_v15, %v10886_v27  ;;  %v15911_v58 = vpop.f32.mrb[1].mxu1  ;;  %v5670_v48 = vpop.f32.mrb[2].mxu0 }
 0x510   : > { %v5740_v41 = vadd.f32 %v21160_v1, %v5723_v57  ;;  %v5724_v44 = vmul.f32 %v21155_v15, %v5670_v48  ;;  %v10889_v51 = vpop.f32.mrb[2].mxu1  ;;  %v14940_v46 = vpop.f32.mrb[3].mxu0 }
 0x511   : > { %v10959_v23 = vadd.f32 %v21160_v1, %v10942_v29  ;;  %v10943_v28 = vmul.f32 %v21155_v15, %v10889_v51  ;;  %v15912_v36 = vpop.f32.mrb[3].mxu1 }
 0x512   : > { %v5750_v11 = vmax.f32 %v5740_v41, 0.0  ;;  %v5741_v5 = vadd.f32 %v21160_v1, %v5724_v44 }
 0x513   : > { %v10969_v43 = vmax.f32 %v10959_v23, 0.0  ;;  %v10960_v24 = vadd.f32 %v21160_v1, %v10943_v28 }
 0x514   : > { %5760 = vst [vmem:[%s20860_s15] sm:$0xff] %v5750_v11  ;;  %v5751_v3 = vmax.f32 %v5741_v5, 0.0 }
 0x515   : > { %13220 = vst [vmem:[%s20860_s15 + $0x50] sm:$0xff] %v10969_v43  ;;  %v11011_v56 = vmax.f32 %v5750_v11, %v10969_v43  ;;  %v10970_v12 = vmax.f32 %v10960_v24, 0.0  ;;  %v5675_v50 = vpop.f32.mrb[4].mxu0 }
 0x516   : > { %5761 = vst [vmem:[%s20860_s15 + $0x8] sm:$0xff] %v5751_v3  ;;  %v5725_v30 = vmul.f32 %v21155_v15, %v5675_v50  ;;  %v10894_v60 = vpop.f32.mrb[4].mxu1  ;;  %v14943_v61 = vpop.f32.mrb[5].mxu0 }
 0x517   : > { %v11031_v47 = vcombine.high %v11011_v56, %v11011_v56  ;;  %v11038_v62 = vrot.slane %v11011_v56, %v21169_v35  ;;  %13221 = vst [vmem:[%s20860_s15 + $0x58] sm:$0xff] %v10970_v12  ;;  %v11012_v13 = vmax.f32 %v5751_v3, %v10970_v12  ;;  %v10944_v21 = vmul.f32 %v21155_v15, %v10894_v60  ;;  %v15915_v22 = vpop.f32.mrb[5].mxu1  ;;  %v5678_v53 = vpop.f32.mrb[6].mxu0 }
 0x518   : > { %v5742_v63 = vadd.f32 %v21160_v1, %v5725_v30  ;;  %v5726_v38 = vmul.f32 %v21155_v15, %v5678_v53  ;;  %v10897_v19 = vpop.f32.mrb[6].mxu1  ;;  %v14944_v14 = vpop.f32.mrb[7].mxu0 }
 0x519   : > { %v11045_v6 = vrot.slane %v11031_v47, %v21169_v35  ;;  %v11046_v25 = vcombine.high %v11038_v62, %v11038_v62  ;;  %v13241_v8 = vrot.slane %v11038_v62, 9  ;;  %v11048_v10 = vcombine.high %v11012_v13, %v11012_v13  ;;  %v15916_v34 = vpop.f32.mrb[7].mxu1 }
 0x51a   : > { %v11055_v2 = vrot.slane %v11012_v13, %v21169_v35  ;;  %v5752_v9 = vmax.f32 %v5742_v63, 0.0  ;;  %v10961_v17 = vadd.f32 %v21160_v1, %v10944_v21  ;;  %v21187_v4 = vadd.f32 %v21160_v1, %v5726_v38 }
 0x51b   : > { %v11047_v7 = vcombine.high %v11045_v6, %v11045_v6  ;;  %v13242_v59 = vrot.slane %v11046_v25, 9  ;;  %v13243_v49 = vrot.slane %v11045_v6, 9  ;;  %v11361_v37 = vmax.f32 %v11038_v62, %v13241_v8 }
 0x51c   : > { %v11062_v45 = vrot.slane %v11048_v10, %v21169_v35  ;;  %v11063_v18 = vcombine.high %v11055_v2, %v11055_v2  ;;  %v13245_v20 = vrot.slane %v11055_v2, 9  ;;  %5762 = vst [vmem:[%s20860_s15 + $0x10] sm:$0xff] %v5752_v9  ;;  %v10971_v52 = vmax.f32 %v10961_v17, 0.0 }
 0x51d   : > { %v13244_v54 = vrot.slane %v11047_v7, 9  ;;  %v11362_v55 = vmax.f32 %v11046_v25, %v13242_v59  ;;  %v11363_v40 = vmax.f32 %v11045_v6, %v13243_v49  ;;  %v5753_v32 = vmax.f32 %v21187_v4, 0.0  ;;  %v5683_v26 = vpop.f32.mrb[8].mxu0 }
 0x51e   : > { %v11064_v16 = vcombine.high %v11062_v45, %v11062_v45  ;;  %v13246_v39 = vrot.slane %v11063_v18, 9  ;;  %v13247_v57 = vrot.slane %v11062_v45, 9  ;;  %v21192_v27 = vmax.f32 %v11055_v2, %v13245_v20  ;;  %13222 = vst [vmem:[%s20860_s15 + $0x60] sm:$0xff] %v10971_v52  ;;  %v10902_v0 = vpop.f32.mrb[8].mxu1  ;;  %v14947_v29 = vpop.f32.mrb[9].mxu0 }
 0x51f   : > { %v11013_v31 = vmax.f32 %v5752_v9, %v10971_v52  ;;  %v11364_v33 = vmax.f32 %v11047_v7, %v13244_v54  ;;  %5763 = vst [vmem:[%s20860_s15 + $0x18] sm:$0xff] %v5753_v32  ;;  %v10945_v58 = vmul.f32 %v21155_v15, %v10897_v19  ;;  %v5727_v48 = vmul.f32 %v21155_v15, %v5683_v26  ;;  %v15919_v41 = vpop.f32.mrb[9].mxu1  ;;  %v5686_v44 = vpop.f32.mrb[10].mxu0 }
 0x520   : > { %v13248_v51 = vrot.slane %v11064_v16, 9  ;;  %v11366_v46 = vmax.f32 %v11063_v18, %v13246_v39  ;;  %v11367_v23 = vmax.f32 %v11062_v45, %v13247_v57  ;;  %v10946_v28 = vmul.f32 %v21155_v15, %v10902_v0  ;;  %v21199_v36 = vpop.f32.mrb[10].mxu1  ;;  %v14948_v11 = vpop.f32.mrb[11].mxu0 }
 0x521   : > { %v11065_v5 = vcombine.high %v11013_v31, %v11013_v31  ;;  %v11072_v43 = vrot.slane %v11013_v31, %v21169_v35  ;;  %v10962_v24 = vadd.f32 %v21160_v1, %v10945_v58  ;;  %v5744_v3 = vadd.f32 %v21160_v1, %v5727_v48  ;;  %v15920_v56 = vpop.f32.mrb[11].mxu1 }
 0x522   : > { %v11368_v12 = vmax.f32 %v11064_v16, %v13248_v51  ;;  %v11401_v50 = vmax.f32 %v11361_v37, %v11366_v46  ;;  %v11402_v30 = vmax.f32 %v11362_v55, %v11367_v23  ;;  %v10963_v60 = vadd.f32 %v21160_v1, %v10946_v28 }
 0x523   : > { %v11079_v61 = vrot.slane %v11065_v5, %v21169_v35  ;;  %v11080_v47 = vcombine.high %v11072_v43, %v11072_v43  ;;  %v13249_v62 = vrot.slane %v11072_v43, 9  ;;  %v10972_v13 = vmax.f32 %v10962_v24, 0.0 }
 0x524   : > { %v11403_v21 = vmax.f32 %v11363_v40, %v11368_v12  ;;  %v11444_v22 = vrot.slane %v11401_v50, %v21179_v42  ;;  %v11448_v53 = vrot.slane %v11402_v30, %v21179_v42  ;;  %v5754_v63 = vmax.f32 %v5744_v3, 0.0 }
 0x525   : > { %v11081_v38 = vcombine.high %v11079_v61, %v11079_v61  ;;  %v13250_v19 = vrot.slane %v11080_v47, 9  ;;  %v13251_v14 = vrot.slane %v11079_v61, 9  ;;  %v11369_v6 = vmax.f32 %v11072_v43, %v13249_v62  ;;  %13223 = vst [vmem:[%s20860_s15 + $0x68] sm:$0xff] %v10972_v13  ;;  %v21210_v25 = vpop.f32.mrb[12].mxu0 }
 0x526   : > { %v11452_v8 = vrot.slane %v11403_v21, %v21179_v42  ;;  %v11522_v10 = vsel %vm11521_vm7, %v11448_v53, %v11444_v22  ;;  %v11014_v34 = vmax.f32 %v5753_v32, %v10972_v13  ;;  %5764 = vst [vmem:[%s20860_s15 + $0x20] sm:$0xff] %v5754_v63  ;;  %v10973_v2 = vmax.f32 %v10963_v60, 0.0  ;;  %v10910_v9 = vpop.f32.mrb[12].mxu1  ;;  %v14951_v17 = vpop.f32.mrb[13].mxu0 }
 0x527   : > { %v13252_v4 = vrot.slane %v11081_v38, 9  ;;  %v11370_v7 = vmax.f32 %v11080_v47, %v13250_v19  ;;  %v21215_v59 = vmax.f32 %v11079_v61, %v13251_v14  ;;  %v11404_v49 = vmax.f32 %v11364_v33, %v11369_v6  ;;  %v15923_v37 = vpop.f32.mrb[13].mxu1  ;;  %v21217_v45 = vpop.f32.mrb[14].mxu0 }
 0x528   : > { %v11524_v18 = vsel %vm11523_vm8, %v11452_v8, %v11522_v10  ;;  %v11082_v20 = vcombine.high %v11014_v34, %v11014_v34  ;;  %v11089_v52 = vrot.slane %v11014_v34, %v21169_v35  ;;  %13224 = vst [vmem:[%s20860_s15 + $0x70] sm:$0xff] %v10973_v2  ;;  %v11015_v54 = vmax.f32 %v5754_v63, %v10973_v2  ;;  %v21227_v55 = vpop.f32.mrb[14].mxu1  ;;  %v14952_v40 = vpop.f32.mrb[15].mxu0 }
 0x529   : > { %v11405_v32 = vmax.f32 %v21192_v27, %v11370_v7  ;;  %v11456_v26 = vrot.slane %v11404_v49, %v21179_v42  ;;  %v11372_v16 = vmax.f32 %v11081_v38, %v13252_v4  ;;  %v5728_v39 = vmul.f32 %v21155_v15, %v5686_v44  ;;  %v15924_v57 = vpop.f32.mrb[15].mxu1 }
 0x52a   : > { %v11096_v0 = vrot.slane %v11082_v20, %v21169_v35  ;;  %v11097_v29 = vcombine.high %v11089_v52, %v11089_v52  ;;  %v13253_v31 = vrot.slane %v11089_v52, 9  ;;  %v11099_v33 = vcombine.high %v11015_v54, %v11015_v54 }
 0x52b   : > { %v11460_v58 = vrot.slane %v11405_v32, %v21179_v42  ;;  %v11526_v48 = vsel %vm11525_vm9, %v11456_v26, %v11524_v18  ;;  %v11106_v41 = vrot.slane %v11015_v54, %v21169_v35  ;;  %v5745_v27 = vadd.f32 %v21160_v1, %v5728_v39 }
 0x52c   : > { %v11098_v51 = vcombine.high %v11096_v0, %v11096_v0  ;;  %v13254_v46 = vrot.slane %v11097_v29, 9  ;;  %v13255_v44 = vrot.slane %v11096_v0, 9  ;;  %v11373_v23 = vmax.f32 %v11089_v52, %v13253_v31 }
 0x52d   : > { %v11528_v28 = vsel %vm11527_vm10, %v11460_v58, %v11526_v48  ;;  %v11113_v11 = vrot.slane %v11099_v33, %v21169_v35  ;;  %v11114_v5 = vcombine.high %v11106_v41, %v11106_v41  ;;  %v13257_v43 = vrot.slane %v11106_v41, 9  ;;  %v5699_v24 = vpop.f32.mrb[16].mxu0 }
 0x52e   : > { %v13256_v3 = vrot.slane %v11098_v51, 9  ;;  %v11374_v56 = vmax.f32 %v11097_v29, %v13254_v46  ;;  %v11375_v12 = vmax.f32 %v11096_v0, %v13255_v44  ;;  %v5755_v50 = vmax.f32 %v5745_v27, 0.0  ;;  %v21241_v30 = vpop.f32.mrb[16].mxu1  ;;  %v14955_v60 = vpop.f32.mrb[17].mxu0 }
 0x52f   : > { %v11115_v61 = vcombine.high %v11113_v11, %v11113_v11  ;;  %v13258_v47 = vrot.slane %v11114_v5, 9  ;;  %v13259_v62 = vrot.slane %v11113_v11, 9  ;;  %v11377_v13 = vmax.f32 %v11106_v41, %v13257_v43  ;;  %v15927_v21 = vpop.f32.mrb[17].mxu1  ;;  %v21243_v22 = vpop.f32.mrb[18].mxu0 }
 0x530   : > { %v11376_v53 = vmax.f32 %v11098_v51, %v13256_v3  ;;  %5765 = vst [vmem:[%s20860_s15 + $0x28] sm:$0xff] %v5755_v50  ;;  %v10947_v63 = vmul.f32 %v21155_v15, %v21199_v36  ;;  %v5729_v38 = vmul.f32 %v21155_v15, %v21210_v25  ;;  %v10948_v19 = vmul.f32 %v21155_v15, %v10910_v9  ;;  %v21255_v14 = vpop.f32.mrb[18].mxu1  ;;  %v14956_v6 = vpop.f32.mrb[19].mxu0 }
 0x531   : > { %v13260_v8 = vrot.slane %v11115_v61, 9  ;;  %v11378_v10 = vmax.f32 %v11114_v5, %v13258_v47  ;;  %v11379_v34 = vmax.f32 %v11113_v11, %v13259_v62  ;;  %v11407_v2 = vmax.f32 %v11372_v16, %v11377_v13  ;;  %v15928_v17 = vpop.f32.mrb[19].mxu1 }
 0x532   : > { %v11406_v4 = vmax.f32 %v21215_v59, %v11376_v53  ;;  %v10964_v7 = vadd.f32 %v21160_v1, %v10947_v63  ;;  %v5746_v49 = vadd.f32 %v21160_v1, %v5729_v38  ;;  %v10965_v36 = vadd.f32 %v21160_v1, %v10948_v19 }
 0x533   : > { %v11380_v25 = vmax.f32 %v11115_v61, %v13260_v8  ;;  %v11408_v9 = vmax.f32 %v11373_v23, %v11378_v10  ;;  %v11409_v37 = vmax.f32 %v11374_v56, %v11379_v34  ;;  %v11468_v18 = vrot.slane %v11407_v2, %v21179_v42 }
 0x534   : > { %v11464_v20 = vrot.slane %v11406_v4, %v21179_v42  ;;  %v10974_v52 = vmax.f32 %v10964_v7, 0.0  ;;  %v5756_v54 = vmax.f32 %v5746_v49, 0.0  ;;  %v10975_v59 = vmax.f32 %v10965_v36, 0.0 }
 0x535   : > { %v11410_v40 = vmax.f32 %v11375_v12, %v11380_v25  ;;  %v11472_v32 = vrot.slane %v11408_v9, %v21179_v42  ;;  %v11476_v26 = vrot.slane %v11409_v37, %v21179_v42  ;;  %v5730_v16 = vmul.f32 %v21155_v15, %v21217_v45 }
 0x536   : > { %v11530_v39 = vsel %vm11529_vm11, %v11464_v20, %v11528_v28  ;;  %13225 = vst [vmem:[%s20860_s15 + $0x78] sm:$0xff] %v10974_v52  ;;  %v11016_v57 = vmax.f32 %v5755_v50, %v10974_v52  ;;  %5766 = vst [vmem:[%s20860_s15 + $0x30] sm:$0xff] %v5756_v54  ;;  %v11017_v0 = vmax.f32 %v5756_v54, %v10975_v59 }
 0x537   : > { %13226 = vst [vmem:[%s20860_s15 + $0x80] sm:$0xff] %v10975_v59  ;;  %v10949_v29 = vmul.f32 %v21155_v15, %v21227_v55  ;;  %v11480_v31 = vrot.slane %v11410_v40, %v21179_v42  ;;  %v11532_v45 = vsel %vm11531_vm12, %v11468_v18, %v11530_v39  ;;  %v5747_v33 = vadd.f32 %v21160_v1, %v5730_v16 }
 0x538   : > { %v5731_v58 = vmul.f32 %v21155_v15, %v5699_v24  ;;  %v11534_v48 = vsel %vm11533_vm13, %v11472_v32, %v11532_v45  ;;  %v11116_v41 = vcombine.high %v11016_v57, %v11016_v57  ;;  %v11123_v27 = vrot.slane %v11016_v57, %v21169_v35 }
 0x539   : > { %v11133_v51 = vcombine.high %v11017_v0, %v11017_v0  ;;  %v11535_v46 = vsel %vm11521_vm7, %v11480_v31, %v11476_v26  ;;  %11548 = vst [vmem:[%s21271_s18] sm:$0xff] %v11534_v48  ;;  %v11140_v55 = vrot.slane %v11017_v0, %v21169_v35  ;;  %v5757_v44 = vmax.f32 %v5747_v33, 0.0 }
 0x53a   : > { %v10966_v23 = vadd.f32 %v21160_v1, %v10949_v29  ;;  %v11130_v28 = vrot.slane %v11116_v41, %v21169_v35  ;;  %v11131_v11 = vcombine.high %v11123_v27, %v11123_v27  ;;  %v13261_v5 = vrot.slane %v11123_v27, 9 }
 0x53b   : > { %v11147_v43 = vrot.slane %v11133_v51, %v21169_v35  ;;  %v11148_v24 = vcombine.high %v11140_v55, %v11140_v55  ;;  %5767 = vst [vmem:[%s20860_s15 + $0x38] sm:$0xff] %v5757_v44  ;;  %v5748_v56 = vadd.f32 %v21160_v1, %v5731_v58  ;;  %v10950_v2 = vmul.f32 %v21155_v15, %v21241_v30 }
 0x53c   : > { %v10976_v3 = vmax.f32 %v10966_v23, 0.0  ;;  %v11132_v12 = vcombine.high %v11130_v28, %v11130_v28  ;;  %v13262_v50 = vrot.slane %v11131_v11, 9  ;;  %v13263_v60 = vrot.slane %v11130_v28, 9 }
 0x53d   : > { %v11149_v61 = vcombine.high %v11147_v43, %v11147_v43  ;;  %v13266_v47 = vrot.slane %v11148_v24, 9  ;;  %v13267_v62 = vrot.slane %v11147_v43, 9  ;;  %v11381_v13 = vmax.f32 %v11123_v27, %v13261_v5 }
 0x53e   : > { %13227 = vst [vmem:[%s20860_s15 + $0x88] sm:$0xff] %v10976_v3  ;;  %v11382_v21 = vmax.f32 %v11131_v11, %v13262_v50  ;;  %v11018_v53 = vmax.f32 %v5757_v44, %v10976_v3  ;;  %v5758_v6 = vmax.f32 %v5748_v56, 0.0  ;;  %v13264_v8 = vrot.slane %v11132_v12, 9 }
 0x53f   : > { %v13268_v63 = vrot.slane %v11149_v61, 9  ;;  %v11386_v38 = vmax.f32 %v11148_v24, %v13266_v47  ;;  %v11387_v19 = vmax.f32 %v11147_v43, %v13267_v62  ;;  %v11383_v10 = vmax.f32 %v11130_v28, %v13263_v60 }
 0x540   : > { %v11157_v34 = vrot.slane %v11018_v53, %v21169_v35  ;;  %5768 = vst [vmem:[%s20860_s15 + $0x40] sm:$0xff] %v5758_v6  ;;  %v5732_v49 = vmul.f32 %v21155_v15, %v21243_v22  ;;  %v13265_v36 = vrot.slane %v11140_v55, 9  ;;  %v10967_v37 = vadd.f32 %v21160_v1, %v10950_v2 }
 0x541   : > { %v11388_v17 = vmax.f32 %v11149_v61, %v13268_v63  ;;  %v11411_v4 = vmax.f32 %v11381_v13, %v11386_v38  ;;  %v11412_v7 = vmax.f32 %v11382_v21, %v11387_v19  ;;  %v11150_v54 = vcombine.high %v11018_v53, %v11018_v53 }
 0x542   : > { %v11165_v25 = vcombine.high %v11157_v34, %v11157_v34  ;;  %v13269_v9 = vrot.slane %v11157_v34, 9  ;;  %v5749_v30 = vadd.f32 %v21160_v1, %v5732_v49  ;;  %v11384_v40 = vmax.f32 %v11132_v12, %v13264_v8 }
 0x543   : > { %v11413_v18 = vmax.f32 %v11383_v10, %v11388_v17  ;;  %v11484_v20 = vrot.slane %v11411_v4, %v21179_v42  ;;  %v11488_v52 = vrot.slane %v11412_v7, %v21179_v42  ;;  %v10977_v16 = vmax.f32 %v10967_v37, 0.0 }
 0x544   : > { %v13270_v59 = vrot.slane %v11165_v25, 9  ;;  %v11389_v32 = vmax.f32 %v11157_v34, %v13269_v9  ;;  %v5759_v39 = vmax.f32 %v5749_v30, 0.0  ;;  %v11385_v57 = vmax.f32 %v11140_v55, %v13265_v36 }
 0x545   : > { %v11492_v22 = vrot.slane %v11413_v18, %v21179_v42  ;;  %v11536_v26 = vsel %vm11523_vm8, %v11484_v20, %v11535_v46  ;;  %13228 = vst [vmem:[%s20860_s15 + $0x90] sm:$0xff] %v10977_v16  ;;  %v11019_v33 = vmax.f32 %v5758_v6, %v10977_v16  ;;  %v10951_v58 = vmul.f32 %v21155_v15, %v21255_v14 }
 0x546   : > { %v11537_v0 = vsel %vm11525_vm9, %v11488_v52, %v11536_v26  ;;  %v11390_v29 = vmax.f32 %v11165_v25, %v13270_v59  ;;  %v11414_v31 = vmax.f32 %v11384_v40, %v11389_v32  ;;  %5769 = vst [vmem:[%s20860_s15 + $0x48] sm:$0x3f] %v5759_v39  ;;  %v11164_v41 = vrot.slane %v11150_v54, %v21169_v35 }
 0x547   : > { %v11538_v45 = vsel %vm11527_vm10, %v11492_v22, %v11537_v0  ;;  %v11167_v51 = vcombine.high %v11019_v33, %v11019_v33  ;;  %v10968_v46 = vadd.f32 %v21160_v1, %v10951_v58  ;;  %v11174_v24 = vrot.slane %v11019_v33, %v21169_v35 }
 0x548   : > { %v11415_v48 = vmax.f32 %v11385_v57, %v11390_v29  ;;  %v11496_v27 = vrot.slane %v11414_v31, %v21179_v42  ;;  %v13271_v15 = vrot.slane %v11164_v41, 9  ;;  %v11166_v1 = vcombine.high %v11164_v41, %v11164_v41 }
 0x549   : > { %v11181_v23 = vrot.slane %v11167_v51, %v21169_v35  ;;  %v10978_v11 = vmax.f32 %v10968_v46, 0.0  ;;  %v11182_v50 = vcombine.high %v11174_v24, %v11174_v24  ;;  %v13273_v63 = vrot.slane %v11174_v24, 9 }
 0x54a   : > { %v11500_v55 = vrot.slane %v11415_v48, %v21179_v42  ;;  %v11539_v44 = vsel %vm11529_vm11, %v11496_v27, %v11538_v45  ;;  %v11391_v43 = vmax.f32 %v11164_v41, %v13271_v15  ;;  %v13272_v62 = vrot.slane %v11166_v1, 9 }
 0x54b   : > { %v11183_v14 = vcombine.high %v11181_v23, %v11181_v23  ;;  %13229 = vst [vmem:[%s20860_s15 + $0x98] sm:$0x3f] %v10978_v11  ;;  %v13274_v38 = vrot.slane %v11182_v50, 9  ;;  %v13275_v10 = vrot.slane %v11181_v23, 9  ;;  %v11393_v49 = vmax.f32 %v11174_v24, %v13273_v63 }
 0x54c   : > { %v11540_v28 = vsel %vm11531_vm12, %v11500_v55, %v11539_v44  ;;  %v11392_v34 = vmax.f32 %v11166_v1, %v13272_v62 }
 0x54d   : > { %v13276_v5 = vrot.slane %v11183_v14, 9  ;;  %v11000_v12 = vld [vmem:[%s20860_s15 + $0x48] sm:$0xff]  ;;  %v11394_v36 = vmax.f32 %v11182_v50, %v13274_v38  ;;  %v11395_v20 = vmax.f32 %v11181_v23, %v13275_v10 }
 0x54f   : > { %v11396_v3 = vmax.f32 %v11183_v14, %v13276_v5 }
 0x551   : > { %v11416_v56 = vmax.f32 %v11391_v43, %v11396_v3 }
 0x552   : > { %v13240_v61 = vld [vmem:[%s20860_s15 + $0x98] sm:$0xff] }
 0x553   : > { %v11504_v60 = vrot.slane %v11416_v56, %v21179_v42  ;;  %v11020_v47 = vmax.f32 %v11000_v12, %v13240_v61 }
 0x555   : > { %v11541_v13 = vsel %vm11533_vm13, %v11504_v60, %v11540_v28  ;;  %v11184_v21 = vcombine.high %v11020_v47, %v11020_v47  ;;  %v11191_v53 = vrot.slane %v11020_v47, %v21169_v35 }
 0x556   : > { %11549 = vst [vmem:[%s21271_s18 + $0x8] sm:$0xff] %v11541_v13 }
 0x557   : > { %v11198_v19 = vrot.slane %v11184_v21, %v21169_v35  ;;  %v11199_v6 = vcombine.high %v11191_v53, %v11191_v53  ;;  %v13277_v8 = vrot.slane %v11191_v53, 9 }
 0x559   : > { %v11200_v2 = vcombine.high %v11198_v19, %v11198_v19  ;;  %v13278_v17 = vrot.slane %v11199_v6, 9  ;;  %v13279_v4 = vrot.slane %v11198_v19, 9  ;;  %v11397_v7 = vmax.f32 %v11191_v53, %v13277_v8 }
 0x55b   : > { %v13280_v25 = vrot.slane %v11200_v2, 9  ;;  %v11398_v9 = vmax.f32 %v11199_v6, %v13278_v17  ;;  %v11399_v37 = vmax.f32 %v11198_v19, %v13279_v4  ;;  %v11417_v18 = vmax.f32 %v11392_v34, %v11397_v7 }
 0x55d   : > { %v11400_v52 = vmax.f32 %v11200_v2, %v13280_v25  ;;  %v11418_v30 = vmax.f32 %v11393_v49, %v11398_v9  ;;  %v11419_v54 = vmax.f32 %v11394_v36, %v11399_v37  ;;  %v11508_v59 = vrot.slane %v11417_v18, %v21179_v42 }
 0x55f   : > { %v11420_v35 = vmax.f32 %v11395_v20, %v11400_v52  ;;  %v11512_v40 = vrot.slane %v11418_v30, %v21179_v42  ;;  %v11516_v32 = vrot.slane %v11419_v54, %v21179_v42 }
 0x561   : > { %v11520_v22 = vrot.slane %v11420_v35, %v21179_v42  ;;  %v11542_v26 = vsel %vm11521_vm7, %v11512_v40, %v11508_v59 }
 0x562   : > { %v11543_v16 = vsel %vm11523_vm8, %v11516_v32, %v11542_v26 }
 0x563   : > { %v11544_v39 = vsel %vm11525_vm9, %v11520_v22, %v11543_v16 }
 0x564   : > { %11550 = vst [vmem:[%s21271_s18 + $0x10] sm:$0xf] %v11544_v39 }
 0x565 PF: > { %s19_s9 = sadd.s32 1, %s17653_s9   ;;  %s21361_s27 = smov %s17645_s29 }
 0x566   : > { %p16_p12 = scmp.ge.s32.totalorder %s19_s9, 10   ;;  %s21362_s28 = smov %s17649_s30 }
 0x567   : > { %s21363_s29 = smov %s21366_s10  ;;  %s21364_s30 = smov %s21370_s11 }
 0x568   :  { %18 = sbr.rel (!%p16_p12) target bundleno = 3 (0x3), region = 126 }

</bundles_post_ra>
